<compile_context>
chip_gen: v5e
topology: v5e:2x2
jax: 0.10.0
libtpu: 0.0.40
codegen_flags: <defaults>
</compile_context>

<pallas_src>
import numpy as np
import jax
import jax.numpy as jnp
from jax import lax
from jax.experimental import pallas as pl
from jax.experimental.pallas import tpu as pltpu

# ---- module hyper-params (small, consistent with the reference module) ------
IMAGE_SHAPE = (16, 16)            # image_shape
NUM_SLOTS = 4                     # num_slots
IN_CH = 6                         # x channels; +2 coord channels -> 8 into convs
HIDDEN = 256
THETA_DIM = 2 * 6 * NUM_SLOTS     # 48
OUT_LANES = 128                   # theta padded to one full lane tile
MAX_BT = 8                        # images processed per grid step

H, W = IMAGE_SHAPE
C0, C1, C2, C3 = 8, 16, 32, 64    # channels entering / leaving each conv
W1P, W2P, W3P = W, W // 2, W // 4  # horizontal positions at each conv level
L1, L2, L3 = W1P * C1, W2P * C2, W3P * C3   # 256 lanes at every conv output
CONV_SIZE = C3 * (H // 8) * (W // 8)        # 256

CONSTRAIN_SCALE = np.array([[0.99, 0.0, 2.0], [0.0, 0.99, 2.0]], np.float32)
CONSTRAIN_SHIFT = np.array([[0.01, 0.0, -1.0], [0.0, 0.01, -1.0]], np.float32)
CONSTRAIN_STD = np.array([[1.0, 0.0, 1.0], [0.0, 1.0, 1.0]], np.float32)


# ------------------------------- kernel --------------------------------------
def spatial_loc_kernel(*refs):
    inp_ref = refs[0]
    out_ref = refs[-1]
    (w1, b1, w2, b2, w3, b3,
     u1, d1, s1, u2, d2, s2, u3, d3, s3,
     pw1, pw2, pw3, sf, sfd,
     vmat, bf1, wf2, bf2, scl, sft) = [r[...] for r in refs[1:-1]]

    f32 = jnp.float32

    def conv(x, u, d, wmat, bvec):
        # vertical taps via constant shift matrices (image-boundary zeros baked in)
        xu = jnp.dot(u, x, preferred_element_type=f32)      # row h-1 (0 at top edge)
        xd = jnp.dot(d, x, preferred_element_type=f32)      # row h+1 (0 at bottom edge)
        x3 = jnp.concatenate([xu, x, xd], axis=1)            # 128-aligned lane concat
        y = jnp.dot(x3, wmat, preferred_element_type=f32) + bvec
        return jnp.maximum(y, 0.0)

    def pool(y, d, pw, s):
        # 2x2 / stride-2 maxpool: max with (w+1) via lane-shift matmul,
        # max with (h+1) via row-shift matmul, then keep even rows.
        yw = jnp.maximum(y, jnp.dot(y, pw, preferred_element_type=f32))
        yh = jnp.maximum(yw, jnp.dot(d, yw, preferred_element_type=f32))
        return jnp.dot(s, yh, preferred_element_type=f32)

    x = inp_ref[...]                                         # (bt*16, 128)
    x = pool(conv(x, u1, d1, w1, b1), d1, pw1, s1)           # (bt*8, 256)
    x = pool(conv(x, u2, d2, w2, b2), d2, pw2, s2)           # (bt*4, 256)
    x = pool(conv(x, u3, d3, w3, b3), d3, pw3, s3)           # (bt*2, 256)

    # pool3 output -> per-image 512-lane feature (two pooled rows, lane concat),
    # NCHW-flatten order is pre-baked into vmat.
    z = jnp.concatenate([jnp.dot(sf, x, preferred_element_type=f32),
                         jnp.dot(sfd, x, preferred_element_type=f32)], axis=1)  # (bt, 512)
    hid = jnp.maximum(jnp.dot(z, vmat, preferred_element_type=f32) + bf1, 0.0)  # (bt, 256)
    logits = jnp.dot(hid, wf2, preferred_element_type=f32) + bf2                # (bt, 128)
    theta = jax.nn.sigmoid(logits)
    # fused constrain affine (mean: *scale+shift ; std: *0.1*std + 1e-4)
    out_ref[...] = theta * scl + sft


# ------------------------- constant / weight packing --------------------------
def create_coord_buffer(shape):
    ys = jnp.linspace(-1.0, 1.0, shape[0])
    xs = jnp.linspace(-1.0, 1.0, shape[1])
    yy = jnp.broadcast_to(ys[:, None], shape)
    xx = jnp.broadcast_to(xs[None, :], shape)
    return jnp.stack([yy, xx], axis=0)[None]          # (1, 2, H, W)


def _shift_select_mats(bt, hl):
    """U (row h-1 or 0), D (row h+1 or 0), S (keep even-h rows) for bt*hl rows."""
    r_tot = bt * hl
    u = np.zeros((r_tot, r_tot), np.float32)
    d = np.zeros((r_tot, r_tot), np.float32)
    for b in range(bt):
        for h in range(hl):
            r = b * hl + h
            if h >= 1:
                u[r, r - 1] = 1.0
            if h <= hl - 2:
                d[r, r + 1] = 1.0
    s = np.zeros((r_tot // 2, r_tot), np.float32)
    s[np.arange(r_tot // 2), 2 * np.arange(r_tot // 2)] = 1.0
    return u, d, s


def _lane_shift_mat(lanes, c):
    """Right-multiply matrix: (y @ P)[:, l] = y[:, l + c] (zero past the end)."""
    p = np.zeros((lanes, lanes), np.float32)
    for l in range(lanes - c):
        p[l + c, l] = 1.0
    return p


def _conv_mat(w, win_pos, cin, wout_pos, cout, stride_in):
    """Block-Toeplitz matrix: 3x3 conv + horizontal zero-pad + horizontal input
    stride (reads only even-w lane groups of the preceding maxpool) as one matmul
    on the (row=(b,h), lane=(w,c)) layout."""
    lin = win_pos * cin
    m = np.zeros((3 * lin, wout_pos * cout), np.float32)
    for p in range(3):                    # vertical tap   (ky)
        for j in range(3):                # horizontal tap (kx)
            for wo in range(wout_pos):
                wsrc = wo + (j - 1)
                if 0 <= wsrc < wout_pos:
                    wi = stride_in * wsrc
                    m[p * lin + wi * cin: p * lin + (wi + 1) * cin,
                      wo * cout: (wo + 1) * cout] = w[:, :, p, j].T
    return m


def _fc1_mat(wf1):
    """Linear(conv_size,256) on PyTorch NCHW-flattened features, remapped to the
    kernel's (half=h4, lane=w3*64+c3) 512-lane layout (odd w3 lane groups = 0)."""
    v = np.zeros((2 * L3, HIDDEN), np.float32)
    for h4 in range(2):
        for w4 in range(2):
            w3 = 2 * w4
            for c in range(C3):
                v[h4 * L3 + w3 * C3 + c, :] = wf1[:, c * 4 + h4 * 2 + w4]
    return v


def _constrain_vectors():
    scale_slot = np.concatenate([CONSTRAIN_SCALE.reshape(-1),
                                 0.1 * CONSTRAIN_STD.reshape(-1)]).astype(np.float32)
    shift_slot = np.concatenate([CONSTRAIN_SHIFT.reshape(-1),
                                 np.full((6,), 1e-4, np.float32)]).astype(np.float32)
    scale = np.zeros((1, OUT_LANES), np.float32)
    shift = np.zeros((1, OUT_LANES), np.float32)
    scale[0, :THETA_DIM] = np.tile(scale_slot, NUM_SLOTS)
    shift[0, :THETA_DIM] = np.tile(shift_slot, NUM_SLOTS)
    return scale, shift


def prepare_params(params, bt=MAX_BT):
    """One-time parameter/constant preprocessing (kept out of the jitted forward)."""
    w1 = np.asarray(params['w1']); b1 = np.asarray(params['b1'])
    w2 = np.asarray(params['w2']); b2 = np.asarray(params['b2'])
    w3 = np.asarray(params['w3']); b3 = np.asarray(params['b3'])
    wf1 = np.asarray(params['wf1']); bf1 = np.asarray(params['bf1'])
    wf2 = np.asarray(params['wf2']); bf2 = np.asarray(params['bf2'])

    u1, d1, s1 = _shift_select_mats(bt, H)
    u2, d2, s2 = _shift_select_mats(bt, H // 2)
    u3, d3, s3 = _shift_select_mats(bt, H // 4)
    _, df, _ = _shift_select_mats(bt, 2)
    sf = np.zeros((bt, 2 * bt), np.float32)
    sf[np.arange(bt), 2 * np.arange(bt)] = 1.0     # row (b, h4=0) of each image
    sfd = sf @ df                                  # row (b, h4=1) of each image

    pw1 = _lane_shift_mat(L1, C1)
    pw2 = _lane_shift_mat(L2, C2)
    pw3 = _lane_shift_mat(L3, C3)

    w1m = _conv_mat(w1, W1P, C0, W1P, C1, 1)
    w2m = _conv_mat(w2, W1P, C1, W2P, C2, 2)
    w3m = _conv_mat(w3, W2P, C2, W3P, C3, 2)

    b1v = np.tile(b1, W1P)[None]
    b2v = np.tile(b2, W2P)[None]
    b3v = np.tile(b3, W3P)[None]

    vmat = _fc1_mat(wf1)
    wf2p = np.zeros((HIDDEN, OUT_LANES), np.float32)
    wf2p[:, :THETA_DIM] = wf2.T
    bf2p = np.zeros((1, OUT_LANES), np.float32)
    bf2p[0, :THETA_DIM] = bf2
    scale, shift = _constrain_vectors()

    consts = (w1m, b1v, w2m, b2v, w3m, b3v,
              u1, d1, s1, u2, d2, s2, u3, d3, s3,
              pw1, pw2, pw3, sf, sfd,
              vmat, bf1[None], wf2p, bf2p, scale, shift)
    return dict(coord=create_coord_buffer(IMAGE_SHAPE),
                consts=tuple(jnp.asarray(c) for c in consts))


def init_params(key):
    ks = jax.random.split(key, 10)

    def conv_w(k, cout, cin):
        return jax.random.uniform(k, (cout, cin, 3, 3), jnp.float32, -1.0, 1.0) / np.sqrt(cin * 9)

    def lin_w(k, cout, cin):
        return jax.random.uniform(k, (cout, cin), jnp.float32, -1.0, 1.0) / np.sqrt(cin)

    return dict(
        w1=conv_w(ks[0], C1, C0),
        b1=jax.random.uniform(ks[1], (C1,), jnp.float32, -0.1, 0.1),
        w2=conv_w(ks[2], C2, C1),
        b2=jax.random.uniform(ks[3], (C2,), jnp.float32, -0.1, 0.1),
        w3=conv_w(ks[4], C3, C2),
        b3=jax.random.uniform(ks[5], (C3,), jnp.float32, -0.1, 0.1),
        wf1=lin_w(ks[6], HIDDEN, CONV_SIZE),
        bf1=jax.random.uniform(ks[7], (HIDDEN,), jnp.float32, -0.1, 0.1),
        wf2=lin_w(ks[8], THETA_DIM, HIDDEN),
        bf2=jax.random.uniform(ks[9], (THETA_DIM,), jnp.float32, -0.1, 0.1),
    )


# ------------------------------ wrapper ---------------------------------------
def _const_spec(a):
    nd = a.ndim
    return pl.BlockSpec(a.shape, lambda i, _nd=nd: (0,) * _nd)


@jax.jit
def spatial_localization_forward(x, prepped):
    b_sz = x.shape[0]
    bt = MAX_BT
    bpad = ((b_sz + bt - 1) // bt) * bt

    coord = jnp.broadcast_to(prepped['coord'], (b_sz, 2, H, W))
    inp = jnp.concatenate([x, coord], axis=1)                         # (B, 8, H, W)
    inp = jnp.transpose(inp, (0, 2, 3, 1)).reshape(b_sz * H, W * C0)  # rows=(b,h), lanes=(w,c)
    if bpad != b_sz:
        inp = jnp.pad(inp, ((0, (bpad - b_sz) * H), (0, 0)))

    consts = prepped['consts']
    in_specs = [pl.BlockSpec((bt * H, W * C0), lambda i: (i, 0))]
    in_specs += [_const_spec(c) for c in consts]

    out = pl.pallas_call(
        spatial_loc_kernel,
        out_shape=jax.ShapeDtypeStruct((bpad, OUT_LANES), jnp.float32),
        grid=(bpad // bt,),
        in_specs=in_specs,
        out_specs=pl.BlockSpec((bt, OUT_LANES), lambda i: (i, 0)),
        compiler_params=pltpu.CompilerParams(
            dimension_semantics=("parallel",)),
    )(inp, *consts)

    theta = out[:b_sz, :THETA_DIM].reshape(b_sz, NUM_SLOTS, 2, 2, 3)
    return theta[:, :, 0], theta[:, :, 1]                             # (theta_mean, theta_std)


# --------------------------- pure-JAX reference --------------------------------
def reference_forward(x, params):
    b_sz = x.shape[0]
    coord = jnp.broadcast_to(create_coord_buffer(IMAGE_SHAPE), (b_sz, 2, H, W))
    h = jnp.concatenate([x, coord], axis=1)
    for w, b in ((params['w1'], params['b1']),
                 (params['w2'], params['b2']),
                 (params['w3'], params['b3'])):
        h = lax.conv_general_dilated(h, w, (1, 1), ((1, 1), (1, 1)),
                                     dimension_numbers=('NCHW', 'OIHW', 'NCHW'),
                                     precision=lax.Precision.HIGHEST)
        h = jnp.maximum(h + b[None, :, None, None], 0.0)
        h = lax.reduce_window(h, -jnp.inf, lax.max, (1, 1, 2, 2), (1, 1, 2, 2), 'VALID')
    flat = h.reshape(b_sz, -1)
    hid = jnp.maximum(jnp.dot(flat, params['wf1'].T, precision=lax.Precision.HIGHEST)
                      + params['bf1'], 0.0)
    theta = jax.nn.sigmoid(jnp.dot(hid, params['wf2'].T, precision=lax.Precision.HIGHEST)
                           + params['bf2'])
    theta = theta.reshape(b_sz, NUM_SLOTS, 2, 2, 3)
    mean = theta[:, :, 0] * CONSTRAIN_SCALE[None, None] + CONSTRAIN_SHIFT[None, None]
    std = 0.1 * theta[:, :, 1] * CONSTRAIN_STD[None, None] + 1e-4
    return mean, std


if __name__ == "__main__":
    key = jax.random.PRNGKey(0)
    pkey, xkey, xkey2 = jax.random.split(key, 3)
    params = init_params(pkey)
    prepped = prepare_params(params)          # one-time constant preprocessing

    # small-batch check (B=2)
    x = jax.random.normal(xkey, (2, IN_CH, H, W), jnp.float32)
    theta_mean, theta_std = spatial_localization_forward(x, prepped)
    jax.block_until_ready((theta_mean, theta_std))
    assert theta_mean.shape == (2, NUM_SLOTS, 2, 3)
    assert theta_std.shape == (2, NUM_SLOTS, 2, 3)
    ref_mean, ref_std = reference_forward(x, params)
    np.testing.assert_allclose(np.asarray(theta_mean), np.asarray(ref_mean),
                               atol=2e-3, rtol=2e-3)
    np.testing.assert_allclose(np.asarray(theta_std), np.asarray(ref_std),
                               atol=2e-3, rtol=2e-3)

    # batch-blocked path (B=16 -> two grid steps of 8 images)
    xb = jax.random.normal(xkey2, (16, IN_CH, H, W), jnp.float32)
    bm, bs = spatial_localization_forward(xb, prepped)
    jax.block_until_ready((bm, bs))
    rbm, rbs = reference_forward(xb, params)
    np.testing.assert_allclose(np.asarray(bm), np.asarray(rbm), atol=2e-3, rtol=2e-3)
    np.testing.assert_allclose(np.asarray(bs), np.asarray(rbs), atol=2e-3, rtol=2e-3)

    print("KERNEL_OK")
</pallas_src>

<mosaic_0001>
module attributes {stable_mosaic.version = 11 : i64} {
  func.func @spatial_loc_kernel(%arg0: i32, %arg1: memref<128x128xf32, #tpu.memory_space<vmem>>, %arg2: memref<384x256xf32, #tpu.memory_space<vmem>>, %arg3: memref<1x256xf32, #tpu.memory_space<vmem>>, %arg4: memref<768x256xf32, #tpu.memory_space<vmem>>, %arg5: memref<1x256xf32, #tpu.memory_space<vmem>>, %arg6: memref<768x256xf32, #tpu.memory_space<vmem>>, %arg7: memref<1x256xf32, #tpu.memory_space<vmem>>, %arg8: memref<128x128xf32, #tpu.memory_space<vmem>>, %arg9: memref<128x128xf32, #tpu.memory_space<vmem>>, %arg10: memref<64x128xf32, #tpu.memory_space<vmem>>, %arg11: memref<64x64xf32, #tpu.memory_space<vmem>>, %arg12: memref<64x64xf32, #tpu.memory_space<vmem>>, %arg13: memref<32x64xf32, #tpu.memory_space<vmem>>, %arg14: memref<32x32xf32, #tpu.memory_space<vmem>>, %arg15: memref<32x32xf32, #tpu.memory_space<vmem>>, %arg16: memref<16x32xf32, #tpu.memory_space<vmem>>, %arg17: memref<256x256xf32, #tpu.memory_space<vmem>>, %arg18: memref<256x256xf32, #tpu.memory_space<vmem>>, %arg19: memref<256x256xf32, #tpu.memory_space<vmem>>, %arg20: memref<8x16xf32, #tpu.memory_space<vmem>>, %arg21: memref<8x16xf32, #tpu.memory_space<vmem>>, %arg22: memref<512x256xf32, #tpu.memory_space<vmem>>, %arg23: memref<1x256xf32, #tpu.memory_space<vmem>>, %arg24: memref<256x128xf32, #tpu.memory_space<vmem>>, %arg25: memref<1x128xf32, #tpu.memory_space<vmem>>, %arg26: memref<1x128xf32, #tpu.memory_space<vmem>>, %arg27: memref<1x128xf32, #tpu.memory_space<vmem>>, %arg28: memref<8x128xf32, #tpu.memory_space<vmem>>) attributes {dimension_semantics = [#tpu.dimension_semantics<parallel>], iteration_bounds = array<i64: 1>, scalar_prefetch = 0 : i64, scratch_operands = 0 : i64, tpu.core_type = #tpu.core_type<tc>, window_params = [{transform_indices = @transform_0, window_bounds = array<i64: 128, 128>}, {pipeline_mode = #tpu.pipeline_mode<synchronous>, transform_indices = @transform_1, window_bounds = array<i64: 384, 256>}, {pipeline_mode = #tpu.pipeline_mode<synchronous>, transform_indices = @transform_2, window_bounds = array<i64: 1, 256>}, {pipeline_mode = #tpu.pipeline_mode<synchronous>, transform_indices = @transform_3, window_bounds = array<i64: 768, 256>}, {pipeline_mode = #tpu.pipeline_mode<synchronous>, transform_indices = @transform_4, window_bounds = array<i64: 1, 256>}, {pipeline_mode = #tpu.pipeline_mode<synchronous>, transform_indices = @transform_5, window_bounds = array<i64: 768, 256>}, {pipeline_mode = #tpu.pipeline_mode<synchronous>, transform_indices = @transform_6, window_bounds = array<i64: 1, 256>}, {pipeline_mode = #tpu.pipeline_mode<synchronous>, transform_indices = @transform_7, window_bounds = array<i64: 128, 128>}, {pipeline_mode = #tpu.pipeline_mode<synchronous>, transform_indices = @transform_8, window_bounds = array<i64: 128, 128>}, {pipeline_mode = #tpu.pipeline_mode<synchronous>, transform_indices = @transform_9, window_bounds = array<i64: 64, 128>}, {pipeline_mode = #tpu.pipeline_mode<synchronous>, transform_indices = @transform_10, window_bounds = array<i64: 64, 64>}, {pipeline_mode = #tpu.pipeline_mode<synchronous>, transform_indices = @transform_11, window_bounds = array<i64: 64, 64>}, {pipeline_mode = #tpu.pipeline_mode<synchronous>, transform_indices = @transform_12, window_bounds = array<i64: 32, 64>}, {pipeline_mode = #tpu.pipeline_mode<synchronous>, transform_indices = @transform_13, window_bounds = array<i64: 32, 32>}, {pipeline_mode = #tpu.pipeline_mode<synchronous>, transform_indices = @transform_14, window_bounds = array<i64: 32, 32>}, {pipeline_mode = #tpu.pipeline_mode<synchronous>, transform_indices = @transform_15, window_bounds = array<i64: 16, 32>}, {pipeline_mode = #tpu.pipeline_mode<synchronous>, transform_indices = @transform_16, window_bounds = array<i64: 256, 256>}, {pipeline_mode = #tpu.pipeline_mode<synchronous>, transform_indices = @transform_17, window_bounds = array<i64: 256, 256>}, {pipeline_mode = #tpu.pipeline_mode<synchronous>, transform_indices = @transform_18, window_bounds = array<i64: 256, 256>}, {pipeline_mode = #tpu.pipeline_mode<synchronous>, transform_indices = @transform_19, window_bounds = array<i64: 8, 16>}, {pipeline_mode = #tpu.pipeline_mode<synchronous>, transform_indices = @transform_20, window_bounds = array<i64: 8, 16>}, {pipeline_mode = #tpu.pipeline_mode<synchronous>, transform_indices = @transform_21, window_bounds = array<i64: 512, 256>}, {pipeline_mode = #tpu.pipeline_mode<synchronous>, transform_indices = @transform_22, window_bounds = array<i64: 1, 256>}, {pipeline_mode = #tpu.pipeline_mode<synchronous>, transform_indices = @transform_23, window_bounds = array<i64: 256, 128>}, {pipeline_mode = #tpu.pipeline_mode<synchronous>, transform_indices = @transform_24, window_bounds = array<i64: 1, 128>}, {pipeline_mode = #tpu.pipeline_mode<synchronous>, transform_indices = @transform_25, window_bounds = array<i64: 1, 128>}, {pipeline_mode = #tpu.pipeline_mode<synchronous>, transform_indices = @transform_26, window_bounds = array<i64: 1, 128>}, {transform_indices = @transform_27, window_bounds = array<i64: 8, 128>}]} {
    %c0 = arith.constant 0 : index
    %c0_0 = arith.constant 0 : index
    %0 = vector.load %arg2[%c0, %c0_0] : memref<384x256xf32, #tpu.memory_space<vmem>>, vector<384x256xf32>
    %c0_1 = arith.constant 0 : index
    %c0_2 = arith.constant 0 : index
    %1 = vector.load %arg3[%c0_1, %c0_2] : memref<1x256xf32, #tpu.memory_space<vmem>>, vector<1x256xf32>
    %c0_3 = arith.constant 0 : index
    %c0_4 = arith.constant 0 : index
    %2 = vector.load %arg4[%c0_3, %c0_4] : memref<768x256xf32, #tpu.memory_space<vmem>>, vector<768x256xf32>
    %c0_5 = arith.constant 0 : index
    %c0_6 = arith.constant 0 : index
    %3 = vector.load %arg5[%c0_5, %c0_6] : memref<1x256xf32, #tpu.memory_space<vmem>>, vector<1x256xf32>
    %c0_7 = arith.constant 0 : index
    %c0_8 = arith.constant 0 : index
    %4 = vector.load %arg6[%c0_7, %c0_8] : memref<768x256xf32, #tpu.memory_space<vmem>>, vector<768x256xf32>
    %c0_9 = arith.constant 0 : index
    %c0_10 = arith.constant 0 : index
    %5 = vector.load %arg7[%c0_9, %c0_10] : memref<1x256xf32, #tpu.memory_space<vmem>>, vector<1x256xf32>
    %c0_11 = arith.constant 0 : index
    %c0_12 = arith.constant 0 : index
    %6 = vector.load %arg8[%c0_11, %c0_12] : memref<128x128xf32, #tpu.memory_space<vmem>>, vector<128x128xf32>
    %c0_13 = arith.constant 0 : index
    %c0_14 = arith.constant 0 : index
    %7 = vector.load %arg9[%c0_13, %c0_14] : memref<128x128xf32, #tpu.memory_space<vmem>>, vector<128x128xf32>
    %c0_15 = arith.constant 0 : index
    %c0_16 = arith.constant 0 : index
    %8 = vector.load %arg10[%c0_15, %c0_16] : memref<64x128xf32, #tpu.memory_space<vmem>>, vector<64x128xf32>
    %c0_17 = arith.constant 0 : index
    %c0_18 = arith.constant 0 : index
    %9 = vector.load %arg11[%c0_17, %c0_18] : memref<64x64xf32, #tpu.memory_space<vmem>>, vector<64x64xf32>
    %c0_19 = arith.constant 0 : index
    %c0_20 = arith.constant 0 : index
    %10 = vector.load %arg12[%c0_19, %c0_20] : memref<64x64xf32, #tpu.memory_space<vmem>>, vector<64x64xf32>
    %c0_21 = arith.constant 0 : index
    %c0_22 = arith.constant 0 : index
    %11 = vector.load %arg13[%c0_21, %c0_22] : memref<32x64xf32, #tpu.memory_space<vmem>>, vector<32x64xf32>
    %c0_23 = arith.constant 0 : index
    %c0_24 = arith.constant 0 : index
    %12 = vector.load %arg14[%c0_23, %c0_24] : memref<32x32xf32, #tpu.memory_space<vmem>>, vector<32x32xf32>
    %c0_25 = arith.constant 0 : index
    %c0_26 = arith.constant 0 : index
    %13 = vector.load %arg15[%c0_25, %c0_26] : memref<32x32xf32, #tpu.memory_space<vmem>>, vector<32x32xf32>
    %c0_27 = arith.constant 0 : index
    %c0_28 = arith.constant 0 : index
    %14 = vector.load %arg16[%c0_27, %c0_28] : memref<16x32xf32, #tpu.memory_space<vmem>>, vector<16x32xf32>
    %c0_29 = arith.constant 0 : index
    %c0_30 = arith.constant 0 : index
    %15 = vector.load %arg17[%c0_29, %c0_30] : memref<256x256xf32, #tpu.memory_space<vmem>>, vector<256x256xf32>
    %c0_31 = arith.constant 0 : index
    %c0_32 = arith.constant 0 : index
    %16 = vector.load %arg18[%c0_31, %c0_32] : memref<256x256xf32, #tpu.memory_space<vmem>>, vector<256x256xf32>
    %c0_33 = arith.constant 0 : index
    %c0_34 = arith.constant 0 : index
    %17 = vector.load %arg19[%c0_33, %c0_34] : memref<256x256xf32, #tpu.memory_space<vmem>>, vector<256x256xf32>
    %c0_35 = arith.constant 0 : index
    %c0_36 = arith.constant 0 : index
    %18 = vector.load %arg20[%c0_35, %c0_36] : memref<8x16xf32, #tpu.memory_space<vmem>>, vector<8x16xf32>
    %c0_37 = arith.constant 0 : index
    %c0_38 = arith.constant 0 : index
    %19 = vector.load %arg21[%c0_37, %c0_38] : memref<8x16xf32, #tpu.memory_space<vmem>>, vector<8x16xf32>
    %c0_39 = arith.constant 0 : index
    %c0_40 = arith.constant 0 : index
    %20 = vector.load %arg22[%c0_39, %c0_40] : memref<512x256xf32, #tpu.memory_space<vmem>>, vector<512x256xf32>
    %c0_41 = arith.constant 0 : index
    %c0_42 = arith.constant 0 : index
    %21 = vector.load %arg23[%c0_41, %c0_42] : memref<1x256xf32, #tpu.memory_space<vmem>>, vector<1x256xf32>
    %c0_43 = arith.constant 0 : index
    %c0_44 = arith.constant 0 : index
    %22 = vector.load %arg24[%c0_43, %c0_44] : memref<256x128xf32, #tpu.memory_space<vmem>>, vector<256x128xf32>
    %c0_45 = arith.constant 0 : index
    %c0_46 = arith.constant 0 : index
    %23 = vector.load %arg25[%c0_45, %c0_46] : memref<1x128xf32, #tpu.memory_space<vmem>>, vector<1x128xf32>
    %c0_47 = arith.constant 0 : index
    %c0_48 = arith.constant 0 : index
    %24 = vector.load %arg26[%c0_47, %c0_48] : memref<1x128xf32, #tpu.memory_space<vmem>>, vector<1x128xf32>
    %c0_49 = arith.constant 0 : index
    %c0_50 = arith.constant 0 : index
    %25 = vector.load %arg27[%c0_49, %c0_50] : memref<1x128xf32, #tpu.memory_space<vmem>>, vector<1x128xf32>
    %c0_51 = arith.constant 0 : index
    %c0_52 = arith.constant 0 : index
    %26 = vector.load %arg1[%c0_51, %c0_52] : memref<128x128xf32, #tpu.memory_space<vmem>>, vector<128x128xf32>
    %cst = arith.constant dense<0.000000e+00> : vector<128x128xf32>
    %27 = tpu.matmul %6, %26, %cst {dimension_numbers = #tpu.dot_dimension_numbers<[1], [0], [0], [1], [0, 0, 1, 1], [], []>} : vector<128x128xf32>, vector<128x128xf32>, vector<128x128xf32> -> vector<128x128xf32>
    %cst_53 = arith.constant dense<0.000000e+00> : vector<128x128xf32>
    %28 = tpu.matmul %7, %26, %cst_53 {dimension_numbers = #tpu.dot_dimension_numbers<[1], [0], [0], [1], [0, 0, 1, 1], [], []>} : vector<128x128xf32>, vector<128x128xf32>, vector<128x128xf32> -> vector<128x128xf32>
    %29 = tpu.concatenate %27, %26, %28 in 1 : vector<128x128xf32>, vector<128x128xf32>, vector<128x128xf32> -> vector<128x384xf32>
    %cst_54 = arith.constant dense<0.000000e+00> : vector<128x256xf32>
    %30 = tpu.matmul %29, %0, %cst_54 {dimension_numbers = #tpu.dot_dimension_numbers<[1], [0], [0], [1], [0, 0, 1, 1], [], []>} : vector<128x384xf32>, vector<384x256xf32>, vector<128x256xf32> -> vector<128x256xf32>
    %31 = vector.broadcast %1 : vector<1x256xf32> to vector<128x256xf32>
    %32 = arith.addf %30, %31 : vector<128x256xf32>
    %cst_55 = arith.constant 0.000000e+00 : f32
    %33 = vector.broadcast %cst_55 : f32 to vector<128x256xf32>
    %34 = arith.maximumf %32, %33 : vector<128x256xf32>
    %cst_56 = arith.constant dense<0.000000e+00> : vector<128x256xf32>
    %35 = tpu.matmul %34, %15, %cst_56 {dimension_numbers = #tpu.dot_dimension_numbers<[1], [0], [0], [1], [0, 0, 1, 1], [], []>} : vector<128x256xf32>, vector<256x256xf32>, vector<128x256xf32> -> vector<128x256xf32>
    %36 = arith.maximumf %34, %35 : vector<128x256xf32>
    %cst_57 = arith.constant dense<0.000000e+00> : vector<128x256xf32>
    %37 = tpu.matmul %7, %36, %cst_57 {dimension_numbers = #tpu.dot_dimension_numbers<[1], [0], [0], [1], [0, 0, 1, 1], [], []>} : vector<128x128xf32>, vector<128x256xf32>, vector<128x256xf32> -> vector<128x256xf32>
    %38 = arith.maximumf %36, %37 : vector<128x256xf32>
    %cst_58 = arith.constant dense<0.000000e+00> : vector<64x256xf32>
    %39 = tpu.matmul %8, %38, %cst_58 {dimension_numbers = #tpu.dot_dimension_numbers<[1], [0], [0], [1], [0, 0, 1, 1], [], []>} : vector<64x128xf32>, vector<128x256xf32>, vector<64x256xf32> -> vector<64x256xf32>
    %cst_59 = arith.constant dense<0.000000e+00> : vector<64x256xf32>
    %40 = tpu.matmul %9, %39, %cst_59 {dimension_numbers = #tpu.dot_dimension_numbers<[1], [0], [0], [1], [0, 0, 1, 1], [], []>} : vector<64x64xf32>, vector<64x256xf32>, vector<64x256xf32> -> vector<64x256xf32>
    %cst_60 = arith.constant dense<0.000000e+00> : vector<64x256xf32>
    %41 = tpu.matmul %10, %39, %cst_60 {dimension_numbers = #tpu.dot_dimension_numbers<[1], [0], [0], [1], [0, 0, 1, 1], [], []>} : vector<64x64xf32>, vector<64x256xf32>, vector<64x256xf32> -> vector<64x256xf32>
    %42 = tpu.concatenate %40, %39, %41 in 1 : vector<64x256xf32>, vector<64x256xf32>, vector<64x256xf32> -> vector<64x768xf32>
    %cst_61 = arith.constant dense<0.000000e+00> : vector<64x256xf32>
    %43 = tpu.matmul %42, %2, %cst_61 {dimension_numbers = #tpu.dot_dimension_numbers<[1], [0], [0], [1], [0, 0, 1, 1], [], []>} : vector<64x768xf32>, vector<768x256xf32>, vector<64x256xf32> -> vector<64x256xf32>
    %44 = vector.broadcast %3 : vector<1x256xf32> to vector<64x256xf32>
    %45 = arith.addf %43, %44 : vector<64x256xf32>
    %cst_62 = arith.constant 0.000000e+00 : f32
    %46 = vector.broadcast %cst_62 : f32 to vector<64x256xf32>
    %47 = arith.maximumf %45, %46 : vector<64x256xf32>
    %cst_63 = arith.constant dense<0.000000e+00> : vector<64x256xf32>
    %48 = tpu.matmul %47, %16, %cst_63 {dimension_numbers = #tpu.dot_dimension_numbers<[1], [0], [0], [1], [0, 0, 1, 1], [], []>} : vector<64x256xf32>, vector<256x256xf32>, vector<64x256xf32> -> vector<64x256xf32>
    %49 = arith.maximumf %47, %48 : vector<64x256xf32>
    %cst_64 = arith.constant dense<0.000000e+00> : vector<64x256xf32>
    %50 = tpu.matmul %10, %49, %cst_64 {dimension_numbers = #tpu.dot_dimension_numbers<[1], [0], [0], [1], [0, 0, 1, 1], [], []>} : vector<64x64xf32>, vector<64x256xf32>, vector<64x256xf32> -> vector<64x256xf32>
    %51 = arith.maximumf %49, %50 : vector<64x256xf32>
    %cst_65 = arith.constant dense<0.000000e+00> : vector<32x256xf32>
    %52 = tpu.matmul %11, %51, %cst_65 {dimension_numbers = #tpu.dot_dimension_numbers<[1], [0], [0], [1], [0, 0, 1, 1], [], []>} : vector<32x64xf32>, vector<64x256xf32>, vector<32x256xf32> -> vector<32x256xf32>
    %cst_66 = arith.constant dense<0.000000e+00> : vector<32x256xf32>
    %53 = tpu.matmul %12, %52, %cst_66 {dimension_numbers = #tpu.dot_dimension_numbers<[1], [0], [0], [1], [0, 0, 1, 1], [], []>} : vector<32x32xf32>, vector<32x256xf32>, vector<32x256xf32> -> vector<32x256xf32>
    %cst_67 = arith.constant dense<0.000000e+00> : vector<32x256xf32>
    %54 = tpu.matmul %13, %52, %cst_67 {dimension_numbers = #tpu.dot_dimension_numbers<[1], [0], [0], [1], [0, 0, 1, 1], [], []>} : vector<32x32xf32>, vector<32x256xf32>, vector<32x256xf32> -> vector<32x256xf32>
    %55 = tpu.concatenate %53, %52, %54 in 1 : vector<32x256xf32>, vector<32x256xf32>, vector<32x256xf32> -> vector<32x768xf32>
    %cst_68 = arith.constant dense<0.000000e+00> : vector<32x256xf32>
    %56 = tpu.matmul %55, %4, %cst_68 {dimension_numbers = #tpu.dot_dimension_numbers<[1], [0], [0], [1], [0, 0, 1, 1], [], []>} : vector<32x768xf32>, vector<768x256xf32>, vector<32x256xf32> -> vector<32x256xf32>
    %57 = vector.broadcast %5 : vector<1x256xf32> to vector<32x256xf32>
    %58 = arith.addf %56, %57 : vector<32x256xf32>
    %cst_69 = arith.constant 0.000000e+00 : f32
    %59 = vector.broadcast %cst_69 : f32 to vector<32x256xf32>
    %60 = arith.maximumf %58, %59 : vector<32x256xf32>
    %cst_70 = arith.constant dense<0.000000e+00> : vector<32x256xf32>
    %61 = tpu.matmul %60, %17, %cst_70 {dimension_numbers = #tpu.dot_dimension_numbers<[1], [0], [0], [1], [0, 0, 1, 1], [], []>} : vector<32x256xf32>, vector<256x256xf32>, vector<32x256xf32> -> vector<32x256xf32>
    %62 = arith.maximumf %60, %61 : vector<32x256xf32>
    %cst_71 = arith.constant dense<0.000000e+00> : vector<32x256xf32>
    %63 = tpu.matmul %13, %62, %cst_71 {dimension_numbers = #tpu.dot_dimension_numbers<[1], [0], [0], [1], [0, 0, 1, 1], [], []>} : vector<32x32xf32>, vector<32x256xf32>, vector<32x256xf32> -> vector<32x256xf32>
    %64 = arith.maximumf %62, %63 : vector<32x256xf32>
    %cst_72 = arith.constant dense<0.000000e+00> : vector<16x256xf32>
    %65 = tpu.matmul %14, %64, %cst_72 {dimension_numbers = #tpu.dot_dimension_numbers<[1], [0], [0], [1], [0, 0, 1, 1], [], []>} : vector<16x32xf32>, vector<32x256xf32>, vector<16x256xf32> -> vector<16x256xf32>
    %cst_73 = arith.constant dense<0.000000e+00> : vector<8x256xf32>
    %66 = tpu.matmul %18, %65, %cst_73 {dimension_numbers = #tpu.dot_dimension_numbers<[1], [0], [0], [1], [0, 0, 1, 1], [], []>} : vector<8x16xf32>, vector<16x256xf32>, vector<8x256xf32> -> vector<8x256xf32>
    %cst_74 = arith.constant dense<0.000000e+00> : vector<8x256xf32>
    %67 = tpu.matmul %19, %65, %cst_74 {dimension_numbers = #tpu.dot_dimension_numbers<[1], [0], [0], [1], [0, 0, 1, 1], [], []>} : vector<8x16xf32>, vector<16x256xf32>, vector<8x256xf32> -> vector<8x256xf32>
    %68 = tpu.concatenate %66, %67 in 1 : vector<8x256xf32>, vector<8x256xf32> -> vector<8x512xf32>
    %cst_75 = arith.constant dense<0.000000e+00> : vector<8x256xf32>
    %69 = tpu.matmul %68, %20, %cst_75 {dimension_numbers = #tpu.dot_dimension_numbers<[1], [0], [0], [1], [0, 0, 1, 1], [], []>} : vector<8x512xf32>, vector<512x256xf32>, vector<8x256xf32> -> vector<8x256xf32>
    %70 = vector.broadcast %21 : vector<1x256xf32> to vector<8x256xf32>
    %71 = arith.addf %69, %70 : vector<8x256xf32>
    %cst_76 = arith.constant 0.000000e+00 : f32
    %72 = vector.broadcast %cst_76 : f32 to vector<8x256xf32>
    %73 = arith.maximumf %71, %72 : vector<8x256xf32>
    %cst_77 = arith.constant dense<0.000000e+00> : vector<8x128xf32>
    %74 = tpu.matmul %73, %22, %cst_77 {dimension_numbers = #tpu.dot_dimension_numbers<[1], [0], [0], [1], [0, 0, 1, 1], [], []>} : vector<8x256xf32>, vector<256x128xf32>, vector<8x128xf32> -> vector<8x128xf32>
    %75 = vector.broadcast %23 : vector<1x128xf32> to vector<8x128xf32>
    %76 = arith.addf %74, %75 : vector<8x128xf32>
    %77 = arith.negf %76 : vector<8x128xf32>
    %78 = math.exp %77 : vector<8x128xf32>
    %cst_78 = arith.constant 1.000000e+00 : f32
    %79 = vector.broadcast %cst_78 : f32 to vector<8x128xf32>
    %80 = arith.addf %79, %78 : vector<8x128xf32>
    %81 = arith.divf %79, %80 : vector<8x128xf32>
    %82 = vector.broadcast %24 : vector<1x128xf32> to vector<8x128xf32>
    %83 = arith.mulf %81, %82 : vector<8x128xf32>
    %84 = vector.broadcast %25 : vector<1x128xf32> to vector<8x128xf32>
    %85 = arith.addf %83, %84 : vector<8x128xf32>
    %c0_79 = arith.constant 0 : index
    %c0_80 = arith.constant 0 : index
    %86 = vector.load %arg28[%c0_79, %c0_80] : memref<8x128xf32, #tpu.memory_space<vmem>>, vector<8x128xf32>
    tpu.vector_store %arg28[%c0_79, %c0_80], %85 {strides = array<i32>} : memref<8x128xf32, #tpu.memory_space<vmem>>, vector<8x128xf32>,
    return
  }
  func.func @transform_0(%arg0: i32) -> (i32, i32) {
    %c0_i32 = arith.constant 0 : i32
    %c0_i32_0 = arith.constant 0 : i32
    return %arg0, %c0_i32 : i32, i32
  }
  func.func @transform_1(%arg0: i32) -> (i32, i32) {
    %c0_i32 = arith.constant 0 : i32
    %c0_i32_0 = arith.constant 0 : i32
    %c0_i32_1 = arith.constant 0 : i32
    return %c0_i32, %c0_i32_0 : i32, i32
  }
  func.func @transform_2(%arg0: i32) -> (i32, i32) {
    %c0_i32 = arith.constant 0 : i32
    %c0_i32_0 = arith.constant 0 : i32
    %c0_i32_1 = arith.constant 0 : i32
    return %c0_i32, %c0_i32_0 : i32, i32
  }
  func.func @transform_3(%arg0: i32) -> (i32, i32) {
    %c0_i32 = arith.constant 0 : i32
    %c0_i32_0 = arith.constant 0 : i32
    %c0_i32_1 = arith.constant 0 : i32
    return %c0_i32, %c0_i32_0 : i32, i32
  }
  func.func @transform_4(%arg0: i32) -> (i32, i32) {
    %c0_i32 = arith.constant 0 : i32
    %c0_i32_0 = arith.constant 0 : i32
    %c0_i32_1 = arith.constant 0 : i32
    return %c0_i32, %c0_i32_0 : i32, i32
  }
  func.func @transform_5(%arg0: i32) -> (i32, i32) {
    %c0_i32 = arith.constant 0 : i32
    %c0_i32_0 = arith.constant 0 : i32
    %c0_i32_1 = arith.constant 0 : i32
    return %c0_i32, %c0_i32_0 : i32, i32
  }
  func.func @transform_6(%arg0: i32) -> (i32, i32) {
    %c0_i32 = arith.constant 0 : i32
    %c0_i32_0 = arith.constant 0 : i32
    %c0_i32_1 = arith.constant 0 : i32
    return %c0_i32, %c0_i32_0 : i32, i32
  }
  func.func @transform_7(%arg0: i32) -> (i32, i32) {
    %c0_i32 = arith.constant 0 : i32
    %c0_i32_0 = arith.constant 0 : i32
    %c0_i32_1 = arith.constant 0 : i32
    return %c0_i32, %c0_i32_0 : i32, i32
  }
  func.func @transform_8(%arg0: i32) -> (i32, i32) {
    %c0_i32 = arith.constant 0 : i32
    %c0_i32_0 = arith.constant 0 : i32
    %c0_i32_1 = arith.constant 0 : i32
    return %c0_i32, %c0_i32_0 : i32, i32
  }
  func.func @transform_9(%arg0: i32) -> (i32, i32) {
    %c0_i32 = arith.constant 0 : i32
    %c0_i32_0 = arith.constant 0 : i32
    %c0_i32_1 = arith.constant 0 : i32
    return %c0_i32, %c0_i32_0 : i32, i32
  }
  func.func @transform_10(%arg0: i32) -> (i32, i32) {
    %c0_i32 = arith.constant 0 : i32
    %c0_i32_0 = arith.constant 0 : i32
    %c0_i32_1 = arith.constant 0 : i32
    return %c0_i32, %c0_i32_0 : i32, i32
  }
  func.func @transform_11(%arg0: i32) -> (i32, i32) {
    %c0_i32 = arith.constant 0 : i32
    %c0_i32_0 = arith.constant 0 : i32
    %c0_i32_1 = arith.constant 0 : i32
    return %c0_i32, %c0_i32_0 : i32, i32
  }
  func.func @transform_12(%arg0: i32) -> (i32, i32) {
    %c0_i32 = arith.constant 0 : i32
    %c0_i32_0 = arith.constant 0 : i32
    %c0_i32_1 = arith.constant 0 : i32
    return %c0_i32, %c0_i32_0 : i32, i32
  }
  func.func @transform_13(%arg0: i32) -> (i32, i32) {
    %c0_i32 = arith.constant 0 : i32
    %c0_i32_0 = arith.constant 0 : i32
    %c0_i32_1 = arith.constant 0 : i32
    return %c0_i32, %c0_i32_0 : i32, i32
  }
  func.func @transform_14(%arg0: i32) -> (i32, i32) {
    %c0_i32 = arith.constant 0 : i32
    %c0_i32_0 = arith.constant 0 : i32
    %c0_i32_1 = arith.constant 0 : i32
    return %c0_i32, %c0_i32_0 : i32, i32
  }
  func.func @transform_15(%arg0: i32) -> (i32, i32) {
    %c0_i32 = arith.constant 0 : i32
    %c0_i32_0 = arith.constant 0 : i32
    %c0_i32_1 = arith.constant 0 : i32
    return %c0_i32, %c0_i32_0 : i32, i32
  }
  func.func @transform_16(%arg0: i32) -> (i32, i32) {
    %c0_i32 = arith.constant 0 : i32
    %c0_i32_0 = arith.constant 0 : i32
    %c0_i32_1 = arith.constant 0 : i32
    return %c0_i32, %c0_i32_0 : i32, i32
  }
  func.func @transform_17(%arg0: i32) -> (i32, i32) {
    %c0_i32 = arith.constant 0 : i32
    %c0_i32_0 = arith.constant 0 : i32
    %c0_i32_1 = arith.constant 0 : i32
    return %c0_i32, %c0_i32_0 : i32, i32
  }
  func.func @transform_18(%arg0: i32) -> (i32, i32) {
    %c0_i32 = arith.constant 0 : i32
    %c0_i32_0 = arith.constant 0 : i32
    %c0_i32_1 = arith.constant 0 : i32
    return %c0_i32, %c0_i32_0 : i32, i32
  }
  func.func @transform_19(%arg0: i32) -> (i32, i32) {
    %c0_i32 = arith.constant 0 : i32
    %c0_i32_0 = arith.constant 0 : i32
    %c0_i32_1 = arith.constant 0 : i32
    return %c0_i32, %c0_i32_0 : i32, i32
  }
  func.func @transform_20(%arg0: i32) -> (i32, i32) {
    %c0_i32 = arith.constant 0 : i32
    %c0_i32_0 = arith.constant 0 : i32
    %c0_i32_1 = arith.constant 0 : i32
    return %c0_i32, %c0_i32_0 : i32, i32
  }
  func.func @transform_21(%arg0: i32) -> (i32, i32) {
    %c0_i32 = arith.constant 0 : i32
    %c0_i32_0 = arith.constant 0 : i32
    %c0_i32_1 = arith.constant 0 : i32
    return %c0_i32, %c0_i32_0 : i32, i32
  }
  func.func @transform_22(%arg0: i32) -> (i32, i32) {
    %c0_i32 = arith.constant 0 : i32
    %c0_i32_0 = arith.constant 0 : i32
    %c0_i32_1 = arith.constant 0 : i32
    return %c0_i32, %c0_i32_0 : i32, i32
  }
  func.func @transform_23(%arg0: i32) -> (i32, i32) {
    %c0_i32 = arith.constant 0 : i32
    %c0_i32_0 = arith.constant 0 : i32
    %c0_i32_1 = arith.constant 0 : i32
    return %c0_i32, %c0_i32_0 : i32, i32
  }
  func.func @transform_24(%arg0: i32) -> (i32, i32) {
    %c0_i32 = arith.constant 0 : i32
    %c0_i32_0 = arith.constant 0 : i32
    %c0_i32_1 = arith.constant 0 : i32
    return %c0_i32, %c0_i32_0 : i32, i32
  }
  func.func @transform_25(%arg0: i32) -> (i32, i32) {
    %c0_i32 = arith.constant 0 : i32
    %c0_i32_0 = arith.constant 0 : i32
    %c0_i32_1 = arith.constant 0 : i32
    return %c0_i32, %c0_i32_0 : i32, i32
  }
  func.func @transform_26(%arg0: i32) -> (i32, i32) {
    %c0_i32 = arith.constant 0 : i32
    %c0_i32_0 = arith.constant 0 : i32
    %c0_i32_1 = arith.constant 0 : i32
    return %c0_i32, %c0_i32_0 : i32, i32
  }
  func.func @transform_27(%arg0: i32) -> (i32, i32) {
    %c0_i32 = arith.constant 0 : i32
    %c0_i32_0 = arith.constant 0 : i32
    return %arg0, %c0_i32 : i32, i32
  }
}

</mosaic_0001>

<bundles_post_ra>
// kernel: spatial_localization_forward.1
= control target key start
LH: loop header
LB: loop body
LE: loop exit
PB: predicated region body
PF: predicated region fallthrough
CT: control target
= control target key end

     0   :  { %s7543_s0 = inlined_call_operand.vmem [shape: f32[128,128], index: 0, kind: input, shape index: {}]   ;;  %s7544_s1 = inlined_call_operand.hbm [shape: f32[384,256], index: 1, kind: input, shape index: {}]   ;;  %s7545_s2 = inlined_call_operand.vmem [shape: f32[1,256], index: 2, kind: input, shape index: {}]   ;;  %s7546_s3 = inlined_call_operand.vmem [shape: f32[768,256], index: 3, kind: input, shape index: {}]   ;;  %s7547_s4 = inlined_call_operand.vmem [shape: f32[1,256], index: 4, kind: input, shape index: {}]   ;;  %s7548_s5 = inlined_call_operand.hbm [shape: f32[768,256], index: 5, kind: input, shape index: {}]   ;;  %s7549_s6 = inlined_call_operand.hbm [shape: f32[1,256], index: 6, kind: input, shape index: {}]   ;;  %s7550_s7 = inlined_call_operand.hbm [shape: f32[128,128], index: 7, kind: input, shape index: {}]   ;;  %s7551_s8 = inlined_call_operand.hbm [shape: f32[128,128], index: 8, kind: input, shape index: {}]   ;;  %s7552_s9 = inlined_call_operand.hbm [shape: f32[64,128], index: 9, kind: input, shape index: {}]   ;;  %s7553_s10 = inlined_call_operand.hbm [shape: f32[64,64], index: 10, kind: input, shape index: {}]   ;;  %s7554_s11 = inlined_call_operand.hbm [shape: f32[64,64], index: 11, kind: input, shape index: {}]   ;;  %s7555_s12 = inlined_call_operand.vmem [shape: f32[32,64], index: 12, kind: input, shape index: {}]   ;;  %s7556_s13 = inlined_call_operand.hbm [shape: f32[32,32], index: 13, kind: input, shape index: {}]   ;;  %s7557_s14 = inlined_call_operand.hbm [shape: f32[32,32], index: 14, kind: input, shape index: {}]   ;;  %s7558_s15 = inlined_call_operand.hbm [shape: f32[16,32], index: 15, kind: input, shape index: {}]   ;;  %s7559_s16 = inlined_call_operand.hbm [shape: f32[256,256], index: 16, kind: input, shape index: {}]   ;;  %s7560_s17 = inlined_call_operand.hbm [shape: f32[256,256], index: 17, kind: input, shape index: {}]   ;;  %s7561_s18 = inlined_call_operand.hbm [shape: f32[256,256], index: 18, kind: input, shape index: {}]   ;;  %s7562_s19 = inlined_call_operand.vmem [shape: f32[8,16], index: 19, kind: input, shape index: {}]   ;;  %s7563_s20 = inlined_call_operand.vmem [shape: f32[8,16], index: 20, kind: input, shape index: {}]   ;;  %s7564_s21 = inlined_call_operand.hbm [shape: f32[512,256], index: 21, kind: input, shape index: {}]   ;;  %s7565_s22 = inlined_call_operand.hbm [shape: f32[1,256], index: 22, kind: input, shape index: {}]   ;;  %s7566_s23 = inlined_call_operand.vmem [shape: f32[256,128], index: 23, kind: input, shape index: {}]   ;;  %s7567_s24 = inlined_call_operand.hbm [shape: f32[1,128], index: 24, kind: input, shape index: {}]   ;;  %s7568_s25 = inlined_call_operand.hbm [shape: f32[1,128], index: 25, kind: input, shape index: {}]   ;;  %s7569_s26 = inlined_call_operand.hbm [shape: f32[1,128], index: 26, kind: input, shape index: {}]   ;;  %s7570_s27 = inlined_call_operand.vmem [shape: f32[8,128], index: 27, kind: output, shape index: {}]  }
   0x1   :  { %7600 = sst [smem:[#allocation83_spill]] %s7543_s0 }
   0x2   :  { %7601 = sst [smem:[#allocation84_spill]] %s7544_s1 }
   0x3   :  { %7602 = sst [smem:[#allocation85_spill]] %s7545_s2 }
   0x4   :  { %7603 = sst [smem:[#allocation86_spill]] %s7546_s3 }
   0x5   :  { %7604 = sst [smem:[#allocation87_spill]] %s7547_s4 }
   0x6   :  { %7605 = sst [smem:[#allocation88_spill]] %s7548_s5 }
   0x7   :  { %7606 = sst [smem:[#allocation89_spill]] %s7549_s6 }
   0x8   :  { %7607 = sst [smem:[#allocation90_spill]] %s7550_s7 }
   0x9   :  { %7608 = sst [smem:[#allocation91_spill]] %s7551_s8 }
   0xa   :  { %7609 = sst [smem:[#allocation92_spill]] %s7552_s9 }
   0xb   :  { %7610 = sst [smem:[#allocation93_spill]] %s7553_s10 }
   0xc   :  { %7611 = sst [smem:[#allocation94_spill]] %s7554_s11 }
   0xd   :  { %7612 = sst [smem:[#allocation95_spill]] %s7570_s27 }
   0xe   :  { %32 = vsyncpa [#allocation3], 0 }
   0xf   :  { %33 = vsyncpa [#allocation5], 0 }
  0x10   :  { %34 = vsyncpa [#allocation8], 0 }
  0x11   :  { %35 = vsyncpa [#allocation11], 0 }
  0x12   :  { %36 = vsyncpa [#allocation14], 0 }
  0x13   :  { %37 = vsyncpa [#allocation17], 0 }
  0x14   :  { %38 = vsyncpa [#allocation20], 0 }
  0x15   :  { %39 = vsyncpa [#allocation23], 0 }
  0x16   :  { %40 = vsyncpa [#allocation26], 0 }
  0x17   :  { %41 = vsyncpa [#allocation29], 0  ;;  %s7613_s8 = sld [smem:[#allocation88_spill]]  ;;  %s5194_s9 = smov [#allocation4]  }
  0x18   :  { %s69_s5 = sshll.u32 %s5194_s9, 4  ;;  %s7614_s10 = sld [smem:[#allocation90_spill]]  ;;  %s70_s5 = int_to_ptr.vmem [resolvable:$true] %s69_s5 }
  0x19   :  { %s7573_s1 = smov 256   ;;  %s7575_s6 = smov 16  }
  0x1a   :  { %s5197_s11 = smov [#allocation7]   ;;  %s7577_s3 = smov 128  }
  0x1b   :  { %s93_s2 = sshll.u32 %s5197_s11, 4  ;;  %s5199_s7 = smov 8   ;;  %s94_s2 = int_to_ptr.vmem [resolvable:$true] %s93_s2 }
  0x1c   :  { %s7615_s9 = sld [smem:[#allocation92_spill]]  ;;  %s5200_s0 = smov [#allocation10]  }
  0x1d   :  { %s67_s30 = sshll.u32 %s7613_s8, 4  ;;  %s5201_s11 = smov [#allocation13]   ;;  %s68_s30 = int_to_ptr.hbm [resolvable:$true] %s67_s30 }
  0x1e   :  { %s91_s29 = sshll.u32 %s7614_s10, 4  ;;  %s119_s10 = sshll.u32 %s5200_s0, 4  ;;  %s92_s29 = int_to_ptr.hbm [resolvable:$true] %s91_s29  ;;  %s120_s10 = int_to_ptr.vmem [resolvable:$true] %s119_s10 }
  0x1f   :  { %75 = dma.hbm_to_vmem [thread:$0]  %s68_s30, 24576, %s70_s5, [#allocation5], %s7573_s1, %s7573_s1, %s7575_s6  }
  0x20   :  { %99 = dma.hbm_to_vmem [thread:$0]  %s92_s29, 2048, %s94_s2, [#allocation8], %s7577_s3, %s7577_s3, %s5199_s7  }
  0x21   :  { %s7616_s5 = sld [smem:[#allocation94_spill]]  ;;  %s145_s6 = sshll.u32 %s5201_s11, 4  ;;  %s146_s6 = int_to_ptr.vmem [resolvable:$true] %s145_s6 }
  0x22   :  { %s117_s28 = sshll.u32 %s7615_s9, 4  ;;  %s171_s4 = sshll.u32 %s7557_s14, 4  ;;  %s118_s28 = int_to_ptr.hbm [resolvable:$true] %s117_s28  ;;  %s172_s4 = int_to_ptr.hbm [resolvable:$true] %s171_s4 }
  0x23   :  { %125 = dma.hbm_to_vmem [thread:$0]  %s118_s28, 1024, %s120_s10, [#allocation11], %s7577_s3, %s7577_s3, %s5199_s7  }
  0x24   :  { %s197_s9 = sshll.u32 %s7559_s16, 4  ;;  %s5202_s0 = smov [#allocation16]   ;;  %s198_s9 = int_to_ptr.hbm [resolvable:$true] %s197_s9 }
  0x25   :  { %s173_s30 = sshll.u32 %s5202_s0, 4  ;;  %s5203_s28 = smov [#allocation19]   ;;  %s174_s30 = int_to_ptr.vmem [resolvable:$true] %s173_s30 }
  0x26   :  { %179 = dma.hbm_to_vmem [thread:$0]  %s172_s4, 512, %s174_s30, [#allocation17], %s7577_s3, %s7577_s3, %s5199_s7  }
  0x27   :  { %s143_s1 = sshll.u32 %s7616_s5, 4  ;;  %s199_s14 = sshll.u32 %s5203_s28, 4  ;;  %s144_s1 = int_to_ptr.hbm [resolvable:$true] %s143_s1  ;;  %s200_s14 = int_to_ptr.vmem [resolvable:$true] %s199_s14 }
  0x28   :  { %151 = dma.hbm_to_vmem [thread:$0]  %s144_s1, 1024, %s146_s6, [#allocation14], %s7577_s3, %s7577_s3, %s5199_s7  }
  0x29   :  { %s223_s11 = sshll.u32 %s7561_s18, 4  ;;  %s7617_s1 = smov 16   ;;  %s224_s11 = int_to_ptr.hbm [resolvable:$true] %s223_s11 }
  0x2a   :  { %s7618_s6 = smov 256   ;;  %s254_s2 = sshll.u32 %s7565_s22, 4  ;;  %s255_s2 = int_to_ptr.hbm [resolvable:$true] %s254_s2 }
  0x2b   :  { %205 = dma.hbm_to_vmem [thread:$0]  %s198_s9, 8192, %s200_s14, [#allocation20], %s7618_s6, %s7618_s6, %s7617_s1  }
  0x2c   :  { %s5204_s8 = smov [#allocation22]   ;;  %s5205_s4 = smov [#allocation25]  }
  0x2d   :  { %s225_s27 = sshll.u32 %s5204_s8, 4  ;;  %s256_s18 = sshll.u32 %s5205_s4, 4  ;;  %s226_s27 = int_to_ptr.vmem [resolvable:$true] %s225_s27  ;;  %s257_s18 = int_to_ptr.vmem [resolvable:$true] %s256_s18 }
  0x2e   :  { %231 = dma.hbm_to_vmem [thread:$0]  %s224_s11, 8192, %s226_s27, [#allocation23], %s7618_s6, %s7618_s6, %s7617_s1  }
  0x2f   :  { %s278_s28 = sshll.u32 %s7568_s25, 4  ;;  %s7619_s22 = sld [smem:[#allocation84_spill]]  ;;  %s279_s28 = int_to_ptr.hbm [resolvable:$true] %s278_s28 }
  0x30   :  { %259 = dma.hbm_to_vmem [thread:$0]  %s255_s2, 32, %s257_s18, [#allocation26]  }
  0x31   :  { %s5206_s5 = smov [#allocation28]   ;;  %s5207_s29 = smov [#allocation2]  }
  0x32   :  { %s280_s16 = sshll.u32 %s5206_s5, 4  ;;  %s50_s11 = sshll.u32 %s5207_s29, 4  ;;  %s281_s16 = int_to_ptr.vmem [resolvable:$true] %s280_s16  ;;  %s51_s11 = int_to_ptr.vmem [resolvable:$true] %s50_s11 }
  0x33   :  { %283 = dma.hbm_to_vmem [thread:$0]  %s279_s28, 16, %s281_s16, [#allocation29]  }
  0x34   :  { %s7620_s4 = sld [smem:[#allocation89_spill]]  ;;  %s5208_s30 = smov [#allocation6]  }
  0x35   :  { %s48_s10 = sshll.u32 %s7619_s22, 4  ;;  %s7621_s18 = sld [smem:[#allocation91_spill]]  ;;  %s49_s10 = int_to_ptr.hbm [resolvable:$true] %s48_s10 }
  0x36   :  { %56 = dma.hbm_to_vmem [thread:$0]  %s49_s10, 12288, %s51_s11, [#allocation3], %s7618_s6, %s7618_s6, %s7617_s1  }
  0x37   :  { %s83_s9 = sshll.u32 %s5208_s30, 4  ;;  %s5209_s28 = smov [#allocation9]   ;;  %s84_s9 = int_to_ptr.vmem [resolvable:$true] %s83_s9 }
  0x38   :  { %s106_s14 = sshll.u32 %s5209_s28, 4  ;;  %s7622_s16 = sld [smem:[#allocation93_spill]]  ;;  %s107_s14 = int_to_ptr.vmem [resolvable:$true] %s106_s14 }
  0x39   :  { %s7623_s8 = smov 128   ;;  %s158_s27 = sshll.u32 %s7556_s13, 4  ;;  %s159_s27 = int_to_ptr.hbm [resolvable:$true] %s158_s27 }
  0x3a   :  { %s81_s3 = sshll.u32 %s7620_s4, 4  ;;  %s5210_s4 = smov [#allocation12]   ;;  %s82_s3 = int_to_ptr.hbm [resolvable:$true] %s81_s3 }
  0x3b   :  { %s104_s0 = sshll.u32 %s7621_s18, 4  ;;  %s132_s25 = sshll.u32 %s5210_s4, 4  ;;  %s105_s0 = int_to_ptr.hbm [resolvable:$true] %s104_s0  ;;  %s133_s25 = int_to_ptr.vmem [resolvable:$true] %s132_s25 }
  0x3c   :  { %86 = dma.hbm_to_vmem [thread:$0]  %s82_s3, 32, %s84_s9, [#allocation5]  }
  0x3d   :  { %112 = dma.hbm_to_vmem [thread:$0]  %s105_s0, 2048, %s107_s14, [#allocation8], %s7623_s8, %s7623_s8, %s5199_s7  }
  0x3e   :  { %s130_s29 = sshll.u32 %s7622_s16, 4  ;;  %s5211_s3 = smov [#allocation15]   ;;  %s131_s29 = int_to_ptr.hbm [resolvable:$true] %s130_s29 }
  0x3f   :  { %138 = dma.hbm_to_vmem [thread:$0]  %s131_s29, 1024, %s133_s25, [#allocation11], %s7623_s8, %s7623_s8, %s5199_s7  }
  0x40   :  { %s160_s2 = sshll.u32 %s5211_s3, 4  ;;  %s184_s9 = sshll.u32 %s7558_s15, 4  ;;  %s161_s2 = int_to_ptr.vmem [resolvable:$true] %s160_s2  ;;  %s185_s9 = int_to_ptr.hbm [resolvable:$true] %s184_s9 }
  0x41   :  { %166 = dma.hbm_to_vmem [thread:$0]  %s159_s27, 512, %s161_s2, [#allocation14], %s7623_s8, %s7623_s8, %s5199_s7  }
  0x42   :  { %s210_s28 = sshll.u32 %s7560_s17, 4  ;;  %s5212_s14 = smov [#allocation18]   ;;  %s211_s28 = int_to_ptr.hbm [resolvable:$true] %s210_s28 }
  0x43   :  { %s186_s22 = sshll.u32 %s5212_s14, 4  ;;  %s5213_s5 = smov [#allocation21]   ;;  %s187_s22 = int_to_ptr.vmem [resolvable:$true] %s186_s22 }
  0x44   :  { %192 = dma.hbm_to_vmem [thread:$0]  %s185_s9, 256, %s187_s22, [#allocation17], %s7623_s8, %s7623_s8, %s5199_s7  }
  0x45   :  { %s212_s15 = sshll.u32 %s5213_s5, 4  ;;  %s240_s10 = sshll.u32 %s7564_s21, 4  ;;  %s213_s15 = int_to_ptr.vmem [resolvable:$true] %s212_s15  ;;  %s241_s10 = int_to_ptr.hbm [resolvable:$true] %s240_s10 }
  0x46   :  { %218 = dma.hbm_to_vmem [thread:$0]  %s211_s28, 8192, %s213_s15, [#allocation20], %s7618_s6, %s7618_s6, %s7617_s1  }
  0x47   :  { %s267_s27 = sshll.u32 %s7567_s24, 4  ;;  %s5214_s4 = smov [#allocation24]   ;;  %s268_s27 = int_to_ptr.hbm [resolvable:$true] %s267_s27 }
  0x48   :  { %s242_s25 = sshll.u32 %s5214_s4, 4  ;;  %s5215_s7 = smov [#allocation27]   ;;  %s243_s25 = int_to_ptr.vmem [resolvable:$true] %s242_s25 }
  0x49   :  { %248 = dma.hbm_to_vmem [thread:$0]  %s241_s10, 16384, %s243_s25, [#allocation23], %s7618_s6, %s7618_s6, %s7617_s1  }
  0x4a   :  { %s269_s21 = sshll.u32 %s5215_s7, 4  ;;  %s289_s2 = sshll.u32 %s7569_s26, 4  ;;  %s270_s21 = int_to_ptr.vmem [resolvable:$true] %s269_s21  ;;  %s290_s2 = int_to_ptr.hbm [resolvable:$true] %s289_s2 }
  0x4b   :  { %272 = dma.hbm_to_vmem [thread:$0]  %s268_s27, 16, %s270_s21, [#allocation26]  }
  0x4c   :  { %s5216_s18 = smov [#allocation30]  }
  0x4d   :  { %s291_s30 = sshll.u32 %s5216_s18, 4  ;;  %s292_s30 = int_to_ptr.vmem [resolvable:$true] %s291_s30 }
  0x4e   :  { %294 = dma.hbm_to_vmem [thread:$0]  %s290_s2, 16, %s292_s30, [#allocation29]  }
  0x4f   :  { %5174 = dma.done.wait [#allocation3], 12288  }
  0x50   :  { %5175 = vsyncadd [#allocation3], 4294955008 }
  0x51   :  { %5176 = dma.done.wait [#allocation5], 24608  }
  0x52   :  { %5177 = vsyncadd [#allocation5], 4294942688 }
  0x53   :  { %5178 = dma.done.wait [#allocation8], 4096  }
  0x54   :  { %5179 = vsyncadd [#allocation8], 4294963200 }
  0x55   :  { %5180 = dma.done.wait [#allocation11], 2048  }
  0x56   :  { %5181 = vsyncadd [#allocation11], 4294965248 }
  0x57   :  { %5182 = dma.done.wait [#allocation14], 1536  }
  0x58   :  { %5183 = vsyncadd [#allocation14], 4294965760 }
  0x59   :  { %5184 = dma.done.wait [#allocation17], 768  }
  0x5a   :  { %5185 = vsyncadd [#allocation17], 4294966528 }
  0x5b   :  { %5186 = dma.done.wait [#allocation20], 16384  }
  0x5c   :  { %5187 = vsyncadd [#allocation20], 4294950912 }
  0x5d   :  { %5188 = dma.done.wait [#allocation23], 24576  }
  0x5e   :  { %5189 = vsyncadd [#allocation23], 4294942720 }
  0x5f   :  { %5190 = dma.done.wait [#allocation26], 48  }
  0x60   :  { %5191 = vsyncadd [#allocation26], 4294967248 }
  0x61   :  { %5192 = dma.done.wait [#allocation29], 32  }
  0x62   :  { %5193 = vsyncadd [#allocation29], 4294967264  ;;  %s7624_s1 = sld [smem:[#allocation83_spill]]  ;;  %v854_v16 = vld [vmem:[#allocation7] sm:$0xff]  ;;  %v855_v18 = vld [vmem:[#allocation7 + $0x8] sm:$0xff]  ;;  %vm2391_vm0 = vcmask 523264  }
  0x63   :  { %v870_v17 = vld [vmem:[#allocation9] sm:$0xff]  ;;  %v871_v19 = vld [vmem:[#allocation9 + $0x8] sm:$0xff]  ;;  %v856_v20 = vld [vmem:[#allocation7 + $0x10] sm:$0xff]  ;;  %s7625_s22 = sld [smem:[#allocation85_spill]]  ;;  %vm3465_vm1 = vcmask 261120   ;;  %vm4209_vm2 = vcmask 130048  }
  0x64   :  { %v872_v21 = vld [vmem:[#allocation9 + $0x10] sm:$0xff]  ;;  %v857_v22 = vld [vmem:[#allocation7 + $0x18] sm:$0xff]  ;;  %v858_v24 = vld [vmem:[#allocation7 + $0x20] sm:$0xff]  ;;  %s7724_s18 = sld [smem:[#allocation86_spill]] }
  0x65   :  { %v873_v23 = vld [vmem:[#allocation9 + $0x18] sm:$0xff]  ;;  %v874_v25 = vld [vmem:[#allocation9 + $0x20] sm:$0xff]  ;;  %v859_v26 = vld [vmem:[#allocation7 + $0x28] sm:$0xff]  ;;  %s7725_s25 = sld [smem:[#allocation87_spill]] }
  0x66   :  { %v875_v27 = vld [vmem:[#allocation9 + $0x28] sm:$0xff]  ;;  %v860_v28 = vld [vmem:[#allocation7 + $0x30] sm:$0xff]  ;;  %v861_v30 = vld [vmem:[#allocation7 + $0x38] sm:$0xff]  ;;  %s7726_s14 = sld [smem:[#allocation95_spill]] }
  0x67   :  { %v876_v29 = vld [vmem:[#allocation9 + $0x30] sm:$0xff]  ;;  %v877_v31 = vld [vmem:[#allocation9 + $0x38] sm:$0xff]  ;;  %v862_v33 = vld [vmem:[#allocation7 + $0x40] sm:$0xff] }
  0x68   :  { %v5459_v0 = vld [vmem:[%s7624_s1 + $0x78] sm:$0xff]  ;;  %v5464_v1 = vld [vmem:[%s7624_s1 + $0x70] sm:$0xff]  ;;  %v5471_v2 = vld [vmem:[%s7624_s1 + $0x68] sm:$0xff] }
  0x69   :  { %1298 = vmatpush.msra.mxu0 %v5459_v0  ;;  %1363 = vmatpush.msra.mxu1 %v5459_v0  ;;  %v5478_v3 = vld [vmem:[%s7624_s1 + $0x60] sm:$0xff]  ;;  %v5485_v4 = vld [vmem:[%s7624_s1 + $0x58] sm:$0xff]  ;;  %v5492_v5 = vld [vmem:[%s7624_s1 + $0x50] sm:$0xff] }
  0x6a   :  { %v5499_v6 = vld [vmem:[%s7624_s1 + $0x48] sm:$0xff]  ;;  %v5506_v7 = vld [vmem:[%s7624_s1 + $0x40] sm:$0xff]  ;;  %v5513_v8 = vld [vmem:[%s7624_s1 + $0x38] sm:$0xff] }
  0x6b   :  { %1299 = vmatpush.msra.mxu0 %v5464_v1  ;;  %1364 = vmatpush.msra.mxu1 %v5464_v1  ;;  %v5520_v9 = vld [vmem:[%s7624_s1 + $0x30] sm:$0xff]  ;;  %v5527_v10 = vld [vmem:[%s7624_s1 + $0x28] sm:$0xff]  ;;  %v5534_v11 = vld [vmem:[%s7624_s1 + $0x20] sm:$0xff] }
  0x6c   :  { %v5541_v12 = vld [vmem:[%s7624_s1 + $0x18] sm:$0xff]  ;;  %v5548_v13 = vld [vmem:[%s7624_s1 + $0x10] sm:$0xff]  ;;  %v5555_v14 = vld [vmem:[%s7624_s1 + $0x8] sm:$0xff] }
  0x6d   :  { %1300 = vmatpush.msra.mxu0 %v5471_v2  ;;  %1365 = vmatpush.msra.mxu1 %v5471_v2  ;;  %v5562_v15 = vld [vmem:[%s7624_s1] sm:$0xff]  ;;  %v401_v32 = vld [vmem:[#allocation2 + $0xf0] sm:$0xff]  ;;  %v402_v37 = vld [vmem:[#allocation2 + $0xf8] sm:$0xff] }
  0x6e   :  { %1433 = vmatpush.msra.mxu2 %v401_v32  ;;  %v878_v34 = vld [vmem:[#allocation9 + $0x40] sm:$0xff]  ;;  %v433_v36 = vld [vmem:[#allocation2 + $0x1f0] sm:$0xff]  ;;  %v398_v43 = vld [vmem:[#allocation2 + $0xd8] sm:$0xff] }
  0x6f   :  { %1301 = vmatpush.msra.mxu0 %v5478_v3  ;;  %1366 = vmatpush.msra.mxu1 %v5478_v3  ;;  %v399_v35 = vld [vmem:[#allocation2 + $0xe0] sm:$0xff]  ;;  %v397_v38 = vld [vmem:[#allocation2 + $0xd0] sm:$0xff]  ;;  %v400_v40 = vld [vmem:[#allocation2 + $0xe8] sm:$0xff] }
  0x70   :  { %1434 = vmatpush.msra.mxu2 %v399_v35  ;;  %1498 = vmatpush.msra.mxu3 %v433_v36  ;;  %v431_v39 = vld [vmem:[#allocation2 + $0x1e0] sm:$0xff]  ;;  %v429_v42 = vld [vmem:[#allocation2 + $0x1d0] sm:$0xff]  ;;  %v396_v48 = vld [vmem:[#allocation2 + $0xc8] sm:$0xff] }
  0x71   :  { %1302 = vmatpush.msra.mxu0 %v5485_v4  ;;  %1367 = vmatpush.msra.mxu1 %v5485_v4  ;;  %v395_v41 = vld [vmem:[#allocation2 + $0xc0] sm:$0xff]  ;;  %v393_v44 = vld [vmem:[#allocation2 + $0xb0] sm:$0xff]  ;;  %v394_v52 = vld [vmem:[#allocation2 + $0xb8] sm:$0xff] }
  0x72   :  { %1435 = vmatpush.msra.mxu2 %v397_v38  ;;  %1499 = vmatpush.msra.mxu3 %v431_v39  ;;  %v427_v45 = vld [vmem:[#allocation2 + $0x1c0] sm:$0xff]  ;;  %v863_v46 = vld [vmem:[#allocation7 + $0x48] sm:$0xff]  ;;  %v390_v60 = vld [vmem:[#allocation2 + $0x98] sm:$0xff] }
  0x73   :  { %1303 = vmatpush.msra.mxu0 %v5492_v5  ;;  %1368 = vmatpush.msra.mxu1 %v5492_v5  ;;  %v879_v47 = vld [vmem:[#allocation9 + $0x48] sm:$0xff]  ;;  %v391_v49 = vld [vmem:[#allocation2 + $0xa0] sm:$0xff]  ;;  %v864_v62 = vld [vmem:[#allocation7 + $0x50] sm:$0xff] }
  0x74   :  { %1436 = vmatpush.msra.mxu2 %v395_v41  ;;  %1500 = vmatpush.msra.mxu3 %v429_v42  ;;  %v425_v50 = vld [vmem:[#allocation2 + $0x1b0] sm:$0xff]  ;;  %v423_v54 = vld [vmem:[#allocation2 + $0x1a0] sm:$0xff]  ;;  %v392_v56 = vld [vmem:[#allocation2 + $0xa8] sm:$0xff] }
  0x75   :  { %1304 = vmatpush.msra.mxu0 %v5499_v6  ;;  %1369 = vmatpush.msra.mxu1 %v5499_v6  ;;  %v465_v51 = vld [vmem:[#allocation2 + $0x2f0] sm:$0xff]  ;;  %v463_v55 = vld [vmem:[#allocation2 + $0x2e0] sm:$0xff]  ;;  %v382_v32 = vld [vmem:[#allocation2 + $0x58] sm:$0xff] }
  0x76   :  { %1437 = vmatpush.msra.mxu2 %v393_v44  ;;  %1501 = vmatpush.msra.mxu3 %v427_v45  ;;  %v389_v53 = vld [vmem:[#allocation2 + $0x90] sm:$0xff]  ;;  %v387_v57 = vld [vmem:[#allocation2 + $0x80] sm:$0xff]  ;;  %v380_v36 = vld [vmem:[#allocation2 + $0x48] sm:$0xff] }
  0x77   :  { %1305 = vmatpush.msra.mxu0 %v5506_v7  ;;  %1370 = vmatpush.msra.mxu1 %v5506_v7  ;;  %v421_v58 = vld [vmem:[#allocation2 + $0x190] sm:$0xff]  ;;  %v451_v35 = vld [vmem:[#allocation2 + $0x280] sm:$0xff]  ;;  %v376_v44 = vld [vmem:[#allocation2 + $0x28] sm:$0xff] }
  0x78   :  { %1438 = vmatpush.msra.mxu2 %v391_v49  ;;  %1502 = vmatpush.msra.mxu3 %v425_v50  ;;  %v461_v59 = vld [vmem:[#allocation2 + $0x2d0] sm:$0xff]  ;;  %v407_v42 = vld [vmem:[#allocation2 + $0x120] sm:$0xff]  ;;  %v374_v50 = vld [vmem:[#allocation2 + $0x18] sm:$0xff] }
  0x79   :  { %1306 = vmatpush.msra.mxu0 %v5513_v8  ;;  %1371 = vmatpush.msra.mxu1 %v5513_v8  ;;  %v385_v61 = vld [vmem:[#allocation2 + $0x70] sm:$0xff]  ;;  %v371_v45 = vld [vmem:[#allocation2] sm:$0xff] }
  0x7a   :  { %1439 = vmatpush.msra.mxu2 %v389_v53  ;;  %1503 = vmatpush.msra.mxu3 %v423_v54  ;;  %v880_v63 = vld [vmem:[#allocation9 + $0x50] sm:$0xff]  ;;  %v372_v53 = vld [vmem:[#allocation2 + $0x8] sm:$0xff] }
  0x7b   :  { %1307 = vmatpush.msra.mxu0 %v5520_v9  ;;  %1372 = vmatpush.msra.mxu1 %v5520_v9  ;;  %v409_v38 = vld [vmem:[#allocation2 + $0x130] sm:$0xff] }
  0x7c   :  { %1440 = vmatpush.msra.mxu2 %v387_v57  ;;  %1504 = vmatpush.msra.mxu3 %v421_v58  ;;  %v449_v39 = vld [vmem:[#allocation2 + $0x270] sm:$0xff] }
  0x7d   :  { %1308 = vmatpush.msra.mxu0 %v5527_v10  ;;  %1373 = vmatpush.msra.mxu1 %v5527_v10  ;;  %v373_v41 = vld [vmem:[#allocation2 + $0x10] sm:$0xff] }
  0x7e   :  { %1441 = vmatpush.msra.mxu2 %v385_v61  ;;  %v445_v49 = vld [vmem:[#allocation2 + $0x250] sm:$0xff] }
  0x7f   :  { %1309 = vmatpush.msra.mxu0 %v5534_v11  ;;  %1374 = vmatpush.msra.mxu1 %v5534_v11  ;;  %v441_v54 = vld [vmem:[#allocation2 + $0x230] sm:$0xff] }
  0x80   :  { %v883_v57 = vld [vmem:[#allocation9 + $0x68] sm:$0xff]  ;;  %v884_v61 = vld [vmem:[#allocation9 + $0x70] sm:$0xff] }
  0x81   :  { %1310 = vmatpush.msra.mxu0 %v5541_v12  ;;  %1375 = vmatpush.msra.mxu1 %v5541_v12  ;;  %v437_v58 = vld [vmem:[#allocation2 + $0x210] sm:$0xff] }
  0x83   :  { %1311 = vmatpush.msra.mxu0 %v5548_v13  ;;  %1376 = vmatpush.msra.mxu1 %v5548_v13 }
  0x85   :  { %1312 = vmatpush.msra.mxu0 %v5555_v14  ;;  %1377 = vmatpush.msra.mxu1 %v5555_v14 }
  0x87   :  { %1313 = vmatpush.msra.mxu0 %v5562_v15  ;;  %1378 = vmatpush.msra.mxu1 %v5562_v15 }
  0x88   :  { %1314 = vmatmul.f32.vlgmr.msra.gmra.mxu0 %v854_v16  ;;  %1379 = vmatmul.f32.vlgmr.msra.gmra.mxu1 %v870_v17  ;;  %v419_v16 = vld [vmem:[#allocation2 + $0x180] sm:$0xff] }
  0x89   :  { %1628 = vmatpush.msrb.mxu1 %v402_v37  ;;  %1563 = vmatpush.msrb.mxu0 %v465_v51  ;;  %v459_v17 = vld [vmem:[#allocation2 + $0x2c0] sm:$0xff] }
  0x8a   :  { %1505 = vmatpush.msra.mxu3 %v419_v16  ;;  %v375_v37 = vld [vmem:[#allocation2 + $0x20] sm:$0xff] }
  0x8b   :  { %1629 = vmatpush.msrb.mxu1 %v400_v40  ;;  %1564 = vmatpush.msrb.mxu0 %v463_v55  ;;  %v378_v40 = vld [vmem:[#allocation2 + $0x38] sm:$0xff]  ;;  %v403_v51 = vld [vmem:[#allocation2 + $0x100] sm:$0xff] }
  0x8c   :  { %v439_v55 = vld [vmem:[#allocation2 + $0x220] sm:$0xff] }
  0x8d   :  { %1630 = vmatpush.msrb.mxu1 %v398_v43  ;;  %1565 = vmatpush.msrb.mxu0 %v461_v59  ;;  %v447_v43 = vld [vmem:[#allocation2 + $0x260] sm:$0xff] }
  0x8e   :  { %v435_v59 = vld [vmem:[#allocation2 + $0x200] sm:$0xff] }
  0x8f   :  { %1631 = vmatpush.msrb.mxu1 %v396_v48  ;;  %1566 = vmatpush.msrb.mxu0 %v459_v17  ;;  %v405_v48 = vld [vmem:[#allocation2 + $0x110] sm:$0xff] }
  0x90   :  { %1317 = vmatmul.f32.gmra.mxu0 %v855_v18  ;;  %1382 = vmatmul.f32.gmra.mxu1 %v871_v19  ;;  %v388_v18 = vld [vmem:[#allocation2 + $0x88] sm:$0xff]  ;;  %v383_v19 = vld [vmem:[#allocation2 + $0x60] sm:$0xff] }
  0x91   :  { %1632 = vmatpush.msrb.mxu1 %v394_v52  ;;  %1442 = vmatpush.msra.mxu2 %v383_v19  ;;  %v443_v52 = vld [vmem:[#allocation2 + $0x240] sm:$0xff] }
  0x93   :  { %1633 = vmatpush.msrb.mxu1 %v392_v56  ;;  %v867_v56 = vld [vmem:[#allocation7 + $0x68] sm:$0xff] }
  0x95   :  { %1634 = vmatpush.msrb.mxu1 %v390_v60  ;;  %v868_v60 = vld [vmem:[#allocation7 + $0x70] sm:$0xff] }
  0x97   :  { %1635 = vmatpush.msrb.mxu1 %v388_v18 }
  0x98   :  { %1320 = vmatmul.f32.gmra.mxu0 %v856_v20  ;;  %1385 = vmatmul.f32.gmra.mxu1 %v872_v21  ;;  %v417_v20 = vld [vmem:[#allocation2 + $0x170] sm:$0xff] }
  0x99   :  { %v457_v21 = vld [vmem:[#allocation2 + $0x2b0] sm:$0xff]  ;;  %1506 = vmatpush.msra.mxu3 %v417_v20 }
  0x9a   :  { %1567 = vmatpush.msrb.mxu0 %v457_v21 }
  0xa0   :  { %1323 = vmatmul.f32.gmra.mxu0 %v857_v22  ;;  %1388 = vmatmul.f32.gmra.mxu1 %v873_v23  ;;  %v386_v22 = vld [vmem:[#allocation2 + $0x78] sm:$0xff]  ;;  %v381_v23 = vld [vmem:[#allocation2 + $0x50] sm:$0xff] }
  0xa1   :  { %1636 = vmatpush.msrb.mxu1 %v386_v22  ;;  %1443 = vmatpush.msra.mxu2 %v381_v23 }
  0xa8   :  { %1326 = vmatmul.f32.gmra.mxu0 %v858_v24  ;;  %1391 = vmatmul.f32.gmra.mxu1 %v874_v25  ;;  %v415_v24 = vld [vmem:[#allocation2 + $0x160] sm:$0xff] }
  0xa9   :  { %v455_v25 = vld [vmem:[#allocation2 + $0x2a0] sm:$0xff]  ;;  %1507 = vmatpush.msra.mxu3 %v415_v24 }
  0xaa   :  { %1568 = vmatpush.msrb.mxu0 %v455_v25 }
  0xb0   :  { %1329 = vmatmul.f32.gmra.mxu0 %v859_v26  ;;  %1394 = vmatmul.f32.gmra.mxu1 %v875_v27  ;;  %v384_v26 = vld [vmem:[#allocation2 + $0x68] sm:$0xff]  ;;  %v379_v27 = vld [vmem:[#allocation2 + $0x40] sm:$0xff] }
  0xb1   :  { %1637 = vmatpush.msrb.mxu1 %v384_v26  ;;  %1444 = vmatpush.msra.mxu2 %v379_v27 }
  0xb3   :  { %1638 = vmatpush.msrb.mxu1 %v382_v32 }
  0xb5   :  { %1639 = vmatpush.msrb.mxu1 %v380_v36  ;;  %v464_v36 = vld [vmem:[#allocation2 + $0x2e8] sm:$0xff] }
  0xb7   :  { %1640 = vmatpush.msrb.mxu1 %v378_v40  ;;  %v426_v40 = vld [vmem:[#allocation2 + $0x1b8] sm:$0xff] }
  0xb8   :  { %1332 = vmatmul.f32.gmra.mxu0 %v860_v28  ;;  %1397 = vmatmul.f32.gmra.mxu1 %v876_v29  ;;  %v413_v28 = vld [vmem:[#allocation2 + $0x150] sm:$0xff] }
  0xb9   :  { %v453_v29 = vld [vmem:[#allocation2 + $0x290] sm:$0xff]  ;;  %1508 = vmatpush.msra.mxu3 %v413_v28  ;;  %1641 = vmatpush.msrb.mxu1 %v376_v44  ;;  %v422_v44 = vld [vmem:[#allocation2 + $0x198] sm:$0xff] }
  0xba   :  { %1569 = vmatpush.msrb.mxu0 %v453_v29 }
  0xbb   :  { %1642 = vmatpush.msrb.mxu1 %v374_v50 }
  0xbc   :  { %1570 = vmatpush.msrb.mxu0 %v451_v35  ;;  %v430_v35 = vld [vmem:[#allocation2 + $0x1d8] sm:$0xff] }
  0xbd   :  { %1643 = vmatpush.msrb.mxu1 %v372_v53  ;;  %v950_v53 = vld [vmem:[#allocation19 + $0xd0] sm:$0xff] }
  0xbe   :  { %1571 = vmatpush.msrb.mxu0 %v449_v39 }
  0xc0   :  { %1335 = vmatmul.f32.gmra.mxu0 %v861_v30  ;;  %1400 = vmatmul.f32.gmra.mxu1 %v877_v31  ;;  %v865_v30 = vld [vmem:[#allocation7 + $0x58] sm:$0xff] }
  0xc1   :  { %v881_v31 = vld [vmem:[#allocation9 + $0x58] sm:$0xff]  ;;  %1572 = vmatpush.msrb.mxu0 %v447_v43 }
  0xc2   :  { %v458_v43 = vld [vmem:[#allocation2 + $0x2b8] sm:$0xff] }
  0xc3   :  { %1573 = vmatpush.msrb.mxu0 %v445_v49 }
  0xc5   :  { %1574 = vmatpush.msrb.mxu0 %v443_v52  ;;  %v452_v52 = vld [vmem:[#allocation2 + $0x288] sm:$0xff] }
  0xc7   :  { %1575 = vmatpush.msrb.mxu0 %v441_v54  ;;  %v416_v54 = vld [vmem:[#allocation2 + $0x168] sm:$0xff] }
  0xc8   :  { %1338 = vmatmul.f32.gmra.mxu0 %v862_v33  ;;  %1403 = vmatmul.f32.gmra.mxu1 %v878_v34  ;;  %v377_v33 = vld [vmem:[#allocation2 + $0x30] sm:$0xff]  ;;  %v411_v34 = vld [vmem:[#allocation2 + $0x140] sm:$0xff] }
  0xc9   :  { %1445 = vmatpush.msra.mxu2 %v377_v33  ;;  %1509 = vmatpush.msra.mxu3 %v411_v34  ;;  %v434_v33 = vld [vmem:[#allocation2 + $0x1f8] sm:$0xff]  ;;  %v432_v34 = vld [vmem:[#allocation2 + $0x1e8] sm:$0xff] }
  0xca   :  { %1576 = vmatpush.msrb.mxu0 %v439_v55  ;;  %v948_v55 = vld [vmem:[#allocation19 + $0xc0] sm:$0xff] }
  0xcb   :  { %1446 = vmatpush.msra.mxu2 %v375_v37  ;;  %1510 = vmatpush.msra.mxu3 %v409_v38  ;;  %v462_v37 = vld [vmem:[#allocation2 + $0x2d8] sm:$0xff] }
  0xcc   :  { %1577 = vmatpush.msrb.mxu0 %v437_v58  ;;  %v946_v58 = vld [vmem:[#allocation19 + $0xb0] sm:$0xff] }
  0xcd   :  { %1447 = vmatpush.msra.mxu2 %v373_v41  ;;  %1511 = vmatpush.msra.mxu3 %v407_v42  ;;  %v460_v41 = vld [vmem:[#allocation2 + $0x2c8] sm:$0xff] }
  0xce   :  { %1578 = vmatpush.msrb.mxu0 %v435_v59  ;;  %v424_v42 = vld [vmem:[#allocation2 + $0x1a8] sm:$0xff] }
  0xcf   :  { %1448 = vmatpush.msra.mxu2 %v371_v45  ;;  %1512 = vmatpush.msra.mxu3 %v405_v48  ;;  %v954_v45 = vld [vmem:[#allocation19 + $0xf0] sm:$0xff]  ;;  %v952_v48 = vld [vmem:[#allocation19 + $0xe0] sm:$0xff] }
  0xd0   :  { %1341 = vmatmul.f32.gmra.mxu0 %v863_v46  ;;  %1406 = vmatmul.f32.gmra.mxu1 %v879_v47  ;;  %v866_v46 = vld [vmem:[#allocation7 + $0x60] sm:$0xff] }
  0xd1   :  { %v882_v47 = vld [vmem:[#allocation9 + $0x60] sm:$0xff]  ;;  %1513 = vmatpush.msra.mxu3 %v403_v51  ;;  %1693 = vmatpush.msrb.mxu2 %v434_v33  ;;  %v418_v51 = vld [vmem:[#allocation2 + $0x178] sm:$0xff] }
  0xd2   :  { %1514 = vmatmul.f32.vlgmr.msra.gmra.mxu3 %v5562_v15  ;;  %1855 = vmatpush.msra.mxu0 %v954_v45  ;;  %v412_v59 = vld [vmem:[#allocation2 + $0x148] sm:$0xff] }
  0xd3   :  { %1694 = vmatpush.msrb.mxu2 %v432_v34  ;;  %v938_v33 = vld [vmem:[#allocation19 + $0x70] sm:$0xff] }
  0xd4   :  { %1856 = vmatpush.msra.mxu0 %v952_v48  ;;  %v404_v34 = vld [vmem:[#allocation2 + $0x108] sm:$0xff] }
  0xd5   :  { %1695 = vmatpush.msrb.mxu2 %v430_v35  ;;  %v936_v35 = vld [vmem:[#allocation19 + $0x60] sm:$0xff] }
  0xd6   :  { %1857 = vmatpush.msra.mxu0 %v950_v53 }
  0xd8   :  { %1344 = vmatmul.f32.gmra.mxu0 %v864_v62  ;;  %1409 = vmatmul.f32.gmra.mxu1 %v880_v63  ;;  %v869_v62 = vld [vmem:[#allocation7 + $0x78] sm:$0xff] }
  0xd9   :  { %v885_v63 = vld [vmem:[#allocation9 + $0x78] sm:$0xff]  ;;  %1858 = vmatpush.msra.mxu0 %v948_v55 }
  0xda   :  { %1517 = vmatmul.f32.gmra.mxu3 %v5555_v14 }
  0xdb   :  { %1859 = vmatpush.msra.mxu0 %v946_v58 }
  0xe0   :  { %1347 = vmatmul.f32.gmra.mxu0 %v865_v30  ;;  %1412 = vmatmul.f32.gmra.mxu1 %v881_v31 }
  0xe2   :  { %1520 = vmatmul.f32.gmra.mxu3 %v5548_v13 }
  0xe8   :  { %1350 = vmatmul.f32.gmra.mxu0 %v866_v46  ;;  %1415 = vmatmul.f32.gmra.mxu1 %v882_v47  ;;  %v420_v46 = vld [vmem:[#allocation2 + $0x188] sm:$0xff]  ;;  %v454_v47 = vld [vmem:[#allocation2 + $0x298] sm:$0xff] }
  0xea   :  { %1523 = vmatmul.f32.gmra.mxu3 %v5541_v12 }
  0xf0   :  { %1353 = vmatmul.f32.gmra.mxu0 %v867_v56  ;;  %1418 = vmatmul.f32.gmra.mxu1 %v883_v57  ;;  %v414_v56 = vld [vmem:[#allocation2 + $0x158] sm:$0xff]  ;;  %v448_v57 = vld [vmem:[#allocation2 + $0x268] sm:$0xff] }
  0xf2   :  { %1526 = vmatmul.f32.gmra.mxu3 %v5534_v11 }
  0xf8   :  { %1356 = vmatmul.f32.gmra.mxu0 %v868_v60  ;;  %1421 = vmatmul.f32.gmra.mxu1 %v884_v61  ;;  %v446_v60 = vld [vmem:[#allocation2 + $0x258] sm:$0xff] }
  0xfa   :  { %1529 = vmatmul.f32.gmra.mxu3 %v5527_v10 }
 0x100   :  { %1359 = vmatmul.f32.gmra.mxu0 %v869_v62  ;;  %1424 = vmatmul.f32.gmra.mxu1 %v885_v63  ;;  %v944_v63 = vld [vmem:[#allocation19 + $0xa0] sm:$0xff] }
 0x101   :  { %1860 = vmatpush.msra.mxu0 %v944_v63 }
 0x102   :  { %1532 = vmatmul.f32.gmra.mxu3 %v5520_v9 }
 0x105   :  { %v1315_v16 = vpop.f32.mrf.mxu0  ;;  %v5572_v17 = vpop.f32.mrf.mxu1 }
 0x106   :  { %1449 = vmatmul.f32.vlgmr.msra.gmra.mxu2 %v1315_v16 }
 0x108   :  { %1644 = vmatmul.f32.vlgmr.msrb.gmra.mxu1 %v1315_v16  ;;  %1579 = vmatmul.f32.vlgmr.msrb.gmra.mxu0 %v5572_v17  ;;  %v410_v16 = vld [vmem:[#allocation2 + $0x138] sm:$0xff] }
 0x10a   :  { %1535 = vmatmul.f32.gmra.mxu3 %v5513_v8 }
 0x10d   :  { %v1318_v18 = vpop.f32.mrf.mxu0  ;;  %v5576_v19 = vpop.f32.mrf.mxu1 }
 0x10e   :  { %1452 = vmatmul.f32.gmra.mxu2 %v1318_v18 }
 0x110   :  { %1647 = vmatmul.f32.gmra.mxu1 %v1318_v18  ;;  %1582 = vmatmul.f32.gmra.mxu0 %v5576_v19  ;;  %v444_v18 = vld [vmem:[#allocation2 + $0x248] sm:$0xff] }
 0x112   :  { %1538 = vmatmul.f32.gmra.mxu3 %v5506_v7 }
 0x115   :  { %v1321_v20 = vpop.f32.mrf.mxu0  ;;  %v5580_v21 = vpop.f32.mrf.mxu1 }
 0x116   :  { %1455 = vmatmul.f32.gmra.mxu2 %v1321_v20 }
 0x118   :  { %1650 = vmatmul.f32.gmra.mxu1 %v1321_v20  ;;  %1585 = vmatmul.f32.gmra.mxu0 %v5580_v21  ;;  %v942_v20 = vld [vmem:[#allocation19 + $0x90] sm:$0xff] }
 0x119   :  { %1861 = vmatpush.msra.mxu0 %v942_v20 }
 0x11a   :  { %1541 = vmatmul.f32.gmra.mxu3 %v5499_v6 }
 0x11d   :  { %v1324_v22 = vpop.f32.mrf.mxu0  ;;  %v5584_v23 = vpop.f32.mrf.mxu1 }
 0x11e   :  { %1458 = vmatmul.f32.gmra.mxu2 %v1324_v22 }
 0x120   :  { %1653 = vmatmul.f32.gmra.mxu1 %v1324_v22  ;;  %1588 = vmatmul.f32.gmra.mxu0 %v5584_v23  ;;  %v408_v22 = vld [vmem:[#allocation2 + $0x128] sm:$0xff] }
 0x122   :  { %1544 = vmatmul.f32.gmra.mxu3 %v5492_v5  ;;  %v466_v5 = vld [vmem:[#allocation2 + $0x2f8] sm:$0xff] }
 0x123   :  { %1758 = vmatpush.msrb.mxu3 %v466_v5  ;;  %v438_v5 = vld [vmem:[#allocation2 + $0x218] sm:$0xff] }
 0x125   :  { %v1327_v24 = vpop.f32.mrf.mxu0  ;;  %v5588_v25 = vpop.f32.mrf.mxu1  ;;  %1759 = vmatpush.msrb.mxu3 %v464_v36  ;;  %v934_v36 = vld [vmem:[#allocation19 + $0x50] sm:$0xff] }
 0x126   :  { %1461 = vmatmul.f32.gmra.mxu2 %v1327_v24 }
 0x127   :  { %1760 = vmatpush.msrb.mxu3 %v462_v37 }
 0x128   :  { %1656 = vmatmul.f32.gmra.mxu1 %v1327_v24  ;;  %1591 = vmatmul.f32.gmra.mxu0 %v5588_v25  ;;  %v940_v24 = vld [vmem:[#allocation19 + $0x80] sm:$0xff] }
 0x129   :  { %1761 = vmatpush.msrb.mxu3 %v460_v41  ;;  %1862 = vmatpush.msra.mxu0 %v940_v24 }
 0x12a   :  { %1547 = vmatmul.f32.gmra.mxu3 %v5485_v4  ;;  %v428_v4 = vld [vmem:[#allocation2 + $0x1c8] sm:$0xff] }
 0x12b   :  { %1696 = vmatpush.msrb.mxu2 %v428_v4  ;;  %1762 = vmatpush.msrb.mxu3 %v458_v43  ;;  %v932_v4 = vld [vmem:[#allocation19 + $0x40] sm:$0xff]  ;;  %v926_v43 = vld [vmem:[#allocation19 + $0x10] sm:$0xff] }
 0x12c   :  { %1863 = vmatpush.msra.mxu0 %v938_v33 }
 0x12d   :  { %v1330_v26 = vpop.f32.mrf.mxu0  ;;  %v5592_v27 = vpop.f32.mrf.mxu1  ;;  %1697 = vmatpush.msrb.mxu2 %v426_v40  ;;  %v930_v40 = vld [vmem:[#allocation19 + $0x30] sm:$0xff] }
 0x12e   :  { %1464 = vmatmul.f32.gmra.mxu2 %v1330_v26  ;;  %1864 = vmatpush.msra.mxu0 %v936_v35 }
 0x12f   :  { %1698 = vmatpush.msrb.mxu2 %v424_v42  ;;  %v928_v42 = vld [vmem:[#allocation19 + $0x20] sm:$0xff] }
 0x130   :  { %1659 = vmatmul.f32.gmra.mxu1 %v1330_v26  ;;  %1594 = vmatmul.f32.gmra.mxu0 %v5592_v27  ;;  %v406_v26 = vld [vmem:[#allocation2 + $0x118] sm:$0xff] }
 0x131   :  { %1699 = vmatpush.msrb.mxu2 %v422_v44  ;;  %1865 = vmatpush.msra.mxu0 %v934_v36  ;;  %v924_v44 = vld [vmem:[#allocation19] sm:$0xff] }
 0x132   :  { %1550 = vmatmul.f32.gmra.mxu3 %v5478_v3  ;;  %v456_v3 = vld [vmem:[#allocation2 + $0x2a8] sm:$0xff] }
 0x133   :  { %1763 = vmatpush.msrb.mxu3 %v456_v3  ;;  %1700 = vmatpush.msrb.mxu2 %v420_v46 }
 0x134   :  { %1866 = vmatpush.msra.mxu0 %v932_v4 }
 0x135   :  { %v1333_v28 = vpop.f32.mrf.mxu0  ;;  %v5596_v29 = vpop.f32.mrf.mxu1  ;;  %1764 = vmatpush.msrb.mxu3 %v454_v47  ;;  %1701 = vmatpush.msrb.mxu2 %v418_v51 }
 0x136   :  { %1467 = vmatmul.f32.gmra.mxu2 %v1333_v28  ;;  %1867 = vmatpush.msra.mxu0 %v930_v40 }
 0x137   :  { %1765 = vmatpush.msrb.mxu3 %v452_v52  ;;  %1702 = vmatpush.msrb.mxu2 %v416_v54 }
 0x138   :  { %1662 = vmatmul.f32.gmra.mxu1 %v1333_v28  ;;  %1597 = vmatmul.f32.gmra.mxu0 %v5596_v29  ;;  %v440_v28 = vld [vmem:[#allocation2 + $0x228] sm:$0xff] }
 0x139   :  { %1703 = vmatpush.msrb.mxu2 %v414_v56  ;;  %1868 = vmatpush.msra.mxu0 %v928_v42 }
 0x13a   :  { %1553 = vmatmul.f32.gmra.mxu3 %v5471_v2  ;;  %v450_v2 = vld [vmem:[#allocation2 + $0x278] sm:$0xff] }
 0x13b   :  { %1766 = vmatpush.msrb.mxu3 %v450_v2  ;;  %1704 = vmatpush.msrb.mxu2 %v412_v59 }
 0x13c   :  { %1869 = vmatpush.msra.mxu0 %v926_v43 }
 0x13d   :  { %v1336_v30 = vpop.f32.mrf.mxu0  ;;  %v5600_v31 = vpop.f32.mrf.mxu1  ;;  %1767 = vmatpush.msrb.mxu3 %v448_v57  ;;  %1705 = vmatpush.msrb.mxu2 %v410_v16 }
 0x13e   :  { %1470 = vmatmul.f32.gmra.mxu2 %v1336_v30  ;;  %1870 = vmatpush.msra.mxu0 %v924_v44 }
 0x13f   :  { %1768 = vmatpush.msrb.mxu3 %v446_v60  ;;  %1706 = vmatpush.msrb.mxu2 %v408_v22 }
 0x140   :  { %1665 = vmatmul.f32.gmra.mxu1 %v1336_v30  ;;  %1600 = vmatmul.f32.gmra.mxu0 %v5600_v31 }
 0x141   :  { %1769 = vmatpush.msrb.mxu3 %v444_v18  ;;  %1707 = vmatpush.msrb.mxu2 %v406_v26 }
 0x142   :  { %1556 = vmatmul.f32.gmra.mxu3 %v5464_v1  ;;  %v442_v1 = vld [vmem:[#allocation2 + $0x238] sm:$0xff] }
 0x143   :  { %1770 = vmatpush.msrb.mxu3 %v442_v1  ;;  %1708 = vmatpush.msrb.mxu2 %v404_v34 }
 0x145   :  { %v1339_v32 = vpop.f32.mrf.mxu0  ;;  %v5604_v6 = vpop.f32.mrf.mxu1  ;;  %1771 = vmatpush.msrb.mxu3 %v440_v28 }
 0x146   :  { %1473 = vmatmul.f32.gmra.mxu2 %v1339_v32 }
 0x147   :  { %1772 = vmatpush.msrb.mxu3 %v438_v5 }
 0x148   :  { %1668 = vmatmul.f32.gmra.mxu1 %v1339_v32  ;;  %1603 = vmatmul.f32.gmra.mxu0 %v5604_v6 }
 0x14a   :  { %1559 = vmatmul.f32.gmra.mxu3 %v5459_v0  ;;  %v436_v0 = vld [vmem:[#allocation2 + $0x208] sm:$0xff] }
 0x14b   :  { %1773 = vmatpush.msrb.mxu3 %v436_v0 }
 0x14d   :  { %v1342_v38 = vpop.f32.mrf.mxu0  ;;  %v5608_v39 = vpop.f32.mrf.mxu1 }
 0x14e   :  { %1476 = vmatmul.f32.gmra.mxu2 %v1342_v38 }
 0x150   :  { %1671 = vmatmul.f32.gmra.mxu1 %v1342_v38  ;;  %1606 = vmatmul.f32.gmra.mxu0 %v5608_v39 }
 0x152   :  { %1774 = vmatmul.f32.vlgmr.msrb.gmra.mxu3 %v5572_v17 }
 0x155   :  { %v1345_v49 = vpop.f32.mrf.mxu0  ;;  %v5612_v50 = vpop.f32.mrf.mxu1 }
 0x156   :  { %1479 = vmatmul.f32.gmra.mxu2 %v1345_v49  ;;  %v1515_v41 = vpop.f32.mrf.mxu3 }
 0x158   :  { %1674 = vmatmul.f32.gmra.mxu1 %v1345_v49  ;;  %1609 = vmatmul.f32.gmra.mxu0 %v5612_v50 }
 0x15a   :  { %1777 = vmatmul.f32.gmra.mxu3 %v5576_v19  ;;  %v5638_v19 = vld [vmem:[%s7625_s22] sm:$0x3] }
 0x15b   :  { %v5643_v51 = vperm.slane %v5638_v19, 0 }
 0x15d   :  { %v1348_v61 = vpop.f32.mrf.mxu0  ;;  %v5616_v62 = vpop.f32.mrf.mxu1 }
 0x15e   :  { %1482 = vmatmul.f32.gmra.mxu2 %v1348_v61  ;;  %v1518_v17 = vpop.f32.mrf.mxu3 }
 0x160   :  { %1677 = vmatmul.f32.gmra.mxu1 %v1348_v61  ;;  %1612 = vmatmul.f32.gmra.mxu0 %v5616_v62 }
 0x162   :  { %1780 = vmatmul.f32.gmra.mxu3 %v5580_v21 }
 0x165   :  { %v1351_v30 = vpop.f32.mrf.mxu0  ;;  %v5620_v32 = vpop.f32.mrf.mxu1 }
 0x166   :  { %1485 = vmatmul.f32.gmra.mxu2 %v1351_v30  ;;  %v1521_v48 = vpop.f32.mrf.mxu3 }
 0x168   :  { %1680 = vmatmul.f32.gmra.mxu1 %v1351_v30  ;;  %1615 = vmatmul.f32.gmra.mxu0 %v5620_v32 }
 0x16a   :  { %1783 = vmatmul.f32.gmra.mxu3 %v5584_v23 }
 0x16d   :  { %v1354_v37 = vpop.f32.mrf.mxu0  ;;  %v5623_v38 = vpop.f32.mrf.mxu1 }
 0x16e   :  { %1488 = vmatmul.f32.gmra.mxu2 %v1354_v37  ;;  %v1524_v21 = vpop.f32.mrf.mxu3 }
 0x170   :  { %1683 = vmatmul.f32.gmra.mxu1 %v1354_v37  ;;  %1618 = vmatmul.f32.gmra.mxu0 %v5623_v38 }
 0x172   :  { %1786 = vmatmul.f32.gmra.mxu3 %v5588_v25 }
 0x175   :  { %v1357_v3 = vpop.f32.mrf.mxu0  ;;  %v5627_v45 = vpop.f32.mrf.mxu1 }
 0x176   :  { %1491 = vmatmul.f32.gmra.mxu2 %v1357_v3  ;;  %v1527_v56 = vpop.f32.mrf.mxu3 }
 0x178   :  { %1686 = vmatmul.f32.gmra.mxu1 %v1357_v3  ;;  %1621 = vmatmul.f32.gmra.mxu0 %v5627_v45 }
 0x17a   :  { %1789 = vmatmul.f32.gmra.mxu3 %v5592_v27 }
 0x17d   :  { %v1360_v46 = vpop.f32.mrf.mxu0  ;;  %v5632_v47 = vpop.f32.mrf.mxu1 }
 0x17e   :  { %1494 = vmatmul.f32.gmra.mxu2 %v1360_v46  ;;  %v1530_v61 = vpop.f32.mrf.mxu3 }
 0x180   :  { %1689 = vmatmul.f32.gmra.mxu1 %v1360_v46  ;;  %1624 = vmatmul.f32.gmra.mxu0 %v5632_v47 }
 0x182   :  { %1792 = vmatmul.f32.gmra.mxu3 %v5596_v29 }
 0x185   :  { %v1580_v49 = vpop.f32.mrf.mxu0 }
 0x186   :  { %1709 = vmatmul.f32.vlgmr.msrb.gmra.mxu2 %v5562_v15  ;;  %v1533_v22 = vpop.f32.mrf.mxu3 }
 0x189   :  { %v1450_v52 = vpop.f32.mrf.mxu2 }
 0x18a   :  { %v1451_v53 = vadd.f32 %v1450_v52, %v5643_v51  ;;  %1795 = vmatmul.f32.gmra.mxu3 %v5600_v31 }
 0x18c   :  { %v1516_v54 = vadd.f32 %v1515_v41, %v1451_v53  ;;  %v953_v53 = vld [vmem:[#allocation19 + $0xe8] sm:$0xff] }
 0x18d   :  { %v1583_v2 = vpop.f32.mrf.mxu0 }
 0x18e   :  { %v1581_v55 = vadd.f32 %v1580_v49, %v1516_v54  ;;  %1712 = vmatmul.f32.gmra.mxu2 %v5555_v14  ;;  %v1536_v30 = vpop.f32.mrf.mxu3 }
 0x190   :  { %v5648_v57 = vmax.f32 %v1581_v55, 0.0  ;;  %v951_v55 = vld [vmem:[#allocation19 + $0xd8] sm:$0xff] }
 0x191   :  { %v1453_v23 = vpop.f32.mrf.mxu2 }
 0x192   :  { %7626 = vst [vmem:[#allocation41_spill] sm:$0xff] %v5648_v57  ;;  %v1454_v15 = vadd.f32 %v1453_v23, %v5643_v51  ;;  %1871 = vmatmul.f32.vlgmr.msra.gmra.mxu0 %v5648_v57  ;;  %1798 = vmatmul.f32.gmra.mxu3 %v5604_v6 }
 0x194   :  { %v1519_v58 = vadd.f32 %v1518_v17, %v1454_v15  ;;  %v4683_v15 = vld [vmem:[%s7624_s1 + $0x48] sm:$0xff] }
 0x195   :  { %v1586_v59 = vpop.f32.mrf.mxu0 }
 0x196   :  { %v1584_v60 = vadd.f32 %v1583_v2, %v1519_v58  ;;  %1715 = vmatmul.f32.gmra.mxu2 %v5548_v13  ;;  %v1539_v0 = vpop.f32.mrf.mxu3  ;;  %v947_v58 = vld [vmem:[#allocation19 + $0xb8] sm:$0xff] }
 0x198   :  { %v5654_v25 = vmax.f32 %v1584_v60, 0.0 }
 0x199   :  { %v1456_v63 = vpop.f32.mrf.mxu2 }
 0x19a   :  { %7627 = vst [vmem:[#allocation42_spill] sm:$0xff] %v5654_v25  ;;  %v1457_v14 = vadd.f32 %v1456_v63, %v5643_v51  ;;  %1874 = vmatmul.f32.gmra.mxu0 %v5654_v25  ;;  %1801 = vmatmul.f32.gmra.mxu3 %v5608_v39  ;;  %v945_v63 = vld [vmem:[#allocation19 + $0xa8] sm:$0xff] }
 0x19c   :  { %v1522_v16 = vadd.f32 %v1521_v48, %v1457_v14  ;;  %v987_v14 = vld [vmem:[#allocation19 + $0x1f8] sm:$0xff] }
 0x19d   :  { %v1589_v18 = vpop.f32.mrf.mxu0  ;;  %2050 = vmatpush.msra.mxu3 %v987_v14  ;;  %v967_v14 = vld [vmem:[#allocation19 + $0x158] sm:$0xff] }
 0x19e   :  { %v1587_v20 = vadd.f32 %v1586_v59, %v1522_v16  ;;  %1718 = vmatmul.f32.gmra.mxu2 %v5541_v12  ;;  %v1542_v41 = vpop.f32.mrf.mxu3 }
 0x1a0   :  { %v5660_v27 = vmax.f32 %v1587_v20, 0.0  ;;  %v943_v20 = vld [vmem:[#allocation19 + $0x98] sm:$0xff] }
 0x1a1   :  { %v1459_v1 = vpop.f32.mrf.mxu2 }
 0x1a2   :  { %7628 = vst [vmem:[#allocation43_spill] sm:$0xff] %v5660_v27  ;;  %v1460_v13 = vadd.f32 %v1459_v1, %v5643_v51  ;;  %1877 = vmatmul.f32.gmra.mxu0 %v5660_v27  ;;  %1804 = vmatmul.f32.gmra.mxu3 %v5612_v50  ;;  %v955_v50 = vld [vmem:[#allocation19 + $0xf8] sm:$0xff] }
 0x1a3   :  { %1985 = vmatpush.msra.mxu2 %v955_v50  ;;  %v973_v50 = vld [vmem:[#allocation19 + $0x188] sm:$0xff] }
 0x1a4   :  { %v1525_v24 = vadd.f32 %v1524_v21, %v1460_v13  ;;  %v982_v13 = vld [vmem:[#allocation19 + $0x1d0] sm:$0xff] }
 0x1a5   :  { %v1592_v26 = vpop.f32.mrf.mxu0  ;;  %1986 = vmatpush.msra.mxu2 %v953_v53 }
 0x1a6   :  { %v1590_v28 = vadd.f32 %v1589_v18, %v1525_v24  ;;  %1721 = vmatmul.f32.gmra.mxu2 %v5534_v11  ;;  %v5684_v17 = vpop.f32.mrf.mxu3  ;;  %v984_v18 = vld [vmem:[#allocation19 + $0x1e0] sm:$0xff]  ;;  %v941_v24 = vld [vmem:[#allocation19 + $0x88] sm:$0xff] }
 0x1a7   :  { %1987 = vmatpush.msra.mxu2 %v951_v55 }
 0x1a8   :  { %v5666_v29 = vmax.f32 %v1590_v28, 0.0 }
 0x1a9   :  { %v1462_v33 = vpop.f32.mrf.mxu2 }
 0x1aa   :  { %7629 = vst [vmem:[#allocation44_spill] sm:$0xff] %v5666_v29  ;;  %v1463_v12 = vadd.f32 %v1462_v33, %v5643_v51  ;;  %1880 = vmatmul.f32.gmra.mxu0 %v5666_v29  ;;  %1807 = vmatmul.f32.gmra.mxu3 %v5616_v62  ;;  %v949_v62 = vld [vmem:[#allocation19 + $0xc8] sm:$0xff]  ;;  %v4684_v33 = vld [vmem:[%s7624_s1 + $0x50] sm:$0xff] }
 0x1ab   :  { %1988 = vmatpush.msra.mxu2 %v949_v62  ;;  %v968_v62 = vld [vmem:[#allocation19 + $0x160] sm:$0xff] }
 0x1ac   :  { %v1528_v34 = vadd.f32 %v1527_v56, %v1463_v12  ;;  %v980_v12 = vld [vmem:[#allocation19 + $0x1c0] sm:$0xff] }
 0x1ad   :  { %v1595_v5 = vpop.f32.mrf.mxu0  ;;  %1989 = vmatpush.msra.mxu2 %v947_v58  ;;  %v966_v58 = vld [vmem:[#allocation19 + $0x150] sm:$0xff] }
 0x1ae   :  { %v1593_v35 = vadd.f32 %v1592_v26, %v1528_v34  ;;  %1724 = vmatmul.f32.gmra.mxu2 %v5527_v10  ;;  %v5692_v52 = vpop.f32.mrf.mxu3  ;;  %v983_v26 = vld [vmem:[#allocation19 + $0x1d8] sm:$0xff] }
 0x1af   :  { %1990 = vmatpush.msra.mxu2 %v945_v63  ;;  %v939_v34 = vld [vmem:[#allocation19 + $0x78] sm:$0xff] }
 0x1b0   :  { %v5672_v31 = vmax.f32 %v1593_v35, 0.0 }
 0x1b1   :  { %v1465_v36 = vpop.f32.mrf.mxu2  ;;  %1991 = vmatpush.msra.mxu2 %v943_v20  ;;  %v5734_v20 = vpop.f32.mrf.mxu1 }
 0x1b2   :  { %7630 = vst [vmem:[#allocation45_spill] sm:$0xff] %v5672_v31  ;;  %v1466_v11 = vadd.f32 %v1465_v36, %v5643_v51  ;;  %1883 = vmatmul.f32.gmra.mxu0 %v5672_v31  ;;  %1810 = vmatmul.f32.gmra.mxu3 %v5620_v32  ;;  %v978_v36 = vld [vmem:[#allocation19 + $0x1b0] sm:$0xff] }
 0x1b3   :  { %1992 = vmatpush.msra.mxu2 %v941_v24  ;;  %v963_v24 = vld [vmem:[#allocation19 + $0x138] sm:$0xff] }
 0x1b4   :  { %v1531_v4 = vadd.f32 %v1530_v61, %v1466_v11  ;;  %v986_v61 = vld [vmem:[#allocation19 + $0x1f0] sm:$0xff]  ;;  %v979_v11 = vld [vmem:[#allocation19 + $0x1b8] sm:$0xff] }
 0x1b5   :  { %v1598_v37 = vpop.f32.mrf.mxu0  ;;  %1920 = vmatpush.msra.mxu1 %v986_v61  ;;  %1993 = vmatpush.msra.mxu2 %v939_v34  ;;  %v925_v61 = vld [vmem:[#allocation19 + $0x8] sm:$0xff]  ;;  %v959_v34 = vld [vmem:[#allocation19 + $0x118] sm:$0xff] }
 0x1b6   :  { %v1596_v40 = vadd.f32 %v1595_v5, %v1531_v4  ;;  %1727 = vmatmul.f32.gmra.mxu2 %v5520_v9  ;;  %v5702_v59 = vpop.f32.mrf.mxu3  ;;  %v981_v5 = vld [vmem:[#allocation19 + $0x1c8] sm:$0xff] }
 0x1b7   :  { %1921 = vmatpush.msra.mxu1 %v984_v18  ;;  %v964_v18 = vld [vmem:[#allocation19 + $0x140] sm:$0xff] }
 0x1b8   :  { %v5678_v6 = vmax.f32 %v1596_v40, 0.0  ;;  %v976_v40 = vld [vmem:[#allocation19 + $0x1a0] sm:$0xff] }
 0x1b9   :  { %v1468_v42 = vpop.f32.mrf.mxu2  ;;  %1922 = vmatpush.msra.mxu1 %v982_v13 }
 0x1ba   :  { %7631 = vst [vmem:[#allocation46_spill] sm:$0xff] %v5678_v6  ;;  %v1469_v10 = vadd.f32 %v1468_v42, %v5643_v51  ;;  %1886 = vmatmul.f32.gmra.mxu0 %v5678_v6  ;;  %1813 = vmatmul.f32.gmra.mxu3 %v5623_v38  ;;  %v937_v38 = vld [vmem:[#allocation19 + $0x68] sm:$0xff] }
 0x1bb   :  { %1923 = vmatpush.msra.mxu1 %v980_v12  ;;  %v977_v42 = vld [vmem:[#allocation19 + $0x1a8] sm:$0xff]  ;;  %1994 = vmatpush.msra.mxu2 %v937_v38  ;;  %v958_v12 = vld [vmem:[#allocation19 + $0x110] sm:$0xff]  ;;  %v956_v38 = vld [vmem:[#allocation19 + $0x100] sm:$0xff] }
 0x1bc   :  { %v1534_v43 = vadd.f32 %v1533_v22, %v1469_v10  ;;  %v985_v22 = vld [vmem:[#allocation19 + $0x1e8] sm:$0xff] }
 0x1bd   :  { %v1601_v44 = vpop.f32.mrf.mxu0  ;;  %2051 = vmatpush.msra.mxu3 %v985_v22  ;;  %1924 = vmatpush.msra.mxu1 %v978_v36  ;;  %v4687_v36 = vld [vmem:[%s7624_s1 + $0x68] sm:$0xff] }
 0x1be   :  { %v1599_v3 = vadd.f32 %v1598_v37, %v1534_v43  ;;  %1730 = vmatmul.f32.gmra.mxu2 %v5513_v8  ;;  %v5712_v35 = vpop.f32.mrf.mxu3  ;;  %v974_v43 = vld [vmem:[#allocation19 + $0x190] sm:$0xff] }
 0x1bf   :  { %2052 = vmatpush.msra.mxu3 %v983_v26  ;;  %1925 = vmatpush.msra.mxu1 %v976_v40 }
 0x1c0   :  { %v5686_v39 = vmax.f32 %v1599_v3, 0.0  ;;  %v975_v3 = vld [vmem:[#allocation19 + $0x198] sm:$0xff] }
 0x1c1   :  { %v1471_v9 = vpop.f32.mrf.mxu2  ;;  %2053 = vmatpush.msra.mxu3 %v981_v5  ;;  %1926 = vmatpush.msra.mxu1 %v974_v43 }
 0x1c2   :  { %7632 = vst [vmem:[#allocation47_spill] sm:$0xff] %v5686_v39  ;;  %v1472_v46 = vadd.f32 %v1471_v9, %v5643_v51  ;;  %1889 = vmatmul.f32.gmra.mxu0 %v5686_v39  ;;  %1816 = vmatmul.f32.gmra.mxu3 %v5627_v45  ;;  %v929_v45 = vld [vmem:[#allocation19 + $0x28] sm:$0xff] }
 0x1c3   :  { %2054 = vmatpush.msra.mxu3 %v979_v11 }
 0x1c4   :  { %v1537_v48 = vadd.f32 %v1536_v30, %v1472_v46 }
 0x1c5   :  { %v1604_v49 = vpop.f32.mrf.mxu0  ;;  %2055 = vmatpush.msra.mxu3 %v977_v42 }
 0x1c6   :  { %v1602_v21 = vadd.f32 %v1601_v44, %v1537_v48  ;;  %1733 = vmatmul.f32.gmra.mxu2 %v5506_v7  ;;  %v933_v44 = vld [vmem:[#allocation19 + $0x48] sm:$0xff]  ;;  %v5723_v53 = vpop.f32.mrf.mxu3 }
 0x1c7   :  { %v4685_v48 = vld [vmem:[%s7624_s1 + $0x58] sm:$0xff]  ;;  %2056 = vmatpush.msra.mxu3 %v975_v3 }
 0x1c8   :  { %v5694_v8 = vmax.f32 %v1602_v21, 0.0  ;;  %v931_v21 = vld [vmem:[#allocation19 + $0x38] sm:$0xff] }
 0x1c9   :  { %v1474_v54 = vpop.f32.mrf.mxu2  ;;  %2057 = vmatpush.msra.mxu3 %v973_v50 }
 0x1ca   :  { %v1475_v2 = vadd.f32 %v1474_v54, %v5643_v51  ;;  %1892 = vmatmul.f32.gmra.mxu0 %v5694_v8  ;;  %v970_v54 = vld [vmem:[#allocation19 + $0x170] sm:$0xff]  ;;  %1819 = vmatmul.f32.gmra.mxu3 %v5632_v47 }
 0x1cb   :  { %v962_v47 = vld [vmem:[#allocation19 + $0x130] sm:$0xff] }
 0x1cc   :  { %v1540_v56 = vadd.f32 %v1539_v0, %v1475_v2  ;;  %v971_v2 = vld [vmem:[#allocation19 + $0x178] sm:$0xff] }
 0x1cd   :  { %v1607_v23 = vpop.f32.mrf.mxu0  ;;  %2058 = vmatpush.msra.mxu3 %v971_v2 }
 0x1ce   :  { %v1605_v7 = vadd.f32 %v1604_v49, %v1540_v56  ;;  %1736 = vmatmul.f32.gmra.mxu2 %v4683_v15  ;;  %v972_v49 = vld [vmem:[#allocation19 + $0x180] sm:$0xff]  ;;  %v1560_v22 = vpop.f32.mrf.mxu3 }
 0x1cf   :  { %1927 = vmatpush.msra.mxu1 %v972_v49 }
 0x1d0   :  { %v5704_v60 = vmax.f32 %v1605_v7, 0.0  ;;  %v969_v7 = vld [vmem:[#allocation19 + $0x168] sm:$0xff] }
 0x1d1   :  { %v1477_v16 = vpop.f32.mrf.mxu2  ;;  %1928 = vmatpush.msra.mxu1 %v970_v54  ;;  %2059 = vmatpush.msra.mxu3 %v969_v7 }
 0x1d2   :  { %v1478_v32 = vadd.f32 %v1477_v16, %v5643_v51  ;;  %1895 = vmatmul.f32.gmra.mxu0 %v5704_v60 }
 0x1d3   :  { %1929 = vmatpush.msra.mxu1 %v968_v62  ;;  %2060 = vmatpush.msra.mxu3 %v967_v14 }
 0x1d4   :  { %v1543_v1 = vadd.f32 %v1542_v41, %v1478_v32  ;;  %v935_v41 = vld [vmem:[#allocation19 + $0x58] sm:$0xff]  ;;  %v4686_v32 = vld [vmem:[%s7624_s1 + $0x60] sm:$0xff] }
 0x1d5   :  { %v1610_v28 = vpop.f32.mrf.mxu0  ;;  %1995 = vmatpush.msra.mxu2 %v935_v41  ;;  %1930 = vmatpush.msra.mxu1 %v966_v58 }
 0x1d6   :  { %v1608_v30 = vadd.f32 %v1607_v23, %v1543_v1  ;;  %1739 = vmatmul.f32.gmra.mxu2 %v4684_v33  ;;  %v927_v23 = vld [vmem:[#allocation19 + $0x18] sm:$0xff]  ;;  %v1775_v40 = vpop.f32.mrf.mxu3 }
 0x1d7   :  { %1996 = vmatpush.msra.mxu2 %v933_v44  ;;  %1931 = vmatpush.msra.mxu1 %v964_v18  ;;  %v4688_v44 = vld [vmem:[%s7624_s1 + $0x70] sm:$0xff] }
 0x1d8   :  { %v5714_v0 = vmax.f32 %v1608_v30, 0.0  ;;  %v961_v30 = vld [vmem:[#allocation19 + $0x128] sm:$0xff] }
 0x1d9   :  { %v1480_v4 = vpop.f32.mrf.mxu2  ;;  %1997 = vmatpush.msra.mxu2 %v931_v21  ;;  %1932 = vmatpush.msra.mxu1 %v962_v47 }
 0x1da   :  { %v1481_v37 = vadd.f32 %v1480_v4, %v5643_v51  ;;  %1898 = vmatmul.f32.gmra.mxu0 %v5714_v0  ;;  %v957_v4 = vld [vmem:[#allocation19 + $0x108] sm:$0xff] }
 0x1db   :  { %1998 = vmatpush.msra.mxu2 %v929_v45 }
 0x1dc   :  { %v1546_v10 = vadd.f32 %v5684_v17, %v1481_v37 }
 0x1dd   :  { %v1613_v9 = vpop.f32.mrf.mxu0  ;;  %1999 = vmatpush.msra.mxu2 %v927_v23  ;;  %v5765_v23 = vperm.slane %v5638_v19, 1 }
 0x1de   :  { %v1611_v46 = vadd.f32 %v1610_v28, %v1546_v10  ;;  %1742 = vmatmul.f32.gmra.mxu2 %v4685_v48  ;;  %v960_v28 = vld [vmem:[#allocation19 + $0x120] sm:$0xff] }
 0x1df   :  { %2000 = vmatpush.msra.mxu2 %v925_v61  ;;  %1933 = vmatpush.msra.mxu1 %v960_v28  ;;  %v1646_v58 = vadd.f32 %v5734_v20, %v5765_v23 }
 0x1e0   :  { %v5725_v17 = vmax.f32 %v1611_v46, 0.0 }
 0x1e1   :  { %v1483_v55 = vpop.f32.mrf.mxu2  ;;  %1934 = vmatpush.msra.mxu1 %v958_v12 }
 0x1e2   :  { %v1484_v56 = vadd.f32 %v1483_v55, %v5643_v51  ;;  %1901 = vmatmul.f32.gmra.mxu0 %v5725_v17 }
 0x1e3   :  { %1935 = vmatpush.msra.mxu1 %v956_v38 }
 0x1e4   :  { %v1549_v15 = vadd.f32 %v5692_v52, %v1484_v56  ;;  %v965_v52 = vld [vmem:[#allocation19 + $0x148] sm:$0xff] }
 0x1e5   :  { %v1616_v63 = vpop.f32.mrf.mxu0  ;;  %2061 = vmatpush.msra.mxu3 %v965_v52 }
 0x1e6   :  { %v1614_v16 = vadd.f32 %v1613_v9, %v1549_v15  ;;  %1745 = vmatmul.f32.gmra.mxu2 %v4686_v32  ;;  %v1778_v9 = vpop.f32.mrf.mxu3 }
 0x1e7   :  { %2062 = vmatpush.msra.mxu3 %v963_v24 }
 0x1e8   :  { %v5736_v1 = vmax.f32 %v1614_v16, 0.0 }
 0x1e9   :  { %v1486_v13 = vpop.f32.mrf.mxu2  ;;  %2063 = vmatpush.msra.mxu3 %v961_v30 }
 0x1ea   :  { %v1487_v26 = vadd.f32 %v1486_v13, %v5643_v51  ;;  %1904 = vmatmul.f32.gmra.mxu0 %v5736_v1 }
 0x1eb   :  { %2064 = vmatpush.msra.mxu3 %v959_v34 }
 0x1ec   :  { %v1552_v33 = vadd.f32 %v5702_v59, %v1487_v26  ;;  %v1648_v59 = vpop.f32.mrf.mxu1 }
 0x1ed   :  { %v1619_v11 = vpop.f32.mrf.mxu0  ;;  %2065 = vmatpush.msra.mxu3 %v957_v4  ;;  %v1649_v18 = vadd.f32 %v1648_v59, %v5765_v23 }
 0x1ee   :  { %v1617_v5 = vadd.f32 %v1616_v63, %v1552_v33  ;;  %1748 = vmatmul.f32.gmra.mxu2 %v4687_v36  ;;  %v1781_v2 = vpop.f32.mrf.mxu3 }
 0x1f0   :  { %v5744_v37 = vmax.f32 %v1617_v5, 0.0 }
 0x1f1   :  { %v1489_v41 = vpop.f32.mrf.mxu2 }
 0x1f2   :  { %v1490_v42 = vadd.f32 %v1489_v41, %v5643_v51  ;;  %1907 = vmatmul.f32.gmra.mxu0 %v5744_v37 }
 0x1f4   :  { %v1555_v10 = vadd.f32 %v5712_v35, %v1490_v42  ;;  %v1651_v21 = vpop.f32.mrf.mxu1  ;;  %v4689_v35 = vld [vmem:[%s7624_s1 + $0x78] sm:$0xff] }
 0x1f5   :  { %v1622_v48 = vpop.f32.mrf.mxu0  ;;  %v1652_v24 = vadd.f32 %v1651_v21, %v5765_v23 }
 0x1f6   :  { %v1620_v43 = vadd.f32 %v1619_v11, %v1555_v10  ;;  %1751 = vmatmul.f32.gmra.mxu2 %v4688_v44  ;;  %v1784_v14 = vpop.f32.mrf.mxu3 }
 0x1f8   :  { %v5752_v3 = vmax.f32 %v1620_v43, 0.0 }
 0x1f9   :  { %v1492_v46 = vpop.f32.mrf.mxu2 }
 0x1fa   :  { %v1493_v49 = vadd.f32 %v1492_v46, %v5643_v51  ;;  %1910 = vmatmul.f32.gmra.mxu0 %v5752_v3 }
 0x1fc   :  { %v1558_v50 = vadd.f32 %v5723_v53, %v1493_v49  ;;  %v1654_v53 = vpop.f32.mrf.mxu1 }
 0x1fd   :  { %v1625_v62 = vpop.f32.mrf.mxu0  ;;  %v1655_v5 = vadd.f32 %v1654_v53, %v5765_v23 }
 0x1fe   :  { %v1623_v54 = vadd.f32 %v1622_v48, %v1558_v50  ;;  %1754 = vmatmul.f32.gmra.mxu2 %v4689_v35  ;;  %v1787_v52 = vpop.f32.mrf.mxu3 }
 0x200   :  { %v5760_v45 = vmax.f32 %v1623_v54, 0.0 }
 0x201   :  { %v1495_v55 = vpop.f32.mrf.mxu2 }
 0x202   :  { %v1496_v56 = vadd.f32 %v1495_v55, %v5643_v51  ;;  %1913 = vmatmul.f32.gmra.mxu0 %v5760_v45 }
 0x204   :  { %v1561_v7 = vadd.f32 %v1560_v22, %v1496_v56  ;;  %v1657_v19 = vpop.f32.mrf.mxu1 }
 0x205   :  { %v1658_v41 = vadd.f32 %v1657_v19, %v5765_v23 }
 0x206   :  { %v1626_v15 = vadd.f32 %v1625_v62, %v1561_v7  ;;  %2001 = vmatmul.f32.vlgmr.msra.gmra.mxu2 %v5648_v57  ;;  %v1790_v12 = vpop.f32.mrf.mxu3 }
 0x208   :  { %v5770_v61 = vmax.f32 %v1626_v15, 0.0 }
 0x209   :  { %v1710_v63 = vpop.f32.mrf.mxu2 }
 0x20a   :  { %v1711_v16 = vadd.f32 %v1710_v63, %v1646_v58  ;;  %1916 = vmatmul.f32.gmra.mxu0 %v5770_v61 }
 0x20c   :  { %v1776_v51 = vadd.f32 %v1775_v40, %v1711_v16  ;;  %v1660_v26 = vpop.f32.mrf.mxu1 }
 0x20d   :  { %v1661_v46 = vadd.f32 %v1660_v26, %v5765_v23 }
 0x20e   :  { %v5773_v32 = vmax.f32 %v1776_v51, 0.0  ;;  %2004 = vmatmul.f32.gmra.mxu2 %v5654_v25  ;;  %v1793_v59 = vpop.f32.mrf.mxu3 }
 0x210   :  { %7633 = vst [vmem:[#allocation48_spill] sm:$0xff] %v5773_v32  ;;  %1936 = vmatmul.f32.vlgmr.msra.gmra.mxu1 %v5773_v32  ;;  %2066 = vmatmul.f32.vlgmr.msra.gmra.mxu3 %v5773_v32 }
 0x211   :  { %v1713_v20 = vpop.f32.mrf.mxu2 }
 0x212   :  { %v1714_v22 = vadd.f32 %v1713_v20, %v1649_v18 }
 0x214   :  { %v1779_v47 = vadd.f32 %v1778_v9, %v1714_v22  ;;  %v1663_v11 = vpop.f32.mrf.mxu1 }
 0x216   :  { %v5779_v13 = vmax.f32 %v1779_v47, 0.0  ;;  %2007 = vmatmul.f32.gmra.mxu2 %v5660_v27  ;;  %v1796_v49 = vpop.f32.mrf.mxu3 }
 0x218   :  { %7634 = vst [vmem:[#allocation49_spill] sm:$0xff] %v5779_v13  ;;  %1939 = vmatmul.f32.gmra.mxu1 %v5779_v13  ;;  %2069 = vmatmul.f32.gmra.mxu3 %v5779_v13 }
 0x219   :  { %v1716_v28 = vpop.f32.mrf.mxu2 }
 0x21a   :  { %v1717_v30 = vadd.f32 %v1716_v28, %v1652_v24 }
 0x21c   :  { %v1782_v33 = vadd.f32 %v1781_v2, %v1717_v30  ;;  %v1666_v44 = vpop.f32.mrf.mxu1  ;;  %v1664_v2 = vadd.f32 %v1663_v11, %v5765_v23 }
 0x21d   :  { %v1667_v15 = vadd.f32 %v1666_v44, %v5765_v23 }
 0x21e   :  { %v5785_v34 = vmax.f32 %v1782_v33, 0.0  ;;  %2010 = vmatmul.f32.gmra.mxu2 %v5666_v29  ;;  %v1799_v62 = vpop.f32.mrf.mxu3 }
 0x220   :  { %7635 = vst [vmem:[#allocation50_spill] sm:$0xff] %v5785_v34  ;;  %1942 = vmatmul.f32.gmra.mxu1 %v5785_v34  ;;  %2072 = vmatmul.f32.gmra.mxu3 %v5785_v34 }
 0x221   :  { %v1719_v36 = vpop.f32.mrf.mxu2 }
 0x222   :  { %v1720_v38 = vadd.f32 %v1719_v36, %v1655_v5 }
 0x224   :  { %v1785_v4 = vadd.f32 %v1784_v14, %v1720_v38  ;;  %v1669_v35 = vpop.f32.mrf.mxu1 }
 0x225   :  { %v1670_v18 = vadd.f32 %v1669_v35, %v5765_v23 }
 0x226   :  { %v5791_v40 = vmax.f32 %v1785_v4, 0.0  ;;  %2013 = vmatmul.f32.gmra.mxu2 %v5672_v31  ;;  %v1802_v51 = vpop.f32.mrf.mxu3 }
 0x228   :  { %7636 = vst [vmem:[#allocation51_spill] sm:$0xff] %v5791_v40  ;;  %1945 = vmatmul.f32.gmra.mxu1 %v5791_v40  ;;  %2075 = vmatmul.f32.gmra.mxu3 %v5791_v40 }
 0x229   :  { %v1722_v42 = vpop.f32.mrf.mxu2 }
 0x22a   :  { %v1723_v10 = vadd.f32 %v1722_v42, %v1658_v41 }
 0x22c   :  { %v1788_v43 = vadd.f32 %v1787_v52, %v1723_v10  ;;  %v1672_v58 = vpop.f32.mrf.mxu1 }
 0x22d   :  { %v1673_v28 = vadd.f32 %v1672_v58, %v5765_v23 }
 0x22e   :  { %v5797_v9 = vmax.f32 %v1788_v43, 0.0  ;;  %2016 = vmatmul.f32.gmra.mxu2 %v5678_v6  ;;  %v1805_v26 = vpop.f32.mrf.mxu3 }
 0x230   :  { %7637 = vst [vmem:[#allocation52_spill] sm:$0xff] %v5797_v9  ;;  %1948 = vmatmul.f32.gmra.mxu1 %v5797_v9  ;;  %2078 = vmatmul.f32.gmra.mxu3 %v5797_v9 }
 0x231   :  { %v1725_v48 = vpop.f32.mrf.mxu2 }
 0x232   :  { %v1726_v21 = vadd.f32 %v1725_v48, %v1661_v46 }
 0x234   :  { %v1791_v50 = vadd.f32 %v1790_v12, %v1726_v21  ;;  %v1675_v52 = vpop.f32.mrf.mxu1 }
 0x235   :  { %v1676_v38 = vadd.f32 %v1675_v52, %v5765_v23 }
 0x236   :  { %v5803_v54 = vmax.f32 %v1791_v50, 0.0  ;;  %2019 = vmatmul.f32.gmra.mxu2 %v5686_v39  ;;  %v1808_v4 = vpop.f32.mrf.mxu3 }
 0x238   :  { %7638 = vst [vmem:[#allocation53_spill] sm:$0xff] %v5803_v54  ;;  %1951 = vmatmul.f32.gmra.mxu1 %v5803_v54  ;;  %2081 = vmatmul.f32.gmra.mxu3 %v5803_v54 }
 0x239   :  { %v1728_v55 = vpop.f32.mrf.mxu2 }
 0x23a   :  { %v1729_v56 = vadd.f32 %v1728_v55, %v1664_v2 }
 0x23c   :  { %v1794_v7 = vadd.f32 %v1793_v59, %v1729_v56  ;;  %v1678_v5 = vpop.f32.mrf.mxu1 }
 0x23d   :  { %v1679_v43 = vadd.f32 %v1678_v5, %v5765_v23 }
 0x23e   :  { %v5809_v53 = vmax.f32 %v1794_v7, 0.0  ;;  %2022 = vmatmul.f32.gmra.mxu2 %v5694_v8  ;;  %v1811_v48 = vpop.f32.mrf.mxu3 }
 0x240   :  { %7639 = vst [vmem:[#allocation54_spill] sm:$0xff] %v5809_v53  ;;  %1954 = vmatmul.f32.gmra.mxu1 %v5809_v53  ;;  %2084 = vmatmul.f32.gmra.mxu3 %v5809_v53 }
 0x241   :  { %v1731_v63 = vpop.f32.mrf.mxu2 }
 0x242   :  { %v1732_v14 = vadd.f32 %v1731_v63, %v1667_v15  ;;  %v5848_v15 = vpop.f32.mrf.mxu0 }
 0x243   :  { %7643 = vst [vmem:[#allocation58_spill] sm:$0xff] %v5848_v15 }
 0x244   :  { %v1797_v16 = vadd.f32 %v1796_v49, %v1732_v14  ;;  %v1681_v10 = vpop.f32.mrf.mxu1 }
 0x245   :  { %v1682_v50 = vadd.f32 %v1681_v10, %v5765_v23 }
 0x246   :  { %v5815_v19 = vmax.f32 %v1797_v16, 0.0  ;;  %2025 = vmatmul.f32.gmra.mxu2 %v5704_v60 }
 0x248   :  { %7640 = vst [vmem:[#allocation55_spill] sm:$0xff] %v5815_v19  ;;  %1957 = vmatmul.f32.gmra.mxu1 %v5815_v19  ;;  %2087 = vmatmul.f32.gmra.mxu3 %v5815_v19 }
 0x249   :  { %v1734_v20 = vpop.f32.mrf.mxu2 }
 0x24a   :  { %v1735_v22 = vadd.f32 %v1734_v20, %v1670_v18  ;;  %v5859_v52 = vpop.f32.mrf.mxu0 }
 0x24b   :  { %7644 = vst [vmem:[#allocation59_spill] sm:$0xff] %v5859_v52 }
 0x24c   :  { %v1800_v47 = vadd.f32 %v1799_v62, %v1735_v22  ;;  %v1684_v35 = vpop.f32.mrf.mxu1  ;;  %v1814_v62 = vpop.f32.mrf.mxu3 }
 0x24d   :  { %v1685_v58 = vadd.f32 %v1684_v35, %v5765_v23 }
 0x24e   :  { %v5821_v24 = vmax.f32 %v1800_v47, 0.0  ;;  %2028 = vmatmul.f32.gmra.mxu2 %v5714_v0 }
 0x250   :  { %7641 = vst [vmem:[#allocation56_spill] sm:$0xff] %v5821_v24  ;;  %1960 = vmatmul.f32.gmra.mxu1 %v5821_v24  ;;  %2090 = vmatmul.f32.gmra.mxu3 %v5821_v24 }
 0x251   :  { %v1737_v30 = vpop.f32.mrf.mxu2 }
 0x252   :  { %v1738_v33 = vadd.f32 %v1737_v30, %v1673_v28 }
 0x254   :  { %v1803_v12 = vadd.f32 %v1802_v51, %v1738_v33  ;;  %v1687_v16 = vpop.f32.mrf.mxu1  ;;  %v1817_v20 = vpop.f32.mrf.mxu3 }
 0x255   :  { %v1688_v22 = vadd.f32 %v1687_v16, %v5765_v23 }
 0x256   :  { %v5827_v36 = vmax.f32 %v1803_v12, 0.0  ;;  %2031 = vmatmul.f32.gmra.mxu2 %v5725_v17 }
 0x258   :  { %7642 = vst [vmem:[#allocation57_spill] sm:$0xff] %v5827_v36  ;;  %1963 = vmatmul.f32.gmra.mxu1 %v5827_v36  ;;  %2093 = vmatmul.f32.gmra.mxu3 %v5827_v36 }
 0x259   :  { %v1740_v11 = vpop.f32.mrf.mxu2 }
 0x25a   :  { %v1741_v59 = vadd.f32 %v1740_v11, %v1676_v38 }
 0x25c   :  { %v1806_v41 = vadd.f32 %v1805_v26, %v1741_v59  ;;  %v1690_v30 = vpop.f32.mrf.mxu1  ;;  %v1820_v38 = vpop.f32.mrf.mxu3 }
 0x25d   :  { %v1691_v12 = vadd.f32 %v1690_v30, %v5765_v23 }
 0x25e   :  { %v5833_v42 = vmax.f32 %v1806_v41, 0.0  ;;  %2034 = vmatmul.f32.gmra.mxu2 %v5736_v1 }
 0x260   :  { %1966 = vmatmul.f32.gmra.mxu1 %v5833_v42  ;;  %2096 = vmatmul.f32.gmra.mxu3 %v5833_v42 }
 0x261   :  { %v1743_v44 = vpop.f32.mrf.mxu2 }
 0x262   :  { %v1744_v46 = vadd.f32 %v1743_v44, %v1679_v43 }
 0x264   :  { %v1809_v49 = vadd.f32 %v1808_v4, %v1744_v46  ;;  %v5867_v4 = vpop.f32.mrf.mxu0 }
 0x265   :  { %7645 = vst [vmem:[#allocation60_spill] sm:$0xff] %v5867_v4 }
 0x266   :  { %v5839_v21 = vmax.f32 %v1809_v49, 0.0  ;;  %2037 = vmatmul.f32.gmra.mxu2 %v5744_v37 }
 0x268   :  { %1969 = vmatmul.f32.gmra.mxu1 %v5839_v21  ;;  %2099 = vmatmul.f32.gmra.mxu3 %v5839_v21 }
 0x269   :  { %v1746_v2 = vpop.f32.mrf.mxu2 }
 0x26a   :  { %v1747_v55 = vadd.f32 %v1746_v2, %v1682_v50 }
 0x26c   :  { %v1812_v56 = vadd.f32 %v1811_v48, %v1747_v55  ;;  %v5875_v43 = vpop.f32.mrf.mxu0 }
 0x26d   :  { %7647 = vst [vmem:[#allocation62_spill] sm:$0xff] %v5875_v43 }
 0x26e   :  { %v5845_v7 = vmax.f32 %v1812_v56, 0.0  ;;  %2040 = vmatmul.f32.gmra.mxu2 %v5752_v3 }
 0x270   :  { %1972 = vmatmul.f32.gmra.mxu1 %v5845_v7  ;;  %2102 = vmatmul.f32.gmra.mxu3 %v5845_v7 }
 0x271   :  { %v1749_v63 = vpop.f32.mrf.mxu2 }
 0x272   :  { %v1750_v14 = vadd.f32 %v1749_v63, %v1685_v58 }
 0x274   :  { %v1815_v51 = vadd.f32 %v1814_v62, %v1750_v14  ;;  %v5885_v49 = vpop.f32.mrf.mxu0 }
 0x276   :  { %v5853_v18 = vmax.f32 %v1815_v51, 0.0  ;;  %2043 = vmatmul.f32.gmra.mxu2 %v5760_v45 }
 0x278   :  { %1975 = vmatmul.f32.gmra.mxu1 %v5853_v18  ;;  %2105 = vmatmul.f32.gmra.mxu3 %v5853_v18 }
 0x279   :  { %v1752_v47 = vpop.f32.mrf.mxu2 }
 0x27a   :  { %v1753_v26 = vadd.f32 %v1752_v47, %v1688_v22 }
 0x27c   :  { %v1818_v28 = vadd.f32 %v1817_v20, %v1753_v26  ;;  %v5893_v55 = vpop.f32.mrf.mxu0 }
 0x27e   :  { %v5861_v33 = vmax.f32 %v1818_v28, 0.0  ;;  %2046 = vmatmul.f32.gmra.mxu2 %v5770_v61 }
 0x280   :  { %1978 = vmatmul.f32.gmra.mxu1 %v5861_v33  ;;  %2108 = vmatmul.f32.gmra.mxu3 %v5861_v33 }
 0x281   :  { %v1755_v5 = vpop.f32.mrf.mxu2 }
 0x282   :  { %v1756_v11 = vadd.f32 %v1755_v5, %v1691_v12 }
 0x284   :  { %v1821_v59 = vadd.f32 %v1820_v38, %v1756_v11  ;;  %v5903_v14 = vpop.f32.mrf.mxu0 }
 0x286   :  { %v5869_v41 = vmax.f32 %v1821_v59, 0.0 }
 0x288   :  { %1981 = vmatmul.f32.gmra.mxu1 %v5869_v41  ;;  %2111 = vmatmul.f32.gmra.mxu3 %v5869_v41 }
 0x289   :  { %v5873_v10 = vpop.f32.mrf.mxu2 }
 0x28a   :  { %7646 = vst [vmem:[#allocation61_spill] sm:$0xff] %v5873_v10 }
 0x28c   :  { %v5913_v47 = vpop.f32.mrf.mxu0 }
 0x28d   :  { %v5877_v23 = vpop.f32.mrf.mxu1 }
 0x28e   :  { %7648 = vst [vmem:[#allocation63_spill] sm:$0xff] %v5877_v23 }
 0x291   :  { %v5879_v44 = vpop.f32.mrf.mxu2 }
 0x292   :  { %7649 = vst [vmem:[#allocation64_spill] sm:$0xff] %v5879_v44 }
 0x293   :  { %v5881_v46 = vpop.f32.mrf.mxu3 }
 0x294   :  { %7650 = vst [vmem:[#allocation65_spill] sm:$0xff] %v5881_v46  ;;  %v1896_v5 = vpop.f32.mrf.mxu0 }
 0x295   :  { %v5883_v48 = vpop.f32.mrf.mxu1 }
 0x296   :  { %7651 = vst [vmem:[#allocation66_spill] sm:$0xff] %v5883_v48 }
 0x299   :  { %v5887_v50 = vpop.f32.mrf.mxu2 }
 0x29a   :  { %7652 = vst [vmem:[#allocation67_spill] sm:$0xff] %v5887_v50 }
 0x29b   :  { %v5889_v35 = vpop.f32.mrf.mxu3 }
 0x29c   :  { %7653 = vst [vmem:[#allocation68_spill] sm:$0xff] %v5889_v35  ;;  %v1899_v32 = vpop.f32.mrf.mxu0 }
 0x29d   :  { %v5891_v2 = vpop.f32.mrf.mxu1 }
 0x29e   :  { %7654 = vst [vmem:[#allocation69_spill] sm:$0xff] %v5891_v2 }
 0x2a1   :  { %v5895_v56 = vpop.f32.mrf.mxu2 }
 0x2a2   :  { %7655 = vst [vmem:[#allocation70_spill] sm:$0xff] %v5895_v56 }
 0x2a3   :  { %v5897_v62 = vpop.f32.mrf.mxu3 }
 0x2a4   :  { %7656 = vst [vmem:[#allocation71_spill] sm:$0xff] %v5897_v62  ;;  %v1902_v40 = vpop.f32.mrf.mxu0 }
 0x2a5   :  { %v5899_v58 = vpop.f32.mrf.mxu1 }
 0x2a6   :  { %7657 = vst [vmem:[#allocation72_spill] sm:$0xff] %v5899_v58 }
 0x2a9   :  { %v5901_v63 = vpop.f32.mrf.mxu2 }
 0x2aa   :  { %7658 = vst [vmem:[#allocation73_spill] sm:$0xff] %v5901_v63 }
 0x2ab   :  { %v5905_v16 = vpop.f32.mrf.mxu3 }
 0x2ac   :  { %7659 = vst [vmem:[#allocation74_spill] sm:$0xff] %v5905_v16  ;;  %v1905_v62 = vpop.f32.mrf.mxu0 }
 0x2ad   :  { %v5907_v51 = vpop.f32.mrf.mxu1 }
 0x2ae   :  { %7660 = vst [vmem:[#allocation75_spill] sm:$0xff] %v5907_v51 }
 0x2b1   :  { %v5909_v20 = vpop.f32.mrf.mxu2 }
 0x2b2   :  { %7661 = vst [vmem:[#allocation76_spill] sm:$0xff] %v5909_v20 }
 0x2b3   :  { %v5911_v22 = vpop.f32.mrf.mxu3 }
 0x2b4   :  { %7662 = vst [vmem:[#allocation77_spill] sm:$0xff] %v5911_v22  ;;  %v1908_v56 = vpop.f32.mrf.mxu0 }
 0x2b5   :  { %v5915_v26 = vpop.f32.mrf.mxu1 }
 0x2b9   :  { %v5917_v28 = vpop.f32.mrf.mxu2 }
 0x2ba   :  { %7663 = vst [vmem:[#allocation78_spill] sm:$0xff] %v5917_v28 }
 0x2bb   :  { %v5919_v30 = vpop.f32.mrf.mxu3 }
 0x2bc   :  { %7664 = vst [vmem:[#allocation79_spill] sm:$0xff] %v5919_v30  ;;  %v1911_v53 = vpop.f32.mrf.mxu0 }
 0x2bd   :  { %v5921_v12 = vpop.f32.mrf.mxu1 }
 0x2c1   :  { %v5923_v38 = vpop.f32.mrf.mxu2 }
 0x2c2   :  { %7665 = vst [vmem:[#allocation80_spill] sm:$0xff] %v5923_v38 }
 0x2c3   :  { %v5925_v11 = vpop.f32.mrf.mxu3 }
 0x2c4   :  { %7666 = vst [vmem:[#allocation81_spill] sm:$0xff] %v5925_v11  ;;  %v1914_v48 = vpop.f32.mrf.mxu0 }
 0x2c5   :  { %v1958_v59 = vpop.f32.mrf.mxu1 }
 0x2c9   :  { %v5927_v13 = vpop.f32.mrf.mxu2 }
 0x2cb   :  { %v5929_v34 = vpop.f32.mrf.mxu3 }
 0x2cc   :  { %7667 = vst [vmem:[#allocation82_spill] sm:$0xff] %v5929_v34  ;;  %v1917_v31 = vpop.f32.mrf.mxu0 }
 0x2cd   :  { %v1961_v46 = vpop.f32.mrf.mxu1 }
 0x2d1   :  { %v5931_v10 = vpop.f32.mrf.mxu2 }
 0x2d3   :  { %v5933_v35 = vpop.f32.mrf.mxu3 }
 0x2d5   :  { %v1964_v44 = vpop.f32.mrf.mxu1 }
 0x2d9   :  { %v2032_v57 = vpop.f32.mrf.mxu2 }
 0x2db   :  { %v2094_v9 = vpop.f32.mrf.mxu3 }
 0x2dd   :  { %v1967_v50 = vpop.f32.mrf.mxu1 }
 0x2e1   :  { %v2035_v25 = vpop.f32.mrf.mxu2 }
 0x2e3   :  { %v2097_v54 = vpop.f32.mrf.mxu3 }
 0x2e5   :  { %v1970_v16 = vpop.f32.mrf.mxu1 }
 0x2e6   :  { %v1971_v34 = vadd.f32 %v1970_v16, %v1905_v62 }
 0x2e9   :  { %v2038_v23 = vpop.f32.mrf.mxu2 }
 0x2eb   :  { %v2100_v27 = vpop.f32.mrf.mxu3 }
 0x2ed   :  { %v1973_v15 = vpop.f32.mrf.mxu1 }
 0x2ee   :  { %v1974_v6 = vadd.f32 %v1973_v15, %v1908_v56  ;;  %v7681_v56 = vld [vmem:[#allocation45_spill] sm:$0xff] }
 0x2f1   :  { %v2041_v29 = vpop.f32.mrf.mxu2 }
 0x2f3   :  { %v2103_v22 = vpop.f32.mrf.mxu3 }
 0x2f5   :  { %v1976_v63 = vpop.f32.mrf.mxu1 }
 0x2f6   :  { %v1977_v11 = vadd.f32 %v1976_v63, %v1911_v53  ;;  %v7682_v63 = vld [vmem:[#allocation76_spill] sm:$0xff] }
 0x2f8   :  { %v5943_v38 = vmax.f32 %v5752_v3, %v1977_v11  ;;  %v2104_v3 = vadd.f32 %v2103_v22, %v2038_v23  ;;  %v7685_v22 = vld [vmem:[#allocation59_spill] sm:$0xff]  ;;  %v7689_v11 = vld [vmem:[#allocation77_spill] sm:$0xff] }
 0x2f9   :  { %v2044_v30 = vpop.f32.mrf.mxu2 }
 0x2fb   :  { %v2106_v52 = vpop.f32.mrf.mxu3 }
 0x2fc   :  { %v2107_v53 = vadd.f32 %v2106_v52, %v2041_v29  ;;  %v7670_v52 = vld [vmem:[#allocation80_spill] sm:$0xff] }
 0x2fd   :  { %v1979_v19 = vpop.f32.mrf.mxu1 }
 0x2fe   :  { %v1980_v4 = vadd.f32 %v1979_v19, %v1914_v48  ;;  %v1965_v19 = vadd.f32 %v1964_v44, %v1899_v32  ;;  %v2098_v32 = vadd.f32 %v2097_v54, %v2032_v57  ;;  %v1953_v57 = vadd.f32 %v5915_v26, %v5893_v55  ;;  %v7676_v44 = vld [vmem:[#allocation78_spill] sm:$0xff] }
 0x2ff   :  { %v2092_v54 = vadd.f32 %v5933_v35, %v5927_v13  ;;  %v7673_v13 = vld [vmem:[#allocation62_spill] sm:$0xff]  ;;  %v7679_v35 = vld [vmem:[#allocation60_spill] sm:$0xff] }
 0x300   :  { %v5939_v58 = vmax.f32 %v5760_v45, %v1980_v4  ;;  %v7672_v4 = vld [vmem:[#allocation57_spill] sm:$0xff] }
 0x301   :  { %v2047_v43 = vpop.f32.mrf.mxu2 }
 0x303   :  { %v2109_v20 = vpop.f32.mrf.mxu3 }
 0x304   :  { %v2110_v39 = vadd.f32 %v2109_v20, %v2044_v30  ;;  %v7687_v30 = vld [vmem:[#allocation44_spill] sm:$0xff] }
 0x305   :  { %v1982_v2 = vpop.f32.mrf.mxu1 }
 0x306   :  { %v1983_v24 = vadd.f32 %v1982_v2, %v1917_v31  ;;  %v1968_v31 = vadd.f32 %v1967_v50, %v1902_v40  ;;  %v5957_v15 = vmax.f32 %v5861_v33, %v2110_v39  ;;  %v5965_v40 = vmax.f32 %v5853_v18, %v2107_v53  ;;  %v7671_v33 = vld [vmem:[#allocation82_spill] sm:$0xff]  ;;  %v7680_v2 = vld [vmem:[#allocation69_spill] sm:$0xff] }
 0x307   :  { %v5971_v39 = vmax.f32 %v5714_v0, %v1965_v19  ;;  %v1944_v55 = vadd.f32 %v7680_v2, %v7679_v35  ;;  %v7691_v19 = vld [vmem:[#allocation58_spill] sm:$0xff]  ;;  %v7707_v35 = vld [vmem:[#allocation65_spill] sm:$0xff] }
 0x308   :  { %v5936_v28 = vmax.f32 %v5770_v61, %v1983_v24  ;;  %v5947_v61 = vmax.f32 %v5744_v37, %v1974_v6  ;;  %v5954_v24 = vmax.f32 %v5736_v1, %v1971_v34  ;;  %v1962_v6 = vadd.f32 %v1961_v46, %v1896_v5  ;;  %v7677_v46 = vld [vmem:[#allocation81_spill] sm:$0xff] }
 0x309   :  { %v5962_v29 = vmax.f32 %v5725_v17, %v1968_v31  ;;  %v2101_v37 = vadd.f32 %v2100_v27, %v2035_v25  ;;  %v1959_v1 = vadd.f32 %v1958_v59, %v5913_v47  ;;  %v5974_v34 = vmax.f32 %v5845_v7, %v2104_v3  ;;  %v7669_v7 = vld [vmem:[#allocation47_spill] sm:$0xff]  ;;  %v7686_v47 = vld [vmem:[#allocation66_spill] sm:$0xff]  ;;  %v7688_v5 = vld [vmem:[#allocation73_spill] sm:$0xff] }
 0x30a   :  { %2147 = vmatpush.msrb.mxu0 %v5936_v28  ;;  %v1956_v25 = vadd.f32 %v5921_v12, %v5903_v14  ;;  %v5981_v27 = vmax.f32 %v5704_v60, %v1962_v6  ;;  %v2095_v17 = vadd.f32 %v2094_v9, %v5931_v10  ;;  %v5997_v60 = vmax.f32 %v5833_v42, %v2098_v32  ;;  %v7668_v9 = vld [vmem:[#allocation75_spill] sm:$0xff]  ;;  %v7674_v42 = vld [vmem:[#allocation72_spill] sm:$0xff]  ;;  %v7690_v31 = vld [vmem:[#allocation54_spill] sm:$0xff] }
 0x30b   :  { %v2112_v36 = vpop.f32.mrf.mxu3  ;;  %v5992_v0 = vmax.f32 %v5694_v8, %v1959_v1  ;;  %v2089_v8 = vadd.f32 %v7671_v33, %v7670_v52  ;;  %v1947_v10 = vadd.f32 %v7674_v42, %v7673_v13  ;;  %v2086_v48 = vadd.f32 %v7677_v46, %v7676_v44  ;;  %v7683_v14 = vld [vmem:[#allocation79_spill] sm:$0xff]  ;;  %v7694_v32 = vld [vmem:[#allocation70_spill] sm:$0xff]  ;;  %v7701_v13 = vld [vmem:[#allocation41_spill] sm:$0xff] }
 0x30c   :  { %v2113_v51 = vadd.f32 %v2112_v36, %v2047_v43  ;;  %2148 = vmatpush.msrb.mxu0 %v5939_v58  ;;  %v5985_v36 = vmax.f32 %v5839_v21, %v2101_v37  ;;  %v1950_v21 = vadd.f32 %v7668_v9, %v5885_v49  ;;  %v6004_v18 = vmax.f32 %v7669_v7, %v1956_v25  ;;  %v7675_v43 = vld [vmem:[#allocation46_spill] sm:$0xff]  ;;  %v7678_v49 = vld [vmem:[#allocation56_spill] sm:$0xff]  ;;  %v7692_v3 = vld [vmem:[#allocation63_spill] sm:$0xff] }
 0x30d   :  { %v6016_v23 = vmax.f32 %v7675_v43, %v1953_v57  ;;  %v6021_v50 = vmax.f32 %v7678_v49, %v2092_v54  ;;  %v2083_v16 = vadd.f32 %v7683_v14, %v7682_v63  ;;  %v1941_v26 = vadd.f32 %v7686_v47, %v7685_v22  ;;  %v7693_v37 = vld [vmem:[#allocation43_spill] sm:$0xff]  ;;  %v7695_v25 = vld [vmem:[#allocation74_spill] sm:$0xff]  ;;  %v7696_v57 = vld [vmem:[#allocation53_spill] sm:$0xff] }
 0x30e   :  { %v5950_v45 = vmax.f32 %v5869_v41, %v2113_v51  ;;  %2149 = vmatpush.msrb.mxu0 %v5943_v38  ;;  %v6009_v41 = vmax.f32 %v7672_v4, %v2095_v17  ;;  %v6028_v62 = vmax.f32 %v7681_v56, %v1950_v21  ;;  %v7684_v51 = vld [vmem:[#allocation55_spill] sm:$0xff]  ;;  %v6040_v12 = vmax.f32 %v7687_v30, %v1947_v10  ;;  %v7697_v9 = vld [vmem:[#allocation42_spill] sm:$0xff]  ;;  %v7702_v10 = vld [vmem:[#allocation64_spill] sm:$0xff] }
 0x30f   :  { %v6033_v20 = vmax.f32 %v7684_v51, %v2089_v8  ;;  %v2080_v59 = vadd.f32 %v7689_v11, %v7688_v5  ;;  %v6045_v53 = vmax.f32 %v7690_v31, %v2086_v48  ;;  %v1938_v6 = vadd.f32 %v7692_v3, %v7691_v19  ;;  %v7698_v7 = vld [vmem:[#allocation67_spill] sm:$0xff]  ;;  %v7700_v8 = vld [vmem:[#allocation52_spill] sm:$0xff]  ;;  %v7706_v49 = vld [vmem:[#allocation61_spill] sm:$0xff] }
 0x310   :  { %2150 = vmatpush.msrb.mxu0 %v5947_v61  ;;  %2212 = vmatpush.msrb.mxu1 %v5950_v45  ;;  %v6052_v1 = vmax.f32 %v7693_v37, %v1944_v55  ;;  %v2077_v17 = vadd.f32 %v7695_v25, %v7694_v32  ;;  %v6057_v54 = vmax.f32 %v7696_v57, %v2083_v16  ;;  %v7699_v52 = vld [vmem:[#allocation71_spill] sm:$0xff]  ;;  %v7703_v43 = vld [vmem:[#allocation68_spill] sm:$0xff]  ;;  %v7708_v55 = vld [vmem:[#allocation50_spill] sm:$0xff] }
 0x311   :  { %v6062_v21 = vmax.f32 %v7697_v9, %v1941_v26  ;;  %v2074_v33 = vadd.f32 %v7699_v52, %v7698_v7  ;;  %v6067_v4 = vmax.f32 %v7700_v8, %v2080_v59  ;;  %v6072_v42 = vmax.f32 %v7701_v13, %v1938_v6  ;;  %v7704_v46 = vld [vmem:[#allocation51_spill] sm:$0xff]  ;;  %v4690_v63 = vld [vmem:[#allocation9] sm:$0xff]  ;;  %v7710_v14 = vld [vmem:[#allocation49_spill] sm:$0xff] }
 0x312   :  { %2151 = vmatpush.msrb.mxu0 %v5954_v24  ;;  %2213 = vmatpush.msrb.mxu1 %v5957_v15  ;;  %v2071_v44 = vadd.f32 %v7703_v43, %v7702_v10  ;;  %v6077_v48 = vmax.f32 %v7704_v46, %v2077_v17  ;;  %v2068_v2 = vadd.f32 %v7707_v35, %v7706_v49  ;;  %v7712_v51 = vld [vmem:[#allocation48_spill] sm:$0xff]  ;;  %v4691_v47 = vld [vmem:[#allocation9 + $0x8] sm:$0xff]  ;;  %v4693_v30 = vld [vmem:[#allocation9 + $0x18] sm:$0xff] }
 0x313   :  { %v6084_v56 = vmax.f32 %v7708_v55, %v2074_v33  ;;  %v4692_v26 = vld [vmem:[#allocation9 + $0x10] sm:$0xff]  ;;  %v4694_v5 = vld [vmem:[#allocation9 + $0x20] sm:$0xff]  ;;  %v4695_v11 = vld [vmem:[#allocation9 + $0x28] sm:$0xff] }
 0x314   :  { %2152 = vmatpush.msrb.mxu0 %v5962_v29  ;;  %2214 = vmatpush.msrb.mxu1 %v5965_v40  ;;  %7705 = vst [vmem:[#allocation75_spill] sm:$0xff] %v6077_v48  ;;  %v6089_v16 = vmax.f32 %v7710_v14, %v2071_v44  ;;  %v6093_v22 = vmax.f32 %v7712_v51, %v2068_v2  ;;  %v4696_v59 = vld [vmem:[#allocation9 + $0x30] sm:$0xff]  ;;  %v4697_v31 = vld [vmem:[#allocation9 + $0x38] sm:$0xff]  ;;  %v4698_v19 = vld [vmem:[#allocation9 + $0x40] sm:$0xff] }
 0x315   :  { %7709 = vst [vmem:[#allocation47_spill] sm:$0xff] %v6084_v56  ;;  %v4699_v3 = vld [vmem:[#allocation9 + $0x48] sm:$0xff]  ;;  %v4700_v6 = vld [vmem:[#allocation9 + $0x50] sm:$0xff]  ;;  %v4701_v37 = vld [vmem:[#allocation9 + $0x58] sm:$0xff] }
 0x316   :  { %2153 = vmatpush.msrb.mxu0 %v5971_v39  ;;  %2215 = vmatpush.msrb.mxu1 %v5974_v34  ;;  %7711 = vst [vmem:[#allocation80_spill] sm:$0xff] %v6089_v16  ;;  %v4702_v32 = vld [vmem:[#allocation9 + $0x60] sm:$0xff]  ;;  %v4703_v25 = vld [vmem:[#allocation9 + $0x68] sm:$0xff]  ;;  %v4704_v17 = vld [vmem:[#allocation9 + $0x70] sm:$0xff] }
 0x317   :  { %7713 = vst [vmem:[#allocation82_spill] sm:$0xff] %v6093_v22  ;;  %v4705_v57 = vld [vmem:[#allocation9 + $0x78] sm:$0xff] }
 0x318   :  { %2154 = vmatpush.msrb.mxu0 %v5981_v27  ;;  %2216 = vmatpush.msrb.mxu1 %v5985_v36 }
 0x31a   :  { %2155 = vmatpush.msrb.mxu0 %v5992_v0  ;;  %2217 = vmatpush.msrb.mxu1 %v5997_v60 }
 0x31c   :  { %2156 = vmatpush.msrb.mxu0 %v6004_v18  ;;  %2218 = vmatpush.msrb.mxu1 %v6009_v41 }
 0x31e   :  { %2157 = vmatpush.msrb.mxu0 %v6016_v23  ;;  %2219 = vmatpush.msrb.mxu1 %v6021_v50 }
 0x320   :  { %2158 = vmatpush.msrb.mxu0 %v6028_v62  ;;  %2220 = vmatpush.msrb.mxu1 %v6033_v20 }
 0x322   :  { %2159 = vmatpush.msrb.mxu0 %v6040_v12  ;;  %2221 = vmatpush.msrb.mxu1 %v6045_v53 }
 0x324   :  { %2160 = vmatpush.msrb.mxu0 %v6052_v1  ;;  %2222 = vmatpush.msrb.mxu1 %v6057_v54 }
 0x326   :  { %2161 = vmatpush.msrb.mxu0 %v6062_v21  ;;  %2223 = vmatpush.msrb.mxu1 %v6067_v4 }
 0x328   :  { %2162 = vmatpush.msrb.mxu0 %v6072_v42  ;;  %2224 = vmatpush.msrb.mxu1 %v6077_v48 }
 0x329   :  { %2163 = vmatmul.f32.vlgmr.msrb.gmra.mxu0 %v4690_v63 }
 0x32a   :  { %2225 = vmatpush.msrb.mxu1 %v6084_v56 }
 0x32c   :  { %2226 = vmatpush.msrb.mxu1 %v6089_v16 }
 0x32e   :  { %2227 = vmatpush.msrb.mxu1 %v6093_v22 }
 0x32f   :  { %2228 = vmatmul.f32.vlgmr.msrb.gmra.mxu1 %v4690_v63 }
 0x331   :  { %2166 = vmatmul.f32.gmra.mxu0 %v4691_v47 }
 0x337   :  { %2231 = vmatmul.f32.gmra.mxu1 %v4691_v47 }
 0x339   :  { %2169 = vmatmul.f32.gmra.mxu0 %v4692_v26 }
 0x33f   :  { %2234 = vmatmul.f32.gmra.mxu1 %v4692_v26 }
 0x341   :  { %2172 = vmatmul.f32.gmra.mxu0 %v4693_v30 }
 0x347   :  { %2237 = vmatmul.f32.gmra.mxu1 %v4693_v30 }
 0x349   :  { %2175 = vmatmul.f32.gmra.mxu0 %v4694_v5 }
 0x34f   :  { %2240 = vmatmul.f32.gmra.mxu1 %v4694_v5 }
 0x351   :  { %2178 = vmatmul.f32.gmra.mxu0 %v4695_v11 }
 0x357   :  { %2243 = vmatmul.f32.gmra.mxu1 %v4695_v11 }
 0x359   :  { %2181 = vmatmul.f32.gmra.mxu0 %v4696_v59 }
 0x35f   :  { %2246 = vmatmul.f32.gmra.mxu1 %v4696_v59 }
 0x361   :  { %2184 = vmatmul.f32.gmra.mxu0 %v4697_v31 }
 0x367   :  { %2249 = vmatmul.f32.gmra.mxu1 %v4697_v31 }
 0x369   :  { %2187 = vmatmul.f32.gmra.mxu0 %v4698_v19 }
 0x36f   :  { %2252 = vmatmul.f32.gmra.mxu1 %v4698_v19 }
 0x371   :  { %2190 = vmatmul.f32.gmra.mxu0 %v4699_v3 }
 0x377   :  { %2255 = vmatmul.f32.gmra.mxu1 %v4699_v3 }
 0x379   :  { %2193 = vmatmul.f32.gmra.mxu0 %v4700_v6 }
 0x37f   :  { %2258 = vmatmul.f32.gmra.mxu1 %v4700_v6 }
 0x381   :  { %2196 = vmatmul.f32.gmra.mxu0 %v4701_v37 }
 0x387   :  { %2261 = vmatmul.f32.gmra.mxu1 %v4701_v37 }
 0x389   :  { %2199 = vmatmul.f32.gmra.mxu0 %v4702_v32 }
 0x38f   :  { %2264 = vmatmul.f32.gmra.mxu1 %v4702_v32 }
 0x391   :  { %2202 = vmatmul.f32.gmra.mxu0 %v4703_v25 }
 0x397   :  { %2267 = vmatmul.f32.gmra.mxu1 %v4703_v25 }
 0x399   :  { %2205 = vmatmul.f32.gmra.mxu0 %v4704_v17 }
 0x39f   :  { %2270 = vmatmul.f32.gmra.mxu1 %v4704_v17 }
 0x3a1   :  { %2208 = vmatmul.f32.gmra.mxu0 %v4705_v57 }
 0x3a6   :  { %v6097_v9 = vpop.f32.mrf.mxu0 }
 0x3a7   :  { %2273 = vmatmul.f32.gmra.mxu1 %v4705_v57 }
 0x3ac   :  { %v6099_v7 = vpop.f32.mrf.mxu1 }
 0x3ad   :  { %7714 = vst [vmem:[#allocation57_spill] sm:$0xff] %v6099_v7 }
 0x3ae   :  { %v6101_v52 = vpop.f32.mrf.mxu0 }
 0x3b4   :  { %v6103_v33 = vpop.f32.mrf.mxu1 }
 0x3b5   :  { %7715 = vst [vmem:[#allocation62_spill] sm:$0xff] %v6103_v33 }
 0x3b6   :  { %v6105_v8 = vpop.f32.mrf.mxu0 }
 0x3bc   :  { %v6107_v13 = vpop.f32.mrf.mxu1 }
 0x3bd   :  { %7716 = vst [vmem:[#allocation72_spill] sm:$0xff] %v6107_v13 }
 0x3be   :  { %v6109_v10 = vpop.f32.mrf.mxu0 }
 0x3c4   :  { %v6111_v43 = vpop.f32.mrf.mxu1 }
 0x3c6   :  { %v6113_v44 = vpop.f32.mrf.mxu0 }
 0x3cc   :  { %v6115_v46 = vpop.f32.mrf.mxu1 }
 0x3ce   :  { %v2179_v49 = vpop.f32.mrf.mxu0 }
 0x3d4   :  { %v6117_v35 = vpop.f32.mrf.mxu1 }
 0x3d6   :  { %v2182_v2 = vpop.f32.mrf.mxu0 }
 0x3dc   :  { %v6119_v55 = vpop.f32.mrf.mxu1 }
 0x3de   :  { %v2185_v63 = vpop.f32.mrf.mxu0 }
 0x3e4   :  { %v2250_v14 = vpop.f32.mrf.mxu1 }
 0x3e6   :  { %v2188_v51 = vpop.f32.mrf.mxu0 }
 0x3ec   :  { %v2253_v47 = vpop.f32.mrf.mxu1 }
 0x3ee   :  { %v2191_v26 = vpop.f32.mrf.mxu0 }
 0x3f4   :  { %v2256_v30 = vpop.f32.mrf.mxu1 }
 0x3f6   :  { %v2194_v5 = vpop.f32.mrf.mxu0 }
 0x3fc   :  { %v2259_v11 = vpop.f32.mrf.mxu1 }
 0x3fe   :  { %v2197_v59 = vpop.f32.mrf.mxu0 }
 0x3ff   :  { %v2299_v13 = vmax.f32 %v5954_v24, %v2197_v59  ;;  %v2291_v24 = vmax.f32 %v5992_v0, %v2185_v63  ;;  %v2283_v0 = vmax.f32 %v6040_v12, %v6109_v10  ;;  %v892_v10 = vld [vmem:[#allocation10 + $0x30] sm:$0xff] }
 0x404   :  { %v2262_v31 = vpop.f32.mrf.mxu1 }
 0x406   :  { %v2200_v19 = vpop.f32.mrf.mxu0 }
 0x407   :  { %v2301_v33 = vmax.f32 %v5947_v61, %v2200_v19  ;;  %v2293_v61 = vmax.f32 %v5981_v27, %v2188_v51  ;;  %v2285_v27 = vmax.f32 %v6028_v62, %v6113_v44  ;;  %v2277_v62 = vmax.f32 %v6072_v42, %v6097_v9  ;;  %v887_v42 = vld [vmem:[#allocation10 + $0x8] sm:$0xff]  ;;  %v888_v9 = vld [vmem:[#allocation10 + $0x10] sm:$0xff]  ;;  %v894_v19 = vld [vmem:[#allocation12] sm:$0xff] }
 0x40c   :  { %v2265_v3 = vpop.f32.mrf.mxu1 }
 0x40e   :  { %v2203_v6 = vpop.f32.mrf.mxu0 }
 0x40f   :  { %v2303_v7 = vmax.f32 %v5943_v38, %v2203_v6  ;;  %v2295_v38 = vmax.f32 %v5971_v39, %v2191_v26  ;;  %v2287_v39 = vmax.f32 %v6016_v23, %v2179_v49  ;;  %v2279_v23 = vmax.f32 %v6062_v21, %v6101_v52  ;;  %v7720_v21 = vld [vmem:[#allocation62_spill] sm:$0xff]  ;;  %v562_v6 = vld [vmem:[%s7724_s18 + $0x2f0] sm:$0xff] }
 0x414   :  { %v2268_v37 = vpop.f32.mrf.mxu1 }
 0x416   :  { %v2206_v32 = vpop.f32.mrf.mxu0 }
 0x417   :  { %v2305_v22 = vmax.f32 %v5939_v58, %v2206_v32  ;;  %v2304_v58 = vmax.f32 %v5965_v40, %v2268_v37  ;;  %v2296_v40 = vmax.f32 %v6009_v41, %v2256_v30  ;;  %v2288_v41 = vmax.f32 %v6057_v54, %v6117_v35  ;;  %v7719_v54 = vld [vmem:[#allocation47_spill] sm:$0xff]  ;;  %v560_v37 = vld [vmem:[%s7724_s18 + $0x2e0] sm:$0xff] }
 0x418   :  { %v558_v32 = vld [vmem:[%s7724_s18 + $0x2d0] sm:$0xff] }
 0x41c   :  { %v2271_v25 = vpop.f32.mrf.mxu1 }
 0x41d   :  { %v2306_v48 = vmax.f32 %v5957_v15, %v2271_v25  ;;  %v2298_v15 = vmax.f32 %v5997_v60, %v2259_v11  ;;  %v2290_v60 = vmax.f32 %v6045_v53, %v6119_v55  ;;  %v886_v53 = vld [vmem:[#allocation10] sm:$0xff]  ;;  %v895_v25 = vld [vmem:[#allocation12 + $0x8] sm:$0xff] }
 0x41e   :  { %v2209_v17 = vpop.f32.mrf.mxu0 }
 0x41f   :  { %v2307_v57 = vmax.f32 %v5936_v28, %v2209_v17  ;;  %v2297_v28 = vmax.f32 %v5962_v29, %v2194_v5  ;;  %v2289_v29 = vmax.f32 %v6004_v18, %v2182_v2  ;;  %v2281_v18 = vmax.f32 %v6052_v1, %v6105_v8  ;;  %v7718_v1 = vld [vmem:[#allocation72_spill] sm:$0xff]  ;;  %v890_v8 = vld [vmem:[#allocation10 + $0x20] sm:$0xff]  ;;  %v903_v17 = vld [vmem:[#allocation13 + $0x8] sm:$0xff] }
 0x421   :  { %2309 = vmatpush.msrb.mxu2 %v2307_v57  ;;  %v556_v57 = vld [vmem:[%s7724_s18 + $0x2c0] sm:$0xff] }
 0x423   :  { %2310 = vmatpush.msrb.mxu2 %v2305_v22  ;;  %v2302_v22 = vmax.f32 %v5974_v34, %v2265_v3  ;;  %v2294_v34 = vmax.f32 %v6021_v50, %v2253_v47  ;;  %v2286_v50 = vmax.f32 %v6067_v4, %v6115_v46  ;;  %v902_v3 = vld [vmem:[#allocation13] sm:$0xff] }
 0x424   :  { %v2274_v16 = vpop.f32.mrf.mxu1 }
 0x425   :  { %v2308_v56 = vmax.f32 %v5950_v45, %v2274_v16  ;;  %2311 = vmatpush.msrb.mxu2 %v2303_v7  ;;  %v2300_v45 = vmax.f32 %v5985_v36, %v2262_v31  ;;  %v2292_v36 = vmax.f32 %v6033_v20, %v2250_v14  ;;  %v7717_v20 = vld [vmem:[#allocation75_spill] sm:$0xff]  ;;  %v7722_v16 = vld [vmem:[#allocation57_spill] sm:$0xff]  ;;  %v7723_v7 = vld [vmem:[#allocation82_spill] sm:$0xff] }
 0x426   :  { %v2284_v12 = vmax.f32 %v7717_v20, %v6111_v43  ;;  %v2278_v52 = vmax.f32 %v7723_v7, %v7722_v16  ;;  %v893_v43 = vld [vmem:[#allocation10 + $0x38] sm:$0xff]  ;;  %v538_v20 = vld [vmem:[%s7724_s18 + $0x230] sm:$0xff] }
 0x427   :  { %2312 = vmatpush.msrb.mxu2 %v2301_v33  ;;  %2350 = vmatpush.msrb.mxu3 %v2308_v56  ;;  %v7721_v56 = vld [vmem:[#allocation80_spill] sm:$0xff]  ;;  %v889_v33 = vld [vmem:[#allocation10 + $0x18] sm:$0xff] }
 0x428   :  { %v2280_v4 = vmax.f32 %v7721_v56, %v7720_v21  ;;  %v898_v21 = vld [vmem:[#allocation12 + $0x20] sm:$0xff]  ;;  %v570_v16 = vld [vmem:[%s7724_s18 + $0x330] sm:$0xff] }
 0x429   :  { %2313 = vmatpush.msrb.mxu2 %v2299_v13  ;;  %2351 = vmatpush.msrb.mxu3 %v2306_v48  ;;  %v2282_v48 = vmax.f32 %v7719_v54, %v7718_v1  ;;  %v891_v13 = vld [vmem:[#allocation10 + $0x28] sm:$0xff]  ;;  %v536_v1 = vld [vmem:[%s7724_s18 + $0x220] sm:$0xff] }
 0x42a   :  { %v572_v54 = vld [vmem:[%s7724_s18 + $0x340] sm:$0xff] }
 0x42b   :  { %2314 = vmatpush.msrb.mxu2 %v2297_v28  ;;  %2352 = vmatpush.msrb.mxu3 %v2304_v58  ;;  %v594_v28 = vld [vmem:[%s7724_s18 + $0x3f0] sm:$0xff]  ;;  %v906_v56 = vld [vmem:[#allocation13 + $0x20] sm:$0xff] }
 0x42c   :  { %v554_v58 = vld [vmem:[%s7724_s18 + $0x2b0] sm:$0xff]  ;;  %v568_v7 = vld [vmem:[%s7724_s18 + $0x320] sm:$0xff] }
 0x42d   :  { %2315 = vmatpush.msrb.mxu2 %v2295_v38  ;;  %2353 = vmatpush.msrb.mxu3 %v2302_v22  ;;  %v592_v38 = vld [vmem:[%s7724_s18 + $0x3e0] sm:$0xff]  ;;  %v590_v22 = vld [vmem:[%s7724_s18 + $0x3d0] sm:$0xff] }
 0x42f   :  { %2316 = vmatpush.msrb.mxu2 %v2293_v61  ;;  %2354 = vmatpush.msrb.mxu3 %v2300_v45  ;;  %v552_v61 = vld [vmem:[%s7724_s18 + $0x2a0] sm:$0xff] }
 0x430   :  { %v588_v45 = vld [vmem:[%s7724_s18 + $0x3c0] sm:$0xff] }
 0x431   :  { %2317 = vmatpush.msrb.mxu2 %v2291_v24  ;;  %2355 = vmatpush.msrb.mxu3 %v2298_v15  ;;  %v550_v24 = vld [vmem:[%s7724_s18 + $0x290] sm:$0xff] }
 0x432   :  { %v896_v15 = vld [vmem:[#allocation12 + $0x10] sm:$0xff] }
 0x433   :  { %2318 = vmatpush.msrb.mxu2 %v2289_v29  ;;  %2356 = vmatpush.msrb.mxu3 %v2296_v40  ;;  %v904_v29 = vld [vmem:[#allocation13 + $0x10] sm:$0xff]  ;;  %v548_v40 = vld [vmem:[%s7724_s18 + $0x280] sm:$0xff] }
 0x435   :  { %2319 = vmatpush.msrb.mxu2 %v2287_v39  ;;  %2357 = vmatpush.msrb.mxu3 %v2294_v34  ;;  %v586_v39 = vld [vmem:[%s7724_s18 + $0x3b0] sm:$0xff] }
 0x436   :  { %v546_v34 = vld [vmem:[%s7724_s18 + $0x270] sm:$0xff] }
 0x437   :  { %2320 = vmatpush.msrb.mxu2 %v2285_v27  ;;  %2358 = vmatpush.msrb.mxu3 %v2292_v36  ;;  %v584_v27 = vld [vmem:[%s7724_s18 + $0x3a0] sm:$0xff]  ;;  %v582_v36 = vld [vmem:[%s7724_s18 + $0x390] sm:$0xff] }
 0x439   :  { %2321 = vmatpush.msrb.mxu2 %v2283_v0  ;;  %2359 = vmatpush.msrb.mxu3 %v2290_v60  ;;  %v544_v0 = vld [vmem:[%s7724_s18 + $0x260] sm:$0xff] }
 0x43a   :  { %v580_v60 = vld [vmem:[%s7724_s18 + $0x380] sm:$0xff] }
 0x43b   :  { %2322 = vmatpush.msrb.mxu2 %v2281_v18  ;;  %2360 = vmatpush.msrb.mxu3 %v2288_v41  ;;  %v542_v18 = vld [vmem:[%s7724_s18 + $0x250] sm:$0xff]  ;;  %v897_v41 = vld [vmem:[#allocation12 + $0x18] sm:$0xff] }
 0x43d   :  { %2323 = vmatpush.msrb.mxu2 %v2279_v23  ;;  %2361 = vmatpush.msrb.mxu3 %v2286_v50  ;;  %v905_v23 = vld [vmem:[#allocation13 + $0x18] sm:$0xff] }
 0x43e   :  { %v540_v50 = vld [vmem:[%s7724_s18 + $0x240] sm:$0xff] }
 0x43f   :  { %2324 = vmatpush.msrb.mxu2 %v2277_v62  ;;  %2362 = vmatpush.msrb.mxu3 %v2284_v12  ;;  %v578_v62 = vld [vmem:[%s7724_s18 + $0x370] sm:$0xff]  ;;  %v576_v12 = vld [vmem:[%s7724_s18 + $0x360] sm:$0xff] }
 0x440   :  { %2325 = vmatmul.f32.vlgmr.msrb.gmra.mxu2 %v886_v53 }
 0x441   :  { %2363 = vmatpush.msrb.mxu3 %v2282_v48  ;;  %v534_v48 = vld [vmem:[%s7724_s18 + $0x210] sm:$0xff] }
 0x443   :  { %2364 = vmatpush.msrb.mxu3 %v2280_v4  ;;  %v532_v4 = vld [vmem:[%s7724_s18 + $0x200] sm:$0xff] }
 0x445   :  { %2365 = vmatpush.msrb.mxu3 %v2278_v52  ;;  %v566_v52 = vld [vmem:[%s7724_s18 + $0x310] sm:$0xff] }
 0x446   :  { %2366 = vmatmul.f32.vlgmr.msrb.gmra.mxu3 %v886_v53  ;;  %v574_v53 = vld [vmem:[%s7724_s18 + $0x350] sm:$0xff] }
 0x448   :  { %2328 = vmatmul.f32.gmra.mxu2 %v887_v42 }
 0x44e   :  { %2369 = vmatmul.f32.gmra.mxu3 %v887_v42  ;;  %v564_v42 = vld [vmem:[%s7724_s18 + $0x300] sm:$0xff] }
 0x450   :  { %2331 = vmatmul.f32.gmra.mxu2 %v888_v9 }
 0x456   :  { %2372 = vmatmul.f32.gmra.mxu3 %v888_v9  ;;  %v899_v9 = vld [vmem:[#allocation12 + $0x28] sm:$0xff] }
 0x458   :  { %2334 = vmatmul.f32.gmra.mxu2 %v889_v33 }
 0x45e   :  { %2375 = vmatmul.f32.gmra.mxu3 %v889_v33  ;;  %v907_v33 = vld [vmem:[#allocation13 + $0x28] sm:$0xff] }
 0x460   :  { %2337 = vmatmul.f32.gmra.mxu2 %v890_v8 }
 0x466   :  { %2378 = vmatmul.f32.gmra.mxu3 %v890_v8  ;;  %v900_v8 = vld [vmem:[#allocation12 + $0x30] sm:$0xff] }
 0x468   :  { %2340 = vmatmul.f32.gmra.mxu2 %v891_v13 }
 0x46e   :  { %2381 = vmatmul.f32.gmra.mxu3 %v891_v13  ;;  %v908_v13 = vld [vmem:[#allocation13 + $0x30] sm:$0xff] }
 0x470   :  { %2343 = vmatmul.f32.gmra.mxu2 %v892_v10 }
 0x476   :  { %2384 = vmatmul.f32.gmra.mxu3 %v892_v10  ;;  %v901_v10 = vld [vmem:[#allocation12 + $0x38] sm:$0xff] }
 0x478   :  { %2346 = vmatmul.f32.gmra.mxu2 %v893_v43 }
 0x47e   :  { %2387 = vmatmul.f32.gmra.mxu3 %v893_v43  ;;  %v909_v43 = vld [vmem:[#allocation13 + $0x38] sm:$0xff] }
 0x4c3   :  { %v6165_v44 = vpop.f32.mrf.mxu2 }
 0x4c9   :  { %v6167_v46 = vpop.f32.mrf.mxu3 }
 0x4cb   :  { %v6169_v49 = vpop.f32.mrf.mxu2 }
 0x4d1   :  { %v6171_v35 = vpop.f32.mrf.mxu3 }
 0x4d3   :  { %v6173_v2 = vpop.f32.mrf.mxu2 }
 0x4d9   :  { %v6175_v55 = vpop.f32.mrf.mxu3 }
 0x4db   :  { %v6177_v63 = vpop.f32.mrf.mxu2 }
 0x4e1   :  { %v6179_v14 = vpop.f32.mrf.mxu3 }
 0x4e3   :  { %v6181_v51 = vpop.f32.mrf.mxu2 }
 0x4e9   :  { %v6183_v47 = vpop.f32.mrf.mxu3 }
 0x4eb   :  { %v6185_v26 = vpop.f32.mrf.mxu2 }
 0x4f1   :  { %v6187_v30 = vpop.f32.mrf.mxu3 }
 0x4f3   :  { %v6189_v5 = vpop.f32.mrf.mxu2 }
 0x4f9   :  { %v6191_v11 = vpop.f32.mrf.mxu3 }
 0x4fb   :  { %v6193_v59 = vpop.f32.mrf.mxu2 }
 0x4fc   :  { %2424 = vmatpush.msra.mxu2 %v6193_v59  ;;  %2530 = vmatpush.msra.mxu0 %v6193_v59 }
 0x4fe   :  { %2425 = vmatpush.msra.mxu2 %v6189_v5  ;;  %2531 = vmatpush.msra.mxu0 %v6189_v5 }
 0x500   :  { %2426 = vmatpush.msra.mxu2 %v6185_v26  ;;  %2532 = vmatpush.msra.mxu0 %v6185_v26 }
 0x501   :  { %v6201_v31 = vpop.f32.mrf.mxu3 }
 0x502   :  { %2427 = vmatpush.msra.mxu2 %v6181_v51  ;;  %2465 = vmatpush.msra.mxu3 %v6201_v31 }
 0x503   :  { %2533 = vmatpush.msra.mxu0 %v6181_v51  ;;  %2571 = vmatpush.msra.mxu1 %v6201_v31 }
 0x504   :  { %2428 = vmatpush.msra.mxu2 %v6177_v63  ;;  %2466 = vmatpush.msra.mxu3 %v6191_v11 }
 0x505   :  { %2534 = vmatpush.msra.mxu0 %v6177_v63  ;;  %2572 = vmatpush.msra.mxu1 %v6191_v11 }
 0x506   :  { %2429 = vmatpush.msra.mxu2 %v6173_v2  ;;  %2467 = vmatpush.msra.mxu3 %v6187_v30 }
 0x507   :  { %2535 = vmatpush.msra.mxu0 %v6173_v2  ;;  %2573 = vmatpush.msra.mxu1 %v6187_v30 }
 0x508   :  { %2430 = vmatpush.msra.mxu2 %v6169_v49  ;;  %2468 = vmatpush.msra.mxu3 %v6183_v47 }
 0x509   :  { %2536 = vmatpush.msra.mxu0 %v6169_v49  ;;  %2574 = vmatpush.msra.mxu1 %v6183_v47 }
 0x50a   :  { %2431 = vmatpush.msra.mxu2 %v6165_v44  ;;  %2469 = vmatpush.msra.mxu3 %v6179_v14 }
 0x50b   :  { %2537 = vmatpush.msra.mxu0 %v6165_v44  ;;  %2575 = vmatpush.msra.mxu1 %v6179_v14 }
 0x50c   :  { %4548 = vmatmul.msk.f32.vlgmr.msra.gmra.mxu2 %vm2391_vm0, %v894_v19  ;;  %4564 = vmatmul.msk.f32.vlgmr.msra.gmra.mxu0 %vm2391_vm0, %v902_v3 }
 0x50d   :  { %2470 = vmatpush.msra.mxu3 %v6175_v55  ;;  %2576 = vmatpush.msra.mxu1 %v6175_v55 }
 0x50e   :  { %2691 = vmatpush.msrb.mxu0 %v562_v6  ;;  %v494_v6 = vld [vmem:[%s7724_s18 + $0xd0] sm:$0xff] }
 0x50f   :  { %2471 = vmatpush.msra.mxu3 %v6171_v35  ;;  %2577 = vmatpush.msra.mxu1 %v6171_v35 }
 0x510   :  { %2692 = vmatpush.msrb.mxu0 %v560_v37  ;;  %v492_v37 = vld [vmem:[%s7724_s18 + $0xc0] sm:$0xff] }
 0x511   :  { %2472 = vmatpush.msra.mxu3 %v6167_v46  ;;  %2578 = vmatpush.msra.mxu1 %v6167_v46 }
 0x512   :  { %4556 = vmatmul.msk.f32.vlgmr.msra.gmra.mxu3 %vm2391_vm0, %v894_v19  ;;  %4572 = vmatmul.msk.f32.vlgmr.msra.gmra.mxu1 %vm2391_vm0, %v902_v3  ;;  %v498_v19 = vld [vmem:[%s7724_s18 + $0xf0] sm:$0xff]  ;;  %v496_v3 = vld [vmem:[%s7724_s18 + $0xe0] sm:$0xff] }
 0x513   :  { %2693 = vmatpush.msrb.mxu0 %v558_v32  ;;  %2732 = vmatpush.msrb.mxu1 %v594_v28  ;;  %v530_v32 = vld [vmem:[%s7724_s18 + $0x1f0] sm:$0xff]  ;;  %v497_v28 = vld [vmem:[%s7724_s18 + $0xe8] sm:$0xff] }
 0x514   :  { %4549 = vmatmul.msk.f32.gmra.mxu2 %vm2391_vm0, %v895_v25  ;;  %4565 = vmatmul.msk.f32.gmra.mxu0 %vm2391_vm0, %v903_v17 }
 0x515   :  { %2694 = vmatpush.msrb.mxu0 %v556_v57  ;;  %2733 = vmatpush.msrb.mxu1 %v592_v38  ;;  %v490_v57 = vld [vmem:[%s7724_s18 + $0xb0] sm:$0xff]  ;;  %v495_v38 = vld [vmem:[%s7724_s18 + $0xd8] sm:$0xff] }
 0x516   :  { %2609 = vmatpush.msrb.mxu2 %v498_v19  ;;  %2650 = vmatpush.msrb.mxu3 %v530_v32  ;;  %v468_v19 = vld [vmem:[%s7724_s18] sm:$0xff]  ;;  %v511_v32 = vld [vmem:[%s7724_s18 + $0x158] sm:$0xff] }
 0x517   :  { %2695 = vmatpush.msrb.mxu0 %v554_v58  ;;  %2734 = vmatpush.msrb.mxu1 %v590_v22  ;;  %v531_v58 = vld [vmem:[%s7724_s18 + $0x1f8] sm:$0xff]  ;;  %v529_v22 = vld [vmem:[%s7724_s18 + $0x1e8] sm:$0xff] }
 0x518   :  { %2610 = vmatpush.msrb.mxu2 %v496_v3  ;;  %v506_v3 = vld [vmem:[%s7724_s18 + $0x130] sm:$0xff] }
 0x519   :  { %2696 = vmatpush.msrb.mxu0 %v552_v61  ;;  %2735 = vmatpush.msrb.mxu1 %v588_v45  ;;  %v488_v61 = vld [vmem:[%s7724_s18 + $0xa0] sm:$0xff]  ;;  %v526_v45 = vld [vmem:[%s7724_s18 + $0x1d0] sm:$0xff] }
 0x51a   :  { %4557 = vmatmul.msk.f32.gmra.mxu3 %vm2391_vm0, %v895_v25  ;;  %4573 = vmatmul.msk.f32.gmra.mxu1 %vm2391_vm0, %v903_v17  ;;  %v528_v25 = vld [vmem:[%s7724_s18 + $0x1e0] sm:$0xff]  ;;  %v499_v17 = vld [vmem:[%s7724_s18 + $0xf8] sm:$0xff] }
 0x51b   :  { %2697 = vmatpush.msrb.mxu0 %v550_v24  ;;  %2736 = vmatpush.msrb.mxu1 %v586_v39  ;;  %v493_v24 = vld [vmem:[%s7724_s18 + $0xc8] sm:$0xff]  ;;  %v484_v39 = vld [vmem:[%s7724_s18 + $0x80] sm:$0xff] }
 0x51c   :  { %4550 = vmatmul.msk.f32.gmra.mxu2 %vm2391_vm0, %v896_v15  ;;  %4566 = vmatmul.msk.f32.gmra.mxu0 %vm2391_vm0, %v904_v29 }
 0x51d   :  { %2698 = vmatpush.msrb.mxu0 %v548_v40  ;;  %2737 = vmatpush.msrb.mxu1 %v584_v27  ;;  %v524_v40 = vld [vmem:[%s7724_s18 + $0x1c0] sm:$0xff]  ;;  %v482_v27 = vld [vmem:[%s7724_s18 + $0x70] sm:$0xff] }
 0x51e   :  { %2611 = vmatpush.msrb.mxu2 %v494_v6  ;;  %2651 = vmatpush.msrb.mxu3 %v528_v25  ;;  %v477_v6 = vld [vmem:[%s7724_s18 + $0x48] sm:$0xff]  ;;  %v502_v25 = vld [vmem:[%s7724_s18 + $0x110] sm:$0xff] }
 0x51f   :  { %2699 = vmatpush.msrb.mxu0 %v546_v34  ;;  %2738 = vmatpush.msrb.mxu1 %v582_v36  ;;  %v522_v34 = vld [vmem:[%s7724_s18 + $0x1b0] sm:$0xff]  ;;  %v520_v36 = vld [vmem:[%s7724_s18 + $0x1a0] sm:$0xff] }
 0x520   :  { %2612 = vmatpush.msrb.mxu2 %v492_v37  ;;  %2652 = vmatpush.msrb.mxu3 %v526_v45  ;;  %v504_v37 = vld [vmem:[%s7724_s18 + $0x120] sm:$0xff]  ;;  %v469_v45 = vld [vmem:[%s7724_s18 + $0x8] sm:$0xff] }
 0x521   :  { %2700 = vmatpush.msrb.mxu0 %v544_v0  ;;  %2739 = vmatpush.msrb.mxu1 %v580_v60  ;;  %v491_v0 = vld [vmem:[%s7724_s18 + $0xb8] sm:$0xff]  ;;  %v525_v60 = vld [vmem:[%s7724_s18 + $0x1c8] sm:$0xff] }
 0x522   :  { %4558 = vmatmul.msk.f32.gmra.mxu3 %vm2391_vm0, %v896_v15  ;;  %4574 = vmatmul.msk.f32.gmra.mxu1 %vm2391_vm0, %v904_v29  ;;  %v527_v15 = vld [vmem:[%s7724_s18 + $0x1d8] sm:$0xff]  ;;  %v486_v29 = vld [vmem:[%s7724_s18 + $0x90] sm:$0xff] }
 0x523   :  { %2701 = vmatpush.msrb.mxu0 %v542_v18  ;;  %2740 = vmatpush.msrb.mxu1 %v578_v62  ;;  %v489_v18 = vld [vmem:[%s7724_s18 + $0xa8] sm:$0xff]  ;;  %v487_v62 = vld [vmem:[%s7724_s18 + $0x98] sm:$0xff] }
 0x524   :  { %4551 = vmatmul.msk.f32.gmra.mxu2 %vm2391_vm0, %v897_v41  ;;  %4567 = vmatmul.msk.f32.gmra.mxu0 %vm2391_vm0, %v905_v23 }
 0x525   :  { %2702 = vmatpush.msrb.mxu0 %v540_v50  ;;  %2741 = vmatpush.msrb.mxu1 %v576_v12  ;;  %v518_v50 = vld [vmem:[%s7724_s18 + $0x190] sm:$0xff] }
 0x526   :  { %2613 = vmatpush.msrb.mxu2 %v490_v57  ;;  %2653 = vmatpush.msrb.mxu3 %v524_v40  ;;  %v478_v12 = vld [vmem:[%s7724_s18 + $0x50] sm:$0xff]  ;;  %v509_v57 = vld [vmem:[%s7724_s18 + $0x148] sm:$0xff] }
 0x527   :  { %2703 = vmatpush.msrb.mxu0 %v538_v20  ;;  %2742 = vmatpush.msrb.mxu1 %v574_v53  ;;  %v521_v20 = vld [vmem:[%s7724_s18 + $0x1a8] sm:$0xff]  ;;  %v516_v53 = vld [vmem:[%s7724_s18 + $0x180] sm:$0xff]  ;;  %v626_v40 = vld [vmem:[%s7724_s18 + $0x4f0] sm:$0xff] }
 0x528   :  { %2614 = vmatpush.msrb.mxu2 %v488_v61  ;;  %2654 = vmatpush.msrb.mxu3 %v522_v34  ;;  %v505_v61 = vld [vmem:[%s7724_s18 + $0x128] sm:$0xff]  ;;  %v622_v34 = vld [vmem:[%s7724_s18 + $0x4d0] sm:$0xff] }
 0x529   :  { %2704 = vmatpush.msrb.mxu0 %v536_v1  ;;  %2743 = vmatpush.msrb.mxu1 %v572_v54  ;;  %v476_v1 = vld [vmem:[%s7724_s18 + $0x40] sm:$0xff]  ;;  %v514_v54 = vld [vmem:[%s7724_s18 + $0x170] sm:$0xff] }
 0x52a   :  { %4559 = vmatmul.msk.f32.gmra.mxu3 %vm2391_vm0, %v897_v41  ;;  %4575 = vmatmul.msk.f32.gmra.mxu1 %vm2391_vm0, %v905_v23  ;;  %v523_v41 = vld [vmem:[%s7724_s18 + $0x1b8] sm:$0xff]  ;;  %v480_v23 = vld [vmem:[%s7724_s18 + $0x60] sm:$0xff] }
 0x52b   :  { %2705 = vmatpush.msrb.mxu0 %v534_v48  ;;  %2744 = vmatpush.msrb.mxu1 %v570_v16  ;;  %v485_v48 = vld [vmem:[%s7724_s18 + $0x88] sm:$0xff]  ;;  %v512_v16 = vld [vmem:[%s7724_s18 + $0x160] sm:$0xff] }
 0x52c   :  { %4552 = vmatmul.msk.f32.gmra.mxu2 %vm2391_vm0, %v898_v21  ;;  %4568 = vmatmul.msk.f32.gmra.mxu0 %vm2391_vm0, %v906_v56 }
 0x52d   :  { %2706 = vmatpush.msrb.mxu0 %v532_v4  ;;  %2745 = vmatpush.msrb.mxu1 %v568_v7  ;;  %v474_v4 = vld [vmem:[%s7724_s18 + $0x30] sm:$0xff]  ;;  %v517_v7 = vld [vmem:[%s7724_s18 + $0x188] sm:$0xff] }
 0x52e   :  { %2615 = vmatpush.msrb.mxu2 %v486_v29  ;;  %2655 = vmatpush.msrb.mxu3 %v520_v36 }
 0x52f   :  { %2746 = vmatpush.msrb.mxu1 %v566_v52  ;;  %2855 = vmatpush.msra.mxu0 %v499_v17  ;;  %v472_v52 = vld [vmem:[%s7724_s18 + $0x20] sm:$0xff]  ;;  %v475_v17 = vld [vmem:[%s7724_s18 + $0x38] sm:$0xff] }
 0x530   :  { %2616 = vmatpush.msrb.mxu2 %v484_v39  ;;  %2656 = vmatpush.msrb.mxu3 %v518_v50  ;;  %v624_v39 = vld [vmem:[%s7724_s18 + $0x4e0] sm:$0xff]  ;;  %v618_v50 = vld [vmem:[%s7724_s18 + $0x4b0] sm:$0xff] }
 0x531   :  { %2747 = vmatpush.msrb.mxu1 %v564_v42  ;;  %2856 = vmatpush.msra.mxu0 %v497_v28  ;;  %v510_v42 = vld [vmem:[%s7724_s18 + $0x150] sm:$0xff]  ;;  %v500_v28 = vld [vmem:[%s7724_s18 + $0x100] sm:$0xff] }
 0x532   :  { %4560 = vmatmul.msk.f32.gmra.mxu3 %vm2391_vm0, %v898_v21  ;;  %4576 = vmatmul.msk.f32.gmra.mxu1 %vm2391_vm0, %v906_v56  ;;  %v519_v21 = vld [vmem:[%s7724_s18 + $0x198] sm:$0xff] }
 0x533   :  { %2896 = vmatpush.msra.mxu1 %v531_v58  ;;  %2857 = vmatpush.msra.mxu0 %v495_v38  ;;  %v483_v56 = vld [vmem:[%s7724_s18 + $0x78] sm:$0xff]  ;;  %v473_v58 = vld [vmem:[%s7724_s18 + $0x28] sm:$0xff] }
 0x534   :  { %4553 = vmatmul.msk.f32.gmra.mxu2 %vm2391_vm0, %v899_v9  ;;  %4569 = vmatmul.msk.f32.gmra.mxu0 %vm2391_vm0, %v907_v33  ;;  %v507_v38 = vld [vmem:[%s7724_s18 + $0x138] sm:$0xff] }
 0x535   :  { %2897 = vmatpush.msra.mxu1 %v529_v22  ;;  %2858 = vmatpush.msra.mxu0 %v493_v24  ;;  %v471_v22 = vld [vmem:[%s7724_s18 + $0x18] sm:$0xff] }
 0x536   :  { %2617 = vmatpush.msrb.mxu2 %v482_v27  ;;  %2657 = vmatpush.msrb.mxu3 %v516_v53  ;;  %v503_v24 = vld [vmem:[%s7724_s18 + $0x118] sm:$0xff]  ;;  %v654_v53 = vld [vmem:[%s7724_s18 + $0x5d0] sm:$0xff] }
 0x537   :  { %2898 = vmatpush.msra.mxu1 %v527_v15  ;;  %2859 = vmatpush.msra.mxu0 %v491_v0  ;;  %v501_v15 = vld [vmem:[%s7724_s18 + $0x108] sm:$0xff]  ;;  %v627_v27 = vld [vmem:[%s7724_s18 + $0x4f8] sm:$0xff]  ;;  %v620_v0 = vld [vmem:[%s7724_s18 + $0x4c0] sm:$0xff] }
 0x538   :  { %2618 = vmatpush.msrb.mxu2 %v480_v23  ;;  %2658 = vmatpush.msrb.mxu3 %v514_v54  ;;  %v659_v23 = vld [vmem:[%s7724_s18 + $0x5f8] sm:$0xff]  ;;  %v614_v54 = vld [vmem:[%s7724_s18 + $0x490] sm:$0xff] }
 0x539   :  { %2899 = vmatpush.msra.mxu1 %v525_v60  ;;  %2860 = vmatpush.msra.mxu0 %v489_v18  ;;  %v658_v60 = vld [vmem:[%s7724_s18 + $0x5f0] sm:$0xff] }
 0x53a   :  { %4561 = vmatmul.msk.f32.gmra.mxu3 %vm2391_vm0, %v899_v9  ;;  %4577 = vmatmul.msk.f32.gmra.mxu1 %vm2391_vm0, %v907_v33  ;;  %v470_v9 = vld [vmem:[%s7724_s18 + $0x10] sm:$0xff]  ;;  %v508_v33 = vld [vmem:[%s7724_s18 + $0x140] sm:$0xff] }
 0x53b   :  { %2900 = vmatpush.msra.mxu1 %v523_v41  ;;  %2619 = vmatpush.msrb.mxu2 %v478_v12  ;;  %v625_v41 = vld [vmem:[%s7724_s18 + $0x4e8] sm:$0xff]  ;;  %v616_v12 = vld [vmem:[%s7724_s18 + $0x4a0] sm:$0xff] }
 0x53c   :  { %4554 = vmatmul.msk.f32.gmra.mxu2 %vm2391_vm0, %v900_v8  ;;  %4570 = vmatmul.msk.f32.gmra.mxu0 %vm2391_vm0, %v908_v13 }
 0x53d   :  { %2861 = vmatpush.msra.mxu0 %v487_v62  ;;  %2901 = vmatpush.msra.mxu1 %v521_v20  ;;  %v656_v62 = vld [vmem:[%s7724_s18 + $0x5e0] sm:$0xff]  ;;  %v623_v20 = vld [vmem:[%s7724_s18 + $0x4d8] sm:$0xff] }
 0x53e   :  { %2620 = vmatpush.msrb.mxu2 %v476_v1  ;;  %2659 = vmatpush.msrb.mxu3 %v512_v16  ;;  %v657_v1 = vld [vmem:[%s7724_s18 + $0x5e8] sm:$0xff] }
 0x53f   :  { %2862 = vmatpush.msra.mxu0 %v485_v48  ;;  %2902 = vmatpush.msra.mxu1 %v519_v21  ;;  %v652_v48 = vld [vmem:[%s7724_s18 + $0x5c0] sm:$0xff] }
 0x540   :  { %2621 = vmatpush.msrb.mxu2 %v474_v4  ;;  %2660 = vmatpush.msrb.mxu3 %v510_v42  ;;  %v650_v4 = vld [vmem:[%s7724_s18 + $0x5b0] sm:$0xff]  ;;  %v655_v42 = vld [vmem:[%s7724_s18 + $0x5d8] sm:$0xff] }
 0x541   :  { %2863 = vmatpush.msra.mxu0 %v483_v56  ;;  %2903 = vmatpush.msra.mxu1 %v517_v7  ;;  %v612_v56 = vld [vmem:[%s7724_s18 + $0x480] sm:$0xff] }
 0x542   :  { %4562 = vmatmul.msk.f32.gmra.mxu3 %vm2391_vm0, %v900_v8  ;;  %4578 = vmatmul.msk.f32.gmra.mxu1 %vm2391_vm0, %v908_v13  ;;  %v481_v8 = vld [vmem:[%s7724_s18 + $0x68] sm:$0xff]  ;;  %v515_v13 = vld [vmem:[%s7724_s18 + $0x178] sm:$0xff] }
 0x543   :  { %2622 = vmatpush.msrb.mxu2 %v472_v52  ;;  %2661 = vmatpush.msrb.mxu3 %v508_v33  ;;  %v621_v52 = vld [vmem:[%s7724_s18 + $0x4c8] sm:$0xff]  ;;  %v648_v33 = vld [vmem:[%s7724_s18 + $0x5a0] sm:$0xff] }
 0x544   :  { %4555 = vmatmul.msk.f32.gmra.mxu2 %vm2391_vm0, %v901_v10  ;;  %4571 = vmatmul.msk.f32.gmra.mxu0 %vm2391_vm0, %v909_v43 }
 0x545   :  { %2623 = vmatpush.msrb.mxu2 %v470_v9  ;;  %2864 = vmatpush.msra.mxu0 %v481_v8  ;;  %v610_v9 = vld [vmem:[%s7724_s18 + $0x470] sm:$0xff]  ;;  %v619_v8 = vld [vmem:[%s7724_s18 + $0x4b8] sm:$0xff] }
 0x546   :  { %2904 = vmatpush.msra.mxu1 %v515_v13  ;;  %2662 = vmatpush.msrb.mxu3 %v506_v3  ;;  %v606_v3 = vld [vmem:[%s7724_s18 + $0x450] sm:$0xff] }
 0x547   :  { %2624 = vmatpush.msrb.mxu2 %v468_v19  ;;  %v653_v19 = vld [vmem:[%s7724_s18 + $0x5c8] sm:$0xff] }
 0x548   :  { %2663 = vmatpush.msrb.mxu3 %v504_v37 }
 0x549   :  { %2773 = vmatpush.msra.mxu2 %v626_v40  ;;  %v598_v40 = vld [vmem:[%s7724_s18 + $0x410] sm:$0xff] }
 0x54a   :  { %4563 = vmatmul.msk.f32.gmra.mxu3 %vm2391_vm0, %v901_v10  ;;  %4579 = vmatmul.msk.f32.gmra.mxu1 %vm2391_vm0, %v909_v43  ;;  %v479_v10 = vld [vmem:[%s7724_s18 + $0x58] sm:$0xff]  ;;  %v513_v43 = vld [vmem:[%s7724_s18 + $0x168] sm:$0xff] }
 0x54b   :  { %2865 = vmatpush.msra.mxu0 %v479_v10  ;;  %2905 = vmatpush.msra.mxu1 %v513_v43  ;;  %v608_v10 = vld [vmem:[%s7724_s18 + $0x460] sm:$0xff]  ;;  %v646_v43 = vld [vmem:[%s7724_s18 + $0x590] sm:$0xff] }
 0x54c   :  { %2707 = vmatmul.f32.vlgmr.msrb.gmra.mxu0 %v6165_v44  ;;  %2664 = vmatpush.msrb.mxu3 %v502_v25  ;;  %v642_v25 = vld [vmem:[%s7724_s18 + $0x570] sm:$0xff] }
 0x54d   :  { %2866 = vmatpush.msra.mxu0 %v477_v6  ;;  %2906 = vmatpush.msra.mxu1 %v511_v32  ;;  %v644_v6 = vld [vmem:[%s7724_s18 + $0x580] sm:$0xff] }
 0x54e   :  { %2665 = vmatpush.msrb.mxu3 %v500_v28  ;;  %2774 = vmatpush.msra.mxu2 %v624_v39  ;;  %v604_v32 = vld [vmem:[%s7724_s18 + $0x440] sm:$0xff]  ;;  %v651_v28 = vld [vmem:[%s7724_s18 + $0x5b8] sm:$0xff] }
 0x54f   :  { %2867 = vmatpush.msra.mxu0 %v475_v17  ;;  %2907 = vmatpush.msra.mxu1 %v509_v57  ;;  %v617_v57 = vld [vmem:[%s7724_s18 + $0x4a8] sm:$0xff]  ;;  %v636_v39 = vld [vmem:[%s7724_s18 + $0x540] sm:$0xff] }
 0x550   :  { %2775 = vmatpush.msra.mxu2 %v622_v34  ;;  %2814 = vmatpush.msra.mxu3 %v658_v60 }
 0x551   :  { %2868 = vmatpush.msra.mxu0 %v473_v58  ;;  %2908 = vmatpush.msra.mxu1 %v507_v38  ;;  %v602_v58 = vld [vmem:[%s7724_s18 + $0x430] sm:$0xff]  ;;  %v640_v38 = vld [vmem:[%s7724_s18 + $0x560] sm:$0xff] }
 0x552   :  { %2748 = vmatmul.f32.vlgmr.msrb.gmra.mxu1 %v6167_v46  ;;  %2776 = vmatpush.msra.mxu2 %v620_v0  ;;  %v613_v0 = vld [vmem:[%s7724_s18 + $0x488] sm:$0xff] }
 0x553   :  { %2869 = vmatpush.msra.mxu0 %v471_v22  ;;  %2909 = vmatpush.msra.mxu1 %v505_v61  ;;  %v615_v22 = vld [vmem:[%s7724_s18 + $0x498] sm:$0xff] }
 0x554   :  { %2710 = vmatmul.f32.gmra.mxu0 %v6169_v49  ;;  %2777 = vmatpush.msra.mxu2 %v618_v50  ;;  %v630_v50 = vld [vmem:[%s7724_s18 + $0x510] sm:$0xff] }
 0x555   :  { %2870 = vmatpush.msra.mxu0 %v469_v45  ;;  %2910 = vmatpush.msra.mxu1 %v503_v24  ;;  %v600_v45 = vld [vmem:[%s7724_s18 + $0x420] sm:$0xff]  ;;  %v638_v24 = vld [vmem:[%s7724_s18 + $0x550] sm:$0xff] }
 0x556   :  { %2815 = vmatpush.msra.mxu3 %v656_v62  ;;  %2778 = vmatpush.msra.mxu2 %v616_v12  ;;  %v645_v62 = vld [vmem:[%s7724_s18 + $0x588] sm:$0xff] }
 0x557   :  { %2911 = vmatpush.msra.mxu1 %v501_v15  ;;  %3019 = vmatpush.msrb.mxu0 %v627_v27  ;;  %v649_v15 = vld [vmem:[%s7724_s18 + $0x5a8] sm:$0xff]  ;;  %v596_v27 = vld [vmem:[%s7724_s18 + $0x400] sm:$0xff] }
 0x558   :  { %2816 = vmatpush.msra.mxu3 %v654_v53  ;;  %2779 = vmatpush.msra.mxu2 %v614_v54  ;;  %v609_v12 = vld [vmem:[%s7724_s18 + $0x468] sm:$0xff]  ;;  %v607_v54 = vld [vmem:[%s7724_s18 + $0x458] sm:$0xff] }
 0x559   :  { %3020 = vmatpush.msrb.mxu0 %v625_v41  ;;  %3060 = vmatpush.msrb.mxu1 %v659_v23  ;;  %v632_v41 = vld [vmem:[%s7724_s18 + $0x520] sm:$0xff]  ;;  %v611_v23 = vld [vmem:[%s7724_s18 + $0x478] sm:$0xff] }
 0x55a   :  { %2751 = vmatmul.f32.gmra.mxu1 %v6171_v35  ;;  %2817 = vmatpush.msra.mxu3 %v652_v48 }
 0x55b   :  { %3021 = vmatpush.msrb.mxu0 %v623_v20  ;;  %3061 = vmatpush.msrb.mxu1 %v657_v1  ;;  %v628_v20 = vld [vmem:[%s7724_s18 + $0x500] sm:$0xff]  ;;  %v643_v1 = vld [vmem:[%s7724_s18 + $0x578] sm:$0xff] }
 0x55c   :  { %2713 = vmatmul.f32.gmra.mxu0 %v6173_v2  ;;  %2780 = vmatpush.msra.mxu2 %v612_v56  ;;  %v641_v56 = vld [vmem:[%s7724_s18 + $0x568] sm:$0xff] }
 0x55d   :  { %2818 = vmatpush.msra.mxu3 %v650_v4  ;;  %3022 = vmatpush.msrb.mxu0 %v621_v52  ;;  %v605_v4 = vld [vmem:[%s7724_s18 + $0x448] sm:$0xff]  ;;  %v639_v52 = vld [vmem:[%s7724_s18 + $0x558] sm:$0xff] }
 0x55e   :  { %2781 = vmatpush.msra.mxu2 %v610_v9  ;;  %3062 = vmatpush.msrb.mxu1 %v655_v42  ;;  %v603_v42 = vld [vmem:[%s7724_s18 + $0x438] sm:$0xff]  ;;  %v637_v9 = vld [vmem:[%s7724_s18 + $0x548] sm:$0xff] }
 0x55f   :  { %2819 = vmatpush.msra.mxu3 %v648_v33  ;;  %3023 = vmatpush.msrb.mxu0 %v619_v8  ;;  %v601_v33 = vld [vmem:[%s7724_s18 + $0x428] sm:$0xff]  ;;  %v635_v8 = vld [vmem:[%s7724_s18 + $0x538] sm:$0xff] }
 0x560   :  { %2782 = vmatpush.msra.mxu2 %v608_v10  ;;  %3063 = vmatpush.msrb.mxu1 %v653_v19  ;;  %v599_v10 = vld [vmem:[%s7724_s18 + $0x418] sm:$0xff] }
 0x561   :  { %2820 = vmatpush.msra.mxu3 %v646_v43  ;;  %3024 = vmatpush.msrb.mxu0 %v617_v57 }
 0x562   :  { %2754 = vmatmul.f32.gmra.mxu1 %v6175_v55  ;;  %2783 = vmatpush.msra.mxu2 %v606_v3  ;;  %v633_v3 = vld [vmem:[%s7724_s18 + $0x528] sm:$0xff] }
 0x563   :  { %2821 = vmatpush.msra.mxu3 %v644_v6  ;;  %3064 = vmatpush.msrb.mxu1 %v651_v28  ;;  %v597_v6 = vld [vmem:[%s7724_s18 + $0x408] sm:$0xff] }
 0x564   :  { %2716 = vmatmul.f32.gmra.mxu0 %v6177_v63  ;;  %2784 = vmatpush.msra.mxu2 %v604_v32 }
 0x565   :  { %2822 = vmatpush.msra.mxu3 %v642_v25  ;;  %3025 = vmatpush.msrb.mxu0 %v615_v22  ;;  %v631_v25 = vld [vmem:[%s7724_s18 + $0x518] sm:$0xff] }
 0x566   :  { %2785 = vmatpush.msra.mxu2 %v602_v58  ;;  %3065 = vmatpush.msrb.mxu1 %v649_v15  ;;  %v561_v15 = vld [vmem:[%s7724_s18 + $0x2e8] sm:$0xff] }
 0x567   :  { %2823 = vmatpush.msra.mxu3 %v640_v38  ;;  %3026 = vmatpush.msrb.mxu0 %v613_v0  ;;  %v591_v0 = vld [vmem:[%s7724_s18 + $0x3d8] sm:$0xff] }
 0x568   :  { %2786 = vmatpush.msra.mxu2 %v600_v45  ;;  %v563_v45 = vld [vmem:[%s7724_s18 + $0x2f8] sm:$0xff] }
 0x569   :  { %2824 = vmatpush.msra.mxu3 %v638_v24  ;;  %3027 = vmatpush.msrb.mxu0 %v611_v23  ;;  %v549_v23 = vld [vmem:[%s7724_s18 + $0x288] sm:$0xff] }
 0x56a   :  { %2757 = vmatmul.f32.gmra.mxu1 %v6179_v14  ;;  %2787 = vmatpush.msra.mxu2 %v598_v40  ;;  %v559_v40 = vld [vmem:[%s7724_s18 + $0x2d8] sm:$0xff] }
 0x56b   :  { %2825 = vmatpush.msra.mxu3 %v636_v39  ;;  %3028 = vmatpush.msrb.mxu0 %v609_v12  ;;  %v583_v12 = vld [vmem:[%s7724_s18 + $0x398] sm:$0xff] }
 0x56c   :  { %2719 = vmatmul.f32.gmra.mxu0 %v6181_v51  ;;  %2788 = vmatpush.msra.mxu2 %v596_v27  ;;  %v555_v27 = vld [vmem:[%s7724_s18 + $0x2b8] sm:$0xff] }
 0x56d   :  { %3029 = vmatpush.msrb.mxu0 %v607_v54  ;;  %v581_v54 = vld [vmem:[%s7724_s18 + $0x388] sm:$0xff] }
 0x56f   :  { %3030 = vmatpush.msrb.mxu0 %v605_v4 }
 0x571   :  { %3031 = vmatpush.msrb.mxu0 %v603_v42  ;;  %v537_v42 = vld [vmem:[%s7724_s18 + $0x228] sm:$0xff] }
 0x572   :  { %2760 = vmatmul.f32.gmra.mxu1 %v6183_v47 }
 0x573   :  { %3032 = vmatpush.msrb.mxu0 %v601_v33  ;;  %v573_v33 = vld [vmem:[%s7724_s18 + $0x348] sm:$0xff] }
 0x574   :  { %2722 = vmatmul.f32.gmra.mxu0 %v6185_v26 }
 0x575   :  { %3033 = vmatpush.msrb.mxu0 %v599_v10  ;;  %v571_v10 = vld [vmem:[%s7724_s18 + $0x338] sm:$0xff] }
 0x577   :  { %3034 = vmatpush.msrb.mxu0 %v597_v6  ;;  %v567_v6 = vld [vmem:[%s7724_s18 + $0x318] sm:$0xff] }
 0x57a   :  { %2763 = vmatmul.f32.gmra.mxu1 %v6187_v30 }
 0x57c   :  { %2725 = vmatmul.f32.gmra.mxu0 %v6189_v5 }
 0x582   :  { %2766 = vmatmul.f32.gmra.mxu1 %v6191_v11 }
 0x584   :  { %2728 = vmatmul.f32.gmra.mxu0 %v6193_v59 }
 0x589   :  { %v6619_v16 = vpop.f32.mrf.mxu0 }
 0x58a   :  { %2769 = vmatmul.f32.gmra.mxu1 %v6201_v31 }
 0x58f   :  { %v2433_v29 = vpop.f32.mrf.mxu2  ;;  %v6636_v13 = vpop.f32.mrf.mxu1 }
 0x590   :  { %2625 = vmatmul.f32.vlgmr.msrb.gmra.mxu2 %v2433_v29  ;;  %2871 = vmatmul.f32.vlgmr.msra.gmra.mxu0 %v2433_v29 }
 0x591   :  { %v6674_v61 = vpop.f32.mrf.mxu0  ;;  %2937 = vmatpush.msrb.mxu2 %v563_v45 }
 0x593   :  { %2938 = vmatpush.msrb.mxu2 %v561_v15 }
 0x595   :  { %v2474_v36 = vpop.f32.mrf.mxu3  ;;  %2939 = vmatpush.msrb.mxu2 %v559_v40  ;;  %v1018_v40 = vld [vmem:[#allocation21 + $0xf0] sm:$0xff] }
 0x596   :  { %2666 = vmatmul.f32.vlgmr.msrb.gmra.mxu3 %v2474_v36  ;;  %2912 = vmatmul.f32.vlgmr.msra.gmra.mxu1 %v2474_v36  ;;  %v634_v36 = vld [vmem:[%s7724_s18 + $0x530] sm:$0xff] }
 0x597   :  { %v2436_v18 = vpop.f32.mrf.mxu2  ;;  %v6685_v29 = vpop.f32.mrf.mxu1  ;;  %2826 = vmatpush.msra.mxu3 %v634_v36  ;;  %v593_v36 = vld [vmem:[%s7724_s18 + $0x3e8] sm:$0xff] }
 0x598   :  { %2628 = vmatmul.f32.gmra.mxu2 %v2436_v18  ;;  %2874 = vmatmul.f32.gmra.mxu0 %v2436_v18  ;;  %v647_v18 = vld [vmem:[%s7724_s18 + $0x598] sm:$0xff] }
 0x599   :  { %2827 = vmatpush.msra.mxu3 %v632_v41  ;;  %3066 = vmatpush.msrb.mxu1 %v647_v18  ;;  %v6723_v53 = vpop.f32.mrf.mxu0  ;;  %v589_v18 = vld [vmem:[%s7724_s18 + $0x3c8] sm:$0xff] }
 0x59b   :  { %2828 = vmatpush.msra.mxu3 %v630_v50  ;;  %3067 = vmatpush.msrb.mxu1 %v645_v62  ;;  %v587_v50 = vld [vmem:[%s7724_s18 + $0x3b8] sm:$0xff] }
 0x59c   :  { %v547_v62 = vld [vmem:[%s7724_s18 + $0x278] sm:$0xff] }
 0x59d   :  { %v2477_v21 = vpop.f32.mrf.mxu3  ;;  %2829 = vmatpush.msra.mxu3 %v628_v20  ;;  %3068 = vmatpush.msrb.mxu1 %v643_v1  ;;  %v585_v20 = vld [vmem:[%s7724_s18 + $0x3a8] sm:$0xff]  ;;  %v543_v1 = vld [vmem:[%s7724_s18 + $0x258] sm:$0xff] }
 0x59e   :  { %2669 = vmatmul.f32.gmra.mxu3 %v2477_v21  ;;  %2915 = vmatmul.f32.gmra.mxu1 %v2477_v21 }
 0x59f   :  { %v2439_v7 = vpop.f32.mrf.mxu2  ;;  %v6731_v48 = vpop.f32.mrf.mxu1  ;;  %3069 = vmatpush.msrb.mxu1 %v641_v56  ;;  %v579_v56 = vld [vmem:[%s7724_s18 + $0x378] sm:$0xff] }
 0x5a0   :  { %2631 = vmatmul.f32.gmra.mxu2 %v2439_v7  ;;  %2877 = vmatmul.f32.gmra.mxu0 %v2439_v7 }
 0x5a1   :  { %3070 = vmatpush.msrb.mxu1 %v639_v52  ;;  %v6757_v43 = vpop.f32.mrf.mxu0  ;;  %v577_v52 = vld [vmem:[%s7724_s18 + $0x368] sm:$0xff] }
 0x5a3   :  { %3071 = vmatpush.msrb.mxu1 %v637_v9  ;;  %v535_v9 = vld [vmem:[%s7724_s18 + $0x218] sm:$0xff] }
 0x5a5   :  { %v2480_v37 = vpop.f32.mrf.mxu3  ;;  %3072 = vmatpush.msrb.mxu1 %v635_v8  ;;  %v533_v8 = vld [vmem:[%s7724_s18 + $0x208] sm:$0xff] }
 0x5a6   :  { %2672 = vmatmul.f32.gmra.mxu3 %v2480_v37  ;;  %2918 = vmatmul.f32.gmra.mxu1 %v2480_v37 }
 0x5a7   :  { %v2442_v17 = vpop.f32.mrf.mxu2  ;;  %v6765_v37 = vpop.f32.mrf.mxu1  ;;  %3073 = vmatpush.msrb.mxu1 %v633_v3 }
 0x5a8   :  { %2634 = vmatmul.f32.gmra.mxu2 %v2442_v17  ;;  %2880 = vmatmul.f32.gmra.mxu0 %v2442_v17  ;;  %v629_v17 = vld [vmem:[%s7724_s18 + $0x508] sm:$0xff] }
 0x5a9   :  { %3074 = vmatpush.msrb.mxu1 %v631_v25  ;;  %v6773_v28 = vpop.f32.mrf.mxu0 }
 0x5ab   :  { %3075 = vmatpush.msrb.mxu1 %v629_v17 }
 0x5ad   :  { %v2483_v34 = vpop.f32.mrf.mxu3 }
 0x5ae   :  { %2675 = vmatmul.f32.gmra.mxu3 %v2483_v34  ;;  %2921 = vmatmul.f32.gmra.mxu1 %v2483_v34  ;;  %v595_v34 = vld [vmem:[%s7724_s18 + $0x3f8] sm:$0xff] }
 0x5af   :  { %v2445_v60 = vpop.f32.mrf.mxu2  ;;  %v6775_v38 = vpop.f32.mrf.mxu1  ;;  %2978 = vmatpush.msrb.mxu3 %v595_v34 }
 0x5b0   :  { %2637 = vmatmul.f32.gmra.mxu2 %v2445_v60  ;;  %2883 = vmatmul.f32.gmra.mxu0 %v2445_v60  ;;  %v551_v60 = vld [vmem:[%s7724_s18 + $0x298] sm:$0xff] }
 0x5b1   :  { %v6782_v24 = vpop.f32.mrf.mxu0  ;;  %2979 = vmatpush.msrb.mxu3 %v593_v36 }
 0x5b3   :  { %2980 = vmatpush.msrb.mxu3 %v591_v0  ;;  %v1013_v0 = vld [vmem:[#allocation21 + $0xc8] sm:$0xff] }
 0x5b5   :  { %v2486_v21 = vpop.f32.mrf.mxu3  ;;  %2981 = vmatpush.msrb.mxu3 %v589_v18  ;;  %v1008_v18 = vld [vmem:[#allocation21 + $0xa0] sm:$0xff] }
 0x5b6   :  { %2678 = vmatmul.f32.gmra.mxu3 %v2486_v21  ;;  %2924 = vmatmul.f32.gmra.mxu1 %v2486_v21  ;;  %v541_v21 = vld [vmem:[%s7724_s18 + $0x248] sm:$0xff] }
 0x5b7   :  { %v2448_v7 = vpop.f32.mrf.mxu2  ;;  %v6790_v39 = vpop.f32.mrf.mxu1  ;;  %2982 = vmatpush.msrb.mxu3 %v587_v50  ;;  %v1007_v50 = vld [vmem:[#allocation21 + $0x98] sm:$0xff] }
 0x5b8   :  { %2640 = vmatmul.f32.gmra.mxu2 %v2448_v7  ;;  %2886 = vmatmul.f32.gmra.mxu0 %v2448_v7  ;;  %v539_v7 = vld [vmem:[%s7724_s18 + $0x238] sm:$0xff] }
 0x5b9   :  { %v6820_v41 = vpop.f32.mrf.mxu0  ;;  %2983 = vmatpush.msrb.mxu3 %v585_v20 }
 0x5bb   :  { %2984 = vmatpush.msrb.mxu3 %v583_v12 }
 0x5bd   :  { %v2489_v19 = vpop.f32.mrf.mxu3  ;;  %2985 = vmatpush.msrb.mxu3 %v581_v54  ;;  %v1000_v54 = vld [vmem:[#allocation21 + $0x60] sm:$0xff] }
 0x5be   :  { %2681 = vmatmul.f32.gmra.mxu3 %v2489_v19  ;;  %2927 = vmatmul.f32.gmra.mxu1 %v2489_v19  ;;  %v569_v19 = vld [vmem:[%s7724_s18 + $0x328] sm:$0xff] }
 0x5bf   :  { %v2451_v32 = vpop.f32.mrf.mxu2  ;;  %2986 = vmatpush.msrb.mxu3 %v579_v56  ;;  %v998_v56 = vld [vmem:[#allocation21 + $0x50] sm:$0xff] }
 0x5c0   :  { %2643 = vmatmul.f32.gmra.mxu2 %v2451_v32  ;;  %2889 = vmatmul.f32.gmra.mxu0 %v2451_v32 }
 0x5c1   :  { %2987 = vmatpush.msrb.mxu3 %v577_v52  ;;  %v996_v52 = vld [vmem:[#allocation21 + $0x40] sm:$0xff] }
 0x5c5   :  { %v2492_v57 = vpop.f32.mrf.mxu3 }
 0x5c6   :  { %2684 = vmatmul.f32.gmra.mxu3 %v2492_v57  ;;  %2930 = vmatmul.f32.gmra.mxu1 %v2492_v57 }
 0x5c7   :  { %v2454_v58 = vpop.f32.mrf.mxu2 }
 0x5c8   :  { %2646 = vmatmul.f32.gmra.mxu2 %v2454_v58  ;;  %2892 = vmatmul.f32.gmra.mxu0 %v2454_v58 }
 0x5cd   :  { %v2495_v22 = vpop.f32.mrf.mxu3 }
 0x5ce   :  { %2687 = vmatmul.f32.gmra.mxu3 %v2495_v22  ;;  %2933 = vmatmul.f32.gmra.mxu1 %v2495_v22 }
 0x5d0   :  { %2789 = vmatmul.f32.vlgmr.msra.gmra.mxu2 %v6619_v16  ;;  %3035 = vmatmul.f32.vlgmr.msrb.gmra.mxu0 %v6619_v16  ;;  %v557_v16 = vld [vmem:[%s7724_s18 + $0x2c8] sm:$0xff] }
 0x5d1   :  { %2940 = vmatpush.msrb.mxu2 %v557_v16 }
 0x5d3   :  { %2941 = vmatpush.msrb.mxu2 %v555_v27  ;;  %v1015_v27 = vld [vmem:[#allocation21 + $0xd8] sm:$0xff] }
 0x5d6   :  { %2830 = vmatmul.f32.vlgmr.msra.gmra.mxu3 %v6636_v13  ;;  %3076 = vmatmul.f32.vlgmr.msrb.gmra.mxu1 %v6636_v13  ;;  %v553_v13 = vld [vmem:[%s7724_s18 + $0x2a8] sm:$0xff] }
 0x5d7   :  { %2942 = vmatpush.msrb.mxu2 %v553_v13 }
 0x5d8   :  { %2792 = vmatmul.f32.gmra.mxu2 %v6674_v61  ;;  %3038 = vmatmul.f32.gmra.mxu0 %v6674_v61  ;;  %v6822_v61 = vpop.f32.mrf.mxu1 }
 0x5d9   :  { %2943 = vmatpush.msrb.mxu2 %v551_v60  ;;  %v1011_v60 = vld [vmem:[#allocation21 + $0xb8] sm:$0xff] }
 0x5db   :  { %2944 = vmatpush.msrb.mxu2 %v549_v23  ;;  %v1006_v23 = vld [vmem:[#allocation21 + $0x90] sm:$0xff] }
 0x5dd   :  { %2945 = vmatpush.msrb.mxu2 %v547_v62 }
 0x5de   :  { %2833 = vmatmul.f32.gmra.mxu3 %v6685_v29  ;;  %3079 = vmatmul.f32.gmra.mxu1 %v6685_v29  ;;  %v545_v29 = vld [vmem:[%s7724_s18 + $0x268] sm:$0xff] }
 0x5df   :  { %2946 = vmatpush.msrb.mxu2 %v545_v29  ;;  %v1005_v29 = vld [vmem:[#allocation21 + $0x88] sm:$0xff] }
 0x5e0   :  { %2795 = vmatmul.f32.gmra.mxu2 %v6723_v53  ;;  %3041 = vmatmul.f32.gmra.mxu0 %v6723_v53  ;;  %v2560_v53 = vpop.f32.mrf.mxu0  ;;  %v2601_v4 = vpop.f32.mrf.mxu1 }
 0x5e1   :  { %2947 = vmatpush.msrb.mxu2 %v543_v1  ;;  %v1003_v1 = vld [vmem:[#allocation21 + $0x78] sm:$0xff] }
 0x5e3   :  { %2948 = vmatpush.msrb.mxu2 %v541_v21 }
 0x5e5   :  { %2949 = vmatpush.msrb.mxu2 %v539_v7 }
 0x5e6   :  { %2836 = vmatmul.f32.gmra.mxu3 %v6731_v48  ;;  %3082 = vmatmul.f32.gmra.mxu1 %v6731_v48  ;;  %v575_v48 = vld [vmem:[%s7724_s18 + $0x358] sm:$0xff] }
 0x5e7   :  { %2950 = vmatpush.msrb.mxu2 %v537_v42  ;;  %2988 = vmatpush.msrb.mxu3 %v575_v48  ;;  %v994_v42 = vld [vmem:[#allocation21 + $0x30] sm:$0xff] }
 0x5e8   :  { %2798 = vmatmul.f32.gmra.mxu2 %v6757_v43  ;;  %3044 = vmatmul.f32.gmra.mxu0 %v6757_v43  ;;  %v6888_v43 = vpop.f32.mrf.mxu0  ;;  %v6895_v3 = vpop.f32.mrf.mxu1 }
 0x5e9   :  { %2951 = vmatpush.msrb.mxu2 %v535_v9  ;;  %2989 = vmatpush.msrb.mxu3 %v573_v33  ;;  %v992_v33 = vld [vmem:[#allocation21 + $0x20] sm:$0xff] }
 0x5eb   :  { %2952 = vmatpush.msrb.mxu2 %v533_v8  ;;  %2990 = vmatpush.msrb.mxu3 %v571_v10  ;;  %v993_v8 = vld [vmem:[#allocation21 + $0x28] sm:$0xff] }
 0x5ed   :  { %2991 = vmatpush.msrb.mxu3 %v569_v19  ;;  %3117 = vmatpush.msra.mxu2 %v1018_v40  ;;  %v990_v19 = vld [vmem:[#allocation21 + $0x10] sm:$0xff]  ;;  %v988_v40 = vld [vmem:[#allocation21] sm:$0xff] }
 0x5ee   :  { %2839 = vmatmul.f32.gmra.mxu3 %v6765_v37  ;;  %3085 = vmatmul.f32.gmra.mxu1 %v6765_v37  ;;  %v565_v37 = vld [vmem:[%s7724_s18 + $0x308] sm:$0xff] }
 0x5ef   :  { %2992 = vmatpush.msrb.mxu3 %v567_v6  ;;  %v991_v6 = vld [vmem:[#allocation21 + $0x18] sm:$0xff] }
 0x5f0   :  { %2801 = vmatmul.f32.gmra.mxu2 %v6773_v28  ;;  %3047 = vmatmul.f32.gmra.mxu0 %v6773_v28  ;;  %v6907_v32 = vpop.f32.mrf.mxu0  ;;  %v6909_v25 = vpop.f32.mrf.mxu1 }
 0x5f1   :  { %2993 = vmatpush.msrb.mxu3 %v565_v37 }
 0x5f6   :  { %2842 = vmatmul.f32.gmra.mxu3 %v6775_v38  ;;  %3088 = vmatmul.f32.gmra.mxu1 %v6775_v38 }
 0x5f8   :  { %2804 = vmatmul.f32.gmra.mxu2 %v6782_v24  ;;  %3050 = vmatmul.f32.gmra.mxu0 %v6782_v24  ;;  %v6915_v17 = vpop.f32.mrf.mxu0  ;;  %v6917_v57 = vpop.f32.mrf.mxu1 }
 0x5fe   :  { %2845 = vmatmul.f32.gmra.mxu3 %v6790_v39  ;;  %3091 = vmatmul.f32.gmra.mxu1 %v6790_v39  ;;  %v1019_v39 = vld [vmem:[#allocation21 + $0xf8] sm:$0xff] }
 0x5ff   :  { %3199 = vmatpush.msra.mxu0 %v1019_v39 }
 0x600   :  { %2807 = vmatmul.f32.gmra.mxu2 %v6820_v41  ;;  %3053 = vmatmul.f32.gmra.mxu0 %v6820_v41  ;;  %v6921_v28 = vpop.f32.mrf.mxu0  ;;  %v6923_v58 = vpop.f32.mrf.mxu1  ;;  %v1009_v41 = vld [vmem:[#allocation21 + $0xa8] sm:$0xff] }
 0x606   :  { %2848 = vmatmul.f32.gmra.mxu3 %v6822_v61  ;;  %3094 = vmatmul.f32.gmra.mxu1 %v6822_v61 }
 0x608   :  { %2810 = vmatmul.f32.gmra.mxu2 %v2560_v53  ;;  %3056 = vmatmul.f32.gmra.mxu0 %v2560_v53  ;;  %v6929_v22 = vpop.f32.mrf.mxu0  ;;  %v6932_v45 = vpop.f32.mrf.mxu1  ;;  %v1001_v53 = vld [vmem:[#allocation21 + $0x68] sm:$0xff] }
 0x60e   :  { %2851 = vmatmul.f32.gmra.mxu3 %v2601_v4  ;;  %3097 = vmatmul.f32.gmra.mxu1 %v2601_v4  ;;  %v999_v4 = vld [vmem:[#allocation21 + $0x58] sm:$0xff] }
 0x610   :  { %2953 = vmatmul.f32.vlgmr.msrb.gmra.mxu2 %v6165_v44  ;;  %v1016_v44 = vld [vmem:[#allocation21 + $0xe0] sm:$0xff]  ;;  %v6940_v16 = vpop.f32.mrf.mxu0  ;;  %v6944_v36 = vpop.f32.mrf.mxu1 }
 0x611   :  { %3118 = vmatpush.msra.mxu2 %v1016_v44 }
 0x613   :  { %v6926_v38 = vpop.f32.mrf.mxu2 }
 0x616   :  { %2994 = vmatmul.f32.vlgmr.msrb.gmra.mxu3 %v6167_v46  ;;  %v1017_v46 = vld [vmem:[#allocation21 + $0xe8] sm:$0xff] }
 0x617   :  { %3200 = vmatpush.msra.mxu0 %v1017_v46 }
 0x618   :  { %2956 = vmatmul.f32.gmra.mxu2 %v6169_v49  ;;  %v1014_v49 = vld [vmem:[#allocation21 + $0xd0] sm:$0xff]  ;;  %v6952_v62 = vpop.f32.mrf.mxu0  ;;  %v6956_v12 = vpop.f32.mrf.mxu1 }
 0x619   :  { %v6934_v24 = vpop.f32.mrf.mxu3  ;;  %3119 = vmatpush.msra.mxu2 %v1014_v49  ;;  %3201 = vmatpush.msra.mxu0 %v1015_v27  ;;  %v6987_v49 = vld [vmem:[%s7725_s25] sm:$0x3] }
 0x61a   :  { %v6990_v27 = vperm.slane %v6987_v49, 0 }
 0x61b   :  { %v6936_v15 = vpop.f32.mrf.mxu2  ;;  %3202 = vmatpush.msra.mxu0 %v1013_v0 }
 0x61c   :  { %v2627_v0 = vadd.f32 %v6926_v38, %v6990_v27 }
 0x61d   :  { %3203 = vmatpush.msra.mxu0 %v1011_v60 }
 0x61e   :  { %2997 = vmatmul.f32.gmra.mxu3 %v6171_v35  ;;  %v1012_v35 = vld [vmem:[#allocation21 + $0xc0] sm:$0xff]  ;;  %v2668_v60 = vadd.f32 %v6934_v24, %v2627_v0 }
 0x61f   :  { %3120 = vmatpush.msra.mxu2 %v1012_v35  ;;  %3204 = vmatpush.msra.mxu0 %v1009_v41  ;;  %v1044_v0 = vld [vmem:[#allocation21 + $0x1c0] sm:$0xff] }
 0x620   :  { %2959 = vmatmul.f32.gmra.mxu2 %v6173_v2  ;;  %v1010_v2 = vld [vmem:[#allocation21 + $0xb0] sm:$0xff]  ;;  %v6964_v48 = vpop.f32.mrf.mxu0  ;;  %v6967_v9 = vpop.f32.mrf.mxu1  ;;  %v2709_v41 = vadd.f32 %v6888_v43, %v2668_v60  ;;  %v1045_v60 = vld [vmem:[#allocation21 + $0x1c8] sm:$0xff] }
 0x621   :  { %v6942_v34 = vpop.f32.mrf.mxu3  ;;  %3121 = vmatpush.msra.mxu2 %v1010_v2  ;;  %3205 = vmatpush.msra.mxu0 %v1007_v50 }
 0x623   :  { %v6946_v13 = vpop.f32.mrf.mxu2  ;;  %3122 = vmatpush.msra.mxu2 %v1008_v18  ;;  %3206 = vmatpush.msra.mxu0 %v1005_v29 }
 0x625   :  { %3123 = vmatpush.msra.mxu2 %v1006_v23  ;;  %3207 = vmatpush.msra.mxu0 %v1003_v1 }
 0x626   :  { %3000 = vmatmul.f32.gmra.mxu3 %v6175_v55  ;;  %v1004_v55 = vld [vmem:[#allocation21 + $0x80] sm:$0xff] }
 0x627   :  { %3124 = vmatpush.msra.mxu2 %v1004_v55  ;;  %3208 = vmatpush.msra.mxu0 %v1001_v53  ;;  %v2750_v55 = vadd.f32 %v6895_v3, %v2709_v41 }
 0x628   :  { %2962 = vmatmul.f32.gmra.mxu2 %v6177_v63  ;;  %v1002_v63 = vld [vmem:[#allocation21 + $0x70] sm:$0xff]  ;;  %v6974_v39 = vpop.f32.mrf.mxu0 }
 0x629   :  { %v6950_v61 = vpop.f32.mrf.mxu3  ;;  %3125 = vmatpush.msra.mxu2 %v1002_v63  ;;  %3209 = vmatpush.msra.mxu0 %v999_v4  ;;  %v2633_v63 = vadd.f32 %v6946_v13, %v6990_v27 }
 0x62b   :  { %v6954_v20 = vpop.f32.mrf.mxu2  ;;  %3126 = vmatpush.msra.mxu2 %v1000_v54 }
 0x62c   :  { %v2636_v4 = vadd.f32 %v6954_v20, %v6990_v27  ;;  %v1046_v20 = vld [vmem:[#allocation21 + $0x1d0] sm:$0xff] }
 0x62d   :  { %3127 = vmatpush.msra.mxu2 %v998_v56  ;;  %v2674_v56 = vadd.f32 %v6950_v61, %v2633_v63 }
 0x62e   :  { %3003 = vmatmul.f32.gmra.mxu3 %v6179_v14  ;;  %v997_v14 = vld [vmem:[#allocation21 + $0x48] sm:$0xff] }
 0x62f   :  { %3128 = vmatpush.msra.mxu2 %v996_v52  ;;  %3210 = vmatpush.msra.mxu0 %v997_v14  ;;  %v2715_v13 = vadd.f32 %v6915_v17, %v2674_v56  ;;  %v1050_v14 = vld [vmem:[#allocation21 + $0x1f0] sm:$0xff] }
 0x630   :  { %2965 = vmatmul.f32.gmra.mxu2 %v6181_v51  ;;  %v995_v51 = vld [vmem:[#allocation21 + $0x38] sm:$0xff]  ;;  %v6993_v35 = vpop.f32.mrf.mxu0  ;;  %3158 = vmatpush.msra.mxu3 %v1050_v14 }
 0x631   :  { %v6960_v21 = vpop.f32.mrf.mxu3  ;;  %3129 = vmatpush.msra.mxu2 %v994_v42  ;;  %3211 = vmatpush.msra.mxu0 %v995_v51  ;;  %v1051_v42 = vld [vmem:[#allocation21 + $0x1f8] sm:$0xff]  ;;  %v2756_v17 = vadd.f32 %v6917_v57, %v2715_v13 }
 0x632   :  { %3240 = vmatpush.msra.mxu1 %v1051_v42  ;;  %v1035_v14 = vld [vmem:[#allocation21 + $0x178] sm:$0xff] }
 0x633   :  { %v6962_v7 = vpop.f32.mrf.mxu2  ;;  %3130 = vmatpush.msra.mxu2 %v992_v33  ;;  %3212 = vmatpush.msra.mxu0 %v993_v8  ;;  %v1049_v33 = vld [vmem:[#allocation21 + $0x1e8] sm:$0xff] }
 0x634   :  { %3241 = vmatpush.msra.mxu1 %v1049_v33  ;;  %v2639_v57 = vadd.f32 %v6962_v7, %v6990_v27  ;;  %v1039_v7 = vld [vmem:[#allocation21 + $0x198] sm:$0xff]  ;;  %v1033_v33 = vld [vmem:[#allocation21 + $0x168] sm:$0xff] }
 0x635   :  { %3131 = vmatpush.msra.mxu2 %v990_v19  ;;  %3213 = vmatpush.msra.mxu0 %v991_v6  ;;  %v2677_v19 = vadd.f32 %v6960_v21, %v2636_v4  ;;  %v1047_v6 = vld [vmem:[#allocation21 + $0x1d8] sm:$0xff] }
 0x636   :  { %3006 = vmatmul.f32.gmra.mxu3 %v6183_v47  ;;  %v989_v47 = vld [vmem:[#allocation21 + $0x8] sm:$0xff]  ;;  %3242 = vmatpush.msra.mxu1 %v1047_v6  ;;  %v1028_v6 = vld [vmem:[#allocation21 + $0x140] sm:$0xff] }
 0x637   :  { %3132 = vmatpush.msra.mxu2 %v988_v40  ;;  %3214 = vmatpush.msra.mxu0 %v989_v47  ;;  %v2718_v21 = vadd.f32 %v6921_v28, %v2677_v19  ;;  %v1038_v28 = vld [vmem:[#allocation21 + $0x190] sm:$0xff] }
 0x638   :  { %2968 = vmatmul.f32.gmra.mxu2 %v6185_v26  ;;  %v6977_v26 = vpop.f32.mrf.mxu1  ;;  %3243 = vmatpush.msra.mxu1 %v1045_v60 }
 0x639   :  { %v6970_v10 = vpop.f32.mrf.mxu3 }
 0x63a   :  { %v2680_v63 = vadd.f32 %v6970_v10, %v2639_v57  ;;  %v1027_v57 = vld [vmem:[#allocation21 + $0x138] sm:$0xff] }
 0x63b   :  { %v6972_v37 = vpop.f32.mrf.mxu2 }
 0x63c   :  { %v2642_v10 = vadd.f32 %v6972_v37, %v6990_v27  ;;  %v1031_v37 = vld [vmem:[#allocation21 + $0x158] sm:$0xff] }
 0x63e   :  { %3009 = vmatmul.f32.gmra.mxu3 %v6187_v30 }
 0x640   :  { %2971 = vmatmul.f32.gmra.mxu2 %v6189_v5  ;;  %v6998_v5 = vpop.f32.mrf.mxu1 }
 0x641   :  { %v6980_v44 = vpop.f32.mrf.mxu3 }
 0x642   :  { %v2683_v19 = vadd.f32 %v6980_v44, %v2642_v10 }
 0x643   :  { %v6982_v46 = vpop.f32.mrf.mxu2 }
 0x644   :  { %v2724_v44 = vadd.f32 %v6940_v16, %v2683_v19  ;;  %v7095_v19 = vperm.slane %v6987_v49, 1 }
 0x646   :  { %3012 = vmatmul.f32.gmra.mxu3 %v6191_v11  ;;  %v7008_v11 = vpop.f32.mrf.mxu0  ;;  %v2765_v16 = vadd.f32 %v6944_v36, %v2724_v44 }
 0x648   :  { %2974 = vmatmul.f32.gmra.mxu2 %v6193_v59  ;;  %v2630_v59 = vadd.f32 %v6936_v15, %v6990_v27  ;;  %v7013_v50 = vpop.f32.mrf.mxu1 }
 0x649   :  { %v6996_v30 = vpop.f32.mrf.mxu3 }
 0x64a   :  { %v2671_v38 = vadd.f32 %v6942_v34, %v2630_v59 }
 0x64b   :  { %v7002_v2 = vpop.f32.mrf.mxu2 }
 0x64e   :  { %3015 = vmatmul.f32.gmra.mxu3 %v6201_v31  ;;  %v2712_v31 = vadd.f32 %v6907_v32, %v2671_v38  ;;  %v7020_v54 = vpop.f32.mrf.mxu0  ;;  %v1043_v38 = vld [vmem:[#allocation21 + $0x1b8] sm:$0xff] }
 0x64f   :  { %3244 = vmatpush.msra.mxu1 %v1043_v38 }
 0x650   :  { %v7024_v15 = vpop.f32.mrf.mxu1  ;;  %v2753_v34 = vadd.f32 %v6909_v25, %v2712_v31  ;;  %v1048_v25 = vld [vmem:[#allocation21 + $0x1e0] sm:$0xff]  ;;  %v1041_v31 = vld [vmem:[#allocation21 + $0x1a8] sm:$0xff] }
 0x651   :  { %v7006_v18 = vpop.f32.mrf.mxu3  ;;  %3159 = vmatpush.msra.mxu3 %v1048_v25  ;;  %3245 = vmatpush.msra.mxu1 %v1041_v31  ;;  %v1032_v25 = vld [vmem:[#allocation21 + $0x160] sm:$0xff] }
 0x653   :  { %v2790_v23 = vpop.f32.mrf.mxu2  ;;  %3160 = vmatpush.msra.mxu3 %v1046_v20  ;;  %3246 = vmatpush.msra.mxu1 %v1039_v7  ;;  %v1021_v7 = vld [vmem:[#allocation21 + $0x108] sm:$0xff] }
 0x654   :  { %v2791_v29 = vadd.f32 %v2790_v23, %v2750_v55  ;;  %v1042_v23 = vld [vmem:[#allocation21 + $0x1b0] sm:$0xff] }
 0x655   :  { %3161 = vmatpush.msra.mxu3 %v1044_v0 }
 0x656   :  { %v7035_v8 = vpop.f32.mrf.mxu0 }
 0x657   :  { %3162 = vmatpush.msra.mxu3 %v1042_v23 }
 0x658   :  { %v7041_v40 = vpop.f32.mrf.mxu1 }
 0x659   :  { %v2831_v24 = vpop.f32.mrf.mxu3 }
 0x65a   :  { %v2832_v1 = vadd.f32 %v2831_v24, %v2791_v29  ;;  %v1040_v24 = vld [vmem:[#allocation21 + $0x1a0] sm:$0xff] }
 0x65b   :  { %v2793_v43 = vpop.f32.mrf.mxu2  ;;  %3163 = vmatpush.msra.mxu3 %v1040_v24  ;;  %v1025_v24 = vld [vmem:[#allocation21 + $0x128] sm:$0xff] }
 0x65c   :  { %v7022_v53 = vmax.f32 %v2832_v1, 0.0  ;;  %v2794_v3 = vadd.f32 %v2793_v43, %v2753_v34  ;;  %v2759_v1 = vadd.f32 %v6923_v58, %v2718_v21  ;;  %v1036_v34 = vld [vmem:[#allocation21 + $0x180] sm:$0xff]  ;;  %v2721_v58 = vadd.f32 %v6929_v22, %v2680_v63  ;;  %v1030_v22 = vld [vmem:[#allocation21 + $0x150] sm:$0xff]  ;;  %v1023_v63 = vld [vmem:[#allocation21 + $0x118] sm:$0xff] }
 0x65d   :  { %3164 = vmatpush.msra.mxu3 %v1038_v28  ;;  %v1026_v21 = vld [vmem:[#allocation21 + $0x130] sm:$0xff]  ;;  %v1020_v28 = vld [vmem:[#allocation21 + $0x100] sm:$0xff] }
 0x65e   :  { %3133 = vmatmul.f32.vlgmr.msra.gmra.mxu2 %v7022_v53  ;;  %3215 = vmatmul.f32.vlgmr.msra.gmra.mxu0 %v7022_v53  ;;  %v7052_v43 = vpop.f32.mrf.mxu0 }
 0x65f   :  { %3165 = vmatpush.msra.mxu3 %v1036_v34 }
 0x661   :  { %v2834_v32 = vpop.f32.mrf.mxu3 }
 0x662   :  { %v2835_v52 = vadd.f32 %v2834_v32, %v2794_v3  ;;  %v1037_v3 = vld [vmem:[#allocation21 + $0x188] sm:$0xff]  ;;  %v7054_v32 = vpop.f32.mrf.mxu1 }
 0x663   :  { %v2796_v51 = vpop.f32.mrf.mxu2  ;;  %3247 = vmatpush.msra.mxu1 %v1037_v3 }
 0x664   :  { %v7033_v61 = vmax.f32 %v2835_v52, 0.0  ;;  %v2797_v47 = vadd.f32 %v2796_v51, %v2756_v17  ;;  %v1034_v52 = vld [vmem:[#allocation21 + $0x170] sm:$0xff]  ;;  %v2762_v17 = vadd.f32 %v6932_v45, %v2721_v58  ;;  %v2645_v45 = vadd.f32 %v6982_v46, %v6990_v27 }
 0x665   :  { %3166 = vmatpush.msra.mxu3 %v1034_v52  ;;  %3248 = vmatpush.msra.mxu1 %v1035_v14  ;;  %v1022_v46 = vld [vmem:[#allocation21 + $0x110] sm:$0xff] }
 0x666   :  { %3136 = vmatmul.f32.gmra.mxu2 %v7033_v61  ;;  %3218 = vmatmul.f32.gmra.mxu0 %v7033_v61  ;;  %v7065_v0 = vpop.f32.mrf.mxu0  ;;  %v2686_v31 = vadd.f32 %v6996_v30, %v2645_v45  ;;  %v2648_v30 = vadd.f32 %v7002_v2, %v6990_v27  ;;  %v2876_v45 = vadd.f32 %v6993_v35, %v7095_v19 }
 0x667   :  { %3167 = vmatpush.msra.mxu3 %v1032_v25  ;;  %3249 = vmatpush.msra.mxu1 %v1033_v33 }
 0x668   :  { %v2727_v34 = vadd.f32 %v6952_v62, %v2686_v31 }
 0x669   :  { %v2837_v41 = vpop.f32.mrf.mxu3  ;;  %3168 = vmatpush.msra.mxu3 %v1030_v22  ;;  %3250 = vmatpush.msra.mxu1 %v1031_v37 }
 0x66a   :  { %v2838_v59 = vadd.f32 %v2837_v41, %v2797_v47  ;;  %v1029_v47 = vld [vmem:[#allocation21 + $0x148] sm:$0xff]  ;;  %v2768_v52 = vadd.f32 %v6956_v12, %v2727_v34 }
 0x66b   :  { %v2799_v55 = vpop.f32.mrf.mxu2  ;;  %3169 = vmatpush.msra.mxu3 %v1028_v6  ;;  %3251 = vmatpush.msra.mxu1 %v1029_v47 }
 0x66c   :  { %v7046_v29 = vmax.f32 %v2838_v59, 0.0  ;;  %v2800_v56 = vadd.f32 %v2799_v55, %v2759_v1  ;;  %v7070_v59 = vpop.f32.mrf.mxu1  ;;  %v1024_v55 = vld [vmem:[#allocation21 + $0x120] sm:$0xff] }
 0x66d   :  { %3170 = vmatpush.msra.mxu3 %v1026_v21  ;;  %3252 = vmatpush.msra.mxu1 %v1027_v57  ;;  %v2917_v57 = vadd.f32 %v6998_v5, %v2876_v45 }
 0x66e   :  { %3139 = vmatmul.f32.gmra.mxu2 %v7046_v29  ;;  %3221 = vmatmul.f32.gmra.mxu0 %v7046_v29  ;;  %v7081_v3 = vpop.f32.mrf.mxu0 }
 0x66f   :  { %3171 = vmatpush.msra.mxu3 %v1024_v55  ;;  %3253 = vmatpush.msra.mxu1 %v1025_v24 }
 0x671   :  { %v2840_v13 = vpop.f32.mrf.mxu3  ;;  %3172 = vmatpush.msra.mxu3 %v1022_v46  ;;  %3254 = vmatpush.msra.mxu1 %v1023_v63 }
 0x672   :  { %v2841_v4 = vadd.f32 %v2840_v13, %v2800_v56 }
 0x673   :  { %v2802_v42 = vpop.f32.mrf.mxu2  ;;  %3173 = vmatpush.msra.mxu3 %v1020_v28  ;;  %3255 = vmatpush.msra.mxu1 %v1021_v7 }
 0x674   :  { %v7059_v51 = vmax.f32 %v2841_v4, 0.0  ;;  %v2803_v20 = vadd.f32 %v2802_v42, %v2762_v17  ;;  %v7085_v10 = vpop.f32.mrf.mxu1  ;;  %v2689_v4 = vadd.f32 %v7006_v18, %v2648_v30  ;;  %v2882_v30 = vadd.f32 %v7020_v54, %v7095_v19 }
 0x676   :  { %3142 = vmatmul.f32.gmra.mxu2 %v7059_v51  ;;  %3224 = vmatmul.f32.gmra.mxu0 %v7059_v51  ;;  %v2730_v27 = vadd.f32 %v6964_v48, %v2689_v4  ;;  %v3036_v33 = vpop.f32.mrf.mxu0  ;;  %v2873_v48 = vadd.f32 %v6974_v39, %v7095_v19 }
 0x678   :  { %v2771_v18 = vadd.f32 %v6967_v9, %v2730_v27  ;;  %v2914_v47 = vadd.f32 %v6977_v26, %v2873_v48 }
 0x679   :  { %v2843_v60 = vpop.f32.mrf.mxu3 }
 0x67a   :  { %v2844_v41 = vadd.f32 %v2843_v60, %v2803_v20 }
 0x67b   :  { %v2805_v23 = vpop.f32.mrf.mxu2 }
 0x67c   :  { %v7072_v38 = vmax.f32 %v2844_v41, 0.0  ;;  %v2806_v1 = vadd.f32 %v2805_v23, %v2765_v16  ;;  %v3077_v12 = vpop.f32.mrf.mxu1  ;;  %v2879_v16 = vadd.f32 %v7008_v11, %v7095_v19 }
 0x67e   :  { %3145 = vmatmul.f32.gmra.mxu2 %v7072_v38  ;;  %3227 = vmatmul.f32.gmra.mxu0 %v7072_v38  ;;  %v3039_v9 = vpop.f32.mrf.mxu0  ;;  %v2920_v28 = vadd.f32 %v7013_v50, %v2879_v16 }
 0x681   :  { %v2846_v56 = vpop.f32.mrf.mxu3 }
 0x682   :  { %v2847_v36 = vadd.f32 %v2846_v56, %v2806_v1 }
 0x683   :  { %v2808_v13 = vpop.f32.mrf.mxu2 }
 0x684   :  { %v7083_v58 = vmax.f32 %v2847_v36, 0.0  ;;  %v2809_v62 = vadd.f32 %v2808_v13, %v2768_v52  ;;  %v3080_v60 = vpop.f32.mrf.mxu1 }
 0x686   :  { %3148 = vmatmul.f32.gmra.mxu2 %v7083_v58  ;;  %3230 = vmatmul.f32.gmra.mxu0 %v7083_v58  ;;  %v3042_v24 = vpop.f32.mrf.mxu0 }
 0x689   :  { %v2849_v14 = vpop.f32.mrf.mxu3 }
 0x68a   :  { %v2850_v2 = vadd.f32 %v2849_v14, %v2809_v62  ;;  %v2923_v62 = vadd.f32 %v7024_v15, %v2882_v30 }
 0x68b   :  { %v2811_v42 = vpop.f32.mrf.mxu2 }
 0x68c   :  { %v7092_v25 = vmax.f32 %v2850_v2, 0.0  ;;  %v2812_v17 = vadd.f32 %v2811_v42, %v2771_v18  ;;  %v3083_v35 = vpop.f32.mrf.mxu1  ;;  %v2885_v42 = vadd.f32 %v7035_v8, %v7095_v19 }
 0x68e   :  { %3151 = vmatmul.f32.gmra.mxu2 %v7092_v25  ;;  %3233 = vmatmul.f32.gmra.mxu0 %v7092_v25  ;;  %v3045_v11 = vpop.f32.mrf.mxu0 }
 0x691   :  { %v2852_v22 = vpop.f32.mrf.mxu3 }
 0x692   :  { %v2853_v37 = vadd.f32 %v2852_v22, %v2812_v17  ;;  %v2926_v17 = vadd.f32 %v7041_v40, %v2885_v42 }
 0x693   :  { %v2954_v20 = vpop.f32.mrf.mxu2 }
 0x694   :  { %v7102_v6 = vmax.f32 %v2853_v37, 0.0  ;;  %v2955_v49 = vadd.f32 %v2954_v20, %v2914_v47  ;;  %v3086_v52 = vpop.f32.mrf.mxu1  ;;  %v2888_v47 = vadd.f32 %v7052_v43, %v7095_v19 }
 0x696   :  { %3154 = vmatmul.f32.gmra.mxu2 %v7102_v6  ;;  %3236 = vmatmul.f32.gmra.mxu0 %v7102_v6 }
 0x699   :  { %v2995_v44 = vpop.f32.mrf.mxu3 }
 0x69a   :  { %v2996_v41 = vadd.f32 %v2995_v44, %v2955_v49 }
 0x69b   :  { %v2957_v21 = vpop.f32.mrf.mxu2 }
 0x69c   :  { %v3037_v39 = vadd.f32 %v3036_v33, %v2996_v41  ;;  %v2958_v26 = vadd.f32 %v2957_v21, %v2917_v57  ;;  %v3089_v15 = vpop.f32.mrf.mxu1  ;;  %v2891_v57 = vadd.f32 %v7065_v0, %v7095_v19 }
 0x69e   :  { %v3078_v23 = vadd.f32 %v3077_v12, %v3037_v39  ;;  %v3048_v12 = vpop.f32.mrf.mxu0 }
 0x6a0   :  { %v7110_v55 = vmax.f32 %v3078_v23, 0.0 }
 0x6a1   :  { %v2998_v31 = vpop.f32.mrf.mxu3 }
 0x6a2   :  { %v2999_v46 = vadd.f32 %v2998_v31, %v2958_v26  ;;  %3174 = vmatmul.f32.vlgmr.msra.gmra.mxu3 %v7110_v55  ;;  %3256 = vmatmul.f32.vlgmr.msra.gmra.mxu1 %v7110_v55 }
 0x6a3   :  { %v2960_v63 = vpop.f32.mrf.mxu2 }
 0x6a4   :  { %v3040_v1 = vadd.f32 %v3039_v9, %v2999_v46  ;;  %v2961_v7 = vadd.f32 %v2960_v63, %v2920_v28  ;;  %v3092_v21 = vpop.f32.mrf.mxu1  ;;  %v2894_v63 = vadd.f32 %v7081_v3, %v7095_v19 }
 0x6a6   :  { %v3081_v5 = vadd.f32 %v3080_v60, %v3040_v1  ;;  %v2929_v60 = vadd.f32 %v7054_v32, %v2888_v47  ;;  %v3051_v40 = vpop.f32.mrf.mxu0 }
 0x6a8   :  { %v7117_v56 = vmax.f32 %v3081_v5, 0.0 }
 0x6a9   :  { %v3001_v34 = vpop.f32.mrf.mxu3 }
 0x6aa   :  { %v3002_v36 = vadd.f32 %v3001_v34, %v2961_v7  ;;  %3177 = vmatmul.f32.gmra.mxu3 %v7117_v56  ;;  %3259 = vmatmul.f32.gmra.mxu1 %v7117_v56  ;;  %v2935_v7 = vadd.f32 %v7085_v10, %v2894_v63 }
 0x6ab   :  { %v2963_v13 = vpop.f32.mrf.mxu2 }
 0x6ac   :  { %v3043_v4 = vadd.f32 %v3042_v24, %v3002_v36  ;;  %v2964_v14 = vadd.f32 %v2963_v13, %v2923_v62  ;;  %v2932_v24 = vadd.f32 %v7070_v59, %v2891_v57  ;;  %v3095_v0 = vpop.f32.mrf.mxu1 }
 0x6ae   :  { %v3084_v50 = vadd.f32 %v3083_v35, %v3043_v4  ;;  %v3054_v46 = vpop.f32.mrf.mxu0 }
 0x6b0   :  { %v7124_v27 = vmax.f32 %v3084_v50, 0.0 }
 0x6b1   :  { %v3004_v2 = vpop.f32.mrf.mxu3 }
 0x6b2   :  { %v3005_v54 = vadd.f32 %v3004_v2, %v2964_v14  ;;  %3180 = vmatmul.f32.gmra.mxu3 %v7124_v27  ;;  %3262 = vmatmul.f32.gmra.mxu1 %v7124_v27 }
 0x6b3   :  { %v2966_v33 = vpop.f32.mrf.mxu2 }
 0x6b4   :  { %v3046_v18 = vadd.f32 %v3045_v11, %v3005_v54  ;;  %v2967_v48 = vadd.f32 %v2966_v33, %v2926_v17  ;;  %v3098_v3 = vpop.f32.mrf.mxu1 }
 0x6b6   :  { %v3087_v22 = vadd.f32 %v3086_v52, %v3046_v18  ;;  %v3057_v13 = vpop.f32.mrf.mxu0 }
 0x6b8   :  { %v7131_v37 = vmax.f32 %v3087_v22, 0.0 }
 0x6b9   :  { %v3007_v20 = vpop.f32.mrf.mxu3 }
 0x6ba   :  { %v3008_v8 = vadd.f32 %v3007_v20, %v2967_v48  ;;  %3183 = vmatmul.f32.gmra.mxu3 %v7131_v37  ;;  %3265 = vmatmul.f32.gmra.mxu1 %v7131_v37 }
 0x6bb   :  { %v2969_v9 = vpop.f32.mrf.mxu2 }
 0x6bc   :  { %v3049_v49 = vadd.f32 %v3048_v12, %v3008_v8  ;;  %v2970_v45 = vadd.f32 %v2969_v9, %v2929_v60 }
 0x6be   :  { %v3090_v44 = vadd.f32 %v3089_v15, %v3049_v49 }
 0x6c0   :  { %v7138_v41 = vmax.f32 %v3090_v44, 0.0 }
 0x6c1   :  { %v3010_v39 = vpop.f32.mrf.mxu3 }
 0x6c2   :  { %v3011_v43 = vadd.f32 %v3010_v39, %v2970_v45  ;;  %3186 = vmatmul.f32.gmra.mxu3 %v7138_v41  ;;  %3268 = vmatmul.f32.gmra.mxu1 %v7138_v41 }
 0x6c3   :  { %v2972_v23 = vpop.f32.mrf.mxu2 }
 0x6c4   :  { %v3052_v26 = vadd.f32 %v3051_v40, %v3011_v43  ;;  %v2973_v31 = vadd.f32 %v2972_v23, %v2932_v24 }
 0x6c6   :  { %v3093_v32 = vadd.f32 %v3092_v21, %v3052_v26 }
 0x6c8   :  { %v7145_v16 = vmax.f32 %v3093_v32, 0.0 }
 0x6c9   :  { %v3013_v35 = vpop.f32.mrf.mxu3 }
 0x6ca   :  { %v3014_v1 = vadd.f32 %v3013_v35, %v2973_v31  ;;  %3189 = vmatmul.f32.gmra.mxu3 %v7145_v16  ;;  %3271 = vmatmul.f32.gmra.mxu1 %v7145_v16 }
 0x6cb   :  { %v2975_v5 = vpop.f32.mrf.mxu2 }
 0x6cc   :  { %v3055_v28 = vadd.f32 %v3054_v46, %v3014_v1  ;;  %v2976_v34 = vadd.f32 %v2975_v5, %v2935_v7 }
 0x6ce   :  { %v3096_v59 = vadd.f32 %v3095_v0, %v3055_v28 }
 0x6d0   :  { %v3114_v30 = vmax.f32 %v3096_v59, 0.0 }
 0x6d1   :  { %v3016_v36 = vpop.f32.mrf.mxu3 }
 0x6d2   :  { %v3017_v11 = vadd.f32 %v3016_v36, %v2976_v34  ;;  %3192 = vmatmul.f32.gmra.mxu3 %v3114_v30  ;;  %3274 = vmatmul.f32.gmra.mxu1 %v3114_v30 }
 0x6d4   :  { %v3058_v4 = vadd.f32 %v3057_v13, %v3017_v11 }
 0x6d6   :  { %v3099_v19 = vadd.f32 %v3098_v3, %v3058_v4 }
 0x6d8   :  { %v3116_v52 = vmax.f32 %v3099_v19, 0.0 }
 0x6da   :  { %3195 = vmatmul.f32.gmra.mxu3 %v3116_v52  ;;  %3277 = vmatmul.f32.gmra.mxu1 %v3116_v52 }
 0x6db   :  { %v3216_v62 = vpop.f32.mrf.mxu0 }
 0x6e1   :  { %v7152_v50 = vpop.f32.mrf.mxu2 }
 0x6e3   :  { %v3219_v14 = vpop.f32.mrf.mxu0 }
 0x6e9   :  { %v7154_v10 = vpop.f32.mrf.mxu2 }
 0x6eb   :  { %v3222_v42 = vpop.f32.mrf.mxu0 }
 0x6f1   :  { %v3140_v18 = vpop.f32.mrf.mxu2 }
 0x6f3   :  { %v3225_v17 = vpop.f32.mrf.mxu0 }
 0x6f9   :  { %v3143_v15 = vpop.f32.mrf.mxu2 }
 0x6fb   :  { %v3228_v47 = vpop.f32.mrf.mxu0 }
 0x701   :  { %v3146_v9 = vpop.f32.mrf.mxu2 }
 0x703   :  { %v3231_v60 = vpop.f32.mrf.mxu0 }
 0x709   :  { %v3149_v45 = vpop.f32.mrf.mxu2 }
 0x70b   :  { %v3234_v21 = vpop.f32.mrf.mxu0 }
 0x711   :  { %v3152_v43 = vpop.f32.mrf.mxu2 }
 0x713   :  { %v3237_v26 = vpop.f32.mrf.mxu0 }
 0x719   :  { %v3155_v0 = vpop.f32.mrf.mxu2 }
 0x71f   :  { %v3257_v2 = vpop.f32.mrf.mxu1 }
 0x725   :  { %v7156_v54 = vpop.f32.mrf.mxu3 }
 0x727   :  { %v3260_v33 = vpop.f32.mrf.mxu1 }
 0x728   :  { %v3261_v4 = vadd.f32 %v3260_v33, %v3219_v14  ;;  %v4713_v33 = vld [vmem:[#allocation13 + $0x38] sm:$0xff] }
 0x72d   :  { %v3178_v12 = vpop.f32.mrf.mxu3 }
 0x72f   :  { %v3263_v22 = vpop.f32.mrf.mxu1 }
 0x730   :  { %v3264_v36 = vadd.f32 %v3263_v22, %v3222_v42 }
 0x735   :  { %v3181_v48 = vpop.f32.mrf.mxu3 }
 0x737   :  { %v3266_v20 = vpop.f32.mrf.mxu1 }
 0x738   :  { %v3267_v5 = vadd.f32 %v3266_v20, %v3225_v17 }
 0x73a   :  { %v7175_v3 = vmax.f32 %v7131_v37, %v3267_v5  ;;  %v7191_v37 = vmax.f32 %v7117_v56, %v3261_v4 }
 0x73d   :  { %v3184_v8 = vpop.f32.mrf.mxu3 }
 0x73f   :  { %v3269_v49 = vpop.f32.mrf.mxu1 }
 0x740   :  { %v3270_v63 = vadd.f32 %v3269_v49, %v3228_v47 }
 0x742   :  { %v7168_v11 = vmax.f32 %v7138_v41, %v3270_v63  ;;  %v3258_v41 = vadd.f32 %v3257_v2, %v3216_v62 }
 0x745   :  { %v3187_v44 = vpop.f32.mrf.mxu3 }
 0x747   :  { %v3272_v40 = vpop.f32.mrf.mxu1 }
 0x748   :  { %v3273_v46 = vadd.f32 %v3272_v40, %v3231_v60 }
 0x74a   :  { %v7164_v7 = vmax.f32 %v7145_v16, %v3273_v46  ;;  %v3188_v16 = vadd.f32 %v3187_v44, %v3146_v9 }
 0x74c   :  { %v7194_v14 = vmax.f32 %v7072_v38, %v3188_v16  ;;  %v3176_v38 = vadd.f32 %v7156_v54, %v7152_v50  ;;  %v4708_v50 = vld [vmem:[#allocation13 + $0x10] sm:$0xff] }
 0x74d   :  { %v3190_v39 = vpop.f32.mrf.mxu3  ;;  %v4712_v54 = vld [vmem:[#allocation13 + $0x30] sm:$0xff] }
 0x74e   :  { %v3191_v13 = vadd.f32 %v3190_v39, %v3149_v45  ;;  %v7220_v2 = vmax.f32 %v7022_v53, %v3176_v38  ;;  %v4710_v53 = vld [vmem:[#allocation13 + $0x20] sm:$0xff] }
 0x74f   :  { %v3275_v57 = vpop.f32.mrf.mxu1  ;;  %v753_v38 = vld [vmem:[#allocation4 + $0x2e0] sm:$0xff] }
 0x750   :  { %v3276_v32 = vadd.f32 %v3275_v57, %v3234_v21  ;;  %v7186_v42 = vmax.f32 %v7083_v58, %v3191_v13  ;;  %v3179_v58 = vadd.f32 %v3178_v12, %v7154_v10  ;;  %v4711_v10 = vld [vmem:[#allocation13 + $0x28] sm:$0xff] }
 0x752   :  { %v7160_v1 = vmax.f32 %v3114_v30, %v3276_v32 }
 0x755   :  { %v3193_v23 = vpop.f32.mrf.mxu3 }
 0x756   :  { %v3194_v59 = vadd.f32 %v3193_v23, %v3152_v43 }
 0x757   :  { %v3278_v24 = vpop.f32.mrf.mxu1 }
 0x758   :  { %v3279_v31 = vadd.f32 %v3278_v24, %v3237_v26  ;;  %v7178_v19 = vmax.f32 %v7092_v25, %v3194_v59  ;;  %v3182_v25 = vadd.f32 %v3181_v48, %v3140_v18 }
 0x75a   :  { %v7158_v35 = vmax.f32 %v3116_v52, %v3279_v31  ;;  %v7183_v52 = vmax.f32 %v7124_v27, %v3264_v36  ;;  %v7199_v27 = vmax.f32 %v7110_v55, %v3258_v41  ;;  %v7210_v56 = vmax.f32 %v7046_v29, %v3182_v25  ;;  %v4706_v55 = vld [vmem:[#allocation13] sm:$0xff]  ;;  %v4707_v29 = vld [vmem:[#allocation13 + $0x8] sm:$0xff] }
 0x75b   :  { %v911_v36 = vld [vmem:[%s7555_s12 + $0x8] sm:$0xff]  ;;  %v785_v25 = vld [vmem:[#allocation4 + $0x3e0] sm:$0xff] }
 0x75c   :  { %3346 = vmatpush.msrb.mxu3 %v7158_v35 }
 0x75d   :  { %v3196_v28 = vpop.f32.mrf.mxu3 }
 0x75e   :  { %v3197_v34 = vadd.f32 %v3196_v28, %v3155_v0  ;;  %3347 = vmatpush.msrb.mxu3 %v7160_v1  ;;  %v910_v28 = vld [vmem:[%s7555_s12] sm:$0xff] }
 0x760   :  { %v7171_v30 = vmax.f32 %v7102_v6, %v3197_v34  ;;  %3348 = vmatpush.msrb.mxu3 %v7164_v7  ;;  %v3185_v6 = vadd.f32 %v3184_v8, %v3143_v15 }
 0x762   :  { %3305 = vmatpush.msrb.mxu2 %v7171_v30  ;;  %3349 = vmatpush.msrb.mxu3 %v7168_v11  ;;  %v7203_v62 = vmax.f32 %v7059_v51, %v3185_v6  ;;  %v7216_v51 = vmax.f32 %v7033_v61, %v3179_v58  ;;  %v4709_v61 = vld [vmem:[#allocation13 + $0x18] sm:$0xff]  ;;  %v918_v6 = vld [vmem:[#allocation16] sm:$0xff]  ;;  %v915_v58 = vld [vmem:[#allocation15 + $0x8] sm:$0xff] }
 0x764   :  { %3306 = vmatpush.msrb.mxu2 %v7178_v19  ;;  %3350 = vmatpush.msrb.mxu3 %v7175_v3 }
 0x766   :  { %3307 = vmatpush.msrb.mxu2 %v7186_v42  ;;  %3351 = vmatpush.msrb.mxu3 %v7183_v52 }
 0x768   :  { %3308 = vmatpush.msrb.mxu2 %v7194_v14  ;;  %3352 = vmatpush.msrb.mxu3 %v7191_v37 }
 0x76a   :  { %3309 = vmatpush.msrb.mxu2 %v7203_v62  ;;  %3353 = vmatpush.msrb.mxu3 %v7199_v27 }
 0x76b   :  { %4588 = vmatmul.msk.f32.vlgmr.msrb.gmra.mxu3 %vm2391_vm0, %v4706_v55 }
 0x76c   :  { %3310 = vmatpush.msrb.mxu2 %v7210_v56 }
 0x76e   :  { %3311 = vmatpush.msrb.mxu2 %v7216_v51 }
 0x770   :  { %3312 = vmatpush.msrb.mxu2 %v7220_v2 }
 0x771   :  { %4580 = vmatmul.msk.f32.vlgmr.msrb.gmra.mxu2 %vm2391_vm0, %v4706_v55  ;;  %v779_v55 = vld [vmem:[#allocation4 + $0x3b0] sm:$0xff] }
 0x773   :  { %4589 = vmatmul.msk.f32.gmra.mxu3 %vm2391_vm0, %v4707_v29 }
 0x779   :  { %4581 = vmatmul.msk.f32.gmra.mxu2 %vm2391_vm0, %v4707_v29  ;;  %v749_v29 = vld [vmem:[#allocation4 + $0x2c0] sm:$0xff] }
 0x77b   :  { %4590 = vmatmul.msk.f32.gmra.mxu3 %vm2391_vm0, %v4708_v50 }
 0x781   :  { %4582 = vmatmul.msk.f32.gmra.mxu2 %vm2391_vm0, %v4708_v50  ;;  %v775_v50 = vld [vmem:[#allocation4 + $0x390] sm:$0xff] }
 0x783   :  { %4591 = vmatmul.msk.f32.gmra.mxu3 %vm2391_vm0, %v4709_v61 }
 0x789   :  { %4583 = vmatmul.msk.f32.gmra.mxu2 %vm2391_vm0, %v4709_v61  ;;  %v747_v61 = vld [vmem:[#allocation4 + $0x2b0] sm:$0xff] }
 0x78b   :  { %4592 = vmatmul.msk.f32.gmra.mxu3 %vm2391_vm0, %v4710_v53 }
 0x791   :  { %4584 = vmatmul.msk.f32.gmra.mxu2 %vm2391_vm0, %v4710_v53  ;;  %v916_v53 = vld [vmem:[#allocation15 + $0x10] sm:$0xff] }
 0x793   :  { %4593 = vmatmul.msk.f32.gmra.mxu3 %vm2391_vm0, %v4711_v10 }
 0x799   :  { %4585 = vmatmul.msk.f32.gmra.mxu2 %vm2391_vm0, %v4711_v10  ;;  %v773_v10 = vld [vmem:[#allocation4 + $0x380] sm:$0xff] }
 0x79b   :  { %4594 = vmatmul.msk.f32.gmra.mxu3 %vm2391_vm0, %v4712_v54 }
 0x7a1   :  { %4586 = vmatmul.msk.f32.gmra.mxu2 %vm2391_vm0, %v4712_v54  ;;  %v745_v54 = vld [vmem:[#allocation4 + $0x2a0] sm:$0xff] }
 0x7a3   :  { %4595 = vmatmul.msk.f32.gmra.mxu3 %vm2391_vm0, %v4713_v33 }
 0x7a9   :  { %4587 = vmatmul.msk.f32.gmra.mxu2 %vm2391_vm0, %v4713_v33  ;;  %v920_v33 = vld [vmem:[#allocation16 + $0x10] sm:$0xff] }
 0x7ee   :  { %v3355_v18 = vpop.f32.mrf.mxu3 }
 0x7ef   :  { %v3380_v0 = vmax.f32 %v7199_v27, %v3355_v18  ;;  %v755_v27 = vld [vmem:[#allocation4 + $0x2f0] sm:$0xff] }
 0x7f0   :  { %v771_v18 = vld [vmem:[#allocation4 + $0x370] sm:$0xff] }
 0x7f4   :  { %v3314_v12 = vpop.f32.mrf.mxu2 }
 0x7f5   :  { %v3379_v34 = vmax.f32 %v7220_v2, %v3314_v12  ;;  %v777_v2 = vld [vmem:[#allocation4 + $0x3a0] sm:$0xff]  ;;  %v743_v12 = vld [vmem:[#allocation4 + $0x290] sm:$0xff] }
 0x7f6   :  { %v3358_v17 = vpop.f32.mrf.mxu3 }
 0x7f7   :  { %v3382_v63 = vmax.f32 %v7191_v37, %v3358_v17  ;;  %v787_v37 = vld [vmem:[#allocation4 + $0x3f0] sm:$0xff]  ;;  %v769_v17 = vld [vmem:[#allocation4 + $0x360] sm:$0xff] }
 0x7fc   :  { %v3317_v22 = vpop.f32.mrf.mxu2 }
 0x7fd   :  { %v3381_v59 = vmax.f32 %v7216_v51, %v3317_v22  ;;  %v751_v51 = vld [vmem:[#allocation4 + $0x2d0] sm:$0xff]  ;;  %v741_v22 = vld [vmem:[#allocation4 + $0x280] sm:$0xff] }
 0x7fe   :  { %v3361_v15 = vpop.f32.mrf.mxu3 }
 0x7ff   :  { %v3384_v46 = vmax.f32 %v7183_v52, %v3361_v15  ;;  %v914_v52 = vld [vmem:[#allocation15] sm:$0xff]  ;;  %v767_v15 = vld [vmem:[#allocation4 + $0x350] sm:$0xff] }
 0x804   :  { %v3320_v48 = vpop.f32.mrf.mxu2 }
 0x805   :  { %v3383_v5 = vmax.f32 %v7210_v56, %v3320_v48  ;;  %v919_v56 = vld [vmem:[#allocation16 + $0x8] sm:$0xff] }
 0x806   :  { %v3364_v20 = vpop.f32.mrf.mxu3  ;;  %v739_v48 = vld [vmem:[#allocation4 + $0x270] sm:$0xff] }
 0x807   :  { %v3386_v32 = vmax.f32 %v7175_v3, %v3364_v20  ;;  %v917_v20 = vld [vmem:[#allocation15 + $0x18] sm:$0xff] }
 0x80c   :  { %v3323_v47 = vpop.f32.mrf.mxu2 }
 0x80e   :  { %v3367_v8 = vpop.f32.mrf.mxu3 }
 0x80f   :  { %v3388_v26 = vmax.f32 %v7168_v11, %v3367_v8  ;;  %v912_v11 = vld [vmem:[%s7555_s12 + $0x10] sm:$0xff]  ;;  %v737_v8 = vld [vmem:[#allocation4 + $0x260] sm:$0xff] }
 0x814   :  { %v3326_v9 = vpop.f32.mrf.mxu2 }
 0x816   :  { %v3370_v49 = vpop.f32.mrf.mxu3 }
 0x817   :  { %v3390_v57 = vmax.f32 %v7164_v7, %v3370_v49  ;;  %v913_v7 = vld [vmem:[%s7555_s12 + $0x18] sm:$0xff]  ;;  %v763_v49 = vld [vmem:[#allocation4 + $0x330] sm:$0xff] }
 0x81c   :  { %v3329_v60 = vpop.f32.mrf.mxu2 }
 0x81d   :  { %v3389_v31 = vmax.f32 %v7186_v42, %v3329_v60  ;;  %v735_v60 = vld [vmem:[#allocation4 + $0x250] sm:$0xff] }
 0x81e   :  { %v3373_v44 = vpop.f32.mrf.mxu3 }
 0x81f   :  { %v3392_v39 = vmax.f32 %v7160_v1, %v3373_v44  ;;  %v3385_v1 = vmax.f32 %v7203_v62, %v3323_v47  ;;  %v781_v62 = vld [vmem:[#allocation4 + $0x3c0] sm:$0xff] }
 0x820   :  { %v765_v47 = vld [vmem:[#allocation4 + $0x340] sm:$0xff] }
 0x821   :  { %v761_v44 = vld [vmem:[#allocation4 + $0x320] sm:$0xff] }
 0x824   :  { %v3332_v40 = vpop.f32.mrf.mxu2 }
 0x825   :  { %v3391_v24 = vmax.f32 %v7178_v19, %v3332_v40  ;;  %v733_v40 = vld [vmem:[#allocation4 + $0x240] sm:$0xff] }
 0x826   :  { %v3376_v45 = vpop.f32.mrf.mxu3 }
 0x827   :  { %v3394_v21 = vmax.f32 %v7158_v35, %v3376_v45  ;;  %v3387_v35 = vmax.f32 %v7194_v14, %v3326_v9  ;;  %v783_v14 = vld [vmem:[#allocation4 + $0x3d0] sm:$0xff]  ;;  %v921_v9 = vld [vmem:[#allocation16 + $0x18] sm:$0xff] }
 0x828   :  { %v759_v45 = vld [vmem:[#allocation4 + $0x310] sm:$0xff] }
 0x829   :  { %3444 = vmatpush.msrb.mxu1 %v3394_v21  ;;  %4645 = vmatpush.msra.mxu3 %v3394_v21  ;;  %v731_v21 = vld [vmem:[#allocation4 + $0x230] sm:$0xff] }
 0x82b   :  { %3445 = vmatpush.msrb.mxu1 %v3392_v39  ;;  %4646 = vmatpush.msra.mxu3 %v3392_v39  ;;  %v757_v39 = vld [vmem:[#allocation4 + $0x300] sm:$0xff] }
 0x82c   :  { %v3335_v43 = vpop.f32.mrf.mxu2 }
 0x82d   :  { %v3393_v23 = vmax.f32 %v7171_v30, %v3335_v43  ;;  %3446 = vmatpush.msrb.mxu1 %v3390_v57  ;;  %4647 = vmatpush.msra.mxu3 %v3390_v57  ;;  %v729_v57 = vld [vmem:[#allocation4 + $0x220] sm:$0xff]  ;;  %v723_v43 = vld [vmem:[#allocation4 + $0x1f0] sm:$0xff] }
 0x82f   :  { %3415 = vmatpush.msrb.mxu0 %v3393_v23  ;;  %4637 = vmatpush.msra.mxu2 %v3393_v23  ;;  %v721_v23 = vld [vmem:[#allocation4 + $0x1e0] sm:$0xff] }
 0x830   :  { %3447 = vmatpush.msrb.mxu1 %v3388_v26  ;;  %4648 = vmatpush.msra.mxu3 %v3388_v26  ;;  %v691_v26 = vld [vmem:[#allocation4 + $0xf0] sm:$0xff] }
 0x831   :  { %3416 = vmatpush.msrb.mxu0 %v3391_v24  ;;  %4638 = vmatpush.msra.mxu2 %v3391_v24  ;;  %v689_v24 = vld [vmem:[#allocation4 + $0xe0] sm:$0xff] }
 0x832   :  { %3448 = vmatpush.msrb.mxu1 %v3386_v32  ;;  %4649 = vmatpush.msra.mxu3 %v3386_v32  ;;  %v727_v32 = vld [vmem:[#allocation4 + $0x210] sm:$0xff] }
 0x833   :  { %3417 = vmatpush.msrb.mxu0 %v3389_v31  ;;  %4639 = vmatpush.msra.mxu2 %v3389_v31  ;;  %v719_v31 = vld [vmem:[#allocation4 + $0x1d0] sm:$0xff] }
 0x834   :  { %3449 = vmatpush.msrb.mxu1 %v3384_v46  ;;  %4650 = vmatpush.msra.mxu3 %v3384_v46  ;;  %v687_v46 = vld [vmem:[#allocation4 + $0xd0] sm:$0xff] }
 0x835   :  { %3418 = vmatpush.msrb.mxu0 %v3387_v35  ;;  %4640 = vmatpush.msra.mxu2 %v3387_v35  ;;  %v725_v35 = vld [vmem:[#allocation4 + $0x200] sm:$0xff] }
 0x836   :  { %3450 = vmatpush.msrb.mxu1 %v3382_v63  ;;  %4651 = vmatpush.msra.mxu3 %v3382_v63  ;;  %v717_v63 = vld [vmem:[#allocation4 + $0x1c0] sm:$0xff] }
 0x837   :  { %3419 = vmatpush.msrb.mxu0 %v3385_v1  ;;  %4641 = vmatpush.msra.mxu2 %v3385_v1  ;;  %v685_v1 = vld [vmem:[#allocation4 + $0xc0] sm:$0xff] }
 0x838   :  { %3451 = vmatpush.msrb.mxu1 %v3380_v0  ;;  %4652 = vmatpush.msra.mxu3 %v3380_v0  ;;  %v715_v0 = vld [vmem:[#allocation4 + $0x1b0] sm:$0xff] }
 0x839   :  { %4600 = vmatmul.msk.f32.vlgmr.msrb.gmra.mxu1 %vm2391_vm0, %v910_v28  ;;  %3420 = vmatpush.msrb.mxu0 %v3383_v5 }
 0x83a   :  { %4642 = vmatpush.msra.mxu2 %v3383_v5  ;;  %4603 = vmatmul.msk.f32.vlgmr.msra.gmra.mxu3 %vm2391_vm0, %v913_v7  ;;  %v713_v5 = vld [vmem:[#allocation4 + $0x1a0] sm:$0xff] }
 0x83b   :  { %3421 = vmatpush.msrb.mxu0 %v3381_v59 }
 0x83c   :  { %4643 = vmatpush.msra.mxu2 %v3381_v59  ;;  %v711_v59 = vld [vmem:[#allocation4 + $0x190] sm:$0xff] }
 0x83d   :  { %3422 = vmatpush.msrb.mxu0 %v3379_v34 }
 0x83e   :  { %4644 = vmatpush.msra.mxu2 %v3379_v34  ;;  %4596 = vmatmul.msk.f32.vlgmr.msrb.gmra.mxu0 %vm2391_vm0, %v910_v28  ;;  %v683_v28 = vld [vmem:[#allocation4 + $0xb0] sm:$0xff] }
 0x83f   :  { %4599 = vmatmul.msk.f32.vlgmr.msra.gmra.mxu2 %vm2391_vm0, %v913_v7  ;;  %v681_v7 = vld [vmem:[#allocation4 + $0xa0] sm:$0xff]  ;;  %v679_v34 = vld [vmem:[#allocation4 + $0x90] sm:$0xff] }
 0x841   :  { %4601 = vmatmul.msk.f32.gmra.mxu1 %vm2391_vm0, %v911_v36 }
 0x846   :  { %4597 = vmatmul.msk.f32.gmra.mxu0 %vm2391_vm0, %v911_v36  ;;  %v709_v36 = vld [vmem:[#allocation4 + $0x180] sm:$0xff] }
 0x849   :  { %4602 = vmatmul.msk.f32.gmra.mxu1 %vm2391_vm0, %v912_v11 }
 0x84e   :  { %4598 = vmatmul.msk.f32.gmra.mxu0 %vm2391_vm0, %v912_v11  ;;  %v677_v11 = vld [vmem:[#allocation4 + $0x80] sm:$0xff] }
 0x8b6   :  { %v7275_v13 = vpop.f32.mrf.mxu1 }
 0x8bb   :  { %v7277_v30 = vpop.f32.mrf.mxu0 }
 0x8bd   :  { %v7279_v4 = vpop.f32.mrf.mxu3 }
 0x8be   :  { %v7281_v3 = vpop.f32.mrf.mxu1  ;;  %3519 = vmatpush.msrb.mxu3 %v7279_v4  ;;  %3589 = vmatpush.msra.mxu1 %v7279_v4 }
 0x8c2   :  { %v7285_v16 = vpop.f32.mrf.mxu2 }
 0x8c3   :  { %v7287_v19 = vpop.f32.mrf.mxu0  ;;  %3490 = vmatpush.msrb.mxu2 %v7285_v16  ;;  %3560 = vmatpush.msra.mxu0 %v7285_v16 }
 0x8c6   :  { %v7291_v41 = vpop.f32.mrf.mxu1 }
 0x8c7   :  { %3520 = vmatpush.msrb.mxu3 %v7291_v41  ;;  %3590 = vmatpush.msra.mxu1 %v7291_v41 }
 0x8c9   :  { %3521 = vmatpush.msrb.mxu3 %v7281_v3  ;;  %3591 = vmatpush.msra.mxu1 %v7281_v3 }
 0x8cb   :  { %3522 = vmatpush.msrb.mxu3 %v7275_v13  ;;  %v7298_v42 = vpop.f32.mrf.mxu0  ;;  %3592 = vmatpush.msra.mxu1 %v7275_v13 }
 0x8cc   :  { %4608 = vmatmul.msk.f32.vlgmr.msrb.gmra.mxu3 %vm3465_vm1, %v914_v52  ;;  %3491 = vmatpush.msrb.mxu2 %v7298_v42 }
 0x8cd   :  { %3561 = vmatpush.msra.mxu0 %v7298_v42  ;;  %4616 = vmatmul.msk.f32.vlgmr.msra.gmra.mxu1 %vm3465_vm1, %v918_v6 }
 0x8ce   :  { %3492 = vmatpush.msrb.mxu2 %v7287_v19  ;;  %3698 = vmatpush.msrb.mxu1 %v787_v37  ;;  %v705_v37 = vld [vmem:[#allocation4 + $0x160] sm:$0xff] }
 0x8cf   :  { %3562 = vmatpush.msra.mxu0 %v7287_v19  ;;  %3640 = vmatpush.msra.mxu3 %v723_v43  ;;  %v851_v43 = vld [vmem:[#allocation4 + $0x5f0] sm:$0xff] }
 0x8d0   :  { %3493 = vmatpush.msrb.mxu2 %v7277_v30  ;;  %3699 = vmatpush.msrb.mxu1 %v785_v25  ;;  %v673_v25 = vld [vmem:[#allocation4 + $0x60] sm:$0xff] }
 0x8d1   :  { %4604 = vmatmul.msk.f32.vlgmr.msrb.gmra.mxu2 %vm3465_vm1, %v914_v52  ;;  %3563 = vmatpush.msra.mxu0 %v7277_v30  ;;  %v707_v52 = vld [vmem:[#allocation4 + $0x170] sm:$0xff] }
 0x8d2   :  { %4612 = vmatmul.msk.f32.vlgmr.msra.gmra.mxu0 %vm3465_vm1, %v918_v6  ;;  %3700 = vmatpush.msrb.mxu1 %v783_v14  ;;  %v675_v6 = vld [vmem:[#allocation4 + $0x70] sm:$0xff] }
 0x8d3   :  { %3669 = vmatpush.msrb.mxu0 %v755_v27  ;;  %3611 = vmatpush.msra.mxu2 %v691_v26  ;;  %v703_v14 = vld [vmem:[#allocation4 + $0x150] sm:$0xff]  ;;  %v849_v26 = vld [vmem:[#allocation4 + $0x5e0] sm:$0xff] }
 0x8d4   :  { %4609 = vmatmul.msk.f32.gmra.mxu3 %vm3465_vm1, %v915_v58  ;;  %3701 = vmatpush.msrb.mxu1 %v781_v62  ;;  %v671_v27 = vld [vmem:[#allocation4 + $0x50] sm:$0xff]  ;;  %v669_v62 = vld [vmem:[#allocation4 + $0x40] sm:$0xff] }
 0x8d5   :  { %3670 = vmatpush.msrb.mxu0 %v753_v38  ;;  %4617 = vmatmul.msk.f32.gmra.mxu1 %vm3465_vm1, %v919_v56  ;;  %v699_v38 = vld [vmem:[#allocation4 + $0x130] sm:$0xff] }
 0x8d6   :  { %3702 = vmatpush.msrb.mxu1 %v779_v55  ;;  %3641 = vmatpush.msra.mxu3 %v721_v23  ;;  %v695_v55 = vld [vmem:[#allocation4 + $0x110] sm:$0xff] }
 0x8d7   :  { %3671 = vmatpush.msrb.mxu0 %v751_v51  ;;  %3612 = vmatpush.msra.mxu2 %v689_v24  ;;  %v692_v51 = vld [vmem:[#allocation4 + $0xf8] sm:$0xff]  ;;  %v663_v23 = vld [vmem:[#allocation4 + $0x10] sm:$0xff]  ;;  %v702_v24 = vld [vmem:[#allocation4 + $0x148] sm:$0xff] }
 0x8d8   :  { %3703 = vmatpush.msrb.mxu1 %v777_v2  ;;  %3642 = vmatpush.msra.mxu3 %v719_v31  ;;  %v690_v2 = vld [vmem:[#allocation4 + $0xe8] sm:$0xff]  ;;  %v700_v31 = vld [vmem:[#allocation4 + $0x138] sm:$0xff] }
 0x8d9   :  { %4605 = vmatmul.msk.f32.gmra.mxu2 %vm3465_vm1, %v915_v58  ;;  %3672 = vmatpush.msrb.mxu0 %v749_v29  ;;  %v701_v58 = vld [vmem:[#allocation4 + $0x140] sm:$0xff]  ;;  %v724_v29 = vld [vmem:[#allocation4 + $0x1f8] sm:$0xff] }
 0x8da   :  { %4613 = vmatmul.msk.f32.gmra.mxu0 %vm3465_vm1, %v919_v56  ;;  %3704 = vmatpush.msrb.mxu1 %v775_v50  ;;  %v697_v56 = vld [vmem:[#allocation4 + $0x120] sm:$0xff]  ;;  %v688_v50 = vld [vmem:[#allocation4 + $0xd8] sm:$0xff] }
 0x8db   :  { %3673 = vmatpush.msrb.mxu0 %v747_v61  ;;  %3613 = vmatpush.msra.mxu2 %v687_v46  ;;  %v722_v61 = vld [vmem:[#allocation4 + $0x1e8] sm:$0xff]  ;;  %v664_v46 = vld [vmem:[#allocation4 + $0x18] sm:$0xff] }
 0x8dc   :  { %4610 = vmatmul.msk.f32.gmra.mxu3 %vm3465_vm1, %v916_v53  ;;  %3705 = vmatpush.msrb.mxu1 %v773_v10  ;;  %v720_v10 = vld [vmem:[#allocation4 + $0x1d8] sm:$0xff] }
 0x8dd   :  { %3674 = vmatpush.msrb.mxu0 %v745_v54  ;;  %4618 = vmatmul.msk.f32.gmra.mxu1 %vm3465_vm1, %v920_v33  ;;  %v684_v54 = vld [vmem:[#allocation4 + $0xb8] sm:$0xff] }
 0x8de   :  { %3706 = vmatpush.msrb.mxu1 %v771_v18  ;;  %3643 = vmatpush.msra.mxu3 %v717_v63  ;;  %v682_v18 = vld [vmem:[#allocation4 + $0xa8] sm:$0xff]  ;;  %v661_v63 = vld [vmem:[#allocation4] sm:$0xff] }
 0x8df   :  { %3675 = vmatpush.msrb.mxu0 %v743_v12  ;;  %3614 = vmatpush.msra.mxu2 %v685_v1  ;;  %v716_v12 = vld [vmem:[#allocation4 + $0x1b8] sm:$0xff]  ;;  %v847_v1 = vld [vmem:[#allocation4 + $0x5d0] sm:$0xff] }
 0x8e0   :  { %3707 = vmatpush.msrb.mxu1 %v769_v17  ;;  %3644 = vmatpush.msra.mxu3 %v715_v0  ;;  %v680_v17 = vld [vmem:[#allocation4 + $0x98] sm:$0xff]  ;;  %v662_v0 = vld [vmem:[#allocation4 + $0x8] sm:$0xff] }
 0x8e1   :  { %4606 = vmatmul.msk.f32.gmra.mxu2 %vm3465_vm1, %v916_v53  ;;  %3676 = vmatpush.msrb.mxu0 %v741_v22  ;;  %v686_v53 = vld [vmem:[#allocation4 + $0xc8] sm:$0xff] }
 0x8e2   :  { %4614 = vmatmul.msk.f32.gmra.mxu0 %vm3465_vm1, %v920_v33  ;;  %3708 = vmatpush.msrb.mxu1 %v767_v15  ;;  %v718_v33 = vld [vmem:[#allocation4 + $0x1c8] sm:$0xff] }
 0x8e3   :  { %3677 = vmatpush.msrb.mxu0 %v739_v48  ;;  %3615 = vmatpush.msra.mxu2 %v683_v28  ;;  %v714_v22 = vld [vmem:[#allocation4 + $0x1a8] sm:$0xff]  ;;  %v712_v48 = vld [vmem:[#allocation4 + $0x198] sm:$0xff] }
 0x8e4   :  { %4611 = vmatmul.msk.f32.gmra.mxu3 %vm3465_vm1, %v917_v20  ;;  %3709 = vmatpush.msrb.mxu1 %v765_v47  ;;  %v678_v15 = vld [vmem:[#allocation4 + $0x88] sm:$0xff]  ;;  %v696_v28 = vld [vmem:[#allocation4 + $0x118] sm:$0xff] }
 0x8e5   :  { %3678 = vmatpush.msrb.mxu0 %v737_v8  ;;  %4619 = vmatmul.msk.f32.gmra.mxu1 %vm3465_vm1, %v921_v9  ;;  %v710_v47 = vld [vmem:[#allocation4 + $0x188] sm:$0xff] }
 0x8e6   :  { %3710 = vmatpush.msrb.mxu1 %v763_v49  ;;  %3645 = vmatpush.msra.mxu3 %v713_v5  ;;  %v674_v8 = vld [vmem:[#allocation4 + $0x68] sm:$0xff]  ;;  %v672_v49 = vld [vmem:[#allocation4 + $0x58] sm:$0xff]  ;;  %v819_v5 = vld [vmem:[#allocation4 + $0x4f0] sm:$0xff] }
 0x8e7   :  { %3679 = vmatpush.msrb.mxu0 %v735_v60  ;;  %3616 = vmatpush.msra.mxu2 %v681_v7  ;;  %v706_v60 = vld [vmem:[#allocation4 + $0x168] sm:$0xff]  ;;  %v845_v7 = vld [vmem:[#allocation4 + $0x5c0] sm:$0xff] }
 0x8e8   :  { %3711 = vmatpush.msrb.mxu1 %v761_v44  ;;  %3646 = vmatpush.msra.mxu3 %v711_v59  ;;  %v670_v44 = vld [vmem:[#allocation4 + $0x48] sm:$0xff]  ;;  %v817_v59 = vld [vmem:[#allocation4 + $0x4e0] sm:$0xff] }
 0x8e9   :  { %4607 = vmatmul.msk.f32.gmra.mxu2 %vm3465_vm1, %v917_v20  ;;  %3680 = vmatpush.msrb.mxu0 %v733_v40  ;;  %v676_v20 = vld [vmem:[#allocation4 + $0x78] sm:$0xff] }
 0x8ea   :  { %4615 = vmatmul.msk.f32.gmra.mxu0 %vm3465_vm1, %v921_v9  ;;  %3712 = vmatpush.msrb.mxu1 %v759_v45  ;;  %v708_v9 = vld [vmem:[#allocation4 + $0x178] sm:$0xff]  ;;  %v667_v45 = vld [vmem:[#allocation4 + $0x30] sm:$0xff] }
 0x8eb   :  { %3681 = vmatpush.msrb.mxu0 %v731_v21  ;;  %3617 = vmatpush.msra.mxu2 %v679_v34  ;;  %v704_v40 = vld [vmem:[#allocation4 + $0x158] sm:$0xff]  ;;  %v693_v21 = vld [vmem:[#allocation4 + $0x100] sm:$0xff]  ;;  %v843_v34 = vld [vmem:[#allocation4 + $0x5b0] sm:$0xff] }
 0x8ec   :  { %3713 = vmatpush.msrb.mxu1 %v757_v39  ;;  %3647 = vmatpush.msra.mxu3 %v709_v36  ;;  %v668_v39 = vld [vmem:[#allocation4 + $0x38] sm:$0xff]  ;;  %v694_v36 = vld [vmem:[#allocation4 + $0x108] sm:$0xff] }
 0x8ed   :  { %3682 = vmatpush.msrb.mxu0 %v729_v57  ;;  %3714 = vmatmul.f32.vlgmr.msrb.gmra.mxu1 %v7275_v13  ;;  %v665_v57 = vld [vmem:[#allocation4 + $0x20] sm:$0xff] }
 0x8ee   :  { %3618 = vmatpush.msra.mxu2 %v677_v11  ;;  %3648 = vmatpush.msra.mxu3 %v707_v52  ;;  %v815_v11 = vld [vmem:[#allocation4 + $0x4d0] sm:$0xff]  ;;  %v841_v52 = vld [vmem:[#allocation4 + $0x5a0] sm:$0xff] }
 0x8ef   :  { %3683 = vmatpush.msrb.mxu0 %v727_v32  ;;  %3814 = vmatpush.msra.mxu1 %v724_v29  ;;  %v666_v32 = vld [vmem:[#allocation4 + $0x28] sm:$0xff]  ;;  %v835_v29 = vld [vmem:[#allocation4 + $0x570] sm:$0xff] }
 0x8f0   :  { %3619 = vmatpush.msra.mxu2 %v675_v6  ;;  %3649 = vmatpush.msra.mxu3 %v705_v37  ;;  %v820_v6 = vld [vmem:[#allocation4 + $0x4f8] sm:$0xff]  ;;  %v818_v37 = vld [vmem:[#allocation4 + $0x4e8] sm:$0xff] }
 0x8f1   :  { %3684 = vmatpush.msrb.mxu0 %v725_v35  ;;  %3815 = vmatpush.msra.mxu1 %v722_v61  ;;  %v698_v35 = vld [vmem:[#allocation4 + $0x128] sm:$0xff]  ;;  %v807_v61 = vld [vmem:[#allocation4 + $0x490] sm:$0xff] }
 0x8f2   :  { %3685 = vmatmul.f32.vlgmr.msrb.gmra.mxu0 %v7277_v30  ;;  %3620 = vmatpush.msra.mxu2 %v673_v25  ;;  %v852_v25 = vld [vmem:[#allocation4 + $0x5f8] sm:$0xff] }
 0x8f3   :  { %3650 = vmatpush.msra.mxu3 %v703_v14  ;;  %3785 = vmatpush.msra.mxu0 %v692_v51  ;;  %v816_v14 = vld [vmem:[#allocation4 + $0x4d8] sm:$0xff]  ;;  %v837_v51 = vld [vmem:[#allocation4 + $0x580] sm:$0xff] }
 0x8f4   :  { %3621 = vmatpush.msra.mxu2 %v671_v27  ;;  %3816 = vmatpush.msra.mxu1 %v720_v10  ;;  %v813_v27 = vld [vmem:[#allocation4 + $0x4c0] sm:$0xff]  ;;  %v846_v10 = vld [vmem:[#allocation4 + $0x5c8] sm:$0xff] }
 0x8f5   :  { %3717 = vmatmul.f32.gmra.mxu1 %v7281_v3  ;;  %3651 = vmatpush.msra.mxu3 %v701_v58  ;;  %v839_v58 = vld [vmem:[#allocation4 + $0x590] sm:$0xff] }
 0x8f6   :  { %3622 = vmatpush.msra.mxu2 %v669_v62  ;;  %3786 = vmatpush.msra.mxu0 %v690_v2  ;;  %v850_v62 = vld [vmem:[#allocation4 + $0x5e8] sm:$0xff]  ;;  %v809_v2 = vld [vmem:[#allocation4 + $0x4a0] sm:$0xff] }
 0x8f7   :  { %3652 = vmatpush.msra.mxu3 %v699_v38  ;;  %3817 = vmatpush.msra.mxu1 %v718_v33  ;;  %v814_v38 = vld [vmem:[#allocation4 + $0x4c8] sm:$0xff]  ;;  %v844_v33 = vld [vmem:[#allocation4 + $0x5b8] sm:$0xff] }
 0x8f8   :  { %3787 = vmatpush.msra.mxu0 %v688_v50  ;;  %3623 = vmatpush.msra.mxu2 %v667_v45  ;;  %v812_v50 = vld [vmem:[#allocation4 + $0x4b8] sm:$0xff]  ;;  %v802_v45 = vld [vmem:[#allocation4 + $0x468] sm:$0xff] }
 0x8f9   :  { %3653 = vmatpush.msra.mxu3 %v697_v56  ;;  %3818 = vmatpush.msra.mxu1 %v716_v12  ;;  %v848_v56 = vld [vmem:[#allocation4 + $0x5d8] sm:$0xff]  ;;  %v805_v12 = vld [vmem:[#allocation4 + $0x480] sm:$0xff] }
 0x8fa   :  { %3688 = vmatmul.f32.gmra.mxu0 %v7287_v19  ;;  %3624 = vmatpush.msra.mxu2 %v665_v57  ;;  %v797_v57 = vld [vmem:[#allocation4 + $0x440] sm:$0xff] }
 0x8fb   :  { %3654 = vmatpush.msra.mxu3 %v695_v55  ;;  %3788 = vmatpush.msra.mxu0 %v686_v53  ;;  %v811_v55 = vld [vmem:[#allocation4 + $0x4b0] sm:$0xff]  ;;  %v833_v53 = vld [vmem:[#allocation4 + $0x560] sm:$0xff] }
 0x8fc   :  { %3819 = vmatpush.msra.mxu1 %v714_v22  ;;  %3625 = vmatpush.msra.mxu2 %v663_v23  ;;  %v842_v22 = vld [vmem:[#allocation4 + $0x5a8] sm:$0xff] }
 0x8fd   :  { %3720 = vmatmul.f32.gmra.mxu1 %v7291_v41  ;;  %3789 = vmatpush.msra.mxu0 %v684_v54  ;;  %v810_v54 = vld [vmem:[#allocation4 + $0x4a8] sm:$0xff] }
 0x8fe   :  { %3820 = vmatpush.msra.mxu1 %v712_v48  ;;  %3655 = vmatpush.msra.mxu3 %v693_v21  ;;  %v840_v48 = vld [vmem:[#allocation4 + $0x598] sm:$0xff]  ;;  %v834_v23 = vld [vmem:[#allocation4 + $0x568] sm:$0xff] }
 0x8ff   :  { %3790 = vmatpush.msra.mxu0 %v682_v18  ;;  %3626 = vmatpush.msra.mxu2 %v661_v63  ;;  %v808_v18 = vld [vmem:[#allocation4 + $0x498] sm:$0xff] }
 0x900   :  { %3821 = vmatpush.msra.mxu1 %v710_v47  ;;  %3756 = vmatpush.msrb.mxu3 %v851_v43  ;;  %v829_v47 = vld [vmem:[#allocation4 + $0x540] sm:$0xff]  ;;  %v836_v21 = vld [vmem:[#allocation4 + $0x578] sm:$0xff]  ;;  %v823_v43 = vld [vmem:[#allocation4 + $0x510] sm:$0xff] }
 0x901   :  { %3791 = vmatpush.msra.mxu0 %v680_v17  ;;  %3727 = vmatpush.msrb.mxu2 %v819_v5  ;;  %v831_v17 = vld [vmem:[#allocation4 + $0x550] sm:$0xff]  ;;  %v832_v63 = vld [vmem:[#allocation4 + $0x558] sm:$0xff] }
 0x902   :  { %3691 = vmatmul.f32.gmra.mxu0 %v7298_v42  ;;  %3822 = vmatpush.msra.mxu1 %v708_v9  ;;  %v827_v9 = vld [vmem:[#allocation4 + $0x530] sm:$0xff]  ;;  %v784_v5 = vld [vmem:[#allocation4 + $0x3d8] sm:$0xff] }
 0x903   :  { %3792 = vmatpush.msra.mxu0 %v678_v15  ;;  %3757 = vmatpush.msrb.mxu3 %v849_v26  ;;  %v806_v15 = vld [vmem:[#allocation4 + $0x488] sm:$0xff]  ;;  %v795_v26 = vld [vmem:[#allocation4 + $0x430] sm:$0xff] }
 0x904   :  { %3823 = vmatpush.msra.mxu1 %v706_v60  ;;  %3728 = vmatpush.msrb.mxu2 %v817_v59  ;;  %v799_v60 = vld [vmem:[#allocation4 + $0x450] sm:$0xff]  ;;  %v796_v59 = vld [vmem:[#allocation4 + $0x438] sm:$0xff] }
 0x905   :  { %3723 = vmatmul.f32.gmra.mxu1 %v7279_v4  ;;  %3793 = vmatpush.msra.mxu0 %v676_v20  ;;  %v803_v20 = vld [vmem:[#allocation4 + $0x470] sm:$0xff] }
 0x906   :  { %3824 = vmatpush.msra.mxu1 %v704_v40  ;;  %3758 = vmatpush.msrb.mxu3 %v847_v1  ;;  %v838_v40 = vld [vmem:[#allocation4 + $0x588] sm:$0xff]  ;;  %v791_v1 = vld [vmem:[#allocation4 + $0x410] sm:$0xff] }
 0x907   :  { %3794 = vmatpush.msra.mxu0 %v674_v8  ;;  %3729 = vmatpush.msrb.mxu2 %v815_v11  ;;  %v801_v8 = vld [vmem:[#allocation4 + $0x460] sm:$0xff]  ;;  %v782_v11 = vld [vmem:[#allocation4 + $0x3c8] sm:$0xff] }
 0x908   :  { %3825 = vmatpush.msra.mxu1 %v702_v24  ;;  %3759 = vmatpush.msrb.mxu3 %v845_v7  ;;  %v821_v24 = vld [vmem:[#allocation4 + $0x500] sm:$0xff] }
 0x909   :  { %3795 = vmatpush.msra.mxu0 %v672_v49  ;;  %3730 = vmatpush.msrb.mxu2 %v813_v27  ;;  %v804_v49 = vld [vmem:[#allocation4 + $0x478] sm:$0xff] }
 0x90a   :  { %3694 = vmatmul.f32.gmra.mxu0 %v7285_v16  ;;  %3826 = vmatpush.msra.mxu1 %v700_v31  ;;  %v798_v31 = vld [vmem:[#allocation4 + $0x448] sm:$0xff]  ;;  %v828_v27 = vld [vmem:[#allocation4 + $0x538] sm:$0xff] }
 0x90b   :  { %3796 = vmatpush.msra.mxu0 %v670_v44  ;;  %3760 = vmatpush.msrb.mxu3 %v843_v34  ;;  %v825_v44 = vld [vmem:[#allocation4 + $0x520] sm:$0xff]  ;;  %v756_v34 = vld [vmem:[#allocation4 + $0x2f8] sm:$0xff] }
 0x90c   :  { %3827 = vmatpush.msra.mxu1 %v698_v35  ;;  %3731 = vmatpush.msrb.mxu2 %v811_v55  ;;  %v788_v35 = vld [vmem:[#allocation4 + $0x3f8] sm:$0xff] }
 0x90d   :  { %3797 = vmatpush.msra.mxu0 %v668_v39  ;;  %3761 = vmatpush.msrb.mxu3 %v841_v52  ;;  %v800_v39 = vld [vmem:[#allocation4 + $0x458] sm:$0xff] }
 0x90e   :  { %3828 = vmatpush.msra.mxu1 %v696_v28  ;;  %3732 = vmatpush.msrb.mxu2 %v809_v2  ;;  %v789_v28 = vld [vmem:[#allocation4 + $0x400] sm:$0xff]  ;;  %v776_v55 = vld [vmem:[#allocation4 + $0x398] sm:$0xff] }
 0x90f   :  { %3798 = vmatpush.msra.mxu0 %v666_v32  ;;  %3762 = vmatpush.msrb.mxu3 %v839_v58  ;;  %v792_v58 = vld [vmem:[#allocation4 + $0x418] sm:$0xff] }
 0x910   :  { %3829 = vmatpush.msra.mxu1 %v694_v36  ;;  %3733 = vmatpush.msrb.mxu2 %v807_v61  ;;  %v830_v36 = vld [vmem:[#allocation4 + $0x548] sm:$0xff]  ;;  %v748_v2 = vld [vmem:[#allocation4 + $0x2b8] sm:$0xff] }
 0x911   :  { %3799 = vmatpush.msra.mxu0 %v664_v46  ;;  %3763 = vmatpush.msrb.mxu3 %v837_v51  ;;  %v793_v46 = vld [vmem:[#allocation4 + $0x420] sm:$0xff]  ;;  %v826_v51 = vld [vmem:[#allocation4 + $0x528] sm:$0xff] }
 0x912   :  { %3930 = vmatpush.msrb.mxu1 %v852_v25  ;;  %3734 = vmatpush.msrb.mxu2 %v805_v12  ;;  %v780_v25 = vld [vmem:[#allocation4 + $0x3b8] sm:$0xff]  ;;  %v742_v12 = vld [vmem:[#allocation4 + $0x288] sm:$0xff] }
 0x913   :  { %3800 = vmatpush.msra.mxu0 %v662_v0  ;;  %3764 = vmatpush.msrb.mxu3 %v835_v29  ;;  %v786_v0 = vld [vmem:[#allocation4 + $0x3e8] sm:$0xff] }
 0x914   :  { %3931 = vmatpush.msrb.mxu1 %v850_v62  ;;  %3735 = vmatpush.msrb.mxu2 %v803_v20  ;;  %v778_v62 = vld [vmem:[#allocation4 + $0x3a8] sm:$0xff] }
 0x915   :  { %3901 = vmatpush.msrb.mxu0 %v820_v6  ;;  %3765 = vmatpush.msrb.mxu3 %v833_v53  ;;  %v794_v6 = vld [vmem:[#allocation4 + $0x428] sm:$0xff] }
 0x916   :  { %3932 = vmatpush.msrb.mxu1 %v848_v56  ;;  %3736 = vmatpush.msrb.mxu2 %v801_v8  ;;  %v774_v29 = vld [vmem:[#allocation4 + $0x388] sm:$0xff] }
 0x917   :  { %3902 = vmatpush.msrb.mxu0 %v818_v37  ;;  %3766 = vmatpush.msrb.mxu3 %v831_v17  ;;  %v754_v37 = vld [vmem:[#allocation4 + $0x2e8] sm:$0xff] }
 0x918   :  { %3933 = vmatpush.msrb.mxu1 %v846_v10  ;;  %3737 = vmatpush.msrb.mxu2 %v799_v60  ;;  %v746_v53 = vld [vmem:[#allocation4 + $0x2a8] sm:$0xff]  ;;  %v772_v10 = vld [vmem:[#allocation4 + $0x378] sm:$0xff] }
 0x919   :  { %3903 = vmatpush.msrb.mxu0 %v816_v14  ;;  %3767 = vmatpush.msrb.mxu3 %v829_v47  ;;  %v752_v14 = vld [vmem:[#allocation4 + $0x2d8] sm:$0xff]  ;;  %v766_v20 = vld [vmem:[#allocation4 + $0x348] sm:$0xff] }
 0x91a   :  { %3934 = vmatpush.msrb.mxu1 %v844_v33  ;;  %3738 = vmatpush.msrb.mxu2 %v797_v57  ;;  %v744_v33 = vld [vmem:[#allocation4 + $0x298] sm:$0xff]  ;;  %v738_v8 = vld [vmem:[#allocation4 + $0x268] sm:$0xff] }
 0x91b   :  { %3904 = vmatpush.msrb.mxu0 %v814_v38  ;;  %3768 = vmatpush.msrb.mxu3 %v827_v9  ;;  %v750_v38 = vld [vmem:[#allocation4 + $0x2c8] sm:$0xff]  ;;  %v764_v9 = vld [vmem:[#allocation4 + $0x338] sm:$0xff] }
 0x91c   :  { %3935 = vmatpush.msrb.mxu1 %v842_v22  ;;  %3739 = vmatpush.msrb.mxu2 %v795_v26  ;;  %v768_v22 = vld [vmem:[#allocation4 + $0x358] sm:$0xff] }
 0x91d   :  { %3905 = vmatpush.msrb.mxu0 %v812_v50  ;;  %3769 = vmatpush.msrb.mxu3 %v825_v44  ;;  %v790_v50 = vld [vmem:[#allocation4 + $0x408] sm:$0xff]  ;;  %v736_v60 = vld [vmem:[#allocation4 + $0x258] sm:$0xff] }
 0x91e   :  { %3936 = vmatpush.msrb.mxu1 %v840_v48  ;;  %3740 = vmatpush.msrb.mxu2 %v793_v46  ;;  %v740_v48 = vld [vmem:[#allocation4 + $0x278] sm:$0xff]  ;;  %v762_v44 = vld [vmem:[#allocation4 + $0x328] sm:$0xff] }
 0x91f   :  { %3906 = vmatpush.msrb.mxu0 %v810_v54  ;;  %3770 = vmatpush.msrb.mxu3 %v823_v43  ;;  %v824_v54 = vld [vmem:[#allocation4 + $0x518] sm:$0xff]  ;;  %v758_v43 = vld [vmem:[#allocation4 + $0x308] sm:$0xff] }
 0x920   :  { %3937 = vmatpush.msrb.mxu1 %v838_v40  ;;  %3741 = vmatpush.msrb.mxu2 %v791_v1  ;;  %v734_v40 = vld [vmem:[#allocation4 + $0x248] sm:$0xff]  ;;  %v728_v26 = vld [vmem:[#allocation4 + $0x218] sm:$0xff] }
 0x921   :  { %3907 = vmatpush.msrb.mxu0 %v808_v18  ;;  %3771 = vmatpush.msrb.mxu3 %v821_v24  ;;  %v770_v18 = vld [vmem:[#allocation4 + $0x368] sm:$0xff] }
 0x922   :  { %3938 = vmatpush.msrb.mxu1 %v836_v21  ;;  %3742 = vmatpush.msrb.mxu2 %v789_v28  ;;  %v760_v21 = vld [vmem:[#allocation4 + $0x318] sm:$0xff]  ;;  %v1083_v28 = vld [vmem:[#allocation22 + $0xf8] sm:$0xff] }
 0x923   :  { %3908 = vmatpush.msrb.mxu0 %v806_v15  ;;  %v822_v15 = vld [vmem:[#allocation4 + $0x508] sm:$0xff] }
 0x924   :  { %3939 = vmatpush.msrb.mxu1 %v834_v23  ;;  %v730_v23 = vld [vmem:[#allocation4 + $0x228] sm:$0xff] }
 0x925   :  { %3909 = vmatpush.msrb.mxu0 %v804_v49 }
 0x926   :  { %3940 = vmatpush.msrb.mxu1 %v832_v63 }
 0x927   :  { %3910 = vmatpush.msrb.mxu0 %v802_v45 }
 0x928   :  { %3941 = vmatpush.msrb.mxu1 %v830_v36  ;;  %v1070_v36 = vld [vmem:[#allocation22 + $0x90] sm:$0xff] }
 0x929   :  { %3911 = vmatpush.msrb.mxu0 %v800_v39  ;;  %v732_v39 = vld [vmem:[#allocation4 + $0x238] sm:$0xff] }
 0x92a   :  { %3942 = vmatpush.msrb.mxu1 %v828_v27 }
 0x92b   :  { %3912 = vmatpush.msrb.mxu0 %v798_v31 }
 0x92c   :  { %3943 = vmatpush.msrb.mxu1 %v826_v51  ;;  %v1060_v51 = vld [vmem:[#allocation22 + $0x40] sm:$0xff] }
 0x92d   :  { %3913 = vmatpush.msrb.mxu0 %v796_v59  ;;  %v1072_v59 = vld [vmem:[#allocation22 + $0xa0] sm:$0xff] }
 0x92e   :  { %3944 = vmatpush.msrb.mxu1 %v824_v54  ;;  %v1057_v54 = vld [vmem:[#allocation22 + $0x28] sm:$0xff] }
 0x92f   :  { %3914 = vmatpush.msrb.mxu0 %v794_v6  ;;  %v1069_v6 = vld [vmem:[#allocation22 + $0x88] sm:$0xff] }
 0x930   :  { %3945 = vmatpush.msrb.mxu1 %v822_v15  ;;  %v1053_v15 = vld [vmem:[#allocation22 + $0x8] sm:$0xff] }
 0x931   :  { %3915 = vmatpush.msrb.mxu0 %v792_v58  ;;  %v1064_v58 = vld [vmem:[#allocation22 + $0x60] sm:$0xff] }
 0x933   :  { %3916 = vmatpush.msrb.mxu0 %v790_v50  ;;  %v1058_v50 = vld [vmem:[#allocation22 + $0x30] sm:$0xff] }
 0x94a   :  { %v3594_v49 = vpop.f32.mrf.mxu1 }
 0x94f   :  { %v3524_v32 = vpop.f32.mrf.mxu3  ;;  %v3565_v57 = vpop.f32.mrf.mxu0 }
 0x950   :  { %3656 = vmatmul.f32.vlgmr.msra.gmra.mxu3 %v3524_v32  ;;  %3830 = vmatmul.f32.vlgmr.msra.gmra.mxu1 %v3524_v32  ;;  %v726_v32 = vld [vmem:[#allocation4 + $0x208] sm:$0xff] }
 0x951   :  { %3872 = vmatpush.msra.mxu3 %v788_v35 }
 0x952   :  { %v3597_v24 = vpop.f32.mrf.mxu1 }
 0x953   :  { %3873 = vmatpush.msra.mxu3 %v786_v0  ;;  %v1082_v0 = vld [vmem:[#allocation22 + $0xf0] sm:$0xff] }
 0x954   :  { %v3495_v7 = vpop.f32.mrf.mxu2 }
 0x955   :  { %3627 = vmatmul.f32.vlgmr.msra.gmra.mxu2 %v3495_v7  ;;  %3801 = vmatmul.f32.vlgmr.msra.gmra.mxu0 %v3495_v7  ;;  %v1078_v7 = vld [vmem:[#allocation22 + $0xd0] sm:$0xff] }
 0x956   :  { %3874 = vmatpush.msra.mxu3 %v784_v5  ;;  %3843 = vmatpush.msra.mxu2 %v756_v34  ;;  %v1080_v5 = vld [vmem:[#allocation22 + $0xe0] sm:$0xff]  ;;  %v1073_v34 = vld [vmem:[#allocation22 + $0xa8] sm:$0xff] }
 0x957   :  { %v3527_v52 = vpop.f32.mrf.mxu3  ;;  %v3568_v31 = vpop.f32.mrf.mxu0  ;;  %4025 = vmatpush.msra.mxu0 %v1083_v28 }
 0x958   :  { %3659 = vmatmul.f32.gmra.mxu3 %v3527_v52  ;;  %3844 = vmatpush.msra.mxu2 %v754_v37  ;;  %v1066_v37 = vld [vmem:[#allocation22 + $0x70] sm:$0xff] }
 0x959   :  { %3875 = vmatpush.msra.mxu3 %v782_v11  ;;  %3833 = vmatmul.f32.gmra.mxu1 %v3527_v52  ;;  %v1071_v11 = vld [vmem:[#allocation22 + $0x98] sm:$0xff]  ;;  %v1068_v52 = vld [vmem:[#allocation22 + $0x80] sm:$0xff] }
 0x95a   :  { %3845 = vmatpush.msra.mxu2 %v752_v14  ;;  %v3600_v46 = vpop.f32.mrf.mxu1 }
 0x95b   :  { %3876 = vmatpush.msra.mxu3 %v780_v25  ;;  %v1067_v25 = vld [vmem:[#allocation22 + $0x78] sm:$0xff] }
 0x95c   :  { %v3498_v56 = vpop.f32.mrf.mxu2  ;;  %3846 = vmatpush.msra.mxu2 %v750_v38  ;;  %v1062_v38 = vld [vmem:[#allocation22 + $0x50] sm:$0xff] }
 0x95d   :  { %3630 = vmatmul.f32.gmra.mxu2 %v3498_v56  ;;  %3877 = vmatpush.msra.mxu3 %v778_v62  ;;  %v1065_v62 = vld [vmem:[#allocation22 + $0x68] sm:$0xff] }
 0x95e   :  { %3804 = vmatmul.f32.gmra.mxu0 %v3498_v56  ;;  %3847 = vmatpush.msra.mxu2 %v748_v2  ;;  %v1061_v2 = vld [vmem:[#allocation22 + $0x48] sm:$0xff] }
 0x95f   :  { %v3530_v61 = vpop.f32.mrf.mxu3  ;;  %3878 = vmatpush.msra.mxu3 %v776_v55  ;;  %v3571_v35 = vpop.f32.mrf.mxu0  ;;  %v1063_v55 = vld [vmem:[#allocation22 + $0x58] sm:$0xff] }
 0x960   :  { %3662 = vmatmul.f32.gmra.mxu3 %v3530_v61  ;;  %3848 = vmatpush.msra.mxu2 %v746_v53 }
 0x961   :  { %3879 = vmatpush.msra.mxu3 %v774_v29  ;;  %3836 = vmatmul.f32.gmra.mxu1 %v3530_v61  ;;  %v1059_v61 = vld [vmem:[#allocation22 + $0x38] sm:$0xff] }
 0x962   :  { %3849 = vmatpush.msra.mxu2 %v744_v33  ;;  %v3603_v63 = vpop.f32.mrf.mxu1 }
 0x963   :  { %3880 = vmatpush.msra.mxu3 %v772_v10  ;;  %v1056_v10 = vld [vmem:[#allocation22 + $0x20] sm:$0xff] }
 0x964   :  { %v3501_v17 = vpop.f32.mrf.mxu2  ;;  %3850 = vmatpush.msra.mxu2 %v742_v12  ;;  %v1055_v12 = vld [vmem:[#allocation22 + $0x18] sm:$0xff] }
 0x965   :  { %3633 = vmatmul.f32.gmra.mxu2 %v3501_v17  ;;  %3881 = vmatpush.msra.mxu3 %v770_v18  ;;  %v1054_v18 = vld [vmem:[#allocation22 + $0x10] sm:$0xff] }
 0x966   :  { %3807 = vmatmul.f32.gmra.mxu0 %v3501_v17  ;;  %3851 = vmatpush.msra.mxu2 %v740_v48  ;;  %v1052_v17 = vld [vmem:[#allocation22] sm:$0xff] }
 0x967   :  { %v3533_v47 = vpop.f32.mrf.mxu3  ;;  %3882 = vmatpush.msra.mxu3 %v768_v22  ;;  %v3574_v1 = vpop.f32.mrf.mxu0 }
 0x968   :  { %3665 = vmatmul.f32.gmra.mxu3 %v3533_v47  ;;  %3852 = vmatpush.msra.mxu2 %v738_v8  ;;  %v1115_v8 = vld [vmem:[#allocation22 + $0x1f8] sm:$0xff] }
 0x969   :  { %3883 = vmatpush.msra.mxu3 %v766_v20  ;;  %3839 = vmatmul.f32.gmra.mxu1 %v3533_v47  ;;  %v1114_v47 = vld [vmem:[#allocation22 + $0x1f0] sm:$0xff] }
 0x96a   :  { %3853 = vmatpush.msra.mxu2 %v736_v60  ;;  %v7359_v60 = vld [vmem:[#allocation6] sm:$0x3]  ;;  %4054 = vmatpush.msra.mxu1 %v1115_v8 }
 0x96b   :  { %3884 = vmatpush.msra.mxu3 %v764_v9  ;;  %v1112_v9 = vld [vmem:[#allocation22 + $0x1e0] sm:$0xff] }
 0x96c   :  { %v3504_v45 = vpop.f32.mrf.mxu2  ;;  %3854 = vmatpush.msra.mxu2 %v734_v40  ;;  %v7362_v40 = vperm.slane %v7359_v60, 0 }
 0x96d   :  { %3636 = vmatmul.f32.gmra.mxu2 %v3504_v45  ;;  %3885 = vmatpush.msra.mxu3 %v762_v44  ;;  %v1113_v44 = vld [vmem:[#allocation22 + $0x1e8] sm:$0xff] }
 0x96e   :  { %3810 = vmatmul.f32.gmra.mxu0 %v3504_v45  ;;  %3855 = vmatpush.msra.mxu2 %v732_v39  ;;  %v1110_v39 = vld [vmem:[#allocation22 + $0x1d0] sm:$0xff] }
 0x96f   :  { %3886 = vmatpush.msra.mxu3 %v760_v21  ;;  %4055 = vmatpush.msra.mxu1 %v1113_v44  ;;  %v1084_v44 = vld [vmem:[#allocation22 + $0x100] sm:$0xff] }
 0x970   :  { %3772 = vmatmul.f32.vlgmr.msrb.gmra.mxu3 %v3594_v49  ;;  %3856 = vmatpush.msra.mxu2 %v730_v23 }
 0x971   :  { %3887 = vmatpush.msra.mxu3 %v758_v43  ;;  %3946 = vmatmul.f32.vlgmr.msrb.gmra.mxu1 %v3594_v49 }
 0x972   :  { %3857 = vmatpush.msra.mxu2 %v728_v26  ;;  %v1108_v26 = vld [vmem:[#allocation22 + $0x1c0] sm:$0xff] }
 0x973   :  { %3996 = vmatpush.msrb.mxu3 %v1114_v47 }
 0x974   :  { %3858 = vmatpush.msra.mxu2 %v726_v32  ;;  %v1106_v32 = vld [vmem:[#allocation22 + $0x1b0] sm:$0xff] }
 0x975   :  { %3743 = vmatmul.f32.vlgmr.msrb.gmra.mxu2 %v3565_v57  ;;  %3997 = vmatpush.msrb.mxu3 %v1112_v9 }
 0x976   :  { %3917 = vmatmul.f32.vlgmr.msrb.gmra.mxu0 %v3565_v57  ;;  %3967 = vmatpush.msrb.mxu2 %v1082_v0  ;;  %v1111_v57 = vld [vmem:[#allocation22 + $0x1d8] sm:$0xff] }
 0x977   :  { %3998 = vmatpush.msrb.mxu3 %v1110_v39  ;;  %4056 = vmatpush.msra.mxu1 %v1111_v57 }
 0x978   :  { %3775 = vmatmul.f32.gmra.mxu3 %v3597_v24  ;;  %3968 = vmatpush.msrb.mxu2 %v1080_v5  ;;  %v1102_v5 = vld [vmem:[#allocation22 + $0x190] sm:$0xff] }
 0x979   :  { %3949 = vmatmul.f32.gmra.mxu1 %v3597_v24  ;;  %v1109_v24 = vld [vmem:[#allocation22 + $0x1c8] sm:$0xff]  ;;  %3999 = vmatpush.msrb.mxu3 %v1108_v26 }
 0x97a   :  { %3969 = vmatpush.msrb.mxu2 %v1078_v7  ;;  %4057 = vmatpush.msra.mxu1 %v1109_v24 }
 0x97b   :  { %4000 = vmatpush.msrb.mxu3 %v1106_v32 }
 0x97d   :  { %3746 = vmatmul.f32.gmra.mxu2 %v3568_v31 }
 0x97e   :  { %3920 = vmatmul.f32.gmra.mxu0 %v3568_v31  ;;  %v1107_v31 = vld [vmem:[#allocation22 + $0x1b8] sm:$0xff] }
 0x97f   :  { %4058 = vmatpush.msra.mxu1 %v1107_v31 }
 0x980   :  { %3778 = vmatmul.f32.gmra.mxu3 %v3600_v46 }
 0x981   :  { %3952 = vmatmul.f32.gmra.mxu1 %v3600_v46  ;;  %v1104_v46 = vld [vmem:[#allocation22 + $0x1a0] sm:$0xff] }
 0x982   :  { %4001 = vmatpush.msrb.mxu3 %v1104_v46 }
 0x984   :  { %4002 = vmatpush.msrb.mxu3 %v1102_v5 }
 0x985   :  { %3749 = vmatmul.f32.gmra.mxu2 %v3571_v35 }
 0x986   :  { %3923 = vmatmul.f32.gmra.mxu0 %v3571_v35 }
 0x988   :  { %3781 = vmatmul.f32.gmra.mxu3 %v3603_v63 }
 0x989   :  { %3955 = vmatmul.f32.gmra.mxu1 %v3603_v63  ;;  %v1105_v63 = vld [vmem:[#allocation22 + $0x1a8] sm:$0xff] }
 0x98a   :  { %4059 = vmatpush.msra.mxu1 %v1105_v63 }
 0x98d   :  { %3752 = vmatmul.f32.gmra.mxu2 %v3574_v1 }
 0x98e   :  { %3926 = vmatmul.f32.gmra.mxu0 %v3574_v1 }
 0x990   :  { %3888 = vmatmul.f32.vlgmr.msra.gmra.mxu3 %v7275_v13  ;;  %v1081_v13 = vld [vmem:[#allocation22 + $0xe8] sm:$0xff] }
 0x991   :  { %4026 = vmatpush.msra.mxu0 %v1081_v13  ;;  %v1103_v13 = vld [vmem:[#allocation22 + $0x198] sm:$0xff] }
 0x992   :  { %4060 = vmatpush.msra.mxu1 %v1103_v13 }
 0x995   :  { %3859 = vmatmul.f32.vlgmr.msra.gmra.mxu2 %v7277_v30  ;;  %v1079_v30 = vld [vmem:[#allocation22 + $0xd8] sm:$0xff] }
 0x996   :  { %4027 = vmatpush.msra.mxu0 %v1079_v30 }
 0x998   :  { %3891 = vmatmul.f32.gmra.mxu3 %v7281_v3  ;;  %v1076_v3 = vld [vmem:[#allocation22 + $0xc0] sm:$0xff] }
 0x999   :  { %3970 = vmatpush.msrb.mxu2 %v1076_v3 }
 0x99d   :  { %3862 = vmatmul.f32.gmra.mxu2 %v7287_v19  ;;  %v1077_v19 = vld [vmem:[#allocation22 + $0xc8] sm:$0xff] }
 0x99e   :  { %4028 = vmatpush.msra.mxu0 %v1077_v19  ;;  %v1100_v19 = vld [vmem:[#allocation22 + $0x180] sm:$0xff] }
 0x99f   :  { %4003 = vmatpush.msrb.mxu3 %v1100_v19 }
 0x9a0   :  { %3894 = vmatmul.f32.gmra.mxu3 %v7291_v41  ;;  %v7339_v41 = vpop.f32.mrf.mxu0 }
 0x9a5   :  { %3865 = vmatmul.f32.gmra.mxu2 %v7298_v42  ;;  %v7341_v42 = vpop.f32.mrf.mxu1 }
 0x9a8   :  { %3897 = vmatmul.f32.gmra.mxu3 %v7279_v4  ;;  %v1074_v4 = vld [vmem:[#allocation22 + $0xb0] sm:$0xff]  ;;  %v7343_v14 = vpop.f32.mrf.mxu0 }
 0x9a9   :  { %3971 = vmatpush.msrb.mxu2 %v1074_v4  ;;  %v1101_v4 = vld [vmem:[#allocation22 + $0x188] sm:$0xff] }
 0x9aa   :  { %4061 = vmatpush.msra.mxu1 %v1101_v4 }
 0x9ab   :  { %3972 = vmatpush.msrb.mxu2 %v1072_v59  ;;  %v1099_v59 = vld [vmem:[#allocation22 + $0x178] sm:$0xff] }
 0x9ac   :  { %4062 = vmatpush.msra.mxu1 %v1099_v59 }
 0x9ad   :  { %3868 = vmatmul.f32.gmra.mxu2 %v7285_v16  ;;  %v1075_v16 = vld [vmem:[#allocation22 + $0xb8] sm:$0xff]  ;;  %v7347_v56 = vpop.f32.mrf.mxu1 }
 0x9ae   :  { %4029 = vmatpush.msra.mxu0 %v1075_v16  ;;  %3973 = vmatpush.msrb.mxu2 %v1070_v36  ;;  %v1098_v16 = vld [vmem:[#allocation22 + $0x170] sm:$0xff]  ;;  %v1097_v36 = vld [vmem:[#allocation22 + $0x168] sm:$0xff] }
 0x9af   :  { %4004 = vmatpush.msrb.mxu3 %v1098_v16  ;;  %4063 = vmatpush.msra.mxu1 %v1097_v36 }
 0x9b0   :  { %4030 = vmatpush.msra.mxu0 %v1073_v34  ;;  %3974 = vmatpush.msrb.mxu2 %v1068_v52  ;;  %v7351_v33 = vpop.f32.mrf.mxu0  ;;  %v1096_v34 = vld [vmem:[#allocation22 + $0x160] sm:$0xff] }
 0x9b1   :  { %4005 = vmatpush.msrb.mxu3 %v1096_v34 }
 0x9b2   :  { %4031 = vmatpush.msra.mxu0 %v1071_v11  ;;  %3975 = vmatpush.msrb.mxu2 %v1066_v37 }
 0x9b4   :  { %4032 = vmatpush.msra.mxu0 %v1069_v6  ;;  %3976 = vmatpush.msrb.mxu2 %v1064_v58 }
 0x9b5   :  { %v7353_v22 = vpop.f32.mrf.mxu1 }
 0x9b6   :  { %4033 = vmatpush.msra.mxu0 %v1067_v25  ;;  %3977 = vmatpush.msrb.mxu2 %v1062_v38  ;;  %v1094_v25 = vld [vmem:[#allocation22 + $0x150] sm:$0xff] }
 0x9b7   :  { %4006 = vmatpush.msrb.mxu3 %v1094_v25 }
 0x9b8   :  { %4034 = vmatpush.msra.mxu0 %v1065_v62  ;;  %3978 = vmatpush.msrb.mxu2 %v1060_v51  ;;  %v7357_v49 = vpop.f32.mrf.mxu0 }
 0x9ba   :  { %4035 = vmatpush.msra.mxu0 %v1063_v55  ;;  %3979 = vmatpush.msrb.mxu2 %v1058_v50  ;;  %v1090_v50 = vld [vmem:[#allocation22 + $0x130] sm:$0xff] }
 0x9bc   :  { %4036 = vmatpush.msra.mxu0 %v1061_v2  ;;  %3980 = vmatpush.msrb.mxu2 %v1056_v10  ;;  %v1092_v2 = vld [vmem:[#allocation22 + $0x140] sm:$0xff] }
 0x9bd   :  { %v7364_v45 = vpop.f32.mrf.mxu1  ;;  %4007 = vmatpush.msrb.mxu3 %v1092_v2 }
 0x9be   :  { %4037 = vmatpush.msra.mxu0 %v1059_v61  ;;  %3981 = vmatpush.msrb.mxu2 %v1054_v18  ;;  %v1091_v61 = vld [vmem:[#allocation22 + $0x138] sm:$0xff] }
 0x9bf   :  { %4008 = vmatpush.msrb.mxu3 %v1090_v50 }
 0x9c0   :  { %4038 = vmatpush.msra.mxu0 %v1057_v54  ;;  %3982 = vmatpush.msrb.mxu2 %v1052_v17  ;;  %v1088_v54 = vld [vmem:[#allocation22 + $0x120] sm:$0xff]  ;;  %v1086_v17 = vld [vmem:[#allocation22 + $0x110] sm:$0xff] }
 0x9c1   :  { %4009 = vmatpush.msrb.mxu3 %v1088_v54 }
 0x9c2   :  { %4039 = vmatpush.msra.mxu0 %v1055_v12 }
 0x9c3   :  { %4010 = vmatpush.msrb.mxu3 %v1086_v17 }
 0x9c4   :  { %4040 = vmatpush.msra.mxu0 %v1053_v15  ;;  %v1087_v15 = vld [vmem:[#allocation22 + $0x118] sm:$0xff] }
 0x9c5   :  { %4011 = vmatpush.msrb.mxu3 %v1084_v44 }
 0x9cd   :  { %v7372_v28 = vpop.f32.mrf.mxu1 }
 0x9d2   :  { %v7369_v35 = vpop.f32.mrf.mxu0 }
 0x9d3   :  { %v7345_v27 = vpop.f32.mrf.mxu3 }
 0x9d6   :  { %v7380_v58 = vpop.f32.mrf.mxu1 }
 0x9d8   :  { %v3628_v29 = vpop.f32.mrf.mxu2 }
 0x9d9   :  { %v3629_v43 = vadd.f32 %v3628_v29, %v7362_v40 }
 0x9db   :  { %v7349_v53 = vpop.f32.mrf.mxu3  ;;  %v3658_v1 = vadd.f32 %v7345_v27, %v3629_v43  ;;  %v7378_v37 = vpop.f32.mrf.mxu0  ;;  %v1095_v27 = vld [vmem:[#allocation22 + $0x158] sm:$0xff] }
 0x9dc   :  { %4064 = vmatpush.msra.mxu1 %v1095_v27 }
 0x9dd   :  { %v3687_v3 = vadd.f32 %v7339_v41, %v3658_v1  ;;  %v3608_v1 = vperm.slane %v7359_v60, 1 }
 0x9df   :  { %v3716_v52 = vadd.f32 %v7341_v42, %v3687_v3  ;;  %v1093_v42 = vld [vmem:[#allocation22 + $0x148] sm:$0xff]  ;;  %v3803_v5 = vadd.f32 %v7369_v35, %v3608_v1 }
 0x9e0   :  { %v3631_v48 = vpop.f32.mrf.mxu2  ;;  %4065 = vmatpush.msra.mxu1 %v1093_v42 }
 0x9e1   :  { %v3632_v7 = vadd.f32 %v3631_v48, %v7362_v40  ;;  %v3832_v3 = vadd.f32 %v7372_v28, %v3803_v5 }
 0x9e2   :  { %4066 = vmatpush.msra.mxu1 %v1091_v61 }
 0x9e3   :  { %v7355_v20 = vpop.f32.mrf.mxu3  ;;  %v3661_v11 = vadd.f32 %v7349_v53, %v3632_v7  ;;  %v3808_v48 = vpop.f32.mrf.mxu0 }
 0x9e4   :  { %v3809_v25 = vadd.f32 %v3808_v48, %v3608_v1 }
 0x9e5   :  { %v3690_v51 = vadd.f32 %v7343_v14, %v3661_v11  ;;  %v1089_v14 = vld [vmem:[#allocation22 + $0x128] sm:$0xff] }
 0x9e6   :  { %4067 = vmatpush.msra.mxu1 %v1089_v14 }
 0x9e7   :  { %v3719_v10 = vadd.f32 %v7347_v56, %v3690_v51  ;;  %v3837_v56 = vpop.f32.mrf.mxu1 }
 0x9e8   :  { %v3634_v21 = vpop.f32.mrf.mxu2  ;;  %4068 = vmatpush.msra.mxu1 %v1087_v15 }
 0x9e9   :  { %v3635_v62 = vadd.f32 %v3634_v21, %v7362_v40  ;;  %v1085_v21 = vld [vmem:[#allocation22 + $0x108] sm:$0xff] }
 0x9ea   :  { %4069 = vmatpush.msra.mxu1 %v1085_v21 }
 0x9eb   :  { %v7367_v23 = vpop.f32.mrf.mxu3  ;;  %v3664_v53 = vadd.f32 %v7355_v20, %v3635_v62  ;;  %v3811_v31 = vpop.f32.mrf.mxu0 }
 0x9ec   :  { %v3812_v50 = vadd.f32 %v3811_v31, %v3608_v1 }
 0x9ed   :  { %v3693_v9 = vadd.f32 %v7351_v33, %v3664_v53 }
 0x9ef   :  { %v3722_v43 = vadd.f32 %v7353_v22, %v3693_v9  ;;  %v3840_v63 = vpop.f32.mrf.mxu1 }
 0x9f0   :  { %v3637_v0 = vpop.f32.mrf.mxu2  ;;  %v3841_v54 = vadd.f32 %v3840_v63, %v3812_v50 }
 0x9f1   :  { %v3638_v47 = vadd.f32 %v3637_v0, %v7362_v40 }
 0x9f3   :  { %v3773_v30 = vpop.f32.mrf.mxu3  ;;  %v3667_v57 = vadd.f32 %v7367_v23, %v3638_v47 }
 0x9f5   :  { %v3696_v33 = vadd.f32 %v7357_v49, %v3667_v57  ;;  %v3918_v49 = vpop.f32.mrf.mxu0 }
 0x9f7   :  { %v3725_v23 = vadd.f32 %v7364_v45, %v3696_v33  ;;  %v3947_v19 = vpop.f32.mrf.mxu1  ;;  %v3806_v45 = vadd.f32 %v7378_v37, %v3608_v1  ;;  %v3838_v37 = vadd.f32 %v3837_v56, %v3809_v25 }
 0x9f8   :  { %v3744_v6 = vpop.f32.mrf.mxu2 }
 0x9f9   :  { %v3745_v41 = vadd.f32 %v3744_v6, %v3716_v52  ;;  %v3835_v35 = vadd.f32 %v7380_v58, %v3806_v45 }
 0x9fb   :  { %v3774_v38 = vadd.f32 %v3773_v30, %v3745_v41  ;;  %v3776_v55 = vpop.f32.mrf.mxu3 }
 0x9fd   :  { %v7384_v29 = vmax.f32 %v3774_v38, 0.0  ;;  %v3921_v52 = vpop.f32.mrf.mxu0 }
 0x9ff   :  { %3983 = vmatmul.f32.vlgmr.msrb.gmra.mxu2 %v7384_v29  ;;  %4041 = vmatmul.f32.vlgmr.msra.gmra.mxu0 %v7384_v29  ;;  %v3950_v41 = vpop.f32.mrf.mxu1 }
 0xa00   :  { %v3747_v18 = vpop.f32.mrf.mxu2 }
 0xa01   :  { %v3748_v12 = vadd.f32 %v3747_v18, %v3719_v10 }
 0xa03   :  { %v3777_v20 = vadd.f32 %v3776_v55, %v3748_v12  ;;  %v3779_v8 = vpop.f32.mrf.mxu3 }
 0xa05   :  { %v7392_v39 = vmax.f32 %v3777_v20, 0.0  ;;  %v3924_v42 = vpop.f32.mrf.mxu0 }
 0xa07   :  { %3986 = vmatmul.f32.gmra.mxu2 %v7392_v39  ;;  %4044 = vmatmul.f32.gmra.mxu0 %v7392_v39  ;;  %v3953_v53 = vpop.f32.mrf.mxu1 }
 0xa08   :  { %v3750_v40 = vpop.f32.mrf.mxu2 }
 0xa09   :  { %v3751_v26 = vadd.f32 %v3750_v40, %v3722_v43 }
 0xa0b   :  { %v3780_v24 = vadd.f32 %v3779_v8, %v3751_v26  ;;  %v3782_v32 = vpop.f32.mrf.mxu3 }
 0xa0d   :  { %v7399_v46 = vmax.f32 %v3780_v24, 0.0  ;;  %v3927_v47 = vpop.f32.mrf.mxu0 }
 0xa0f   :  { %3989 = vmatmul.f32.gmra.mxu2 %v7399_v46  ;;  %4047 = vmatmul.f32.gmra.mxu0 %v7399_v46  ;;  %v3956_v8 = vpop.f32.mrf.mxu1 }
 0xa10   :  { %v3753_v0 = vpop.f32.mrf.mxu2 }
 0xa11   :  { %v3754_v22 = vadd.f32 %v3753_v0, %v3725_v23 }
 0xa13   :  { %v3783_v13 = vadd.f32 %v3782_v32, %v3754_v22  ;;  %v3889_v7 = vpop.f32.mrf.mxu3 }
 0xa15   :  { %v7406_v30 = vmax.f32 %v3783_v13, 0.0 }
 0xa17   :  { %3992 = vmatmul.f32.gmra.mxu2 %v7406_v30  ;;  %4050 = vmatmul.f32.gmra.mxu0 %v7406_v30 }
 0xa18   :  { %v3860_v60 = vpop.f32.mrf.mxu2 }
 0xa19   :  { %v3861_v4 = vadd.f32 %v3860_v60, %v3832_v3 }
 0xa1b   :  { %v3890_v16 = vadd.f32 %v3889_v7, %v3861_v4  ;;  %v3892_v34 = vpop.f32.mrf.mxu3 }
 0xa1d   :  { %v3919_v59 = vadd.f32 %v3918_v49, %v3890_v16 }
 0xa1f   :  { %v3948_v36 = vadd.f32 %v3947_v19, %v3919_v59 }
 0xa20   :  { %v3863_v11 = vpop.f32.mrf.mxu2 }
 0xa21   :  { %v7413_v6 = vmax.f32 %v3948_v36, 0.0  ;;  %v3864_v28 = vadd.f32 %v3863_v11, %v3835_v35 }
 0xa23   :  { %4012 = vmatmul.f32.vlgmr.msrb.gmra.mxu3 %v7413_v6  ;;  %4070 = vmatmul.f32.vlgmr.msra.gmra.mxu1 %v7413_v6  ;;  %v3893_v27 = vadd.f32 %v3892_v34, %v3864_v28  ;;  %v3895_v55 = vpop.f32.mrf.mxu3 }
 0xa25   :  { %v3922_v62 = vadd.f32 %v3921_v52, %v3893_v27  ;;  %v4714_v52 = vld [vmem:[#allocation16] sm:$0xff] }
 0xa27   :  { %v3951_v38 = vadd.f32 %v3950_v41, %v3922_v62 }
 0xa28   :  { %v3866_v51 = vpop.f32.mrf.mxu2 }
 0xa29   :  { %v3962_v2 = vmax.f32 %v3951_v38, 0.0  ;;  %v3867_v58 = vadd.f32 %v3866_v51, %v3838_v37 }
 0xa2b   :  { %4015 = vmatmul.f32.gmra.mxu3 %v3962_v2  ;;  %4073 = vmatmul.f32.gmra.mxu1 %v3962_v2  ;;  %v3896_v61 = vadd.f32 %v3895_v55, %v3867_v58  ;;  %v3898_v15 = vpop.f32.mrf.mxu3 }
 0xa2d   :  { %v3925_v10 = vadd.f32 %v3924_v42, %v3896_v61  ;;  %v922_v61 = vld [vmem:[#allocation18] sm:$0xff] }
 0xa2f   :  { %v3954_v14 = vadd.f32 %v3953_v53, %v3925_v10 }
 0xa30   :  { %v3869_v18 = vpop.f32.mrf.mxu2 }
 0xa31   :  { %v3964_v12 = vmax.f32 %v3954_v14, 0.0  ;;  %v3870_v17 = vadd.f32 %v3869_v18, %v3841_v54  ;;  %v923_v14 = vld [vmem:[#allocation18 + $0x8] sm:$0xff]  ;;  %v1148_v18 = vld [vmem:[#allocation24 + $0xf0] sm:$0xff] }
 0xa33   :  { %4018 = vmatmul.f32.gmra.mxu3 %v3964_v12  ;;  %4076 = vmatmul.f32.gmra.mxu1 %v3964_v12  ;;  %v3899_v48 = vadd.f32 %v3898_v15, %v3870_v17  ;;  %v1180_v17 = vld [vmem:[#allocation24 + $0x1f0] sm:$0xff] }
 0xa34   :  { %v1144_v15 = vld [vmem:[#allocation24 + $0xd0] sm:$0xff] }
 0xa35   :  { %v3928_v20 = vadd.f32 %v3927_v47, %v3899_v48  ;;  %v1178_v48 = vld [vmem:[#allocation24 + $0x1e0] sm:$0xff] }
 0xa36   :  { %v1142_v47 = vld [vmem:[#allocation24 + $0xc0] sm:$0xff] }
 0xa37   :  { %v3957_v9 = vadd.f32 %v3956_v8, %v3928_v20  ;;  %v1176_v20 = vld [vmem:[#allocation24 + $0x1d0] sm:$0xff] }
 0xa39   :  { %v3966_v44 = vmax.f32 %v3957_v9, 0.0  ;;  %v1174_v9 = vld [vmem:[#allocation24 + $0x1c0] sm:$0xff] }
 0xa3b   :  { %4021 = vmatmul.f32.gmra.mxu3 %v3966_v44  ;;  %4079 = vmatmul.f32.gmra.mxu1 %v3966_v44 }
 0xa7c   :  { %v4042_v21 = vpop.f32.mrf.mxu0 }
 0xa82   :  { %v3984_v56 = vpop.f32.mrf.mxu2 }
 0xa84   :  { %v4045_v43 = vpop.f32.mrf.mxu0 }
 0xa8a   :  { %v3987_v24 = vpop.f32.mrf.mxu2 }
 0xa8c   :  { %v4048_v32 = vpop.f32.mrf.mxu0 }
 0xa92   :  { %v3990_v63 = vpop.f32.mrf.mxu2 }
 0xa94   :  { %v4051_v23 = vpop.f32.mrf.mxu0 }
 0xa9a   :  { %v3993_v60 = vpop.f32.mrf.mxu2 }
 0xaa0   :  { %v4071_v57 = vpop.f32.mrf.mxu1 }
 0xaa1   :  { %v4072_v49 = vadd.f32 %v4071_v57, %v4042_v21  ;;  %v1172_v21 = vld [vmem:[#allocation24 + $0x1b0] sm:$0xff]  ;;  %v1170_v57 = vld [vmem:[#allocation24 + $0x1a0] sm:$0xff] }
 0xaa3   :  { %v4084_v59 = vmax.f32 %v7413_v6, %v4072_v49  ;;  %v4715_v6 = vld [vmem:[#allocation16 + $0x8] sm:$0xff]  ;;  %v1126_v49 = vld [vmem:[#allocation24 + $0x40] sm:$0xff] }
 0xaa6   :  { %v4013_v40 = vpop.f32.mrf.mxu3 }
 0xaa7   :  { %v4014_v36 = vadd.f32 %v4013_v40, %v3984_v56  ;;  %v1138_v56 = vld [vmem:[#allocation24 + $0xa0] sm:$0xff] }
 0xaa8   :  { %v4074_v26 = vpop.f32.mrf.mxu1 }
 0xaa9   :  { %v4075_v13 = vadd.f32 %v4074_v26, %v4045_v43  ;;  %v4083_v41 = vmax.f32 %v7384_v29, %v4014_v36  ;;  %v1136_v43 = vld [vmem:[#allocation24 + $0x90] sm:$0xff]  ;;  %v1122_v36 = vld [vmem:[#allocation24 + $0x20] sm:$0xff] }
 0xaaa   :  { %v1168_v26 = vld [vmem:[#allocation24 + $0x190] sm:$0xff] }
 0xaab   :  { %v4086_v4 = vmax.f32 %v3962_v2, %v4075_v13 }
 0xaae   :  { %v4016_v33 = vpop.f32.mrf.mxu3 }
 0xaaf   :  { %v4017_v34 = vadd.f32 %v4016_v33, %v3987_v24  ;;  %v1134_v24 = vld [vmem:[#allocation24 + $0x80] sm:$0xff] }
 0xab0   :  { %v4077_v31 = vpop.f32.mrf.mxu1  ;;  %v1166_v33 = vld [vmem:[#allocation24 + $0x180] sm:$0xff] }
 0xab1   :  { %v4078_v22 = vadd.f32 %v4077_v31, %v4048_v32  ;;  %v4085_v28 = vmax.f32 %v7392_v39, %v4017_v34  ;;  %v1132_v31 = vld [vmem:[#allocation24 + $0x70] sm:$0xff]  ;;  %v1158_v34 = vld [vmem:[#allocation24 + $0x140] sm:$0xff] }
 0xab3   :  { %v4088_v3 = vmax.f32 %v3964_v12, %v4078_v22  ;;  %v1146_v12 = vld [vmem:[#allocation24 + $0xe0] sm:$0xff]  ;;  %v1128_v22 = vld [vmem:[#allocation24 + $0x50] sm:$0xff] }
 0xab6   :  { %v4019_v1 = vpop.f32.mrf.mxu3 }
 0xab7   :  { %v4020_v45 = vadd.f32 %v4019_v1, %v3990_v63  ;;  %v1116_v63 = vld [vmem:[%s7562_s19] sm:$0xff] }
 0xab8   :  { %v4080_v0 = vpop.f32.mrf.mxu1  ;;  %v1164_v1 = vld [vmem:[#allocation24 + $0x170] sm:$0xff] }
 0xab9   :  { %v4081_v5 = vadd.f32 %v4080_v0, %v4051_v23  ;;  %v4087_v11 = vmax.f32 %v7399_v46, %v4020_v45  ;;  %v4716_v46 = vld [vmem:[#allocation16 + $0x10] sm:$0xff]  ;;  %v1244_v0 = vld [vmem:[#allocation24 + $0x3f0] sm:$0xff] }
 0xaba   :  { %v1130_v23 = vld [vmem:[#allocation24 + $0x60] sm:$0xff] }
 0xabb   :  { %v4090_v7 = vmax.f32 %v3966_v44, %v4081_v5  ;;  %v1140_v44 = vld [vmem:[#allocation24 + $0xb0] sm:$0xff]  ;;  %v1162_v5 = vld [vmem:[#allocation24 + $0x160] sm:$0xff] }
 0xabc   :  { %v1238_v45 = vld [vmem:[#allocation24 + $0x3c0] sm:$0xff] }
 0xabd   :  { %4132 = vmatpush.msra.mxu3 %v4090_v7 }
 0xabe   :  { %v4022_v19 = vpop.f32.mrf.mxu3 }
 0xabf   :  { %v4023_v16 = vadd.f32 %v4022_v19, %v3993_v60  ;;  %4133 = vmatpush.msra.mxu3 %v4088_v3  ;;  %v1160_v60 = vld [vmem:[#allocation24 + $0x150] sm:$0xff] }
 0xac0   :  { %v1117_v19 = vld [vmem:[%s7563_s20] sm:$0xff] }
 0xac1   :  { %v4089_v35 = vmax.f32 %v7406_v30, %v4023_v16  ;;  %4134 = vmatpush.msra.mxu3 %v4086_v4  ;;  %v4717_v30 = vld [vmem:[#allocation16 + $0x18] sm:$0xff]  ;;  %v1124_v16 = vld [vmem:[#allocation24 + $0x30] sm:$0xff] }
 0xac3   :  { %4103 = vmatpush.msra.mxu2 %v4089_v35  ;;  %4135 = vmatpush.msra.mxu3 %v4084_v59 }
 0xac4   :  { %4624 = vmatmul.msk.f32.vlgmr.msra.gmra.mxu3 %vm3465_vm1, %v4714_v52 }
 0xac5   :  { %4104 = vmatpush.msra.mxu2 %v4087_v11 }
 0xac7   :  { %4105 = vmatpush.msra.mxu2 %v4085_v28 }
 0xac9   :  { %4106 = vmatpush.msra.mxu2 %v4083_v41 }
 0xaca   :  { %4620 = vmatmul.msk.f32.vlgmr.msra.gmra.mxu2 %vm3465_vm1, %v4714_v52  ;;  %v1156_v52 = vld [vmem:[#allocation24 + $0x130] sm:$0xff] }
 0xacc   :  { %4625 = vmatmul.msk.f32.gmra.mxu3 %vm3465_vm1, %v4715_v6 }
 0xad2   :  { %4621 = vmatmul.msk.f32.gmra.mxu2 %vm3465_vm1, %v4715_v6  ;;  %v1154_v6 = vld [vmem:[#allocation24 + $0x120] sm:$0xff] }
 0xad4   :  { %4626 = vmatmul.msk.f32.gmra.mxu3 %vm3465_vm1, %v4716_v46 }
 0xada   :  { %4622 = vmatmul.msk.f32.gmra.mxu2 %vm3465_vm1, %v4716_v46  ;;  %v1206_v46 = vld [vmem:[#allocation24 + $0x2c0] sm:$0xff] }
 0xadc   :  { %4627 = vmatmul.msk.f32.gmra.mxu3 %vm3465_vm1, %v4717_v30 }
 0xae2   :  { %4623 = vmatmul.msk.f32.gmra.mxu2 %vm3465_vm1, %v4717_v30  ;;  %v1232_v30 = vld [vmem:[#allocation24 + $0x390] sm:$0xff] }
 0xb47   :  { %v4137_v29 = vpop.f32.mrf.mxu3 }
 0xb48   :  { %v4150_v42 = vmax.f32 %v4084_v59, %v4137_v29  ;;  %v1210_v59 = vld [vmem:[#allocation24 + $0x2e0] sm:$0xff] }
 0xb49   :  { %v1118_v29 = vld [vmem:[#allocation24] sm:$0xff] }
 0xb4d   :  { %v4108_v39 = vpop.f32.mrf.mxu2 }
 0xb4e   :  { %v4149_v54 = vmax.f32 %v4083_v41, %v4108_v39  ;;  %v1120_v41 = vld [vmem:[#allocation24 + $0x10] sm:$0xff] }
 0xb4f   :  { %v4140_v25 = vpop.f32.mrf.mxu3  ;;  %v1152_v39 = vld [vmem:[#allocation24 + $0x110] sm:$0xff] }
 0xb50   :  { %v4152_v2 = vmax.f32 %v4086_v4, %v4140_v25  ;;  %v1212_v4 = vld [vmem:[#allocation24 + $0x2f0] sm:$0xff] }
 0xb51   :  { %v1204_v25 = vld [vmem:[#allocation24 + $0x2b0] sm:$0xff] }
 0xb55   :  { %v4111_v27 = vpop.f32.mrf.mxu2 }
 0xb56   :  { %v4151_v10 = vmax.f32 %v4085_v28, %v4111_v27  ;;  %v1234_v28 = vld [vmem:[#allocation24 + $0x3a0] sm:$0xff] }
 0xb57   :  { %v4143_v62 = vpop.f32.mrf.mxu3  ;;  %v1230_v27 = vld [vmem:[#allocation24 + $0x380] sm:$0xff] }
 0xb58   :  { %v4154_v51 = vmax.f32 %v4088_v3, %v4143_v62  ;;  %v1240_v3 = vld [vmem:[#allocation24 + $0x3d0] sm:$0xff]  ;;  %v1149_v62 = vld [vmem:[#allocation24 + $0xf8] sm:$0xff] }
 0xb5d   :  { %v4114_v37 = vpop.f32.mrf.mxu2 }
 0xb5e   :  { %v4153_v53 = vmax.f32 %v4087_v11, %v4114_v37  ;;  %v1208_v11 = vld [vmem:[#allocation24 + $0x2d0] sm:$0xff]  ;;  %v1150_v37 = vld [vmem:[#allocation24 + $0x100] sm:$0xff] }
 0xb5f   :  { %v4146_v38 = vpop.f32.mrf.mxu3 }
 0xb60   :  { %v4156_v55 = vmax.f32 %v4090_v7, %v4146_v38  ;;  %v1242_v7 = vld [vmem:[#allocation24 + $0x3e0] sm:$0xff] }
 0xb61   :  { %v1202_v38 = vld [vmem:[#allocation24 + $0x2a0] sm:$0xff] }
 0xb62   :  { %4198 = vmatpush.msrb.mxu1 %v4156_v55  ;;  %v1228_v55 = vld [vmem:[#allocation24 + $0x370] sm:$0xff] }
 0xb64   :  { %4199 = vmatpush.msrb.mxu1 %v4154_v51  ;;  %v1147_v51 = vld [vmem:[#allocation24 + $0xe8] sm:$0xff] }
 0xb65   :  { %v4117_v58 = vpop.f32.mrf.mxu2 }
 0xb66   :  { %v4155_v50 = vmax.f32 %v4089_v35, %v4117_v58  ;;  %4200 = vmatpush.msrb.mxu1 %v4152_v2  ;;  %v1236_v35 = vld [vmem:[#allocation24 + $0x3b0] sm:$0xff]  ;;  %v1181_v2 = vld [vmem:[#allocation24 + $0x1f8] sm:$0xff] }
 0xb67   :  { %v1200_v58 = vld [vmem:[#allocation24 + $0x290] sm:$0xff] }
 0xb68   :  { %4175 = vmatpush.msrb.mxu0 %v4155_v50  ;;  %4201 = vmatpush.msrb.mxu1 %v4150_v42  ;;  %v1226_v42 = vld [vmem:[#allocation24 + $0x360] sm:$0xff]  ;;  %v1145_v50 = vld [vmem:[#allocation24 + $0xd8] sm:$0xff] }
 0xb69   :  { %4630 = vmatmul.msk.f32.vlgmr.msrb.gmra.mxu1 %vm3465_vm1, %v922_v61 }
 0xb6a   :  { %4176 = vmatpush.msrb.mxu0 %v4153_v53  ;;  %4321 = vmatpush.msra.mxu1 %v1180_v17  ;;  %v1198_v53 = vld [vmem:[#allocation24 + $0x280] sm:$0xff]  ;;  %v1141_v17 = vld [vmem:[#allocation24 + $0xb8] sm:$0xff] }
 0xb6c   :  { %4177 = vmatpush.msrb.mxu0 %v4151_v10  ;;  %4322 = vmatpush.msra.mxu1 %v1178_v48  ;;  %v1224_v10 = vld [vmem:[#allocation24 + $0x350] sm:$0xff]  ;;  %v1194_v48 = vld [vmem:[#allocation24 + $0x260] sm:$0xff] }
 0xb6e   :  { %4178 = vmatpush.msrb.mxu0 %v4149_v54  ;;  %4323 = vmatpush.msra.mxu1 %v1176_v20  ;;  %v1143_v54 = vld [vmem:[#allocation24 + $0xc8] sm:$0xff] }
 0xb6f   :  { %4628 = vmatmul.msk.f32.vlgmr.msrb.gmra.mxu0 %vm3465_vm1, %v922_v61  ;;  %v1179_v61 = vld [vmem:[#allocation24 + $0x1e8] sm:$0xff] }
 0xb70   :  { %4301 = vmatpush.msra.mxu0 %v1148_v18  ;;  %4324 = vmatpush.msra.mxu1 %v1174_v9  ;;  %v1196_v18 = vld [vmem:[#allocation24 + $0x270] sm:$0xff]  ;;  %v1139_v20 = vld [vmem:[#allocation24 + $0xa8] sm:$0xff] }
 0xb71   :  { %4631 = vmatmul.msk.f32.gmra.mxu1 %vm3465_vm1, %v923_v14  ;;  %v1192_v9 = vld [vmem:[#allocation24 + $0x250] sm:$0xff] }
 0xb72   :  { %4302 = vmatpush.msra.mxu0 %v1146_v12  ;;  %4325 = vmatpush.msra.mxu1 %v1172_v21  ;;  %v1222_v12 = vld [vmem:[#allocation24 + $0x340] sm:$0xff] }
 0xb73   :  { %v1190_v21 = vld [vmem:[#allocation24 + $0x240] sm:$0xff] }
 0xb74   :  { %4303 = vmatpush.msra.mxu0 %v1144_v15  ;;  %4326 = vmatpush.msra.mxu1 %v1170_v57  ;;  %v1175_v15 = vld [vmem:[#allocation24 + $0x1c8] sm:$0xff]  ;;  %v1188_v57 = vld [vmem:[#allocation24 + $0x230] sm:$0xff] }
 0xb76   :  { %4304 = vmatpush.msra.mxu0 %v1142_v47  ;;  %4327 = vmatpush.msra.mxu1 %v1168_v26  ;;  %v1220_v47 = vld [vmem:[#allocation24 + $0x330] sm:$0xff]  ;;  %v1186_v26 = vld [vmem:[#allocation24 + $0x220] sm:$0xff] }
 0xb77   :  { %4629 = vmatmul.msk.f32.gmra.mxu0 %vm3465_vm1, %v923_v14  ;;  %v1177_v14 = vld [vmem:[#allocation24 + $0x1d8] sm:$0xff] }
 0xb78   :  { %4305 = vmatpush.msra.mxu0 %v1140_v44  ;;  %4328 = vmatpush.msra.mxu1 %v1166_v33  ;;  %v1218_v44 = vld [vmem:[#allocation24 + $0x320] sm:$0xff]  ;;  %v1241_v33 = vld [vmem:[#allocation24 + $0x3d8] sm:$0xff] }
 0xb7a   :  { %4306 = vmatpush.msra.mxu0 %v1138_v56  ;;  %4329 = vmatpush.msra.mxu1 %v1164_v1  ;;  %v1216_v56 = vld [vmem:[#allocation24 + $0x310] sm:$0xff]  ;;  %v1239_v1 = vld [vmem:[#allocation24 + $0x3c8] sm:$0xff] }
 0xb7c   :  { %4307 = vmatpush.msra.mxu0 %v1136_v43  ;;  %4330 = vmatpush.msra.mxu1 %v1162_v5  ;;  %v1214_v43 = vld [vmem:[#allocation24 + $0x300] sm:$0xff]  ;;  %v1235_v5 = vld [vmem:[#allocation24 + $0x3a8] sm:$0xff] }
 0xb7e   :  { %4308 = vmatpush.msra.mxu0 %v1134_v24  ;;  %4331 = vmatpush.msra.mxu1 %v1160_v60  ;;  %v1243_v24 = vld [vmem:[#allocation24 + $0x3e8] sm:$0xff] }
 0xb7f   :  { %v1171_v60 = vld [vmem:[#allocation24 + $0x1a8] sm:$0xff] }
 0xb80   :  { %4309 = vmatpush.msra.mxu0 %v1132_v31  ;;  %4332 = vmatpush.msra.mxu1 %v1158_v34  ;;  %v1182_v31 = vld [vmem:[#allocation24 + $0x200] sm:$0xff]  ;;  %v1233_v34 = vld [vmem:[#allocation24 + $0x398] sm:$0xff] }
 0xb82   :  { %4310 = vmatpush.msra.mxu0 %v1130_v23  ;;  %4333 = vmatpush.msra.mxu1 %v1156_v52  ;;  %v1211_v23 = vld [vmem:[#allocation24 + $0x2e8] sm:$0xff]  ;;  %v1133_v52 = vld [vmem:[#allocation24 + $0x78] sm:$0xff] }
 0xb84   :  { %4311 = vmatpush.msra.mxu0 %v1128_v22  ;;  %4334 = vmatpush.msra.mxu1 %v1154_v6  ;;  %v1209_v22 = vld [vmem:[#allocation24 + $0x2d8] sm:$0xff]  ;;  %v1131_v6 = vld [vmem:[#allocation24 + $0x68] sm:$0xff] }
 0xb86   :  { %4312 = vmatpush.msra.mxu0 %v1126_v49  ;;  %4335 = vmatpush.msra.mxu1 %v1152_v39  ;;  %v1203_v49 = vld [vmem:[#allocation24 + $0x2a8] sm:$0xff] }
 0xb87   :  { %v1155_v39 = vld [vmem:[#allocation24 + $0x128] sm:$0xff] }
 0xb88   :  { %4313 = vmatpush.msra.mxu0 %v1124_v16  ;;  %4336 = vmatpush.msra.mxu1 %v1150_v37  ;;  %v1137_v16 = vld [vmem:[#allocation24 + $0x98] sm:$0xff] }
 0xb89   :  { %v1225_v37 = vld [vmem:[#allocation24 + $0x358] sm:$0xff] }
 0xb8a   :  { %4314 = vmatpush.msra.mxu0 %v1122_v36  ;;  %4401 = vmatpush.msrb.mxu1 %v1181_v2  ;;  %v1161_v36 = vld [vmem:[#allocation24 + $0x158] sm:$0xff] }
 0xb8b   :  { %v1153_v2 = vld [vmem:[#allocation24 + $0x118] sm:$0xff] }
 0xb8c   :  { %4315 = vmatpush.msra.mxu0 %v1120_v41  ;;  %4402 = vmatpush.msrb.mxu1 %v1179_v61  ;;  %v1229_v41 = vld [vmem:[#allocation24 + $0x378] sm:$0xff]  ;;  %v1123_v61 = vld [vmem:[#allocation24 + $0x28] sm:$0xff] }
 0xb8e   :  { %4316 = vmatpush.msra.mxu0 %v1118_v29  ;;  %4403 = vmatpush.msrb.mxu1 %v1177_v14  ;;  %v1129_v29 = vld [vmem:[#allocation24 + $0x58] sm:$0xff] }
 0xb8f   :  { %v1217_v14 = vld [vmem:[#allocation24 + $0x318] sm:$0xff] }
 0xb90   :  { %4381 = vmatpush.msrb.mxu0 %v1149_v62  ;;  %4404 = vmatpush.msrb.mxu1 %v1175_v15  ;;  %v1195_v62 = vld [vmem:[#allocation24 + $0x268] sm:$0xff] }
 0xb91   :  { %v1215_v15 = vld [vmem:[#allocation24 + $0x308] sm:$0xff] }
 0xb92   :  { %4382 = vmatpush.msrb.mxu0 %v1147_v51  ;;  %v1125_v51 = vld [vmem:[#allocation24 + $0x38] sm:$0xff] }
 0xb94   :  { %4383 = vmatpush.msrb.mxu0 %v1145_v50  ;;  %v1221_v50 = vld [vmem:[#allocation24 + $0x338] sm:$0xff] }
 0xb96   :  { %4384 = vmatpush.msrb.mxu0 %v1143_v54  ;;  %v1191_v54 = vld [vmem:[#allocation24 + $0x248] sm:$0xff] }
 0xb98   :  { %4385 = vmatpush.msrb.mxu0 %v1141_v17  ;;  %v1187_v17 = vld [vmem:[#allocation24 + $0x228] sm:$0xff] }
 0xb9a   :  { %4386 = vmatpush.msrb.mxu0 %v1139_v20  ;;  %v1278_v20 = vld [vmem:[%s7566_s23 + $0xf8] sm:$0xff] }
 0xb9c   :  { %4387 = vmatpush.msrb.mxu0 %v1137_v16  ;;  %v1268_v16 = vld [vmem:[%s7566_s23 + $0xa8] sm:$0xff] }
 0xbe6   :  { %v4203_v8 = vpop.f32.mrf.mxu1 }
 0xbec   :  { %v4180_v40 = vpop.f32.mrf.mxu0 }
 0xbee   :  { %v4206_v32 = vpop.f32.mrf.mxu1 }
 0xbef   :  { %4247 = vmatpush.msrb.mxu3 %v4206_v32 }
 0xbf1   :  { %4248 = vmatpush.msrb.mxu3 %v4203_v8 }
 0xbf2   :  { %4633 = vmatmul.msk.f32.vlgmr.msrb.gmra.mxu3 %vm4209_vm2, %v1116_v63 }
 0xbf3   :  { %4290 = vmatpush.msra.mxu3 %v4206_v32  ;;  %v1184_v32 = vld [vmem:[#allocation24 + $0x210] sm:$0xff] }
 0xbf4   :  { %v4183_v13 = vpop.f32.mrf.mxu0 }
 0xbf5   :  { %4291 = vmatpush.msra.mxu3 %v4203_v8  ;;  %4227 = vmatpush.msrb.mxu2 %v4183_v13  ;;  %v1173_v8 = vld [vmem:[#allocation24 + $0x1b8] sm:$0xff] }
 0xbf6   :  { %4405 = vmatpush.msrb.mxu1 %v1173_v8 }
 0xbf7   :  { %4361 = vmatpush.msrb.mxu3 %v1244_v0  ;;  %4228 = vmatpush.msrb.mxu2 %v4180_v40  ;;  %v1237_v0 = vld [vmem:[#allocation24 + $0x3b8] sm:$0xff] }
 0xbf8   :  { %4632 = vmatmul.msk.f32.vlgmr.msrb.gmra.mxu2 %vm4209_vm2, %v1116_v63  ;;  %v1213_v63 = vld [vmem:[#allocation24 + $0x2f8] sm:$0xff]  ;;  %4406 = vmatpush.msrb.mxu1 %v1171_v60  ;;  %v1270_v60 = vld [vmem:[%s7566_s23 + $0xb8] sm:$0xff] }
 0xbf9   :  { %4362 = vmatpush.msrb.mxu3 %v1242_v7  ;;  %4270 = vmatpush.msra.mxu2 %v4183_v13  ;;  %v1207_v13 = vld [vmem:[#allocation24 + $0x2c8] sm:$0xff]  ;;  %v1205_v7 = vld [vmem:[#allocation24 + $0x2b8] sm:$0xff] }
 0xbfa   :  { %4635 = vmatmul.msk.f32.vlgmr.msra.gmra.mxu3 %vm4209_vm2, %v1117_v19 }
 0xbfb   :  { %4363 = vmatpush.msrb.mxu3 %v1240_v3  ;;  %4271 = vmatpush.msra.mxu2 %v4180_v40  ;;  %v1245_v40 = vld [vmem:[#allocation24 + $0x3f8] sm:$0xff] }
 0xbfc   :  { %v1201_v3 = vld [vmem:[#allocation24 + $0x298] sm:$0xff] }
 0xbfd   :  { %4341 = vmatpush.msrb.mxu2 %v1212_v4  ;;  %4364 = vmatpush.msrb.mxu3 %v1238_v45  ;;  %v1167_v4 = vld [vmem:[#allocation24 + $0x188] sm:$0xff]  ;;  %v1165_v45 = vld [vmem:[#allocation24 + $0x178] sm:$0xff] }
 0xbff   :  { %4342 = vmatpush.msrb.mxu2 %v1210_v59  ;;  %4365 = vmatpush.msrb.mxu3 %v1236_v35  ;;  %v1163_v59 = vld [vmem:[#allocation24 + $0x168] sm:$0xff] }
 0xc00   :  { %4634 = vmatmul.msk.f32.vlgmr.msra.gmra.mxu2 %vm4209_vm2, %v1117_v19  ;;  %v1169_v19 = vld [vmem:[#allocation24 + $0x198] sm:$0xff]  ;;  %v1135_v35 = vld [vmem:[#allocation24 + $0x88] sm:$0xff] }
 0xc01   :  { %4343 = vmatpush.msrb.mxu2 %v1208_v11  ;;  %4366 = vmatpush.msrb.mxu3 %v1234_v28  ;;  %v1231_v11 = vld [vmem:[#allocation24 + $0x388] sm:$0xff] }
 0xc02   :  { %4407 = vmatpush.msrb.mxu1 %v1169_v19  ;;  %4388 = vmatpush.msrb.mxu0 %v1135_v35  ;;  %v1159_v28 = vld [vmem:[#allocation24 + $0x148] sm:$0xff] }
 0xc03   :  { %4344 = vmatpush.msrb.mxu2 %v1206_v46  ;;  %4367 = vmatpush.msrb.mxu3 %v1232_v30  ;;  %v1157_v46 = vld [vmem:[#allocation24 + $0x138] sm:$0xff]  ;;  %v1227_v30 = vld [vmem:[#allocation24 + $0x368] sm:$0xff] }
 0xc04   :  { %4408 = vmatpush.msrb.mxu1 %v1167_v4  ;;  %4389 = vmatpush.msrb.mxu0 %v1133_v52  ;;  %v1250_v19 = vld [vmem:[%s7566_s23 + $0x18] sm:$0xff]  ;;  %v1269_v4 = vld [vmem:[%s7566_s23 + $0xb0] sm:$0xff]  ;;  %v1247_v35 = vld [vmem:[%s7566_s23] sm:$0xff] }
 0xc05   :  { %4345 = vmatpush.msrb.mxu2 %v1204_v25  ;;  %4368 = vmatpush.msrb.mxu3 %v1230_v27  ;;  %v1199_v25 = vld [vmem:[#allocation24 + $0x288] sm:$0xff]  ;;  %v1197_v27 = vld [vmem:[#allocation24 + $0x278] sm:$0xff] }
 0xc06   :  { %4409 = vmatpush.msrb.mxu1 %v1165_v45  ;;  %4390 = vmatpush.msrb.mxu0 %v1131_v6  ;;  %v1249_v45 = vld [vmem:[%s7566_s23 + $0x10] sm:$0xff]  ;;  %v1264_v52 = vld [vmem:[%s7566_s23 + $0x88] sm:$0xff] }
 0xc07   :  { %4346 = vmatpush.msrb.mxu2 %v1202_v38  ;;  %4369 = vmatpush.msrb.mxu3 %v1228_v55  ;;  %v1127_v38 = vld [vmem:[#allocation24 + $0x48] sm:$0xff] }
 0xc08   :  { %4410 = vmatpush.msrb.mxu1 %v1163_v59  ;;  %4391 = vmatpush.msrb.mxu0 %v1129_v29  ;;  %v1223_v55 = vld [vmem:[#allocation24 + $0x348] sm:$0xff]  ;;  %v1248_v59 = vld [vmem:[%s7566_s23 + $0x8] sm:$0xff] }
 0xc09   :  { %4347 = vmatpush.msrb.mxu2 %v1200_v58  ;;  %4370 = vmatpush.msrb.mxu3 %v1226_v42  ;;  %v1151_v58 = vld [vmem:[#allocation24 + $0x108] sm:$0xff]  ;;  %v1193_v42 = vld [vmem:[#allocation24 + $0x258] sm:$0xff] }
 0xc0a   :  { %4411 = vmatpush.msrb.mxu1 %v1161_v36  ;;  %4392 = vmatpush.msrb.mxu0 %v1127_v38  ;;  %v1266_v36 = vld [vmem:[%s7566_s23 + $0x98] sm:$0xff] }
 0xc0b   :  { %4348 = vmatpush.msrb.mxu2 %v1198_v53  ;;  %4371 = vmatpush.msrb.mxu3 %v1224_v10  ;;  %v1219_v53 = vld [vmem:[#allocation24 + $0x328] sm:$0xff]  ;;  %v1121_v10 = vld [vmem:[#allocation24 + $0x18] sm:$0xff] }
 0xc0c   :  { %4412 = vmatpush.msrb.mxu1 %v1159_v28  ;;  %4393 = vmatpush.msrb.mxu0 %v1125_v51  ;;  %v1263_v28 = vld [vmem:[%s7566_s23 + $0x80] sm:$0xff] }
 0xc0d   :  { %4349 = vmatpush.msrb.mxu2 %v1196_v18  ;;  %4372 = vmatpush.msrb.mxu3 %v1222_v12  ;;  %v1119_v18 = vld [vmem:[#allocation24 + $0x8] sm:$0xff]  ;;  %v1189_v12 = vld [vmem:[#allocation24 + $0x238] sm:$0xff] }
 0xc0e   :  { %4413 = vmatpush.msrb.mxu1 %v1157_v46  ;;  %4394 = vmatpush.msrb.mxu0 %v1123_v61 }
 0xc0f   :  { %4350 = vmatpush.msrb.mxu2 %v1194_v48  ;;  %4373 = vmatpush.msrb.mxu3 %v1220_v47  ;;  %v1185_v48 = vld [vmem:[#allocation24 + $0x218] sm:$0xff]  ;;  %v1183_v47 = vld [vmem:[#allocation24 + $0x208] sm:$0xff] }
 0xc10   :  { %4414 = vmatpush.msrb.mxu1 %v1155_v39  ;;  %4395 = vmatpush.msrb.mxu0 %v1121_v10 }
 0xc11   :  { %4351 = vmatpush.msrb.mxu2 %v1192_v9  ;;  %4374 = vmatpush.msrb.mxu3 %v1218_v44  ;;  %v1277_v9 = vld [vmem:[%s7566_s23 + $0xf0] sm:$0xff]  ;;  %v1276_v44 = vld [vmem:[%s7566_s23 + $0xe8] sm:$0xff] }
 0xc12   :  { %4415 = vmatpush.msrb.mxu1 %v1153_v2  ;;  %4396 = vmatpush.msrb.mxu0 %v1119_v18 }
 0xc13   :  { %4352 = vmatpush.msrb.mxu2 %v1190_v21  ;;  %4375 = vmatpush.msrb.mxu3 %v1216_v56  ;;  %v1262_v21 = vld [vmem:[%s7566_s23 + $0x78] sm:$0xff]  ;;  %v1275_v56 = vld [vmem:[%s7566_s23 + $0xe0] sm:$0xff] }
 0xc14   :  { %4416 = vmatpush.msrb.mxu1 %v1151_v58 }
 0xc15   :  { %4353 = vmatpush.msrb.mxu2 %v1188_v57  ;;  %4376 = vmatpush.msrb.mxu3 %v1214_v43  ;;  %v1261_v43 = vld [vmem:[%s7566_s23 + $0x70] sm:$0xff] }
 0xc17   :  { %4441 = vmatpush.msra.mxu3 %v1245_v40  ;;  %4354 = vmatpush.msrb.mxu2 %v1186_v26  ;;  %v1274_v40 = vld [vmem:[%s7566_s23 + $0xd8] sm:$0xff] }
 0xc19   :  { %4442 = vmatpush.msra.mxu3 %v1243_v24  ;;  %4355 = vmatpush.msrb.mxu2 %v1184_v32  ;;  %v1260_v24 = vld [vmem:[%s7566_s23 + $0x68] sm:$0xff]  ;;  %v1273_v32 = vld [vmem:[%s7566_s23 + $0xd0] sm:$0xff] }
 0xc1b   :  { %4443 = vmatpush.msra.mxu3 %v1241_v33  ;;  %4356 = vmatpush.msrb.mxu2 %v1182_v31  ;;  %v1259_v33 = vld [vmem:[%s7566_s23 + $0x60] sm:$0xff]  ;;  %v1258_v31 = vld [vmem:[%s7566_s23 + $0x58] sm:$0xff] }
 0xc1d   :  { %4421 = vmatpush.msra.mxu2 %v1213_v63  ;;  %4444 = vmatpush.msra.mxu3 %v1239_v1  ;;  %v1257_v1 = vld [vmem:[%s7566_s23 + $0x50] sm:$0xff] }
 0xc1f   :  { %4422 = vmatpush.msra.mxu2 %v1211_v23  ;;  %4445 = vmatpush.msra.mxu3 %v1237_v0  ;;  %v1256_v23 = vld [vmem:[%s7566_s23 + $0x48] sm:$0xff]  ;;  %v1255_v0 = vld [vmem:[%s7566_s23 + $0x40] sm:$0xff] }
 0xc21   :  { %4423 = vmatpush.msra.mxu2 %v1209_v22  ;;  %4446 = vmatpush.msra.mxu3 %v1235_v5  ;;  %v1272_v22 = vld [vmem:[%s7566_s23 + $0xc8] sm:$0xff]  ;;  %v1254_v5 = vld [vmem:[%s7566_s23 + $0x38] sm:$0xff] }
 0xc23   :  { %4424 = vmatpush.msra.mxu2 %v1207_v13  ;;  %4447 = vmatpush.msra.mxu3 %v1233_v34  ;;  %v1271_v13 = vld [vmem:[%s7566_s23 + $0xc0] sm:$0xff] }
 0xc24   :  { %v1267_v34 = vld [vmem:[%s7566_s23 + $0xa0] sm:$0xff] }
 0xc25   :  { %4425 = vmatpush.msra.mxu2 %v1205_v7  ;;  %4448 = vmatpush.msra.mxu3 %v1231_v11  ;;  %v1253_v7 = vld [vmem:[%s7566_s23 + $0x30] sm:$0xff] }
 0xc26   :  { %v1265_v11 = vld [vmem:[%s7566_s23 + $0x90] sm:$0xff] }
 0xc27   :  { %4426 = vmatpush.msra.mxu2 %v1203_v49  ;;  %4449 = vmatpush.msra.mxu3 %v1229_v41  ;;  %v1252_v49 = vld [vmem:[%s7566_s23 + $0x28] sm:$0xff]  ;;  %v1246_v41 = vld [vmem:[#allocation25] sm:$0x3] }
 0xc28   :  { %v4297_v46 = vperm.slane %v1246_v41, 0 }
 0xc29   :  { %4427 = vmatpush.msra.mxu2 %v1201_v3  ;;  %4450 = vmatpush.msra.mxu3 %v1227_v30  ;;  %v1251_v3 = vld [vmem:[%s7566_s23 + $0x20] sm:$0xff] }
 0xc2b   :  { %4428 = vmatpush.msra.mxu2 %v1199_v25  ;;  %4451 = vmatpush.msra.mxu3 %v1225_v37 }
 0xc2d   :  { %4429 = vmatpush.msra.mxu2 %v1197_v27  ;;  %4452 = vmatpush.msra.mxu3 %v1223_v55  ;;  %v4298_v27 = vperm.slane %v1246_v41, 1 }
 0xc2f   :  { %4430 = vmatpush.msra.mxu2 %v1195_v62  ;;  %4453 = vmatpush.msra.mxu3 %v1221_v50 }
 0xc31   :  { %4431 = vmatpush.msra.mxu2 %v1193_v42  ;;  %4454 = vmatpush.msra.mxu3 %v1219_v53 }
 0xc33   :  { %4432 = vmatpush.msra.mxu2 %v1191_v54  ;;  %4455 = vmatpush.msra.mxu3 %v1217_v14  ;;  %v4676_v14 = vld [vmem:[#allocation27] ss:$0 sm:$0xff] }
 0xc35   :  { %4433 = vmatpush.msra.mxu2 %v1189_v12  ;;  %4456 = vmatpush.msra.mxu3 %v1215_v15 }
 0xc37   :  { %4434 = vmatpush.msra.mxu2 %v1187_v17 }
 0xc39   :  { %4435 = vmatpush.msra.mxu2 %v1185_v48 }
 0xc3b   :  { %4436 = vmatpush.msra.mxu2 %v1183_v47 }
 0xc75   :  { %v4250_v8 = vpop.f32.mrf.mxu3 }
 0xc76   :  { %4337 = vmatmul.f32.vlgmr.msra.gmra.mxu1 %v4250_v8 }
 0xc77   :  { %4486 = vmatpush.msra.mxu1 %v1278_v20 }
 0xc79   :  { %4487 = vmatpush.msra.mxu1 %v1277_v9 }
 0xc7b   :  { %v4230_v57 = vpop.f32.mrf.mxu2  ;;  %4488 = vmatpush.msra.mxu1 %v1276_v44 }
 0xc7c   :  { %4317 = vmatmul.f32.vlgmr.msra.gmra.mxu0 %v4230_v57 }
 0xc7d   :  { %v4293_v26 = vpop.f32.mrf.mxu3  ;;  %4466 = vmatpush.msra.mxu0 %v1262_v21  ;;  %4489 = vmatpush.msra.mxu1 %v1275_v56 }
 0xc7e   :  { %4377 = vmatmul.f32.vlgmr.msrb.gmra.mxu3 %v4293_v26  ;;  %4417 = vmatmul.f32.vlgmr.msrb.gmra.mxu1 %v4250_v8 }
 0xc7f   :  { %4467 = vmatpush.msra.mxu0 %v1261_v43  ;;  %4490 = vmatpush.msra.mxu1 %v1274_v40  ;;  %v4677_v40 = vld [vmem:[#allocation28] ss:$0 sm:$0xff] }
 0xc81   :  { %4468 = vmatpush.msra.mxu0 %v1260_v24  ;;  %4491 = vmatpush.msra.mxu1 %v1273_v32  ;;  %v4678_v32 = vld [vmem:[#allocation30] ss:$0 sm:$0xff] }
 0xc83   :  { %v4273_v63 = vpop.f32.mrf.mxu2  ;;  %4469 = vmatpush.msra.mxu0 %v1259_v33  ;;  %4492 = vmatpush.msra.mxu1 %v1272_v22 }
 0xc84   :  { %4357 = vmatmul.f32.vlgmr.msrb.gmra.mxu2 %v4273_v63  ;;  %4397 = vmatmul.f32.vlgmr.msrb.gmra.mxu0 %v4230_v57 }
 0xc85   :  { %4470 = vmatpush.msra.mxu0 %v1258_v31  ;;  %4493 = vmatpush.msra.mxu1 %v1271_v13 }
 0xc86   :  { %4457 = vmatmul.f32.vlgmr.msra.gmra.mxu3 %v4293_v26 }
 0xc87   :  { %4471 = vmatpush.msra.mxu0 %v1257_v1  ;;  %4494 = vmatpush.msra.mxu1 %v1270_v60 }
 0xc89   :  { %4472 = vmatpush.msra.mxu0 %v1256_v23  ;;  %4495 = vmatpush.msra.mxu1 %v1269_v4 }
 0xc8b   :  { %4473 = vmatpush.msra.mxu0 %v1255_v0  ;;  %4496 = vmatpush.msra.mxu1 %v1268_v16 }
 0xc8c   :  { %4437 = vmatmul.f32.vlgmr.msra.gmra.mxu2 %v4273_v63 }
 0xc8d   :  { %4474 = vmatpush.msra.mxu0 %v1254_v5  ;;  %4497 = vmatpush.msra.mxu1 %v1267_v34 }
 0xc8f   :  { %4475 = vmatpush.msra.mxu0 %v1253_v7  ;;  %4498 = vmatpush.msra.mxu1 %v1266_v36 }
 0xc91   :  { %4476 = vmatpush.msra.mxu0 %v1252_v49  ;;  %4499 = vmatpush.msra.mxu1 %v1265_v11 }
 0xc93   :  { %4477 = vmatpush.msra.mxu0 %v1251_v3  ;;  %4500 = vmatpush.msra.mxu1 %v1264_v52 }
 0xc95   :  { %4478 = vmatpush.msra.mxu0 %v1250_v19  ;;  %4501 = vmatpush.msra.mxu1 %v1263_v28 }
 0xc97   :  { %4479 = vmatpush.msra.mxu0 %v1249_v45 }
 0xc99   :  { %4480 = vmatpush.msra.mxu0 %v1248_v59 }
 0xc9b   :  { %4481 = vmatpush.msra.mxu0 %v1247_v35 }
 0xcf3   :  { %v4338_v29 = vpop.f32.mrf.mxu1 }
 0xcf9   :  { %v4318_v6 = vpop.f32.mrf.mxu0 }
 0xcfa   :  { %v4319_v30 = vadd.f32 %v4318_v6, %v4297_v46 }
 0xcfb   :  { %v4418_v58 = vpop.f32.mrf.mxu1 }
 0xcfc   :  { %v4339_v39 = vadd.f32 %v4338_v29, %v4319_v30 }
 0xd01   :  { %v4378_v25 = vpop.f32.mrf.mxu3  ;;  %v4398_v37 = vpop.f32.mrf.mxu0 }
 0xd02   :  { %v4399_v51 = vadd.f32 %v4398_v37, %v4298_v27 }
 0xd04   :  { %v4419_v42 = vadd.f32 %v4418_v58, %v4399_v51 }
 0xd07   :  { %v4358_v62 = vpop.f32.mrf.mxu2 }
 0xd08   :  { %v4359_v38 = vadd.f32 %v4358_v62, %v4339_v39 }
 0xd09   :  { %v4458_v53 = vpop.f32.mrf.mxu3 }
 0xd0a   :  { %v4379_v55 = vadd.f32 %v4378_v25, %v4359_v38 }
 0xd0c   :  { %v4461_v2 = vmax.f32 %v4379_v55, 0.0 }
 0xd0e   :  { %4482 = vmatmul.f32.vlgmr.msra.gmra.mxu0 %v4461_v2 }
 0xd0f   :  { %v4438_v50 = vpop.f32.mrf.mxu2 }
 0xd10   :  { %v4439_v61 = vadd.f32 %v4438_v50, %v4419_v42 }
 0xd12   :  { %v4459_v10 = vadd.f32 %v4458_v53, %v4439_v61 }
 0xd14   :  { %v4462_v54 = vmax.f32 %v4459_v10, 0.0 }
 0xd16   :  { %4502 = vmatmul.f32.vlgmr.msra.gmra.mxu1 %v4462_v54 }
 0xd8b   :  { %v4483_v18 = vpop.f32.mrf.mxu0 }
 0xd8c   :  { %v4484_v12 = vadd.f32 %v4676_v14, %v4483_v18 }
 0xd93   :  { %v4503_v17 = vpop.f32.mrf.mxu1 }
 0xd94   :  { %v4504_v15 = vadd.f32 %v4503_v17, %v4484_v12 }
 0xd96   :  { %v4636_v48 = vmul.f32 -1.442695, %v4504_v15 }
 0xd98   :  { %4679 = vpow2.f32 %v4636_v48 }
 0xd9e   :  { %v4680_v47 = vpop.eup %4679 }
 0xd9f   :  { %v4509_v20 = vadd.f32 1.0, %v4680_v47 }
 0xda1   :  { %4681 = vrcp.f32 %v4509_v20  ;;  %v4521_v21 = vand.u32 2147483648, %v4509_v20  ;;  %v4519_v57 = vand.u32 2147483647, %v4509_v20  ;;  %vm4515_vm4 = vweird.f32 %v4509_v20 }
 0xda3   :  { %v4522_v26 = vor.u32 1.1754944e-38, %v4521_v21  ;;  %vm4520_vm6 = vcmp.eq.f32.partialorder %v4519_v57, 8.507059e+37 }
 0xda7   :  { %v4682_v8 = vpop.eup %4681 }
 0xda8   :  { %v4511_v9 = vmul.f32 %v4682_v8, %v4509_v20  ;;  %vm4516_vm3 = vweird.f32 %v4682_v8 }
 0xda9   :  { %vm4517_vm5 = vmor %vm4515_vm4, %vm4516_vm3 }
 0xdaa   :  { %v4512_v44 = vsub.f32 1.0, %v4511_v9 }
 0xdac   :  { %v4513_v56 = vmul.f32 %v4682_v8, %v4512_v44 }
 0xdae   :  { %v4514_v43 = vadd.f32 %v4682_v8, %v4513_v56 }
 0xdb0   :  { %v4518_v24 = vsel %vm4517_vm5, %v4682_v8, %v4514_v43 }
 0xdb1   :  { %v4523_v33 = vsel %vm4520_vm6, %v4522_v26, %v4518_v24 }
 0xdb2   :  { %v4528_v31 = vmul.f32 %v4677_v40, %v4523_v33 }
 0xdb4   :  { %v4532_v63 = vadd.f32 %v4678_v32, %v4528_v31 }
 0xdb6   :  { %4533 = vst [vmem:[%s7726_s14] sm:$0xff] %v4532_v63 }
 0xdb7   :  { %4538 = vsyncpa [#allocation3], 1 }
 0xdb8   :  { %4539 = vsyncpa [#allocation5], 1 }
 0xdb9   :  { %4540 = vsyncpa [#allocation8], 1 }
 0xdba   :  { %4541 = vsyncpa [#allocation11], 1 }
 0xdbb   :  { %4542 = vsyncpa [#allocation14], 1 }
 0xdbc   :  { %4543 = vsyncpa [#allocation17], 1 }
 0xdbd   :  { %4544 = vsyncpa [#allocation20], 1 }
 0xdbe   :  { %4545 = vsyncpa [#allocation23], 1 }
 0xdbf   :  { %4546 = vsyncpa [#allocation26], 1 }
 0xdc0   :  { %4547 = vsyncpa [#allocation29], 1 }

</bundles_post_ra>
